<compile_context>
chip_gen: v5e
topology: v5e:2x2
jax: 0.10.0
libtpu: 0.0.40
codegen_flags: <defaults>
</compile_context>

<pallas_src>
import functools
import math

import jax
import jax.numpy as jnp
from jax.experimental import pallas as pl
from jax.experimental.pallas import tpu as pltpu


def _full_spec(a):
    """BlockSpec for an array that is fully resident (weights / biases)."""
    return pl.BlockSpec(a.shape, lambda *_: (0,) * a.ndim)


# ----------------------------------------------------------------------------
# Kernel A: fully fused MBConv residual branch (per batch element)
#   1x1 expand (+folded pre-BN/BN) + GELU -> depthwise 3x3 (+BN) + GELU
#   -> Squeeze-Excitation -> 1x1 project (bias) -> identity shortcut add
# ----------------------------------------------------------------------------
def _mbconv_kernel(H, W, x_ref, w1_ref, b1_ref, dww_ref, dws_ref, dwt_ref,
                   sew1_ref, seb1_ref, sew2_ref, seb2_ref, wp_ref, bp_ref,
                   o_ref, pad_sc):
    HW = H * W
    P = W + 1                                   # top / bottom zero-pad rows
    hidden = pad_sc.shape[1]
    x = x_ref[0]                                # (HW, Cin) f32

    # 1x1 expand conv (pre-BN + BN folded into w/b) + GELU(tanh).  bf16 MXU, f32 acc.
    h = jnp.dot(x.astype(jnp.bfloat16), w1_ref[...],
                preferred_element_type=jnp.float32) + b1_ref[0]
    h = jax.nn.gelu(h, approximate=True)        # (HW, hidden) f32

    # Depthwise 3x3, stride 1, zero padding.  The padded image is kept flattened
    # in a (P + HW + P, hidden) VMEM scratch; tap (dh, dw) is the row slice
    # shifted by dh*W + dw, and taps that would wrap horizontally into the
    # neighbouring image row are masked to zero.
    zeros_pad = jnp.zeros((P, hidden), jnp.float32)
    pad_sc[0:P, :] = zeros_pad
    pad_sc[P + HW:P + HW + P, :] = zeros_pad
    pad_sc[P:P + HW, :] = h

    col = jax.lax.broadcasted_iota(jnp.int32, (HW, 1), 0) % W
    wdw = dww_ref[...]                          # (9, hidden)
    acc = jnp.zeros((HW, hidden), jnp.float32)
    for dh in (-1, 0, 1):
        for dw in (-1, 0, 1):
            off = P + dh * W + dw
            tap = pad_sc[off:off + HW, :]
            if dw == -1:
                tap = jnp.where(col != 0, tap, 0.0)
            elif dw == 1:
                tap = jnp.where(col != W - 1, tap, 0.0)
            acc = acc + tap * wdw[(dh + 1) * 3 + (dw + 1)]
    y = jax.nn.gelu(acc * dws_ref[0] + dwt_ref[0], approximate=True)

    # Squeeze-Excitation: global mean over HW rows -> FC -> SiLU -> FC -> sigmoid gate.
    m = jnp.mean(y, axis=0, keepdims=True)      # (1, hidden)
    g = jax.nn.silu(jnp.dot(m, sew1_ref[...],
                            preferred_element_type=jnp.float32) + seb1_ref[0])
    gate = jax.nn.sigmoid(jnp.dot(g, sew2_ref[...],
                                  preferred_element_type=jnp.float32) + seb2_ref[0])
    y = y * gate

    # 1x1 projection (bias=True) + identity shortcut (stride=1, in_dim == out_dim).
    out = jnp.dot(y.astype(jnp.bfloat16), wp_ref[...],
                  preferred_element_type=jnp.float32) + bp_ref[0]
    o_ref[0] = x + out


def mbconv(x_nhwc, p):
    N, H, W, C = x_nhwc.shape
    hidden = p["w1_eff"].shape[1]
    Cout = p["w_proj"].shape[1]
    assert C == Cout, "identity shortcut requires in_dim == out_dim"
    # TODO(synk): stride>1 shortcut (AvgPool + 1x1 conv) not implemented; this
    #             config uses stride=1 with in_dim == out_dim (identity shortcut).
    HW = H * W
    P = W + 1
    xf = x_nhwc.reshape(N, HW, C)

    args = [
        xf,
        p["w1_eff"].astype(jnp.bfloat16),
        p["b1_eff"].reshape(1, hidden),
        p["dw_w"],
        p["dw_scale"].reshape(1, hidden),
        p["dw_shift"].reshape(1, hidden),
        p["se_w1"],
        p["se_b1"].reshape(1, -1),
        p["se_w2"],
        p["se_b2"].reshape(1, hidden),
        p["w_proj"].astype(jnp.bfloat16),
        p["b_proj"].reshape(1, Cout),
    ]
    in_specs = [pl.BlockSpec((1, HW, C), lambda n: (n, 0, 0))]
    in_specs += [_full_spec(a) for a in args[1:]]

    out = pl.pallas_call(
        functools.partial(_mbconv_kernel, H, W),
        out_shape=jax.ShapeDtypeStruct((N, HW, Cout), jnp.float32),
        grid=(N,),
        in_specs=in_specs,
        out_specs=pl.BlockSpec((1, HW, Cout), lambda n: (n, 0, 0)),
        scratch_shapes=[pltpu.VMEM((HW + 2 * P, hidden), jnp.float32)],
        compiler_params=pltpu.CompilerParams(dimension_semantics=("parallel",)),
    )(*args)
    # TODO(synk): for large H*W, tile the fused MBConv over row strips (two-pass
    #             SE) so the expanded-activation strip fits v7x's 64 MiB VMEM.
    return out.reshape(N, H, W, Cout)


# ----------------------------------------------------------------------------
# Kernel B: transformer EncoderLayer for Wb windows per grid step
# ----------------------------------------------------------------------------
def _layernorm(x, g, b, eps=1e-5):
    mu = jnp.mean(x, axis=-1, keepdims=True)
    var = jnp.mean(jnp.square(x - mu), axis=-1, keepdims=True)
    return (x - mu) * jax.lax.rsqrt(var + eps) * g + b


def _encoder_kernel(n_heads, head_dim, Wb, S, C,
                    x_ref, ln1g_ref, ln1b_ref, wqkv_ref, bqkv_ref,
                    wo_ref, bo_ref, bias_ref, ln2g_ref, ln2b_ref,
                    w1_ref, b1_ref, w2_ref, b2_ref,
                    o_ref, x2_sc, qkv_sc):
    # Gather this step's Wb windows into one (Wb*S, C) slab so the dense
    # projections / MLP run as single large, lane-dense MXU matmuls.
    for w in range(Wb):
        x2_sc[w * S:(w + 1) * S, :] = x_ref[w]
    x = x2_sc[...]                               # (Wb*S, C) f32

    # --- self-attention sub-block (pre-LN, fused QKV projection) ---
    xn = _layernorm(x, ln1g_ref[0], ln1b_ref[0])
    qkv_sc[...] = jnp.dot(xn.astype(jnp.bfloat16), wqkv_ref[...],
                          preferred_element_type=jnp.float32) + bqkv_ref[0]

    scale = 1.0 / math.sqrt(head_dim)
    for w in range(Wb):
        r0 = w * S
        acc_w = jnp.zeros((S, C), jnp.float32)
        for h in range(n_heads):
            lo = h * head_dim
            qh = qkv_sc[r0:r0 + S, lo:lo + head_dim].astype(jnp.bfloat16)
            kh = qkv_sc[r0:r0 + S, C + lo:C + lo + head_dim].astype(jnp.bfloat16)
            vh = qkv_sc[r0:r0 + S, 2 * C + lo:2 * C + lo + head_dim].astype(jnp.bfloat16)
            s = jax.lax.dot_general(qh, kh, (((1,), (1,)), ((), ())),
                                    preferred_element_type=jnp.float32) * scale
            s = s + bias_ref[h]
            s = s - jnp.max(s, axis=-1, keepdims=True)
            e = jnp.exp(s)
            p = e * pl.reciprocal(jnp.sum(e, axis=-1, keepdims=True), approx=True)
            oh = jnp.dot(p.astype(jnp.bfloat16), vh,
                         preferred_element_type=jnp.float32)
            # concatenation over heads folded into the output projection:
            acc_w = acc_w + jnp.dot(oh.astype(jnp.bfloat16),
                                    wo_ref[lo:lo + head_dim, :],
                                    preferred_element_type=jnp.float32)
        # first residual: x2_sc rows become y = x + attn + bo
        x2_sc[r0:r0 + S, :] = x2_sc[r0:r0 + S, :] + acc_w + bo_ref[0]

    # --- MLP sub-block ---
    y = x2_sc[...]
    yn = _layernorm(y, ln2g_ref[0], ln2b_ref[0])
    h1 = jnp.dot(yn.astype(jnp.bfloat16), w1_ref[...],
                 preferred_element_type=jnp.float32) + b1_ref[0]
    h1 = jax.nn.gelu(h1, approximate=True)
    out = y + jnp.dot(h1.astype(jnp.bfloat16), w2_ref[...],
                      preferred_element_type=jnp.float32) + b2_ref[0]
    for w in range(Wb):
        o_ref[w] = out[w * S:(w + 1) * S, :]


def relative_bias(attn_bias, window):
    # attn_bias: (n_heads, 2*window-1, 2*window-1) -> (n_heads, window^2, window^2)
    idx = jnp.arange(window)[None, :] - jnp.arange(window)[:, None] + window - 1
    b = attn_bias[:, idx, :]               # (h, W, W, 2W-1)
    b = b[..., idx]                        # (h, W, W, W, W)
    b = jnp.transpose(b, (0, 1, 3, 2, 4))
    return b.reshape(attn_bias.shape[0], window * window, window * window)


def encoder_layer_apply(xw, p, n_heads, head_dim, window):
    N, nWin, S, C = xw.shape
    B = N * nWin
    Wb = next(w for w in (4, 2, 1) if B % w == 0)     # windows per grid step
    xf = xw.reshape(B, S, C)
    bias = relative_bias(p["attn_bias"], window)      # (heads, S, S) f32
    wqkv = jnp.concatenate([p["wq"], p["wk"], p["wv"]], axis=1).astype(jnp.bfloat16)
    bqkv = jnp.concatenate([p["bq"], p["bk"], p["bv"]]).reshape(1, 3 * C)

    args = [
        xf,
        p["ln1_g"].reshape(1, C), p["ln1_b"].reshape(1, C),
        wqkv, bqkv,
        p["wo"].astype(jnp.bfloat16), p["bo"].reshape(1, C),
        bias,
        p["ln2_g"].reshape(1, C), p["ln2_b"].reshape(1, C),
        p["w1"].astype(jnp.bfloat16), p["b1"].reshape(1, -1),
        p["w2"].astype(jnp.bfloat16), p["b2"].reshape(1, C),
    ]
    in_specs = [pl.BlockSpec((Wb, S, C), lambda i: (i, 0, 0))]
    in_specs += [_full_spec(a) for a in args[1:]]

    out = pl.pallas_call(
        functools.partial(_encoder_kernel, n_heads, head_dim, Wb, S, C),
        out_shape=jax.ShapeDtypeStruct((B, S, C), jnp.float32),
        grid=(B // Wb,),
        in_specs=in_specs,
        out_specs=pl.BlockSpec((Wb, S, C), lambda i: (i, 0, 0)),
        scratch_shapes=[pltpu.VMEM((Wb * S, C), jnp.float32),
                        pltpu.VMEM((Wb * S, 3 * C), jnp.float32)],
        compiler_params=pltpu.CompilerParams(dimension_semantics=("parallel",)),
    )(*args)
    return out.reshape(N, nWin, S, C)


# ----------------------------------------------------------------------------
# block / grid partitioning (glue, pure reshapes/transposes, done by XLA)
# ----------------------------------------------------------------------------
def block_partition(x, size):
    N, H, W, C = x.shape
    nH, nW = H // size, W // size
    x = x.reshape(N, nH, size, nW, size, C).transpose(0, 1, 3, 2, 4, 5)
    return x.reshape(N, nH * nW, size * size, C), nH, nW


def unblock(x, nH, nW, size):
    N, _, _, C = x.shape
    x = x.reshape(N, nH, nW, size, size, C).transpose(0, 1, 3, 2, 4, 5)
    return x.reshape(N, nH * size, nW * size, C)


def grid_partition(x, size):
    N, H, W, C = x.shape
    nH, nW = H // size, W // size
    x = x.reshape(N, size, nH, size, nW, C).transpose(0, 2, 4, 1, 3, 5)
    return x.reshape(N, nH * nW, size * size, C), nH, nW


def ungrid(x, nH, nW, size):
    N, _, _, C = x.shape
    x = x.reshape(N, nH, nW, size, size, C).transpose(0, 3, 1, 4, 2, 5)
    return x.reshape(N, size * nH, size * nW, C)


# ----------------------------------------------------------------------------
# MaxViTBlock forward
# ----------------------------------------------------------------------------
def maxvit_block(x_nchw, params, window):
    x = jnp.transpose(x_nchw, (0, 2, 3, 1))                # NCHW -> NHWC
    x = mbconv(x, params["mbconv"])
    nh, hd = params["n_heads"], params["head_dim"]
    xb, nH, nW = block_partition(x, window)
    xb = encoder_layer_apply(xb, params["block_layer"], nh, hd, window)
    x = unblock(xb, nH, nW, window)
    xg, nH, nW = grid_partition(x, window)
    xg = encoder_layer_apply(xg, params["grid_layer"], nh, hd, window)
    x = ungrid(xg, nH, nW, window)
    return jnp.transpose(x, (0, 3, 1, 2))                  # NHWC -> NCHW


# ----------------------------------------------------------------------------
# deterministic parameter init (synthetic; BN uses inference-mode folding)
# ----------------------------------------------------------------------------
def init_params(key, in_dim, out_dim, window):
    hidden = out_dim * 4
    head_dim = 32
    n_heads = out_dim // head_dim
    keys = iter(jax.random.split(key, 64))

    def nrm(shape, s=0.05):
        return jax.random.normal(next(keys), shape, jnp.float32) * s

    def uni(shape, lo=0.8, hi=1.2):
        return jax.random.uniform(next(keys), shape, jnp.float32, lo, hi)

    eps = 1e-3
    # pre-BN (in_dim)
    g0, b0 = uni((in_dim,)), nrm((in_dim,), 0.1)
    rm0, rv0 = nrm((in_dim,), 0.1), uni((in_dim,))
    a0 = g0 / jnp.sqrt(rv0 + eps)
    c0 = b0 - rm0 * a0
    # 1x1 expand conv (no bias) + BN
    w1 = nrm((in_dim, hidden))
    g1, b1 = uni((hidden,)), nrm((hidden,), 0.1)
    rm1, rv1 = nrm((hidden,), 0.1), uni((hidden,))
    a1 = g1 / jnp.sqrt(rv1 + eps)
    c1 = b1 - rm1 * a1
    w1_eff = (a0[:, None] * w1) * a1[None, :]
    b1_eff = (c0 @ w1) * a1 + c1
    # depthwise 3x3 (no bias) + BN
    dw_w = nrm((3, 3, hidden), 0.1)
    g2, b2 = uni((hidden,)), nrm((hidden,), 0.1)
    rm2, rv2 = nrm((hidden,), 0.1), uni((hidden,))
    a2 = g2 / jnp.sqrt(rv2 + eps)
    c2 = b2 - rm2 * a2
    # squeeze-excitation (bias=True convs)
    se_w1, se_b1 = nrm((hidden, hidden // 16)), nrm((hidden // 16,), 0.02)
    se_w2, se_b2 = nrm((hidden // 16, hidden)), nrm((hidden,), 0.02)
    # 1x1 projection (bias=True)
    w_proj, b_proj = nrm((hidden, out_dim)), nrm((out_dim,), 0.02)

    mb = dict(w1_eff=w1_eff, b1_eff=b1_eff,
              dw_w=dw_w.reshape(9, hidden), dw_scale=a2, dw_shift=c2,
              se_w1=se_w1, se_b1=se_b1, se_w2=se_w2, se_b2=se_b2,
              w_proj=w_proj, b_proj=b_proj)

    def enc_params():
        d = out_dim
        return dict(
            ln1_g=jnp.ones((d,), jnp.float32), ln1_b=jnp.zeros((d,), jnp.float32),
            wq=nrm((d, d)), bq=nrm((d,), 0.02),
            wk=nrm((d, d)), bk=nrm((d,), 0.02),
            wv=nrm((d, d)), bv=nrm((d,), 0.02),
            wo=nrm((d, d)), bo=nrm((d,), 0.02),
            attn_bias=nrm((n_heads, 2 * window - 1, 2 * window - 1), 0.02),
            ln2_g=jnp.ones((d,), jnp.float32), ln2_b=jnp.zeros((d,), jnp.float32),
            w1=nrm((d, 4 * d)), b1=nrm((4 * d,), 0.02),
            w2=nrm((4 * d, d)), b2=nrm((d,), 0.02),
        )

    return dict(mbconv=mb, block_layer=enc_params(), grid_layer=enc_params(),
                n_heads=n_heads, head_dim=head_dim)


if __name__ == "__main__":
    key = jax.random.PRNGKey(0)
    N, in_dim, H, W = 2, 64, 14, 14        # spatial must be a multiple of window_size
    out_dim, window = 64, 7                # head_dim=32 -> n_heads=2
    kx, kp = jax.random.split(key)
    x_nchw = jax.random.normal(kx, (N, in_dim, H, W), jnp.float32)
    params = init_params(kp, in_dim, out_dim, window)

    y = maxvit_block(x_nchw, params, window)
    y = jax.block_until_ready(y)
    assert y.shape == (N, out_dim, H, W), y.shape
    assert bool(jnp.all(jnp.isfinite(y)))
    print("KERNEL_OK")
</pallas_src>

<mosaic_0001>
module attributes {stable_mosaic.version = 11 : i64} {
  func.func @_mbconv_kernel(%arg0: i32, %arg1: memref<1x196x64xf32, #tpu.memory_space<vmem>>, %arg2: memref<64x256xbf16, #tpu.memory_space<vmem>>, %arg3: memref<1x256xf32, #tpu.memory_space<vmem>>, %arg4: memref<9x256xf32, #tpu.memory_space<vmem>>, %arg5: memref<1x256xf32, #tpu.memory_space<vmem>>, %arg6: memref<1x256xf32, #tpu.memory_space<vmem>>, %arg7: memref<256x16xf32, #tpu.memory_space<vmem>>, %arg8: memref<1x16xf32, #tpu.memory_space<vmem>>, %arg9: memref<16x256xf32, #tpu.memory_space<vmem>>, %arg10: memref<1x256xf32, #tpu.memory_space<vmem>>, %arg11: memref<256x64xbf16, #tpu.memory_space<vmem>>, %arg12: memref<1x64xf32, #tpu.memory_space<vmem>>, %arg13: memref<1x196x64xf32, #tpu.memory_space<vmem>>, %arg14: memref<226x256xf32, #tpu.memory_space<vmem>>) attributes {dimension_semantics = [#tpu.dimension_semantics<parallel>], iteration_bounds = array<i64: 2>, scalar_prefetch = 0 : i64, scratch_operands = 1 : i64, tpu.core_type = #tpu.core_type<tc>, window_params = [{transform_indices = @transform_0, window_bounds = array<i64: 1, 196, 64>}, {pipeline_mode = #tpu.pipeline_mode<synchronous>, transform_indices = @transform_1, window_bounds = array<i64: 64, 256>}, {pipeline_mode = #tpu.pipeline_mode<synchronous>, transform_indices = @transform_2, window_bounds = array<i64: 1, 256>}, {pipeline_mode = #tpu.pipeline_mode<synchronous>, transform_indices = @transform_3, window_bounds = array<i64: 9, 256>}, {pipeline_mode = #tpu.pipeline_mode<synchronous>, transform_indices = @transform_4, window_bounds = array<i64: 1, 256>}, {pipeline_mode = #tpu.pipeline_mode<synchronous>, transform_indices = @transform_5, window_bounds = array<i64: 1, 256>}, {pipeline_mode = #tpu.pipeline_mode<synchronous>, transform_indices = @transform_6, window_bounds = array<i64: 256, 16>}, {pipeline_mode = #tpu.pipeline_mode<synchronous>, transform_indices = @transform_7, window_bounds = array<i64: 1, 16>}, {pipeline_mode = #tpu.pipeline_mode<synchronous>, transform_indices = @transform_8, window_bounds = array<i64: 16, 256>}, {pipeline_mode = #tpu.pipeline_mode<synchronous>, transform_indices = @transform_9, window_bounds = array<i64: 1, 256>}, {pipeline_mode = #tpu.pipeline_mode<synchronous>, transform_indices = @transform_10, window_bounds = array<i64: 256, 64>}, {pipeline_mode = #tpu.pipeline_mode<synchronous>, transform_indices = @transform_11, window_bounds = array<i64: 1, 64>}, {transform_indices = @transform_12, window_bounds = array<i64: 1, 196, 64>}]} {
    %c0 = arith.constant 0 : index
    %c0_0 = arith.constant 0 : index
    %c0_1 = arith.constant 0 : index
    %0 = vector.load %arg1[%c0, %c0_0, %c0_1] : memref<1x196x64xf32, #tpu.memory_space<vmem>>, vector<1x196x64xf32>
    %1 = vector.shape_cast %0 : vector<1x196x64xf32> to vector<196x64xf32>
    %2 = arith.truncf %1 : vector<196x64xf32> to vector<196x64xbf16>
    %c0_2 = arith.constant 0 : index
    %c0_3 = arith.constant 0 : index
    %3 = vector.load %arg2[%c0_2, %c0_3] : memref<64x256xbf16, #tpu.memory_space<vmem>>, vector<64x256xbf16>
    %cst = arith.constant dense<0.000000e+00> : vector<196x256xf32>
    %4 = tpu.matmul %2, %3, %cst {dimension_numbers = #tpu.dot_dimension_numbers<[1], [0], [0], [1], [0, 0, 1, 1], [], []>} : vector<196x64xbf16>, vector<64x256xbf16>, vector<196x256xf32> -> vector<196x256xf32>
    %c0_4 = arith.constant 0 : index
    %c0_5 = arith.constant 0 : index
    %5 = vector.load %arg3[%c0_4, %c0_5] : memref<1x256xf32, #tpu.memory_space<vmem>>, vector<1x256xf32>
    %6 = vector.shape_cast %5 : vector<1x256xf32> to vector<256xf32>
    %7 = vector.shape_cast %6 : vector<256xf32> to vector<1x256xf32>
    %8 = vector.broadcast %7 : vector<1x256xf32> to vector<196x256xf32>
    %9 = arith.addf %4, %8 : vector<196x256xf32>
    %10 = arith.mulf %9, %9 : vector<196x256xf32>
    %11 = arith.mulf %9, %10 : vector<196x256xf32>
    %cst_6 = arith.constant 4.471500e-02 : f32
    %12 = vector.broadcast %cst_6 : f32 to vector<196x256xf32>
    %13 = arith.mulf %12, %11 : vector<196x256xf32>
    %14 = arith.addf %9, %13 : vector<196x256xf32>
    %cst_7 = arith.constant 0.797884583 : f32
    %15 = vector.broadcast %cst_7 : f32 to vector<196x256xf32>
    %16 = arith.mulf %15, %14 : vector<196x256xf32>
    %17 = math.tanh %16 : vector<196x256xf32>
    %cst_8 = arith.constant 1.000000e+00 : f32
    %18 = vector.broadcast %cst_8 : f32 to vector<196x256xf32>
    %19 = arith.addf %18, %17 : vector<196x256xf32>
    %cst_9 = arith.constant 5.000000e-01 : f32
    %20 = vector.broadcast %cst_9 : f32 to vector<196x256xf32>
    %21 = arith.mulf %20, %19 : vector<196x256xf32>
    %22 = arith.mulf %9, %21 : vector<196x256xf32>
    %cst_10 = arith.constant 0.000000e+00 : f32
    %23 = vector.broadcast %cst_10 : f32 to vector<15x256xf32>
    %c0_11 = arith.constant 0 : index
    %c0_12 = arith.constant 0 : index
    %24 = vector.load %arg14[%c0_11, %c0_12] : memref<226x256xf32, #tpu.memory_space<vmem>>, vector<15x256xf32>
    tpu.vector_store %arg14[%c0_11, %c0_12], %23 {strides = array<i32>} : memref<226x256xf32, #tpu.memory_space<vmem>>, vector<15x256xf32>,
    %c211 = arith.constant 211 : index
    %c0_13 = arith.constant 0 : index
    %25 = vector.load %arg14[%c211, %c0_13] : memref<226x256xf32, #tpu.memory_space<vmem>>, vector<15x256xf32>
    tpu.vector_store %arg14[%c211, %c0_13], %23 {strides = array<i32>} : memref<226x256xf32, #tpu.memory_space<vmem>>, vector<15x256xf32>,
    %c15 = arith.constant 15 : index
    %c0_14 = arith.constant 0 : index
    %26 = vector.load %arg14[%c15, %c0_14] : memref<226x256xf32, #tpu.memory_space<vmem>>, vector<196x256xf32>
    tpu.vector_store %arg14[%c15, %c0_14], %22 {strides = array<i32>} : memref<226x256xf32, #tpu.memory_space<vmem>>, vector<196x256xf32>,
    %27 = tpu.iota {dimensions = array<i32: 0>} : vector<196x1xi32>
    %c14_i32 = arith.constant 14 : i32
    %c0_i32 = arith.constant 0 : i32
    %28 = arith.cmpi eq, %c14_i32, %c0_i32 : i32
    %c1_i32 = arith.constant 1 : i32
    %29 = arith.select %28, %c1_i32, %c14_i32 : i32
    %30 = vector.broadcast %29 : i32 to vector<196x1xi32>
    %31 = arith.remsi %27, %30 : vector<196x1xi32>
    %c0_i32_15 = arith.constant 0 : i32
    %32 = vector.broadcast %c0_i32_15 : i32 to vector<196x1xi32>
    %33 = arith.cmpi ne, %31, %32 : vector<196x1xi32>
    %c0_i32_16 = arith.constant 0 : i32
    %34 = vector.broadcast %c0_i32_16 : i32 to vector<196x1xi32>
    %35 = arith.cmpi slt, %31, %34 : vector<196x1xi32>
    %c0_i32_17 = arith.constant 0 : i32
    %36 = arith.cmpi slt, %29, %c0_i32_17 : i32
    %37 = vector.broadcast %36 : i1 to vector<196x1xi1>
    %38 = vector.broadcast %37 : vector<196x1xi1> to vector<196x1xi1>
    %39 = arith.xori %35, %38 : vector<196x1xi1>
    %40 = arith.andi %39, %33 : vector<196x1xi1>
    %41 = vector.broadcast %29 : i32 to vector<196x1xi32>
    %42 = arith.addi %31, %41 : vector<196x1xi32>
    %43 = arith.select %40, %42, %31 : vector<196x1xi1>, vector<196x1xi32>
    %c0_18 = arith.constant 0 : index
    %c0_19 = arith.constant 0 : index
    %44 = vector.load %arg4[%c0_18, %c0_19] : memref<9x256xf32, #tpu.memory_space<vmem>>, vector<9x256xf32>
    %cst_20 = arith.constant 0.000000e+00 : f32
    %45 = vector.broadcast %cst_20 : f32 to vector<196x256xf32>
    %c0_21 = arith.constant 0 : index
    %c0_22 = arith.constant 0 : index
    %46 = vector.load %arg14[%c0_21, %c0_22] : memref<226x256xf32, #tpu.memory_space<vmem>>, vector<196x256xf32>
    %c0_i32_23 = arith.constant 0 : i32
    %47 = vector.broadcast %c0_i32_23 : i32 to vector<196x1xi32>
    %48 = arith.cmpi ne, %43, %47 : vector<196x1xi32>
    %cst_24 = arith.constant 0.000000e+00 : f32
    %49 = vector.shape_cast %48 : vector<196x1xi1> to vector<196x1xi1>
    %50 = vector.broadcast %49 : vector<196x1xi1> to vector<196x256xi1>
    %51 = vector.broadcast %cst_24 : f32 to vector<196x256xf32>
    %52 = arith.select %50, %46, %51 : vector<196x256xi1>, vector<196x256xf32>
    %53 = vector.extract_strided_slice %44 {offsets = [0, 0], sizes = [1, 256], strides = [1, 1]} : vector<9x256xf32> to vector<1x256xf32>
    %54 = vector.shape_cast %53 : vector<1x256xf32> to vector<256xf32>
    %55 = vector.shape_cast %54 : vector<256xf32> to vector<1x256xf32>
    %56 = vector.broadcast %55 : vector<1x256xf32> to vector<196x256xf32>
    %57 = arith.mulf %52, %56 : vector<196x256xf32>
    %58 = arith.addf %45, %57 : vector<196x256xf32>
    %c1 = arith.constant 1 : index
    %c0_25 = arith.constant 0 : index
    %59 = vector.load %arg14[%c1, %c0_25] : memref<226x256xf32, #tpu.memory_space<vmem>>, vector<196x256xf32>
    %60 = vector.extract_strided_slice %44 {offsets = [1, 0], sizes = [1, 256], strides = [1, 1]} : vector<9x256xf32> to vector<1x256xf32>
    %61 = vector.shape_cast %60 : vector<1x256xf32> to vector<256xf32>
    %62 = vector.shape_cast %61 : vector<256xf32> to vector<1x256xf32>
    %63 = vector.broadcast %62 : vector<1x256xf32> to vector<196x256xf32>
    %64 = arith.mulf %59, %63 : vector<196x256xf32>
    %65 = arith.addf %58, %64 : vector<196x256xf32>
    %c2 = arith.constant 2 : index
    %c0_26 = arith.constant 0 : index
    %66 = vector.load %arg14[%c2, %c0_26] : memref<226x256xf32, #tpu.memory_space<vmem>>, vector<196x256xf32>
    %c13_i32 = arith.constant 13 : i32
    %67 = vector.broadcast %c13_i32 : i32 to vector<196x1xi32>
    %68 = arith.cmpi ne, %43, %67 : vector<196x1xi32>
    %cst_27 = arith.constant 0.000000e+00 : f32
    %69 = vector.shape_cast %68 : vector<196x1xi1> to vector<196x1xi1>
    %70 = vector.broadcast %69 : vector<196x1xi1> to vector<196x256xi1>
    %71 = vector.broadcast %cst_27 : f32 to vector<196x256xf32>
    %72 = arith.select %70, %66, %71 : vector<196x256xi1>, vector<196x256xf32>
    %73 = vector.extract_strided_slice %44 {offsets = [2, 0], sizes = [1, 256], strides = [1, 1]} : vector<9x256xf32> to vector<1x256xf32>
    %74 = vector.shape_cast %73 : vector<1x256xf32> to vector<256xf32>
    %75 = vector.shape_cast %74 : vector<256xf32> to vector<1x256xf32>
    %76 = vector.broadcast %75 : vector<1x256xf32> to vector<196x256xf32>
    %77 = arith.mulf %72, %76 : vector<196x256xf32>
    %78 = arith.addf %65, %77 : vector<196x256xf32>
    %c14 = arith.constant 14 : index
    %c0_28 = arith.constant 0 : index
    %79 = vector.load %arg14[%c14, %c0_28] : memref<226x256xf32, #tpu.memory_space<vmem>>, vector<196x256xf32>
    %c0_i32_29 = arith.constant 0 : i32
    %80 = vector.broadcast %c0_i32_29 : i32 to vector<196x1xi32>
    %81 = arith.cmpi ne, %43, %80 : vector<196x1xi32>
    %cst_30 = arith.constant 0.000000e+00 : f32
    %82 = vector.shape_cast %81 : vector<196x1xi1> to vector<196x1xi1>
    %83 = vector.broadcast %82 : vector<196x1xi1> to vector<196x256xi1>
    %84 = vector.broadcast %cst_30 : f32 to vector<196x256xf32>
    %85 = arith.select %83, %79, %84 : vector<196x256xi1>, vector<196x256xf32>
    %86 = vector.extract_strided_slice %44 {offsets = [3, 0], sizes = [1, 256], strides = [1, 1]} : vector<9x256xf32> to vector<1x256xf32>
    %87 = vector.shape_cast %86 : vector<1x256xf32> to vector<256xf32>
    %88 = vector.shape_cast %87 : vector<256xf32> to vector<1x256xf32>
    %89 = vector.broadcast %88 : vector<1x256xf32> to vector<196x256xf32>
    %90 = arith.mulf %85, %89 : vector<196x256xf32>
    %91 = arith.addf %78, %90 : vector<196x256xf32>
    %c15_31 = arith.constant 15 : index
    %c0_32 = arith.constant 0 : index
    %92 = vector.load %arg14[%c15_31, %c0_32] : memref<226x256xf32, #tpu.memory_space<vmem>>, vector<196x256xf32>
    %93 = vector.extract_strided_slice %44 {offsets = [4, 0], sizes = [1, 256], strides = [1, 1]} : vector<9x256xf32> to vector<1x256xf32>
    %94 = vector.shape_cast %93 : vector<1x256xf32> to vector<256xf32>
    %95 = vector.shape_cast %94 : vector<256xf32> to vector<1x256xf32>
    %96 = vector.broadcast %95 : vector<1x256xf32> to vector<196x256xf32>
    %97 = arith.mulf %92, %96 : vector<196x256xf32>
    %98 = arith.addf %91, %97 : vector<196x256xf32>
    %c16 = arith.constant 16 : index
    %c0_33 = arith.constant 0 : index
    %99 = vector.load %arg14[%c16, %c0_33] : memref<226x256xf32, #tpu.memory_space<vmem>>, vector<196x256xf32>
    %c13_i32_34 = arith.constant 13 : i32
    %100 = vector.broadcast %c13_i32_34 : i32 to vector<196x1xi32>
    %101 = arith.cmpi ne, %43, %100 : vector<196x1xi32>
    %cst_35 = arith.constant 0.000000e+00 : f32
    %102 = vector.shape_cast %101 : vector<196x1xi1> to vector<196x1xi1>
    %103 = vector.broadcast %102 : vector<196x1xi1> to vector<196x256xi1>
    %104 = vector.broadcast %cst_35 : f32 to vector<196x256xf32>
    %105 = arith.select %103, %99, %104 : vector<196x256xi1>, vector<196x256xf32>
    %106 = vector.extract_strided_slice %44 {offsets = [5, 0], sizes = [1, 256], strides = [1, 1]} : vector<9x256xf32> to vector<1x256xf32>
    %107 = vector.shape_cast %106 : vector<1x256xf32> to vector<256xf32>
    %108 = vector.shape_cast %107 : vector<256xf32> to vector<1x256xf32>
    %109 = vector.broadcast %108 : vector<1x256xf32> to vector<196x256xf32>
    %110 = arith.mulf %105, %109 : vector<196x256xf32>
    %111 = arith.addf %98, %110 : vector<196x256xf32>
    %c28 = arith.constant 28 : index
    %c0_36 = arith.constant 0 : index
    %112 = vector.load %arg14[%c28, %c0_36] : memref<226x256xf32, #tpu.memory_space<vmem>>, vector<196x256xf32>
    %c0_i32_37 = arith.constant 0 : i32
    %113 = vector.broadcast %c0_i32_37 : i32 to vector<196x1xi32>
    %114 = arith.cmpi ne, %43, %113 : vector<196x1xi32>
    %cst_38 = arith.constant 0.000000e+00 : f32
    %115 = vector.shape_cast %114 : vector<196x1xi1> to vector<196x1xi1>
    %116 = vector.broadcast %115 : vector<196x1xi1> to vector<196x256xi1>
    %117 = vector.broadcast %cst_38 : f32 to vector<196x256xf32>
    %118 = arith.select %116, %112, %117 : vector<196x256xi1>, vector<196x256xf32>
    %119 = vector.extract_strided_slice %44 {offsets = [6, 0], sizes = [1, 256], strides = [1, 1]} : vector<9x256xf32> to vector<1x256xf32>
    %120 = vector.shape_cast %119 : vector<1x256xf32> to vector<256xf32>
    %121 = vector.shape_cast %120 : vector<256xf32> to vector<1x256xf32>
    %122 = vector.broadcast %121 : vector<1x256xf32> to vector<196x256xf32>
    %123 = arith.mulf %118, %122 : vector<196x256xf32>
    %124 = arith.addf %111, %123 : vector<196x256xf32>
    %c29 = arith.constant 29 : index
    %c0_39 = arith.constant 0 : index
    %125 = vector.load %arg14[%c29, %c0_39] : memref<226x256xf32, #tpu.memory_space<vmem>>, vector<196x256xf32>
    %126 = vector.extract_strided_slice %44 {offsets = [7, 0], sizes = [1, 256], strides = [1, 1]} : vector<9x256xf32> to vector<1x256xf32>
    %127 = vector.shape_cast %126 : vector<1x256xf32> to vector<256xf32>
    %128 = vector.shape_cast %127 : vector<256xf32> to vector<1x256xf32>
    %129 = vector.broadcast %128 : vector<1x256xf32> to vector<196x256xf32>
    %130 = arith.mulf %125, %129 : vector<196x256xf32>
    %131 = arith.addf %124, %130 : vector<196x256xf32>
    %c30 = arith.constant 30 : index
    %c0_40 = arith.constant 0 : index
    %132 = vector.load %arg14[%c30, %c0_40] : memref<226x256xf32, #tpu.memory_space<vmem>>, vector<196x256xf32>
    %c13_i32_41 = arith.constant 13 : i32
    %133 = vector.broadcast %c13_i32_41 : i32 to vector<196x1xi32>
    %134 = arith.cmpi ne, %43, %133 : vector<196x1xi32>
    %cst_42 = arith.constant 0.000000e+00 : f32
    %135 = vector.shape_cast %134 : vector<196x1xi1> to vector<196x1xi1>
    %136 = vector.broadcast %135 : vector<196x1xi1> to vector<196x256xi1>
    %137 = vector.broadcast %cst_42 : f32 to vector<196x256xf32>
    %138 = arith.select %136, %132, %137 : vector<196x256xi1>, vector<196x256xf32>
    %139 = vector.extract_strided_slice %44 {offsets = [8, 0], sizes = [1, 256], strides = [1, 1]} : vector<9x256xf32> to vector<1x256xf32>
    %140 = vector.shape_cast %139 : vector<1x256xf32> to vector<256xf32>
    %141 = vector.shape_cast %140 : vector<256xf32> to vector<1x256xf32>
    %142 = vector.broadcast %141 : vector<1x256xf32> to vector<196x256xf32>
    %143 = arith.mulf %138, %142 : vector<196x256xf32>
    %144 = arith.addf %131, %143 : vector<196x256xf32>
    %c0_43 = arith.constant 0 : index
    %c0_44 = arith.constant 0 : index
    %145 = vector.load %arg5[%c0_43, %c0_44] : memref<1x256xf32, #tpu.memory_space<vmem>>, vector<1x256xf32>
    %146 = vector.shape_cast %145 : vector<1x256xf32> to vector<256xf32>
    %147 = vector.shape_cast %146 : vector<256xf32> to vector<1x256xf32>
    %148 = vector.broadcast %147 : vector<1x256xf32> to vector<196x256xf32>
    %149 = arith.mulf %144, %148 : vector<196x256xf32>
    %c0_45 = arith.constant 0 : index
    %c0_46 = arith.constant 0 : index
    %150 = vector.load %arg6[%c0_45, %c0_46] : memref<1x256xf32, #tpu.memory_space<vmem>>, vector<1x256xf32>
    %151 = vector.shape_cast %150 : vector<1x256xf32> to vector<256xf32>
    %152 = vector.shape_cast %151 : vector<256xf32> to vector<1x256xf32>
    %153 = vector.broadcast %152 : vector<1x256xf32> to vector<196x256xf32>
    %154 = arith.addf %149, %153 : vector<196x256xf32>
    %155 = arith.mulf %154, %154 : vector<196x256xf32>
    %156 = arith.mulf %154, %155 : vector<196x256xf32>
    %cst_47 = arith.constant 4.471500e-02 : f32
    %157 = vector.broadcast %cst_47 : f32 to vector<196x256xf32>
    %158 = arith.mulf %157, %156 : vector<196x256xf32>
    %159 = arith.addf %154, %158 : vector<196x256xf32>
    %cst_48 = arith.constant 0.797884583 : f32
    %160 = vector.broadcast %cst_48 : f32 to vector<196x256xf32>
    %161 = arith.mulf %160, %159 : vector<196x256xf32>
    %162 = math.tanh %161 : vector<196x256xf32>
    %cst_49 = arith.constant 1.000000e+00 : f32
    %163 = vector.broadcast %cst_49 : f32 to vector<196x256xf32>
    %164 = arith.addf %163, %162 : vector<196x256xf32>
    %cst_50 = arith.constant 5.000000e-01 : f32
    %165 = vector.broadcast %cst_50 : f32 to vector<196x256xf32>
    %166 = arith.mulf %165, %164 : vector<196x256xf32>
    %167 = arith.mulf %154, %166 : vector<196x256xf32>
    %cst_51 = arith.constant dense<0.000000e+00> : vector<256xf32>
    %168 = vector.multi_reduction <add>, %167, %cst_51 [0] : vector<196x256xf32> to vector<256xf32>
    %169 = vector.shape_cast %168 : vector<256xf32> to vector<1x256xf32>
    %cst_52 = arith.constant 1.960000e+02 : f32
    %170 = vector.broadcast %cst_52 : f32 to vector<1x256xf32>
    %171 = arith.divf %169, %170 : vector<1x256xf32>
    %c0_53 = arith.constant 0 : index
    %c0_54 = arith.constant 0 : index
    %172 = vector.load %arg7[%c0_53, %c0_54] : memref<256x16xf32, #tpu.memory_space<vmem>>, vector<256x16xf32>
    %cst_55 = arith.constant dense<0.000000e+00> : vector<1x16xf32>
    %173 = tpu.matmul %171, %172, %cst_55 {dimension_numbers = #tpu.dot_dimension_numbers<[1], [0], [0], [1], [0, 0, 1, 1], [], []>} : vector<1x256xf32>, vector<256x16xf32>, vector<1x16xf32> -> vector<1x16xf32>
    %c0_56 = arith.constant 0 : index
    %c0_57 = arith.constant 0 : index
    %174 = vector.load %arg8[%c0_56, %c0_57] : memref<1x16xf32, #tpu.memory_space<vmem>>, vector<1x16xf32>
    %175 = vector.shape_cast %174 : vector<1x16xf32> to vector<16xf32>
    %176 = vector.shape_cast %175 : vector<16xf32> to vector<1x16xf32>
    %177 = arith.addf %173, %176 : vector<1x16xf32>
    %178 = arith.negf %177 : vector<1x16xf32>
    %179 = math.exp %178 : vector<1x16xf32>
    %cst_58 = arith.constant 1.000000e+00 : f32
    %180 = vector.broadcast %cst_58 : f32 to vector<1x16xf32>
    %181 = arith.addf %180, %179 : vector<1x16xf32>
    %182 = arith.divf %180, %181 : vector<1x16xf32>
    %183 = arith.mulf %177, %182 : vector<1x16xf32>
    %c0_59 = arith.constant 0 : index
    %c0_60 = arith.constant 0 : index
    %184 = vector.load %arg9[%c0_59, %c0_60] : memref<16x256xf32, #tpu.memory_space<vmem>>, vector<16x256xf32>
    %cst_61 = arith.constant dense<0.000000e+00> : vector<1x256xf32>
    %185 = tpu.matmul %183, %184, %cst_61 {dimension_numbers = #tpu.dot_dimension_numbers<[1], [0], [0], [1], [0, 0, 1, 1], [], []>} : vector<1x16xf32>, vector<16x256xf32>, vector<1x256xf32> -> vector<1x256xf32>
    %c0_62 = arith.constant 0 : index
    %c0_63 = arith.constant 0 : index
    %186 = vector.load %arg10[%c0_62, %c0_63] : memref<1x256xf32, #tpu.memory_space<vmem>>, vector<1x256xf32>
    %187 = vector.shape_cast %186 : vector<1x256xf32> to vector<256xf32>
    %188 = vector.shape_cast %187 : vector<256xf32> to vector<1x256xf32>
    %189 = arith.addf %185, %188 : vector<1x256xf32>
    %190 = arith.negf %189 : vector<1x256xf32>
    %191 = math.exp %190 : vector<1x256xf32>
    %cst_64 = arith.constant 1.000000e+00 : f32
    %192 = vector.broadcast %cst_64 : f32 to vector<1x256xf32>
    %193 = arith.addf %192, %191 : vector<1x256xf32>
    %194 = arith.divf %192, %193 : vector<1x256xf32>
    %195 = vector.broadcast %194 : vector<1x256xf32> to vector<196x256xf32>
    %196 = arith.mulf %167, %195 : vector<196x256xf32>
    %197 = arith.truncf %196 : vector<196x256xf32> to vector<196x256xbf16>
    %c0_65 = arith.constant 0 : index
    %c0_66 = arith.constant 0 : index
    %198 = vector.load %arg11[%c0_65, %c0_66] : memref<256x64xbf16, #tpu.memory_space<vmem>>, vector<256x64xbf16>
    %cst_67 = arith.constant dense<0.000000e+00> : vector<196x64xf32>
    %199 = tpu.matmul %197, %198, %cst_67 {dimension_numbers = #tpu.dot_dimension_numbers<[1], [0], [0], [1], [0, 0, 1, 1], [], []>} : vector<196x256xbf16>, vector<256x64xbf16>, vector<196x64xf32> -> vector<196x64xf32>
    %c0_68 = arith.constant 0 : index
    %c0_69 = arith.constant 0 : index
    %200 = vector.load %arg12[%c0_68, %c0_69] : memref<1x64xf32, #tpu.memory_space<vmem>>, vector<1x64xf32>
    %201 = vector.shape_cast %200 : vector<1x64xf32> to vector<64xf32>
    %202 = vector.shape_cast %201 : vector<64xf32> to vector<1x64xf32>
    %203 = vector.broadcast %202 : vector<1x64xf32> to vector<196x64xf32>
    %204 = arith.addf %199, %203 : vector<196x64xf32>
    %205 = arith.addf %1, %204 : vector<196x64xf32>
    %c0_70 = arith.constant 0 : index
    %c0_71 = arith.constant 0 : index
    %c0_72 = arith.constant 0 : index
    %206 = vector.load %arg13[%c0_70, %c0_71, %c0_72] : memref<1x196x64xf32, #tpu.memory_space<vmem>>, vector<1x196x64xf32>
    %207 = vector.shape_cast %206 : vector<1x196x64xf32> to vector<196x64xf32>
    %208 = vector.shape_cast %205 : vector<196x64xf32> to vector<1x196x64xf32>
    tpu.vector_store %arg13[%c0_70, %c0_71, %c0_72], %208 {strides = array<i32>} : memref<1x196x64xf32, #tpu.memory_space<vmem>>, vector<1x196x64xf32>,
    return
  }
  func.func @transform_0(%arg0: i32) -> (i32, i32, i32) {
    %c0_i32 = arith.constant 0 : i32
    %c0_i32_0 = arith.constant 0 : i32
    %c0_i32_1 = arith.constant 0 : i32
    return %arg0, %c0_i32, %c0_i32_0 : i32, i32, i32
  }
  func.func @transform_1(%arg0: i32) -> (i32, i32) {
    %c0_i32 = arith.constant 0 : i32
    %c0_i32_0 = arith.constant 0 : i32
    %c0_i32_1 = arith.constant 0 : i32
    return %c0_i32, %c0_i32_0 : i32, i32
  }
  func.func @transform_2(%arg0: i32) -> (i32, i32) {
    %c0_i32 = arith.constant 0 : i32
    %c0_i32_0 = arith.constant 0 : i32
    %c0_i32_1 = arith.constant 0 : i32
    return %c0_i32, %c0_i32_0 : i32, i32
  }
  func.func @transform_3(%arg0: i32) -> (i32, i32) {
    %c0_i32 = arith.constant 0 : i32
    %c0_i32_0 = arith.constant 0 : i32
    %c0_i32_1 = arith.constant 0 : i32
    return %c0_i32, %c0_i32_0 : i32, i32
  }
  func.func @transform_4(%arg0: i32) -> (i32, i32) {
    %c0_i32 = arith.constant 0 : i32
    %c0_i32_0 = arith.constant 0 : i32
    %c0_i32_1 = arith.constant 0 : i32
    return %c0_i32, %c0_i32_0 : i32, i32
  }
  func.func @transform_5(%arg0: i32) -> (i32, i32) {
    %c0_i32 = arith.constant 0 : i32
    %c0_i32_0 = arith.constant 0 : i32
    %c0_i32_1 = arith.constant 0 : i32
    return %c0_i32, %c0_i32_0 : i32, i32
  }
  func.func @transform_6(%arg0: i32) -> (i32, i32) {
    %c0_i32 = arith.constant 0 : i32
    %c0_i32_0 = arith.constant 0 : i32
    %c0_i32_1 = arith.constant 0 : i32
    return %c0_i32, %c0_i32_0 : i32, i32
  }
  func.func @transform_7(%arg0: i32) -> (i32, i32) {
    %c0_i32 = arith.constant 0 : i32
    %c0_i32_0 = arith.constant 0 : i32
    %c0_i32_1 = arith.constant 0 : i32
    return %c0_i32, %c0_i32_0 : i32, i32
  }
  func.func @transform_8(%arg0: i32) -> (i32, i32) {
    %c0_i32 = arith.constant 0 : i32
    %c0_i32_0 = arith.constant 0 : i32
    %c0_i32_1 = arith.constant 0 : i32
    return %c0_i32, %c0_i32_0 : i32, i32
  }
  func.func @transform_9(%arg0: i32) -> (i32, i32) {
    %c0_i32 = arith.constant 0 : i32
    %c0_i32_0 = arith.constant 0 : i32
    %c0_i32_1 = arith.constant 0 : i32
    return %c0_i32, %c0_i32_0 : i32, i32
  }
  func.func @transform_10(%arg0: i32) -> (i32, i32) {
    %c0_i32 = arith.constant 0 : i32
    %c0_i32_0 = arith.constant 0 : i32
    %c0_i32_1 = arith.constant 0 : i32
    return %c0_i32, %c0_i32_0 : i32, i32
  }
  func.func @transform_11(%arg0: i32) -> (i32, i32) {
    %c0_i32 = arith.constant 0 : i32
    %c0_i32_0 = arith.constant 0 : i32
    %c0_i32_1 = arith.constant 0 : i32
    return %c0_i32, %c0_i32_0 : i32, i32
  }
  func.func @transform_12(%arg0: i32) -> (i32, i32, i32) {
    %c0_i32 = arith.constant 0 : i32
    %c0_i32_0 = arith.constant 0 : i32
    %c0_i32_1 = arith.constant 0 : i32
    return %arg0, %c0_i32, %c0_i32_0 : i32, i32, i32
  }
}

</mosaic_0001>

<bundles_post_ra>
// kernel: tpu_custom_call.1
= control target key start
LH: loop header
LB: loop body
LE: loop exit
PB: predicated region body
PF: predicated region fallthrough
CT: control target
= control target key end

     0   :  { %s6778_s21 = smov 0   ;;  %s13280_s0 = inlined_call_operand.vmem [shape: f32[2,196,64], index: 0, kind: input, shape index: {}]   ;;  %s13281_s1 = inlined_call_operand.vmem [shape: bf16[64,256], index: 1, kind: input, shape index: {}]   ;;  %s13282_s2 = inlined_call_operand.vmem [shape: f32[1,256], index: 2, kind: input, shape index: {}]   ;;  %s13283_s3 = inlined_call_operand.vmem [shape: f32[9,256], index: 3, kind: input, shape index: {}]   ;;  %s13284_s4 = inlined_call_operand.vmem [shape: f32[1,256], index: 4, kind: input, shape index: {}]   ;;  %s13285_s5 = inlined_call_operand.vmem [shape: f32[1,256], index: 5, kind: input, shape index: {}]   ;;  %s13286_s6 = inlined_call_operand.vmem [shape: f32[256,16], index: 6, kind: input, shape index: {}]   ;;  %s13287_s7 = inlined_call_operand.vmem [shape: f32[1,16], index: 7, kind: input, shape index: {}]   ;;  %s13288_s8 = inlined_call_operand.vmem [shape: f32[16,256], index: 8, kind: input, shape index: {}]   ;;  %s13289_s9 = inlined_call_operand.vmem [shape: f32[1,256], index: 9, kind: input, shape index: {}]   ;;  %s13290_s10 = inlined_call_operand.vmem [shape: bf16[256,64], index: 10, kind: input, shape index: {}]   ;;  %s13291_s11 = inlined_call_operand.vmem [shape: f32[1,64], index: 11, kind: input, shape index: {}]   ;;  %s13292_s12 = inlined_call_operand.vmem [shape: f32[2,196,64], index: 12, kind: output, shape index: {}]  }
   0x1 LB: > { %s6250_s22 = sadd.s32 4294967295, %s6708_s21   ;;  %p6254_p0 = scmp.ge.s32.totalorder %s6708_s21, 1  ;;  %s6708_s21 = sphi %s6778_s21, %s22_s21  }
   0x2   : > { %p362_p1 = scmp.lt.s32.totalorder %s6708_s21, 3 }
   0x4   : > { %p363_p2 = pnand %p6254_p0, %p362_p1 }
   0x6   : > { %366 = sbr.rel (%p363_p2) target bundleno = 1890 (0x762), region = 68 }
   0xb   : > { %v6283_v0 = vld [vmem:[%s13281_s1 + $0x30] sm:$0xf]  ;;  %v6393_v1 = vld [vmem:[%s13281_s1 + $0x34] sm:$0xf0]  ;;  %v6392_v2 = vld [vmem:[%s13281_s1 + $0x34] sm:$0xf]  ;;  %v1406_v45 = vlaneseq }
   0xc   : > { %v6284_v3 = vor.u32 %v6393_v1, %v6283_v0  ;;  %v6285_v4 = vld [vmem:[%s13281_s1 + $0x38] sm:$0xf0]  ;;  %v6275_v5 = vld [vmem:[%s13281_s1 + $0x20] sm:$0xf]  ;;  %v6391_v6 = vld [vmem:[%s13281_s1 + $0x24] sm:$0xf0] }
   0xd   : > { %v6288_v7 = vor.u32 %v6392_v2, %v6285_v4  ;;  %v6390_v8 = vld [vmem:[%s13281_s1 + $0x24] sm:$0xf]  ;;  %v6277_v9 = vld [vmem:[%s13281_s1 + $0x28] sm:$0xf0]  ;;  %v6276_v10 = vor.u32 %v6391_v6, %v6275_v5  ;;  %v6267_v12 = vld [vmem:[%s13281_s1 + $0x10] sm:$0xf] }
   0xe   : > { %551 = vmatpush.bf16.msra.mxu0 %v6284_v3  ;;  %v6280_v11 = vor.u32 %v6390_v8, %v6277_v9  ;;  %v6389_v13 = vld [vmem:[%s13281_s1 + $0x14] sm:$0xf0]  ;;  %v6388_v14 = vld [vmem:[%s13281_s1 + $0x14] sm:$0xf]  ;;  %v6269_v15 = vld [vmem:[%s13281_s1 + $0x18] sm:$0xf0] }
   0xf   : > { %624 = vmatpush.bf16.msra.mxu1 %v6288_v7  ;;  %p404_p3 = scmp.lt.s32.totalorder %s6250_s22, 1  ;;  %v6268_v16 = vor.u32 %v6389_v13, %v6267_v12  ;;  %v6272_v17 = vor.u32 %v6388_v14, %v6269_v15  ;;  %v6259_v18 = vld [vmem:[%s13281_s1] sm:$0xf]  ;;  %v6387_v19 = vld [vmem:[%s13281_s1 + $0x4] sm:$0xf0]  ;;  %vm13351_vm0 = vcmask 523264  }
  0x10   : > { %v6386_v20 = vld [vmem:[%s13281_s1 + $0x4] sm:$0xf]  ;;  %v6261_v21 = vld [vmem:[%s13281_s1 + $0x8] sm:$0xf0]  ;;  %v6260_v22 = vor.u32 %v6387_v19, %v6259_v18  ;;  %v6872_v46 = vshrl.u32 %v1406_v45, 7  ;;  %v13293_v6 = vmov 0  }
  0x11   : > { %s14999_s22 = smov (!%p404_p3, %s6250_s22), 1  ;;  %v6264_v23 = vor.u32 %v6386_v20, %v6261_v21 }
  0x12   : > { %552 = vmatpush.bf16.msra.mxu0 %v6276_v10  ;;  %s6410_s23 = smul.u32 200, %s14999_s22  ;;  %13761 = vst [vmem:[#allocation3_spill] sm:$0xff] %v6872_v46  ;;  %v6875_v47 = vadd.s32 8, %v6872_v46  ;;  %v1435_v51 = vand.u32 65535, %v6872_v46  ;;  %v1436_v54 = vshrl.u32 %v6872_v46, 16  ;;  %v6884_v56 = vadd.s32 16, %v6872_v46 }
  0x13   : > { %625 = vmatpush.bf16.msra.mxu1 %v6280_v11 }
  0x14   : > { %s6842_s26 = scalar_lea.vmem %s13280_s0, %s6410_s23  ;;  %v1467_v48 = vand.u32 65535, %v6875_v47  ;;  %v1468_v52 = vshrl.u32 %v6875_v47, 16  ;;  %v1439_v55 = vmul.u32 37449, %v1435_v51  ;;  %v1438_v61 = vmul.u32 9362, %v1435_v51  ;;  %s13149_s24 = scalar_lea.vmem %s13292_s12, %s6410_s23 }
  0x15   : > { %v415_v24 = vld [vmem:[%s6842_s26] sm:$0xff]  ;;  %v416_v25 = vld [vmem:[%s6842_s26 + $0x8] sm:$0xff]  ;;  %v417_v27 = vld [vmem:[%s6842_s26 + $0x10] sm:$0xff]  ;;  %v1440_v62 = vmul.u32 9362, %v1436_v54  ;;  %v1499_v0 = vand.u32 65535, %v6884_v56  ;;  %v1441_v3 = vmul.u32 37449, %v1436_v54 }
  0x16   : > { %553 = vmatpush.bf16.msra.mxu0 %v6268_v16  ;;  %v440_v26 = vpack.c.bf16 %v416_v25, %v415_v24  ;;  %v418_v28 = vld [vmem:[%s6842_s26 + $0x18] sm:$0xff]  ;;  %v419_v30 = vld [vmem:[%s6842_s26 + $0x20] sm:$0xff]  ;;  %v420_v31 = vld [vmem:[%s6842_s26 + $0x28] sm:$0xff]  ;;  %v1471_v53 = vmul.u32 37449, %v1467_v48  ;;  %v1470_v58 = vmul.u32 9362, %v1467_v48  ;;  %v1472_v59 = vmul.u32 9362, %v1468_v52 }
  0x17   : > { %626 = vmatpush.bf16.msra.mxu1 %v6272_v17  ;;  %v441_v29 = vpack.c.bf16 %v418_v28, %v417_v27  ;;  %v442_v32 = vpack.c.bf16 %v420_v31, %v419_v30  ;;  %v421_v33 = vld [vmem:[%s6842_s26 + $0x30] sm:$0xff]  ;;  %v422_v34 = vld [vmem:[%s6842_s26 + $0x38] sm:$0xff]  ;;  %v423_v36 = vld [vmem:[%s6842_s26 + $0x40] sm:$0xff]  ;;  %v1442_v63 = vshll.u32 %v1439_v55, 16  ;;  %v1473_v1 = vmul.u32 37449, %v1468_v52 }
  0x18   : > { %v443_v35 = vpack.c.bf16 %v422_v34, %v421_v33  ;;  %v424_v37 = vld [vmem:[%s6842_s26 + $0x48] sm:$0xff]  ;;  %v425_v39 = vld [vmem:[%s6842_s26 + $0x50] sm:$0xff]  ;;  %v426_v40 = vld [vmem:[%s6842_s26 + $0x58] sm:$0xff]  ;;  %v1474_v60 = vshll.u32 %v1471_v53, 16  ;;  %v1476_v2 = vshll.u32 %v1472_v59, 16  ;;  %v1444_v4 = vshll.u32 %v1440_v62, 16 }
  0x19   : > { %v444_v38 = vpack.c.bf16 %v424_v37, %v423_v36  ;;  %v445_v41 = vpack.c.bf16 %v426_v40, %v425_v39  ;;  %v427_v42 = vld [vmem:[%s6842_s26 + $0x60] sm:$0xff]  ;;  %v428_v43 = vld [vmem:[%s6842_s26 + $0x68] sm:$0xff]  ;;  %v429_v49 = vld [vmem:[%s6842_s26 + $0x70] sm:$0xff]  ;;  %vm1446_vm2 = vc.u32 %v1438_v61, %v1442_v63  ;;  %v1448_v5 = vadd.s32 %v1442_v63, %v1438_v61 }
  0x1a   : > { %554 = vmatpush.bf16.msra.mxu0 %v6260_v22  ;;  %v446_v44 = vpack.c.bf16 %v428_v43, %v427_v42  ;;  %v430_v50 = vld [vmem:[%s6842_s26 + $0x78] sm:$0xff]  ;;  %vm1478_vm1 = vc.u32 %v1470_v58, %v1474_v60  ;;  %v1447_v7 = vsel %vm1446_vm2, 1, %v13293_v6  ;;  %v1480_v9 = vadd.s32 %v1474_v60, %v1470_v58  ;;  %v432_v42 = vld [vmem:[%s6842_s26 + $0x88] sm:$0xff] }
  0x1b   : > { %627 = vmatpush.bf16.msra.mxu1 %v6264_v23  ;;  %v447_v57 = vpack.c.bf16 %v430_v50, %v429_v49  ;;  %v1479_v8 = vsel %vm1478_vm1, 1, %v13293_v6  ;;  %v1500_v10 = vshrl.u32 %v6884_v56, 16  ;;  %v1449_v11 = vadd.s32 %v1447_v7, %v1441_v3 }
  0x1c   : > { %vm1450_vm3 = vc.u32 %v1448_v5, %v1444_v4  ;;  %v1481_v12 = vadd.s32 %v1479_v8, %v1473_v1  ;;  %v1475_v14 = vshrl.u32 %v1471_v53, 16  ;;  %vm1482_vm4 = vc.u32 %v1480_v9, %v1476_v2 }
  0x1d   : > { %6289 = vmatmul.msk.bf16.vlgmr.msra.gmra.mxu0 %vm13351_vm0, %v440_v26  ;;  %v1451_v13 = vsel %vm1450_vm3, 1, %v13293_v6  ;;  %v6892_v15 = vmul.u32 37449, %v1499_v0  ;;  %v1443_v16 = vshrl.u32 %v1439_v55, 16  ;;  %v1483_v18 = vsel %vm1482_vm4, 1, %v13293_v6 }
  0x1e   : > { %6302 = vmatmul.msk.bf16.vlgmr.msra.gmra.mxu1 %vm13351_vm0, %v440_v26  ;;  %v1453_v17 = vadd.s32 %v1451_v13, %v1449_v11  ;;  %v1502_v19 = vmul.u32 9362, %v1499_v0  ;;  %v1477_v20 = vshrl.u32 %v1472_v59, 16  ;;  %v1484_v21 = vadd.s32 %v1480_v9, %v1476_v2 }
  0x1f   : > { %v1485_v22 = vadd.s32 %v1483_v18, %v1481_v12  ;;  %v6896_v23 = vmul.u32 9362, %v1500_v10  ;;  %v1445_v24 = vshrl.u32 %v1440_v62, 16  ;;  %v1452_v25 = vadd.s32 %v1448_v5, %v1444_v4  ;;  %v6934_v5 = vld [vmem:[%s13283_s3] sm:$0xff] }
  0x20   : > { %v1454_v26 = vadd.s32 %v1453_v17, %v1443_v16  ;;  %v1506_v27 = vshll.u32 %v6892_v15, 16  ;;  %vm1488_vm5 = vc.u32 %v1484_v21, 2454267026  ;;  %v6711_v30 = vmov 0.0  }
  0x21   : > { %v1486_v28 = vadd.s32 %v1485_v22, %v1475_v14  ;;  %vm1456_vm6 = vc.u32 %v1452_v25, 2454267026  ;;  %1143 = vst [vmem:[#allocation2 + $0x80] sm:$0xff] %v6711_v30  ;;  %v1489_v33 = vsel %vm1488_vm5, 1, %v13293_v6  ;;  %v1508_v34 = vshll.u32 %v6896_v23, 16 }
  0x22   : > { %v1457_v31 = vsel %vm1456_vm6, 1, %v13293_v6  ;;  %1145 = vst [vmem:[#allocation2 + $0xa8] sm:$0x7f] %v6711_v30  ;;  %vm1510_vm7 = vc.u32 %v1502_v19, %v1506_v27  ;;  %v1512_v37 = vadd.s32 %v1506_v27, %v1502_v19  ;;  %v1505_v39 = vmul.u32 37449, %v1500_v10 }
  0x23   : > { %1144 = vst [vmem:[#allocation2 + $0x180] sm:$0xff] %v6711_v30  ;;  %v1511_v43 = vsel %vm1510_vm7, 1, %v13293_v6  ;;  %v1507_v62 = vshrl.u32 %v6892_v15, 16  ;;  %v1509_v8 = vshrl.u32 %v6896_v23, 16  ;;  %v6941_v12 = vperm.slane %v6934_v5, 1 }
  0x24   : > { %1146 = vst [vmem:[#allocation2 + $0x18] sm:$0x7f] %v6711_v30  ;;  %vm1514_vm8 = vc.u32 %v1512_v37, %v1508_v34  ;;  %v1513_v51 = vadd.s32 %v1511_v43, %v1505_v39  ;;  %v1516_v63 = vadd.s32 %v1512_v37, %v1508_v34  ;;  %v6948_v18 = vadd.s32 24, %v6872_v46  ;;  %v6978_v37 = vld [vmem:[%s13283_s3 + $0x8] sm:$0xff] }
  0x25   : > { %1147 = vst [vmem:[#allocation2 + $0x20] sm:$0xf8] %v6711_v30  ;;  %v1515_v55 = vsel %vm1514_vm8, 1, %v13293_v6  ;;  %v6984_v43 = vperm.slane %v6934_v5, 2  ;;  %vm13593_vm5 = vcmask 1046528   ;;  %vm13590_vm6 = vcmask 1045504  }
  0x26   : > { %1148 = vst [vmem:[#allocation2 + $0x138] sm:$0xf8] %v6711_v30  ;;  %v1517_v0 = vadd.s32 %v1515_v55, %v1513_v51  ;;  %vm1520_vm12 = vc.u32 %v1516_v63, 2454267026 }
  0x27   : > { %1151 = vst [vmem:[#allocation2 + $0x150] sm:$0x3] %v6711_v30  ;;  %v1521_v17 = vsel %vm1520_vm12, 1, %v13293_v6 }
  0x28   : > { %1152 = vst [vmem:[#allocation2 + $0xe0] sm:$0x3] %v6711_v30  ;;  %v1518_v9 = vadd.s32 %v1517_v0, %v1507_v62  ;;  %v2638_v14 = vld [vmem:[#allocation2 + $0x80] sm:$0xfe] }
  0x29   : > { %13764 = vst [vmem:[#allocation6_spill] sm:$0xff] %v6941_v12  ;;  %v6951_v22 = vld [vmem:[#allocation2 + $0x80] sm:$0xfc]  ;;  %v6963_v27 = vmul.f32 %v6941_v12, %v2638_v14 }
  0x2a   : > { %v1519_v21 = vadd.s32 %v1518_v9, %v1509_v8  ;;  %13767 = vst [vmem:[#allocation9_spill] sm:$0xff] %v6984_v43  ;;  %v6992_v51 = vld [vmem:[#allocation2 + $0x180] sm:$0xfc] }
  0x2b   : > { %v2639_v0 = vld [vmem:[#allocation2 + $0x180] sm:$0xfe] }
  0x2d   : > { %6290 = vmatmul.msk.bf16.gmra.mxu0 %vm13351_vm0, %v441_v29 }
  0x2e   : > { %6303 = vmatmul.msk.bf16.gmra.mxu1 %vm13351_vm0, %v441_v29  ;;  %v1455_v29 = vadd.s32 %v1454_v26, %v1445_v24  ;;  %v6960_v26 = vperm.slane %v6934_v5, 0 }
  0x30   : > { %v1458_v36 = vadd.s32 %v1457_v31, %v1455_v29  ;;  %13765 = vst [vmem:[#allocation7_spill] sm:$0xff] %v6960_v26  ;;  %v6972_v34 = vmul.f32 0.0, %v6960_v26 }
  0x32   : > { %v1459_v40 = vshrl.u32 %v1458_v36, 3 }
  0x34   : > { %v1460_v48 = vmul.u32 14, %v1459_v40 }
  0x36   : > { %v1461_v53 = vsub.s32 %v6872_v46, %v1460_v48 }
  0x38   : > { %vm2232_vm9 = vcmp.ne.s32.totalorder %v1461_v53, 0  ;;  %vm2257_vm10 = vcmp.lt.s32.totalorder %v1461_v53, 0  ;;  %v2307_v59 = vadd.s32 14, %v1461_v53 }
  0x39   : > { %vm2282_vm11 = vmand %vm2257_vm10, %vm2232_vm9 }
  0x3a   : > { %v6929_v4 = vsel %vm2282_vm11, %v2307_v59, %v1461_v53  ;;  %v7001_v59 = vperm.slane %v6978_v37, 1 }
  0x3b   : > { %vm2411_vm15 = vcmp.ne.s32.totalorder %v6929_v4, 0  ;;  %vm2946_vm10 = vcmp.ne.s32.totalorder %v6929_v4, 13 }
  0x3c   : > { %13770 = vst [vmem:[#allocation12_spill] sm:$0xff] %v7001_v59 }
  0x3d   : > { %6291 = vmatmul.msk.bf16.gmra.mxu0 %vm13351_vm0, %v442_v32 }
  0x3e   : > { %6304 = vmatmul.msk.bf16.gmra.mxu1 %vm13351_vm0, %v442_v32  ;;  %v1487_v32 = vadd.s32 %v1486_v28, %v1477_v20  ;;  %v1522_v28 = vadd.s32 %v1521_v17, %v1519_v21 }
  0x40   : > { %v1523_v36 = vshrl.u32 %v1522_v28, 3  ;;  %v434_v28 = vld [vmem:[%s6842_s26 + $0x98] sm:$0xff] }
  0x4d   : > { %6292 = vmatmul.msk.bf16.gmra.mxu0 %vm13351_vm0, %v443_v35 }
  0x4e   : > { %6305 = vmatmul.msk.bf16.gmra.mxu1 %vm13351_vm0, %v443_v35  ;;  %v461_v35 = vld [vmem:[%s13282_s2] sm:$0x3] }
  0x4f   : > { %v6910_v49 = vperm.slane %v461_v35, 1 }
  0x51   : > { %13763 = vst [vmem:[#allocation5_spill] sm:$0xff] %v6910_v49 }
  0x5d   : > { %6293 = vmatmul.msk.bf16.gmra.mxu0 %vm13351_vm0, %v444_v38 }
  0x5e   : > { %6306 = vmatmul.msk.bf16.gmra.mxu1 %vm13351_vm0, %v444_v38  ;;  %v1490_v38 = vadd.s32 %v1489_v33, %v1487_v32  ;;  %v1531_v32 = vand.u32 65535, %v6948_v18 }
  0x60   : > { %v1491_v45 = vshrl.u32 %v1490_v38, 3  ;;  %v1534_v9 = vmul.u32 9362, %v1531_v32 }
  0x62   : > { %v1492_v54 = vmul.u32 14, %v1491_v45  ;;  %v1524_v45 = vmul.u32 14, %v1523_v36 }
  0x64   : > { %v1493_v1 = vsub.s32 %v6875_v47, %v1492_v54  ;;  %v6995_v54 = vmul.u32 37449, %v1531_v32 }
  0x66   : > { %vm2233_vm13 = vcmp.ne.s32.totalorder %v1493_v1, 0  ;;  %vm2258_vm14 = vcmp.lt.s32.totalorder %v1493_v1, 0  ;;  %v2308_v20 = vadd.s32 14, %v1493_v1 }
  0x67   : > { %vm2283_vm1 = vmand %vm2258_vm14, %vm2233_vm13  ;;  %vm13591_vm14 = vcmask 1041408  }
  0x68   : > { %v6969_v33 = vsel %vm2283_vm1, %v2308_v20, %v1493_v1  ;;  %vm13585_vm1 = vcmask 1040384  }
  0x69   : > { %13766 = vst [vmem:[#allocation8_spill] sm:$0xff] %v6969_v33  ;;  %vm13320_vm9 = vcmp.ne.s32.totalorder %v6969_v33, 0  ;;  %vm13321_vm13 = vcmp.ne.s32.totalorder %v6969_v33, 13 }
  0x6d   : > { %6294 = vmatmul.msk.bf16.gmra.mxu0 %vm13351_vm0, %v445_v41 }
  0x6e   : > { %6307 = vmatmul.msk.bf16.gmra.mxu1 %vm13351_vm0, %v445_v41  ;;  %v431_v41 = vld [vmem:[%s6842_s26 + $0x80] sm:$0xff] }
  0x6f   : > { %v448_v50 = vpack.c.bf16 %v432_v42, %v431_v41  ;;  %v1532_v41 = vshrl.u32 %v6948_v18, 16  ;;  %v2744_v42 = vrot.slane %v6963_v27, 1 }
  0x71   : > { %v1537_v17 = vmul.u32 37449, %v1532_v41 }
  0x7d   : > { %6295 = vmatmul.msk.bf16.gmra.mxu0 %vm13351_vm0, %v446_v44 }
  0x7e   : > { %6308 = vmatmul.msk.bf16.gmra.mxu1 %vm13351_vm0, %v446_v44  ;;  %v6908_v44 = vperm.slane %v461_v35, 0  ;;  %v3072_v35 = vrot.slane %v6951_v22, 2 }
  0x80   : > { %13762 = vst [vmem:[#allocation4_spill] sm:$0xff] %v6908_v44 }
  0x8d   : > { %6296 = vmatmul.msk.bf16.gmra.mxu0 %vm13351_vm0, %v447_v57 }
  0x8e   : > { %6309 = vmatmul.msk.bf16.gmra.mxu1 %vm13351_vm0, %v447_v57 }
  0x9a   : > { %v556_v52 = vpop.f32.mrf.mxu0 }
  0x9b   : > { %v6915_v57 = vadd.f32 %v556_v52, %v6908_v44  ;;  %v629_v58 = vpop.f32.mrf.mxu1 }
  0x9c   : > { %v6918_v60 = vadd.f32 %v629_v58, %v6910_v49  ;;  %v6998_v58 = vperm.slane %v6978_v37, 0 }
  0x9d   : > { %v693_v61 = vmul.f32 %v6915_v57, %v6915_v57  ;;  %6297 = vmatmul.msk.bf16.gmra.mxu0 %vm13351_vm0, %v448_v50 }
  0x9e   : > { %v694_v2 = vmul.f32 %v6918_v60, %v6918_v60  ;;  %6310 = vmatmul.msk.bf16.gmra.mxu1 %vm13351_vm0, %v448_v50  ;;  %v6990_v50 = vperm.slane %v6934_v5, 4  ;;  %13769 = vst [vmem:[#allocation11_spill] sm:$0xff] %v6998_v58 }
  0x9f   : > { %v743_v3 = vmul.f32 %v693_v61, %v6915_v57  ;;  %v7004_v61 = vsub.s32 %v6884_v56, %v1524_v45 }
  0xa0   : > { %v744_v47 = vmul.f32 %v694_v2, %v6918_v60  ;;  %13768 = vst [vmem:[#allocation10_spill] sm:$0xff] %v6990_v50 }
  0xa1   : > { %v793_v7 = vmul.f32 0.044715, %v743_v3  ;;  %v7009_v3 = vmul.u32 9362, %v1532_v41  ;;  %vm2234_vm2 = vcmp.ne.s32.totalorder %v7004_v61, 0  ;;  %vm2259_vm3 = vcmp.lt.s32.totalorder %v7004_v61, 0 }
  0xa2   : > { %v558_v10 = vpop.f32.mrf.mxu0  ;;  %v794_v15 = vmul.f32 0.044715, %v744_v47  ;;  %v1538_v47 = vshll.u32 %v6995_v54, 16  ;;  %vm7049_vm8 = vmand %vm2259_vm3, %vm2234_vm2 }
  0xa3   : > { %v843_v11 = vadd.f32 %v793_v7, %v6915_v57  ;;  %v631_v13 = vpop.f32.mrf.mxu1  ;;  %v6944_v16 = vadd.f32 %v558_v10, %v6908_v44  ;;  %v3075_v7 = vrot.slane %v6992_v51, 2 }
  0xa4   : > { %v844_v23 = vadd.f32 %v794_v15, %v6918_v60  ;;  %v6957_v25 = vadd.f32 %v631_v13, %v6910_v49  ;;  %v7018_v15 = vmul.f32 %v7001_v59, %v2639_v0  ;;  %vm1542_vm4 = vc.u32 %v1534_v9, %v1538_v47 }
  0xa5   : > { %v893_v19 = vmul.f32 0.7978846, %v843_v11  ;;  %v695_v24 = vmul.f32 %v6944_v16, %v6944_v16  ;;  %v7015_v11 = vperm.slane %v6978_v37, 2  ;;  %v1543_v36 = vsel %vm1542_vm4, 1, %v13293_v6 }
  0xa6   : > { %v894_v29 = vmul.f32 0.7978846, %v844_v23  ;;  %v696_v31 = vmul.f32 %v6957_v25, %v6957_v25  ;;  %v1540_v23 = vshll.u32 %v7009_v3, 16  ;;  %v1545_v41 = vadd.s32 %v1543_v36, %v1537_v17 }
  0xa7   : > { %6425 = vtanh.f32 %v893_v19  ;;  %v745_v30 = vmul.f32 %v695_v24, %v6944_v16  ;;  %13771 = vst [vmem:[#allocation13_spill] sm:$0xff] %v7015_v11  ;;  %v433_v24 = vld [vmem:[%s6842_s26 + $0x90] sm:$0xff] }
  0xa8   : > { %6427 = vtanh.f32 %v894_v29  ;;  %v746_v39 = vmul.f32 %v696_v31, %v6957_v25  ;;  %v449_v45 = vpack.c.bf16 %v434_v28, %v433_v24 }
  0xa9   : > { %v795_v38 = vmul.f32 0.044715, %v745_v30  ;;  %v2309_v30 = vadd.s32 14, %v7004_v61 }
  0xaa   : > { %v561_v40 = vpop.f32.mrf.mxu0  ;;  %v796_v53 = vmul.f32 0.044715, %v746_v39 }
  0xab   : > { %v6987_v48 = vadd.f32 %v561_v40, %v6908_v44  ;;  %v845_v52 = vadd.f32 %v795_v38, %v6944_v16  ;;  %v634_v19 = vpop.f32.mrf.mxu1  ;;  %v1539_v40 = vshrl.u32 %v6995_v54, 16 }
  0xac   : > { %v846_v2 = vadd.f32 %v796_v53, %v6957_v25  ;;  %v7032_v38 = vadd.f32 %v634_v19, %v6910_v49  ;;  %v7073_v19 = vsel %vm7049_vm8, %v2309_v30, %v7004_v61  ;;  %v7089_v61 = vperm.slane %v6978_v37, 3 }
  0xad   : > { %v6426_v55 = vpop.eup %6425  ;;  %v697_v62 = vmul.f32 %v6987_v48, %v6987_v48  ;;  %v895_v1 = vmul.f32 0.7978846, %v845_v52  ;;  %6298 = vmatmul.msk.bf16.gmra.mxu0 %vm13351_vm0, %v449_v45  ;;  %13775 = vst [vmem:[#allocation15_spill] sm:$0xff] %v7073_v19  ;;  %v7092_v30 = vperm.slane %v6978_v37, 5  ;;  %vm2413_vm12 = vcmp.ne.s32.totalorder %v7073_v19, 0 }
  0xae   : > { %v993_v63 = vadd.f32 1.0, %v6426_v55  ;;  %v6428_v56 = vpop.eup %6427  ;;  %v896_v13 = vmul.f32 0.7978846, %v846_v2  ;;  %v698_v55 = vmul.f32 %v7032_v38, %v7032_v38  ;;  %6311 = vmatmul.msk.bf16.gmra.mxu1 %vm13351_vm0, %v449_v45  ;;  %13778 = vst [vmem:[#allocation18_spill] sm:$0xff] %v7089_v61  ;;  %vm2948_vm2 = vcmp.ne.s32.totalorder %v7073_v19, 13 }
  0xaf   : > { %v747_v8 = vmul.f32 %v697_v62, %v6987_v48  ;;  %6429 = vtanh.f32 %v895_v1  ;;  %v994_v14 = vadd.f32 1.0, %v6428_v56  ;;  %13779 = vst [vmem:[#allocation19_spill] sm:$0xff] %v7092_v30 }
  0xb0   : > { %v1043_v10 = vmul.f32 0.5, %v993_v63  ;;  %6431 = vtanh.f32 %v896_v13 }
  0xb1   : > { %v797_v21 = vmul.f32 0.044715, %v747_v8  ;;  %v1044_v29 = vmul.f32 0.5, %v994_v14  ;;  %v7058_v8 = vmul.f32 0.0, %v6998_v58  ;;  %v748_v14 = vmul.f32 %v698_v55, %v7032_v38 }
  0xb2   : > { %v7022_v20 = vmul.f32 %v1043_v10, %v6915_v57  ;;  %v563_v31 = vpop.f32.mrf.mxu0  ;;  %v1544_v57 = vadd.s32 %v1538_v47, %v1534_v9  ;;  %v2747_v9 = vrot.slane %v7018_v15, 1  ;;  %v7062_v47 = vperm.slane %v6978_v37, 4 }
  0xb3   : > { %v7035_v39 = vmul.f32 %v1044_v29, %v6918_v60  ;;  %v847_v53 = vadd.f32 %v797_v21, %v6987_v48  ;;  %v7042_v62 = vadd.f32 %v563_v31, %v6908_v44  ;;  %v7083_v29 = vadd.s32 32, %v6872_v46 }
  0xb4   : > { %v1204_v32 = vrot.slane %v7022_v20, 1  ;;  %vm1546_vm7 = vc.u32 %v1544_v57, %v1540_v23  ;;  %v1548_v1 = vadd.s32 %v1544_v57, %v1540_v23  ;;  %13774 = vst [vmem:[#allocation14_spill] sm:$0xff] %v7062_v47  ;;  %v7076_v20 = vperm.slane %v6934_v5, 5 }
  0xb5   : > { %v6430_v52 = vpop.eup %6429  ;;  %v13296_v63 = vrot.slane %v7035_v39, 1  ;;  %v1547_v54 = vsel %vm1546_vm7, 1, %v13293_v6  ;;  %v699_v17 = vmul.f32 %v7042_v62, %v7042_v62  ;;  %v897_v21 = vmul.f32 0.7978846, %v847_v53  ;;  %v636_v53 = vpop.f32.mrf.mxu1 }
  0xb6   : > { %1354 = vst [vmem:[#allocation2 + $0xa8] sm:$0x80] %v1204_v32  ;;  %v995_v0 = vadd.f32 1.0, %v6430_v52  ;;  %v6432_v2 = vpop.eup %6431  ;;  %v1549_v56 = vadd.s32 %v1547_v54, %v1545_v41  ;;  %v1541_v23 = vshrl.u32 %v7009_v3, 16  ;;  %vm1552_vm11 = vc.u32 %v1548_v1, 2454267026 }
  0xb7   : > { %1355 = vst [vmem:[#allocation2 + $0x18] sm:$0x80] %v13296_v63  ;;  %v996_v13 = vadd.f32 1.0, %v6432_v2  ;;  %v7086_v31 = vperm.slane %v6934_v5, 3  ;;  %6433 = vtanh.f32 %v897_v21  ;;  %v7101_v52 = vsel %vm1552_vm11, 1, %v13293_v6 }
  0xb8   : > { %v1045_v10 = vmul.f32 0.5, %v995_v0  ;;  %13776 = vst [vmem:[#allocation16_spill] sm:$0xff] %v7076_v20  ;;  %v1550_v28 = vadd.s32 %v1549_v56, %v1539_v40  ;;  %v749_v40 = vmul.f32 %v699_v17, %v7042_v62  ;;  %v7131_v22 = vadd.f32 %v636_v53, %v6910_v49 }
  0xb9   : > { %13777 = vst [vmem:[#allocation17_spill] sm:$0xff] %v7086_v31  ;;  %v1046_v36 = vmul.f32 0.5, %v996_v13 }
  0xba   : > { %v7080_v24 = vmul.f32 %v1045_v10, %v6944_v16  ;;  %v798_v16 = vmul.f32 0.044715, %v748_v14  ;;  %v7108_v60 = vadd.s32 %v1550_v28, %v1541_v23  ;;  %v7128_v23 = vmul.f32 0.044715, %v749_v40 }
  0xbc   : > { %v13295_v3 = vrot.slane %v7080_v24, 1  ;;  %v7126_v21 = vadd.f32 %v798_v16, %v7032_v38 }
  0xbd   : > { %v2363_v57 = vld [vmem:[#allocation2 + $0xa8] sm:$0xff]  ;;  %v6434_v6 = vpop.eup %6433 }
  0xbe   : > { %v2646_v41 = vmul.f32 %v6941_v12, %v2363_v57  ;;  %v3073_v45 = vrot.slane %v2363_v57, 2  ;;  %v3693_v55 = vld [vmem:[#allocation2 + $0xa8] sm:$0x80]  ;;  %v7106_v0 = vsel %vm13593_vm5, %v1204_v32, %v13295_v3  ;;  %v2364_v13 = vld [vmem:[#allocation2 + $0x18] sm:$0xff]  ;;  %v7120_v32 = vmul.f32 %v1046_v36, %v6957_v25 }
  0xbf   : > { %v3372_v10 = vld [vmem:[#allocation2 + $0xa8] sm:$0xc0]  ;;  %v7117_v14 = vmul.f32 %v6941_v12, %v7106_v0  ;;  %v7123_v17 = vmul.f32 %v7001_v59, %v2364_v13  ;;  %v3699_v25 = vmul.f32 %v6990_v50, %v3693_v55  ;;  %v3076_v36 = vrot.slane %v2364_v13, 2  ;;  %v3373_v54 = vld [vmem:[#allocation2 + $0x18] sm:$0xc0] }
  0xc0   : > { %v2745_v56 = vrot.slane %v2646_v41, 1  ;;  %v3074_v1 = vsel %vm13590_vm6, %v3072_v35, %v3073_v45  ;;  %v2488_v41 = vsel %vm13320_vm9, %v2363_v57, 0.0  ;;  %v3389_v16 = vrot.slane %v3372_v10, 6 }
  0xc1   : > { %v3220_v28 = vsel %vm2946_vm10, %v3074_v1, 0.0  ;;  %v2489_v40 = vsel %vm13320_vm9, %v2364_v13, 0.0  ;;  %v2748_v53 = vrot.slane %v7123_v17, 1  ;;  %v3077_v27 = vsel %vm13590_vm6, %v3075_v7, %v3076_v36 }
  0xc2   : > { %v2746_v35 = vsel %vm13593_vm5, %v2744_v42, %v2745_v56  ;;  %v3694_v42 = vld [vmem:[#allocation2 + $0x18] sm:$0x80]  ;;  %v13300_v1 = vrot.slane %v7117_v14, 1  ;;  %v3078_v55 = vrot.slane %v7106_v0, 2  ;;  %v13299_v3 = vrot.slane %v7120_v32, 1 }
  0xc3   : > { %v2892_v57 = vadd.f32 %v2746_v35, %v6972_v34  ;;  %v3272_v10 = vmul.f32 %v6984_v43, %v3220_v28  ;;  %v2749_v13 = vsel %vm13593_vm5, %v2747_v9, %v2748_v53  ;;  %v3221_v51 = vsel %vm2946_vm10, %v3077_v27, 0.0 }
  0xc4   : > { %v2540_v7 = vmul.f32 %v6960_v26, %v2488_v41  ;;  %v3804_v17 = vrot.slane %v3699_v25, 7  ;;  %v7159_v2 = vmul.f32 %v6998_v58, %v2489_v40  ;;  %v7163_v63 = vmul.f32 %v6990_v50, %v7106_v0 }
  0xc5   : > { %v3700_v34 = vmul.f32 %v7062_v47, %v3694_v42  ;;  %v2490_v15 = vsel %vm2413_vm12, %v7106_v0, 0.0  ;;  %v3079_v9 = vsel %vm13590_vm6, %v3073_v45, %v3078_v55  ;;  %v13302_v35 = vrot.slane %v7106_v0, 6 }
  0xc6   : > { %v2893_v28 = vadd.f32 %v2749_v13, %v7058_v8  ;;  %v3273_v25 = vmul.f32 %v7015_v11, %v3221_v51  ;;  %v2751_v41 = vsel %vm13593_vm5, %v2745_v56, %v13300_v1  ;;  %v13780_v40 = vrot.slane %v7035_v39, 1 }
  0xc7   : > { %v3322_v42 = vadd.f32 %v3272_v10, %v2892_v57  ;;  %v3392_v49 = vrot.slane %v3373_v54, 6  ;;  %v3222_v45 = vsel %vm13321_vm13, %v3079_v9, 0.0  ;;  %v3391_v8 = vsel %vm13591_vm14, %v3389_v16, %v13302_v35 }
  0xc8   : > { %v7183_v27 = vsel %vm13593_vm5, %v13780_v40, %v13299_v3  ;;  %v3541_v13 = vsel %vm2411_vm15, %v3391_v8, 0.0  ;;  %v13304_v56 = vrot.slane %v7163_v63, 7  ;;  %v3807_v57 = vrot.slane %v3700_v34, 7 }
  0xc9   : > { %v7195_v39 = vmul.f32 %v7001_v59, %v7183_v27  ;;  %v13301_v51 = vrot.slane %v7183_v27, 2  ;;  %v7199_v54 = vmul.f32 %v6960_v26, %v2490_v15  ;;  %v2894_v10 = vadd.f32 %v2751_v41, %v2540_v7 }
  0xca   : > { %v13303_v9 = vrot.slane %v7183_v27, 6  ;;  %v3323_v40 = vadd.f32 %v3273_v25, %v2893_v28  ;;  %v3274_v16 = vmul.f32 %v6984_v43, %v3222_v45  ;;  %v4008_v8 = vsel %vm2946_vm10, %v7106_v0, 0.0 }
  0xcb   : > { %v7208_v3 = vmul.f32 %v7062_v47, %v7183_v27  ;;  %v3593_v1 = vmul.f32 %v7086_v31, %v3541_v13  ;;  %v13309_v34 = vrot.slane %v7195_v39, 1  ;;  %v3081_v7 = vsel %vm13590_vm6, %v3076_v36, %v13301_v51 }
  0xcc   : > { %v3394_v15 = vsel %vm13591_vm14, %v3392_v49, %v13303_v9  ;;  %v3806_v28 = vsel %vm13585_vm1, %v3804_v17, %v13304_v56  ;;  %v4009_v45 = vsel %vm2946_vm10, %v7183_v27, 0.0  ;;  %v4060_v36 = vmul.f32 %v7076_v20, %v4008_v8 }
  0xcd   : > { %v3542_v25 = vsel %vm2411_vm15, %v3394_v15, 0.0  ;;  %v13305_v41 = vrot.slane %v7208_v3, 7  ;;  %v3643_v13 = vadd.f32 %v3593_v1, %v3322_v42  ;;  %v997_v35 = vadd.f32 1.0, %v6434_v6 }
  0xce   : > { %v3594_v51 = vmul.f32 %v7089_v61, %v3542_v25  ;;  %v2491_v49 = vsel %vm2413_vm12, %v7183_v27, 0.0  ;;  %v3223_v17 = vsel %vm13321_vm13, %v3081_v7, 0.0  ;;  %v1554_v15 = vadd.s32 %v7101_v52, %v7108_v60 }
  0xcf   : > { %v898_v9 = vmul.f32 0.7978846, %v7126_v21  ;;  %v2753_v1 = vsel %vm13593_vm5, %v2748_v53, %v13309_v34  ;;  %v4061_v6 = vmul.f32 %v7092_v30, %v4009_v45  ;;  %v1047_v8 = vmul.f32 0.5, %v997_v35 }
  0xd0   : > { %v3644_v42 = vadd.f32 %v3594_v51, %v3323_v40  ;;  %v3809_v25 = vsel %vm13585_vm1, %v3807_v57, %v13305_v41  ;;  %v1555_v7 = vshrl.u32 %v1554_v15, 3  ;;  %v849_v52 = vadd.f32 %v7128_v23, %v7042_v62 }
  0xd1   : > { %6435 = vtanh.f32 %v898_v9  ;;  %v3956_v60 = vadd.f32 %v3806_v28, %v3643_v13  ;;  %v7248_v56 = vmul.f32 %v1047_v8, %v6987_v48  ;;  %v13781_v53 = vand.u32 65535, %v7083_v29 }
  0xd2   : > { %v3957_v21 = vadd.f32 %v3809_v25, %v3644_v42  ;;  %v3324_v40 = vadd.f32 %v3274_v16, %v2894_v10  ;;  %v7255_v35 = vmul.f32 %v6998_v58, %v2491_v49  ;;  %v1556_v45 = vmul.u32 14, %v1555_v7 }
  0xd3   : > { %v7252_v51 = vmul.u32 37449, %v13781_v53  ;;  %v899_v57 = vmul.f32 0.7978846, %v849_v52  ;;  %v3275_v9 = vmul.f32 %v7015_v11, %v3223_v17  ;;  %v13310_v23 = vrot.slane %v7248_v56, 1 }
  0xd4   : > { %v7258_v15 = vadd.f32 %v4061_v6, %v3957_v21  ;;  %v13782_v28 = vshrl.u32 %v7083_v29, 16  ;;  %v2895_v13 = vadd.f32 %v2753_v1, %v7159_v2  ;;  %v1557_v42 = vsub.s32 %v6948_v18, %v1556_v45 }
  0xd5   : > { %v7268_v10 = vperm.slane %v6934_v5, 7  ;;  %6437 = vtanh.f32 %v899_v57  ;;  %v7270_v16 = vadd.f32 %v4060_v36, %v3956_v60  ;;  %v13784_v49 = vrot.slane %v7080_v24, 1 }
  0xd6   : > { %v7263_v48 = vmul.u32 9362, %v13782_v28  ;;  %v13785_v6 = vmov %v13781_v53  ;;  %v1570_v2 = vshll.u32 %v7252_v51, 16  ;;  %vm2235_vm3 = vcmp.ne.s32.totalorder %v1557_v42, 0 }
  0xd7   : > { %13783 = vst [vmem:[#allocation20_spill] sm:$0xff] %v7268_v10  ;;  %v7277_v17 = vsel %vm13593_vm5, %v13784_v49, %v13310_v23  ;;  %v1566_v8 = vmul.u32 9362, %v13785_v6  ;;  %v6436_v1 = vpop.eup %6435  ;;  %vm2260_vm4 = vcmp.lt.s32.totalorder %v1557_v42, 0  ;;  %v2310_v18 = vadd.s32 14, %v1557_v42 }
  0xd8   : > { %1358 = vst [vmem:[#allocation2 + $0xf0] sm:$0xff] %v7277_v17  ;;  %v7285_v36 = vmul.f32 %v6941_v12, %v7277_v17  ;;  %vm2285_vm7 = vmand %vm2260_vm4, %vm2235_vm3  ;;  %v13308_v24 = vrot.slane %v7277_v17, 2  ;;  %v13306_v25 = vrot.slane %v7277_v17, 6  ;;  %v13786_v7 = vmov %v13782_v28 }
  0xd9   : > { %v1569_v52 = vmul.u32 37449, %v13786_v7  ;;  %v1572_v60 = vshll.u32 %v7263_v48, 16  ;;  %v7292_v21 = vsel %vm2285_vm7, %v2310_v18, %v1557_v42  ;;  %v7297_v45 = vmul.f32 %v6990_v50, %v7277_v17 }
  0xda   : > { %13787 = vst [vmem:[#allocation21_spill] sm:$0xff] %v7292_v21  ;;  %v13307_v53 = vrot.slane %v7285_v36, 1  ;;  %v998_v57 = vadd.f32 1.0, %v6436_v1  ;;  %v3083_v28 = vsel %vm13590_vm6, %v3078_v55, %v13308_v24  ;;  %v13788_v49 = vrot.slane %v7106_v0, 6 }
  0xdb   : > { %vm1574_vm8 = vc.u32 %v1566_v8, %v1570_v2  ;;  %v1576_v6 = vadd.s32 %v1570_v2, %v1566_v8  ;;  %v6438_v18 = vpop.eup %6437  ;;  %v13789_v7 = vrot.slane %v7117_v14, 1  ;;  %v3224_v41 = vsel %vm2948_vm2, %v3083_v28, 0.0 }
  0xdc   : > { %v3396_v42 = vsel %vm13591_vm14, %v13788_v49, %v13306_v25  ;;  %v4010_v0 = vsel %vm13321_vm13, %v7277_v17, 0.0  ;;  %vm13372_vm11 = vcmp.ne.s32.totalorder %v7292_v21, 0  ;;  %v3276_v2 = vmul.f32 %v6984_v43, %v3224_v41 }
  0xdd   : > { %v2755_v1 = vsel %vm13593_vm5, %v13789_v7, %v13307_v53  ;;  %v3543_v55 = vsel %vm13320_vm9, %v3396_v42, 0.0  ;;  %v13311_v49 = vrot.slane %v7297_v45, 7  ;;  %v1048_v7 = vmul.f32 0.5, %v998_v57 }
  0xde   : > { %v2896_v8 = vadd.f32 %v2755_v1, %v7199_v54  ;;  %v3595_v14 = vmul.f32 %v7086_v31, %v3543_v55  ;;  %v999_v25 = vadd.f32 1.0, %v6438_v18  ;;  %v13790_v28 = vmov 0  }
  0xdf   : > { %v1575_v53 = vsel %vm1574_vm8, 1, %v13790_v28  ;;  %vm1578_vm3 = vc.u32 %v1576_v6, %v1572_v60  ;;  %v2492_v23 = vsel %vm13372_vm11, %v7277_v17, 0.0  ;;  %v13791_v54 = vrot.slane %v7163_v63, 7  ;;  %v4473_v18 = vld [vmem:[#allocation2 + $0xf0] sm:$0xe0] }
  0xe0   : > { %v7327_v24 = vadd.f32 %v3276_v2, %v2896_v8  ;;  %v3645_v42 = vadd.f32 %v3595_v14, %v3324_v40  ;;  %v1577_v34 = vadd.s32 %v1575_v53, %v1569_v52  ;;  %v4062_v57 = vmul.f32 %v7076_v20, %v4010_v0  ;;  %v7343_v2 = vld [vmem:[#allocation2 + $0xf0] sm:$0xf0] }
  0xe1   : > { %v3811_v41 = vsel %vm13585_vm1, %v13791_v54, %v13311_v49  ;;  %v1571_v1 = vshrl.u32 %v7252_v51, 16  ;;  %v7340_v40 = vmul.f32 %v1048_v7, %v7032_v38  ;;  %v1049_v52 = vmul.f32 0.5, %v999_v25  ;;  %v7353_v51 = vld [vmem:[#allocation2 + $0xf0] sm:$0xc0] }
  0xe2   : > { %v3958_v55 = vadd.f32 %v3811_v41, %v3645_v42  ;;  %v1579_v53 = vsel %vm1578_vm3, 1, %v13790_v28  ;;  %v3325_v8 = vadd.f32 %v3275_v9, %v2895_v13  ;;  %v7346_v14 = vperm.slane %v6978_v37, 7 }
  0xe3   : > { %v1580_v63 = vadd.s32 %v1576_v6, %v1572_v60  ;;  %v1581_v54 = vadd.s32 %v1579_v53, %v1577_v34  ;;  %v7351_v0 = vmul.f32 %v7268_v10, %v4473_v18  ;;  %v13313_v38 = vrot.slane %v7340_v40, 1 }
  0xe4   : > { %13792 = vst [vmem:[#allocation22_spill] sm:$0xff] %v7346_v14  ;;  %v7348_v49 = vadd.f32 %v4062_v57, %v3958_v55  ;;  %v7357_v25 = vmul.f32 %v1049_v52, %v7042_v62  ;;  %v2544_v9 = vmul.f32 %v6960_v26, %v2492_v23  ;;  %v1573_v13 = vshrl.u32 %v7263_v48, 16 }
  0xe5   : > { %vm1584_vm4 = vc.u32 %v1580_v63, 2454267026  ;;  %v700_v34 = vmul.f32 %v7131_v22, %v7131_v22  ;;  %v13794_v6 = vrot.slane %v7120_v32, 1  ;;  %v1582_v42 = vadd.s32 %v1581_v54, %v1571_v1 }
  0xe6   : > { %13793 = vst [vmem:[#allocation23_spill] sm:$0xff] %v7348_v49  ;;  %v13312_v62 = vrot.slane %v7357_v25, 1  ;;  %v4794_v23 = vrot.slane %v7353_v51, 6  ;;  %vm2949_vm7 = vcmp.ne.s32.totalorder %v7292_v21, 13  ;;  %v13795_v1 = vrot.slane %v7248_v56, 1 }
  0xe7   : > { %v7369_v7 = vsel %vm13593_vm5, %v13794_v6, %v13313_v38  ;;  %v1585_v52 = vsel %vm1584_vm4, 1, %v13790_v28  ;;  %v13796_v63 = vrot.slane %v7183_v27, 2  ;;  %v13797_v51 = vrot.slane %v7183_v27, 6 }
  0xe8   : > { %1359 = vst [vmem:[#allocation2 + $0x120] sm:$0xff] %v7369_v7  ;;  %v7376_v48 = vmul.f32 %v7001_v59, %v7369_v7  ;;  %v13315_v41 = vrot.slane %v7369_v7, 2  ;;  %v13314_v57 = vrot.slane %v7369_v7, 6  ;;  %v7384_v18 = vmul.f32 %v7062_v47, %v7369_v7 }
  0xe9   : > { %v7391_v55 = vsel %vm13593_vm5, %v13795_v1, %v13312_v62  ;;  %v4011_v56 = vsel %vm13321_vm13, %v7369_v7, 0.0  ;;  %v1583_v32 = vadd.s32 %v1582_v42, %v1573_v13  ;;  %vm13583_vm8 = vcmask 1043456  }
  0xea   : > { %v13316_v53 = vrot.slane %v7376_v48, 1  ;;  %v3085_v54 = vsel %vm13590_vm6, %v13796_v63, %v13315_v41  ;;  %v3398_v6 = vsel %vm13591_vm14, %v13797_v51, %v13314_v57  ;;  %v13317_v38 = vrot.slane %v7384_v18, 7 }
  0xeb   : > { %v3225_v1 = vsel %vm2948_vm2, %v3085_v54, 0.0  ;;  %v3544_v62 = vsel %vm13320_vm9, %v3398_v6, 0.0  ;;  %v13798_v27 = vrot.slane %v7195_v39, 1  ;;  %v7422_v54 = vmul.f32 %v6941_v12, %v7391_v55 }
  0xec   : > { %v3277_v51 = vmul.f32 %v7015_v11, %v3225_v1  ;;  %v3596_v57 = vmul.f32 %v7089_v61, %v3544_v62  ;;  %v13799_v13 = vrot.slane %v7208_v3, 7  ;;  %v1586_v41 = vadd.s32 %v1585_v52, %v1583_v32 }
  0xed   : > { %v2757_v63 = vsel %vm13593_vm5, %v13798_v27, %v13316_v53  ;;  %v13318_v39 = vrot.slane %v7391_v55, 2  ;;  %v2493_v1 = vsel %vm13372_vm11, %v7369_v7, 0.0  ;;  %v13319_v27 = vrot.slane %v7422_v54, 1 }
  0xee   : > { %v2897_v6 = vadd.f32 %v2757_v63, %v7255_v35  ;;  %v3813_v42 = vsel %vm13585_vm1, %v13799_v13, %v13317_v38  ;;  %v3646_v62 = vadd.f32 %v3596_v57, %v3325_v8  ;;  %v7436_v53 = vrot.slane %v7391_v55, 6  ;;  %v566_v8 = vpop.f32.mrf.mxu0 }
  0xef   : > { %v13800_v3 = vrot.slane %v7277_v17, 2  ;;  %v7447_v52 = vmul.f32 %v6990_v50, %v7391_v55  ;;  %v7450_v63 = vperm.slane %v6934_v5, 6  ;;  %v4063_v13 = vmul.f32 %v7092_v30, %v4011_v56  ;;  %v7457_v38 = vld [vmem:[#allocation2 + $0x120] sm:$0xf0] }
  0xf0   : > { %v7438_v35 = vadd.f32 %v3277_v51, %v2897_v6  ;;  %v3959_v57 = vadd.f32 %v3813_v42, %v3646_v62  ;;  %vm13533_vm3 = vcmask 1042432   ;;  %v750_v51 = vmul.f32 %v700_v34, %v7131_v22 }
  0xf1   : > { %v3087_v32 = vsel %vm13590_vm6, %v13800_v3, %v13318_v39  ;;  %13801 = vst [vmem:[#allocation24_spill] sm:$0xff] %v7450_v63  ;;  %v7455_v6 = vmul.f32 %v6998_v58, %v2493_v1  ;;  %v1587_v3 = vshrl.u32 %v1586_v41, 3  ;;  %v13802_v39 = vrot.slane %v7285_v36, 1 }
  0xf2   : > { %v13803_v42 = vrot.slane %v7277_v17, 6  ;;  %v7468_v62 = vadd.f32 %v4063_v13, %v3959_v57  ;;  %v7472_v1 = vmul.f32 %v7268_v10, %v7391_v55  ;;  %v7475_v41 = vadd.f32 %v566_v8, %v6908_v44  ;;  %v4474_v57 = vld [vmem:[#allocation2 + $0x120] sm:$0xe0] }
  0xf3   : > { %v2759_v5 = vsel %vm13593_vm5, %v13802_v39, %v13319_v27  ;;  %v1588_v60 = vmul.u32 14, %v1587_v3  ;;  %v13323_v39 = vrot.slane %v7447_v52, 7  ;;  %v4012_v17 = vsel %vm2948_vm2, %v7391_v55, 0.0 }
  0xf4   : > { %v3400_v56 = vsel %vm13591_vm14, %v13803_v42, %v7436_v53  ;;  %13804 = vst [vmem:[#allocation25_spill] sm:$0xff] %v7468_v62  ;;  %v2898_v34 = vadd.f32 %v2759_v5, %v2544_v9  ;;  %v3226_v9 = vsel %vm2949_vm7, %v3087_v32, 0.0  ;;  %v13322_v8 = vrot.slane %v7391_v55, 4 }
  0xf5   : > { %13805 = vst [vmem:[#allocation26_spill] sm:$0xff] %v7472_v1  ;;  %v3545_v36 = vsel %vm2413_vm12, %v3400_v56, 0.0  ;;  %v1589_v3 = vsub.s32 %v7083_v29, %v1588_v60  ;;  %v13806_v5 = vrot.slane %v7297_v45, 7  ;;  %v4795_v56 = vsel %vm13591_vm14, %v4794_v23, %v7436_v53  ;;  %v435_v60 = vld [vmem:[%s6842_s26 + $0xa0] sm:$0xff] }
  0xf6   : > { %v3597_v13 = vmul.f32 %v7086_v31, %v3545_v36  ;;  %v800_v27 = vmul.f32 0.044715, %v750_v51  ;;  %v4064_v32 = vmul.f32 %v7076_v20, %v4012_v17  ;;  %v13807_v36 = vrot.slane %v7343_v2, 4 }
  0xf7   : > { %v3815_v42 = vsel %vm13585_vm1, %v13806_v5, %v13323_v39  ;;  %vm2236_vm4 = vcmp.ne.s32.totalorder %v1589_v3, 0  ;;  %vm2261_vm9 = vcmp.lt.s32.totalorder %v1589_v3, 0  ;;  %v2311_v45 = vadd.s32 14, %v1589_v3  ;;  %v639_v5 = vpop.f32.mrf.mxu1 }
  0xf8   : > { %v3647_v62 = vadd.f32 %v3597_v13, %v7327_v24  ;;  %v4175_v29 = vsel %vm13583_vm8, %v13807_v36, %v13322_v8  ;;  %v7509_v24 = vld [vmem:[%s13283_s3 + $0x10] ss:$0 sm:$0xff]  ;;  %vm2286_vm13 = vmand %vm2261_vm9, %vm2236_vm4  ;;  %v4818_v17 = vsel %vm2946_vm10, %v4795_v56, 0.0  ;;  %v850_v13 = vadd.f32 %v800_v27, %v7131_v22 }
  0xf9   : > { %v4321_v23 = vsel %vm2411_vm15, %v4175_v29, 0.0  ;;  %13808 = vst [vmem:[#allocation27_spill] sm:$0xff] %v7509_v24  ;;  %v7516_v36 = vmul.f32 %v7346_v14, %v4474_v57  ;;  %v7518_v8 = vsel %vm2286_vm13, %v2311_v45, %v1589_v3  ;;  %v3278_v29 = vmul.f32 %v6984_v43, %v3226_v9 }
  0xfa   : > { %v3960_v51 = vadd.f32 %v3815_v42, %v3647_v62  ;;  %v4373_v2 = vmul.f32 %v7450_v63, %v4321_v23  ;;  %13809 = vst [vmem:[#allocation28_spill] sm:$0xff] %v7518_v8  ;;  %v701_v39 = vmul.f32 %v7475_v41, %v7475_v41  ;;  %v436_v62 = vld [vmem:[%s6842_s26 + $0xa8] sm:$0xff]  ;;  %v13811_v56 = vrot.slane %v7472_v1, 5  ;;  %v13813_v63 = vld [vmem:[#allocation5_spill] sm:$0xff] }
  0xfb   : > { %v13812_v27 = vrot.slane %v7351_v0, 5  ;;  %v900_v49 = vmul.f32 0.7978846, %v850_v13  ;;  %v4870_v3 = vmul.f32 %v7509_v24, %v4818_v17  ;;  %v7536_v45 = vadd.s32 40, %v6872_v46  ;;  %v7542_v0 = vld [vmem:[#allocation2 + $0x120] sm:$0xc0] }
  0xfc   : > { %v7525_v42 = vadd.f32 %v4064_v32, %v3960_v51  ;;  %v4423_v23 = vadd.f32 %v4373_v2, %v7270_v16  ;;  %v751_v9 = vmul.f32 %v701_v39, %v7475_v41  ;;  %v7539_v20 = vadd.f32 %v639_v5, %v13813_v63  ;;  %v568_v32 = vpop.f32.mrf.mxu0 }
  0xfd   : > { %v4586_v57 = vsel %vm13533_vm3, %v13812_v27, %v13811_v56  ;;  %vm2415_vm9 = vcmp.ne.s32.totalorder %v7518_v8, 0  ;;  %6439 = vtanh.f32 %v900_v49  ;;  %v450_v51 = vpack.c.bf16 %v436_v62, %v435_v60 }
  0xfe   : > { %13810 = vst [vmem:[#allocation29_spill] sm:$0xff] %v7525_v42  ;;  %v4736_v16 = vadd.f32 %v4586_v57, %v4423_v23  ;;  %v801_v2 = vmul.f32 0.044715, %v751_v9  ;;  %v1595_v13 = vand.u32 65535, %v7536_v45  ;;  %v1596_v17 = vshrl.u32 %v7536_v45, 16 }
  0xff   : > { %v7546_v39 = vadd.f32 %v3278_v29, %v2898_v34  ;;  %v702_v5 = vmul.f32 %v7539_v20, %v7539_v20  ;;  %6299 = vmatmul.msk.bf16.gmra.mxu0 %vm13351_vm0, %v450_v51  ;;  %6312 = vmatmul.msk.bf16.gmra.mxu1 %vm13351_vm0, %v450_v51  ;;  %v7555_v49 = vadd.f32 %v568_v32, %v6908_v44  ;;  %v7558_v60 = vadd.s32 48, %v6872_v46 }
 0x100   : > { %v7548_v56 = vadd.f32 %v4870_v3, %v4736_v16  ;;  %v851_v62 = vadd.f32 %v801_v2, %v7475_v41  ;;  %v1598_v23 = vmul.u32 9362, %v1595_v13  ;;  %v1599_v34 = vmul.u32 37449, %v1595_v13 }
 0x101   : > { %13815 = vst [vmem:[#allocation31_spill] sm:$0xff] %v7555_v49  ;;  %v1600_v29 = vmul.u32 9362, %v1596_v17  ;;  %v2494_v3 = vsel %vm2415_vm9, %v7391_v55, 0.0  ;;  %v752_v9 = vmul.f32 %v702_v5, %v7539_v20  ;;  %v1601_v16 = vmul.u32 37449, %v1596_v17 }
 0x102   : > { %13814 = vst [vmem:[#allocation30_spill] sm:$0xff] %v7548_v56  ;;  %v901_v32 = vmul.f32 0.7978846, %v851_v62  ;;  %v1602_v51 = vshll.u32 %v1599_v34, 16  ;;  %v1603_v46 = vshrl.u32 %v1599_v34, 16  ;;  %v703_v13 = vmul.f32 %v7555_v49, %v7555_v49 }
 0x103   : > { %13816 = vst [vmem:[#allocation32_spill] sm:$0xff] %v7558_v60  ;;  %v1604_v56 = vshll.u32 %v1600_v29, 16  ;;  %v6440_v42 = vpop.eup %6439  ;;  %v802_v2 = vmul.f32 0.044715, %v752_v9  ;;  %v1627_v27 = vand.u32 65535, %v7558_v60  ;;  %v1628_v62 = vshrl.u32 %v7558_v60, 16 }
 0x104   : > { %v1000_v44 = vadd.f32 1.0, %v6440_v42  ;;  %6441 = vtanh.f32 %v901_v32  ;;  %vm1606_vm13 = vc.u32 %v1598_v23, %v1602_v51  ;;  %v1608_v57 = vadd.s32 %v1602_v51, %v1598_v23  ;;  %v4970_v34 = vld [vmem:[%s13284_s4] sm:$0x3] }
 0x105   : > { %v1607_v24 = vsel %vm1606_vm13, 1, %v13790_v28  ;;  %v852_v5 = vadd.f32 %v802_v2, %v7539_v20  ;;  %v753_v17 = vmul.f32 %v703_v13, %v7555_v49  ;;  %v7578_v42 = vperm.slane %v6978_v37, 6 }
 0x106   : > { %v1050_v9 = vmul.f32 0.5, %v1000_v44  ;;  %v1609_v1 = vadd.s32 %v1607_v24, %v1601_v16  ;;  %vm1610_vm4 = vc.u32 %v1608_v57, %v1604_v56  ;;  %v1612_v33 = vadd.s32 %v1608_v57, %v1604_v56 }
 0x107   : > { %13817 = vst [vmem:[#allocation33_spill] sm:$0xff] %v7578_v42  ;;  %v1611_v23 = vsel %vm1610_vm4, 1, %v13790_v28  ;;  %v902_v32 = vmul.f32 0.7978846, %v852_v5  ;;  %v803_v51 = vmul.f32 0.044715, %v753_v17  ;;  %v7587_v10 = vmul.f32 %v6960_v26, %v2494_v3 }
 0x108   : > { %v7582_v2 = vmul.f32 %v1050_v9, %v7131_v22  ;;  %v1613_v13 = vadd.s32 %v1611_v23, %v1609_v1  ;;  %vm1616_vm13 = vc.u32 %v1612_v33, 2454267026  ;;  %v7584_v60 = vmul.u32 37449, %v1627_v27 }
 0x109   : > { %v7589_v44 = vperm.slane %v4970_v34, 1  ;;  %v853_v24 = vadd.f32 %v803_v51, %v7555_v49  ;;  %v7592_v37 = vmul.u32 9362, %v1628_v62  ;;  %v1605_v16 = vshrl.u32 %v1600_v29, 16 }
 0x10a   : > { %v6442_v56 = vpop.eup %6441  ;;  %v13340_v57 = vrot.slane %v7582_v2, 1  ;;  %v1614_v5 = vadd.s32 %v1613_v13, %v1603_v46  ;;  %v7595_v22 = vmul.u32 9362, %v1627_v27  ;;  %v1617_v33 = vsel %vm1616_vm13, 1, %v13790_v28 }
 0x10b   : > { %13818 = vst [vmem:[#allocation34_spill] sm:$0xff] %v7589_v44  ;;  %6443 = vtanh.f32 %v902_v32  ;;  %v7598_v1 = vmul.u32 37449, %v1628_v62  ;;  %v13819_v17 = vrot.slane %v7340_v40, 1  ;;  %v1001_v9 = vadd.f32 1.0, %v6442_v56 }
 0x10c   : > { %v903_v23 = vmul.f32 0.7978846, %v853_v24  ;;  %v1615_v24 = vadd.s32 %v1614_v5, %v1605_v16  ;;  %v13822_v32 = vrot.slane %v7369_v7, 6  ;;  %v13825_v49 = vrot.slane %v7376_v48, 1 }
 0x10d   : > { %v7606_v34 = vsel %vm13593_vm5, %v13819_v17, %v13340_v57  ;;  %v13821_v17 = vrot.slane %v7369_v7, 2 }
 0x10e   : > { %v7611_v29 = vmul.f32 %v7001_v59, %v7606_v34  ;;  %v13341_v27 = vrot.slane %v7606_v34, 2  ;;  %v7615_v62 = vrot.slane %v7606_v34, 6  ;;  %v2495_v40 = vsel %vm2415_vm9, %v7606_v34, 0.0 }
 0x10f   : > { %v7623_v51 = vmul.f32 %v7062_v47, %v7606_v34  ;;  %v13347_v13 = vrot.slane %v7606_v34, 4  ;;  %v4013_v3 = vsel %vm2948_vm2, %v7606_v34, 0.0  ;;  %v7667_v48 = vmul.f32 %v7346_v14, %v7606_v34 }
 0x110   : > { %13820 = vst [vmem:[#allocation35_spill] sm:$0xff] %v7611_v29  ;;  %v3089_v46 = vsel %vm13590_vm6, %v13821_v17, %v13341_v27  ;;  %v3402_v57 = vsel %vm13591_vm14, %v13822_v32, %v7615_v62  ;;  %v13823_v17 = vrot.slane %v7457_v38, 4  ;;  %v13824_v32 = vrot.slane %v7611_v29, 1 }
 0x111   : > { %v3227_v16 = vsel %vm2949_vm7, %v3089_v46, 0.0  ;;  %v3546_v5 = vsel %vm2413_vm12, %v3402_v57, 0.0  ;;  %v6444_v27 = vpop.eup %6443  ;;  %v13826_v38 = vrot.slane %v7623_v51, 7  ;;  %v4065_v14 = vmul.f32 %v7092_v30, %v4013_v3 }
 0x112   : > { %v4178_v7 = vsel %vm13583_vm8, %v13823_v17, %v13347_v13  ;;  %v2761_v26 = vsel %vm13593_vm5, %v13825_v49, %v13824_v32  ;;  %v3279_v46 = vmul.f32 %v7015_v11, %v3227_v16  ;;  %v3598_v19 = vmul.f32 %v7089_v61, %v3546_v5  ;;  %v7672_v49 = vld [vmem:[%s13283_s3 + $0x18] ss:$0 sm:$0xff] }
 0x113   : > { %v4322_v57 = vsel %vm2411_vm15, %v4178_v7, 0.0  ;;  %v2899_v56 = vadd.f32 %v2761_v26, %v7455_v6  ;;  %v13827_v17 = vrot.slane %v7384_v18, 7  ;;  %vm13392_vm15 = vcmp.ne.s32.totalorder %v7518_v8, 13 }
 0x114   : > { %v4374_v29 = vmul.f32 %v7578_v42, %v4322_v57  ;;  %v3648_v26 = vadd.f32 %v3598_v19, %v7438_v35  ;;  %v13828_v18 = vrot.slane %v7542_v0, 6  ;;  %v1051_v16 = vmul.f32 0.5, %v1001_v9 }
 0x115   : > { %v3817_v13 = vsel %vm13585_vm1, %v13827_v17, %v13826_v38  ;;  %v1618_v5 = vadd.s32 %v1617_v33, %v1615_v24  ;;  %v13360_v32 = vrot.slane %v7667_v48, 5  ;;  %v1002_v38 = vadd.f32 1.0, %v6444_v27 }
 0x116   : > { %v4797_v6 = vsel %vm13591_vm14, %v13828_v18, %v7615_v62  ;;  %v4424_v7 = vadd.f32 %v4374_v29, %v7258_v15  ;;  %v3961_v17 = vadd.f32 %v3817_v13, %v3648_v26  ;;  %v7686_v19 = vmul.f32 %v1051_v16, %v7475_v41 }
 0x117   : > { %v4819_v57 = vsel %vm2946_vm10, %v4797_v6, 0.0  ;;  %v1619_v35 = vshrl.u32 %v1618_v5, 3  ;;  %v13829_v0 = vrot.slane %v7516_v36, 5  ;;  %v1052_v9 = vmul.f32 0.5, %v1002_v38 }
 0x118   : > { %v4871_v15 = vmul.f32 %v7672_v49, %v4819_v57  ;;  %v7694_v29 = vadd.f32 %v3279_v46, %v2899_v56  ;;  %v7696_v4 = vadd.f32 %v4065_v14, %v3961_v17  ;;  %v13359_v3 = vrot.slane %v7686_v19, 1 }
 0x119   : > { %v4589_v33 = vsel %vm13533_vm3, %v13829_v0, %v13360_v32  ;;  %v1620_v13 = vmul.u32 14, %v1619_v35  ;;  %v7700_v41 = vmul.f32 %v6998_v58, %v2495_v40  ;;  %6445 = vtanh.f32 %v903_v23  ;;  %v641_v35 = vpop.f32.mrf.mxu1 }
 0x11a   : > { %v4737_v27 = vadd.f32 %v4589_v33, %v4424_v7  ;;  %v13830_v36 = vshll.u32 %v7584_v60, 16  ;;  %v13833_v14 = vrot.slane %v7357_v25, 1  ;;  %v7719_v23 = vmul.f32 %v1052_v9, %v7539_v20 }
 0x11b   : > { %v1621_v40 = vsub.s32 %v7536_v45, %v1620_v13  ;;  %v13835_v7 = vrot.slane %v7391_v55, 2  ;;  %v13838_v26 = vrot.slane %v7447_v52, 7 }
 0x11c   : > { %vm7706_vm10 = vc.u32 %v7595_v22, %v13830_v36  ;;  %v4921_v56 = vadd.f32 %v4871_v15, %v4737_v27  ;;  %v7715_v46 = vsel %vm13593_vm5, %v13833_v14, %v13359_v3  ;;  %v13837_v14 = vshll.u32 %v7584_v60, 16 }
 0x11d   : > { %v7723_v18 = vmul.f32 %v6941_v12, %v7715_v46  ;;  %v13356_v6 = vrot.slane %v7715_v46, 2  ;;  %v13354_v16 = vrot.slane %v7715_v46, 6  ;;  %v7729_v5 = vmul.f32 %v6990_v50, %v7715_v46 }
 0x11e   : > { %v7732_v25 = vmul.f32 %v7589_v44, %v4921_v56  ;;  %vm2237_vm4 = vcmp.ne.s32.totalorder %v1621_v40, 0  ;;  %vm2262_vm13 = vcmp.lt.s32.totalorder %v1621_v40, 0  ;;  %v2312_v45 = vadd.s32 14, %v1621_v40 }
 0x11f   : > { %vm2287_vm0 = vmand %vm2262_vm13, %vm2237_vm4  ;;  %v13353_v20 = vrot.slane %v7723_v18, 1  ;;  %v3091_v57 = vsel %vm13590_vm6, %v13835_v7, %v13356_v6  ;;  %v3404_v38 = vsel %vm13591_vm14, %v7436_v53, %v13354_v16  ;;  %v13352_v17 = vrot.slane %v7729_v5, 7  ;;  %v6446_v27 = vpop.eup %6445 }
 0x120   : > { %13834 = vst [vmem:[#allocation36_spill] sm:$0xff] %v7732_v25  ;;  %v7745_v0 = vsel %vm2287_vm0, %v2312_v45, %v1621_v40  ;;  %v3228_v33 = vsel %vm13392_vm15, %v3091_v57, 0.0  ;;  %v3547_v15 = vsel %vm13372_vm11, %v3404_v38, 0.0  ;;  %v1639_v9 = vsel %vm7706_vm10, 1, %v13790_v28 }
 0x121   : > { %v13836_v53 = vrot.slane %v7422_v54, 1  ;;  %v3280_v36 = vmul.f32 %v6984_v43, %v3228_v33  ;;  %v3599_v56 = vmul.f32 %v7086_v31, %v3547_v15  ;;  %v7764_v40 = vadd.s32 %v13837_v14, %v7595_v22 }
 0x122   : > { %v3819_v7 = vsel %vm13585_vm1, %v13838_v26, %v13352_v17  ;;  %v4014_v54 = vsel %vm2949_vm7, %v7715_v46, 0.0  ;;  %v7776_v57 = vadd.f32 %v641_v35, %v13813_v63  ;;  %vm2416_vm0 = vcmp.ne.s32.totalorder %v7745_v0, 0  ;;  %v13842_v17 = vld [vmem:[#allocation16_spill] sm:$0xff] }
 0x123   : > { %v2763_v13 = vsel %vm13593_vm5, %v13836_v53, %v13353_v20  ;;  %v3649_v22 = vadd.f32 %v3599_v56, %v7546_v39  ;;  %v13355_v33 = vrot.slane %v7715_v46, 4  ;;  %v13840_v53 = vld [vmem:[#allocation8_spill] sm:$0xff]  ;;  %v13357_v14 = vrot.slane %v7719_v23, 1 }
 0x124   : > { %v2900_v45 = vadd.f32 %v2763_v13, %v7587_v10  ;;  %v13839_v10 = vld [vmem:[#allocation20_spill] sm:$0xff]  ;;  %vm13841_vm10 = vcmp.ne.s32.totalorder %v13840_v53, 13  ;;  %v1003_v26 = vadd.f32 1.0, %v6446_v27  ;;  %v4066_v20 = vmul.f32 %v13842_v17, %v4014_v54 }
 0x125   : > { %v7783_v15 = vmul.f32 %v13839_v10, %v7715_v46  ;;  %v4820_v13 = vsel %vm13841_vm10, %v3404_v38, 0.0  ;;  %v3962_v35 = vadd.f32 %v3819_v7, %v3649_v22  ;;  %v13843_v39 = vrot.slane %v7391_v55, 4  ;;  %v13847_v54 = vld [vmem:[#allocation24_spill] sm:$0xff] }
 0x126   : > { %v7785_v52 = vadd.f32 %v3280_v36, %v2900_v45  ;;  %v2496_v36 = vsel %vm2416_vm0, %v7715_v46, 0.0  ;;  %vm13844_vm4 = vcmp.ne.s32.totalorder %v13840_v53, 0  ;;  %v13845_v27 = vrot.slane %v7582_v2, 1 }
 0x127   : > { %v4180_v56 = vsel %vm13583_vm8, %v13843_v39, %v13355_v33  ;;  %v13358_v16 = vrot.slane %v7783_v15, 5  ;;  %v1641_v55 = vadd.s32 %v1639_v9, %v7598_v1  ;;  %v7810_v7 = vadd.f32 %v4066_v20, %v3962_v35  ;;  %v13848_v39 = vld [vmem:[#allocation26_spill] sm:$0xff]  ;;  %v13851_v9 = vld [vmem:[#allocation23_spill] sm:$0xff]  ;;  %vm13863_vm10 = vmmov %vm13844_vm4 }
 0x128   : > { %v4323_v38 = vsel %vm13844_vm4, %v4180_v56, 0.0  ;;  %v7807_v45 = vsel %vm13593_vm5, %v13845_v27, %v13357_v14  ;;  %v13849_v33 = vrot.slane %v13848_v39, 5  ;;  %v13850_v56 = vld [vmem:[#allocation27_spill] sm:$0xff]  ;;  %v1053_v20 = vmul.f32 0.5, %v1003_v26 }
 0x129   : > { %13846 = vst [vmem:[#allocation8_spill] sm:$0xff] %v7810_v7  ;;  %v4375_v22 = vmul.f32 %v13847_v54, %v4323_v38  ;;  %v4872_v24 = vmul.f32 %v13850_v56, %v4820_v13  ;;  %v7821_v2 = vmul.f32 %v7001_v59, %v7807_v45  ;;  %v13361_v27 = vrot.slane %v7807_v45, 2 }
 0x12a   : > { %v4591_v6 = vsel %vm13533_vm3, %v13849_v33, %v13358_v16  ;;  %v13362_v1 = vrot.slane %v7807_v45, 6  ;;  %v7828_v38 = vmul.f32 %v7062_v47, %v7807_v45  ;;  %v13852_v33 = vshll.u32 %v7592_v37, 16 }
 0x12b   : > { %v4425_v35 = vadd.f32 %v4375_v22, %v13851_v9  ;;  %v13365_v14 = vrot.slane %v7821_v2, 1  ;;  %v13855_v26 = vrot.slane %v7606_v34, 2  ;;  %vm13865_vm4 = vcmp.ne.s32.totalorder %v13840_v53, 13 }
 0x12c   : > { %vm7834_vm13 = vc.u32 %v7764_v40, %v13852_v33  ;;  %v3406_v9 = vsel %vm13591_vm14, %v7615_v62, %v13362_v1  ;;  %v4015_v33 = vsel %vm2949_vm7, %v7807_v45, 0.0  ;;  %v13861_v21 = vrot.slane %v7828_v38, 7 }
 0x12d   : > { %v3093_v22 = vsel %vm13590_vm6, %v13855_v26, %v13361_v27  ;;  %v4738_v16 = vadd.f32 %v4591_v6, %v4425_v35  ;;  %v3548_v32 = vsel %vm13372_vm11, %v3406_v9, 0.0  ;;  %v13856_v26 = vld [vmem:[#allocation35_spill] sm:$0xff]  ;;  %v13858_v6 = vrot.slane %v7807_v45, 4 }
 0x12e   : > { %v3229_v3 = vsel %vm13392_vm15, %v3093_v22, 0.0  ;;  %v13857_v27 = vrot.slane %v13856_v26, 1  ;;  %v3600_v1 = vmul.f32 %v7089_v61, %v3548_v32  ;;  %v13859_v35 = vrot.slane %v7606_v34, 4  ;;  %v13864_v34 = vld [vmem:[#allocation22_spill] sm:$0xff] }
 0x12f   : > { %v3281_v62 = vmul.f32 %v7015_v11, %v3229_v3  ;;  %v7868_v7 = vadd.f32 %v4872_v24, %v4738_v16  ;;  %v13862_v26 = vrot.slane %v7623_v51, 7  ;;  %v13866_v24 = vld [vmem:[#allocation7_spill] sm:$0xff]  ;;  %v704_v13 = vmul.f32 %v7776_v57, %v7776_v57 }
 0x130   : > { %v2765_v25 = vsel %vm13593_vm5, %v13857_v27, %v13365_v14  ;;  %v4182_v22 = vsel %vm13583_vm8, %v13859_v35, %v13858_v6  ;;  %v3650_v32 = vadd.f32 %v3600_v1, %v7694_v29  ;;  %v7882_v6 = vmul.f32 %v13864_v34, %v7807_v45  ;;  %v13867_v51 = vld [vmem:[#allocation31_spill] sm:$0xff]  ;;  %v13868_v29 = vld [vmem:[#allocation25_spill] sm:$0xff] }
 0x131   : > { %13860 = vst [vmem:[#allocation26_spill] sm:$0xff] %v7868_v7  ;;  %v2901_v39 = vadd.f32 %v2765_v25, %v7700_v41  ;;  %v3821_v27 = vsel %vm13585_vm1, %v13862_v26, %v13861_v21  ;;  %v4324_v3 = vsel %vm13863_vm10, %v4182_v22, 0.0  ;;  %v4821_v41 = vsel %vm13865_vm4, %v3406_v9, 0.0 }
 0x132   : > { %v4376_v14 = vmul.f32 %v7578_v42, %v4324_v3  ;;  %v2548_v16 = vmul.f32 %v13866_v24, %v2496_v36  ;;  %v4067_v21 = vmul.f32 %v7092_v30, %v4015_v33  ;;  %v7891_v35 = vmul.f32 %v1053_v20, %v13867_v51 }
 0x133   : > { %v7887_v25 = vadd.f32 %v3281_v62, %v2901_v39  ;;  %v3963_v22 = vadd.f32 %v3821_v27, %v3650_v32  ;;  %v13374_v26 = vrot.slane %v7882_v6, 5  ;;  %v1643_v3 = vsel %vm7834_vm13, 1, %v13790_v28  ;;  %v571_v27 = vpop.f32.mrf.mxu0 }
 0x134   : > { %v4426_v1 = vadd.f32 %v4376_v14, %v13868_v29  ;;  %v4873_v53 = vmul.f32 %v7672_v49, %v4821_v41  ;;  %v13368_v36 = vrot.slane %v7891_v35, 1  ;;  %v13869_v39 = vshll.u32 %v7592_v37, 16 }
 0x135   : > { %v1645_v33 = vadd.s32 %v1643_v3, %v1641_v55  ;;  %v7903_v20 = vadd.f32 %v4067_v21, %v3963_v22  ;;  %v13871_v14 = vrot.slane %v7667_v48, 5  ;;  %vm13414_vm10 = vcmp.ne.s32.totalorder %v7745_v0, 13 }
 0x136   : > { %v1644_v9 = vadd.s32 %v7764_v40, %v13869_v39  ;;  %v13872_v40 = vrot.slane %v7686_v19, 1  ;;  %v13873_v41 = vshrl.u32 %v7584_v60, 16  ;;  %v13874_v19 = vshrl.u32 %v7592_v37, 16  ;;  %v13875_v60 = vld [vmem:[#allocation4_spill] sm:$0xff] }
 0x137   : > { %13870 = vst [vmem:[#allocation23_spill] sm:$0xff] %v7903_v20  ;;  %v4593_v62 = vsel %vm13533_vm3, %v13871_v14, %v13374_v26  ;;  %v13876_v14 = vrot.slane %v7715_v46, 2  ;;  %v13877_v37 = vrot.slane %v7715_v46, 6 }
 0x138   : > { %v4739_v32 = vadd.f32 %v4593_v62, %v4426_v1  ;;  %v7918_v55 = vsel %vm13593_vm5, %v13872_v40, %v13368_v36  ;;  %v1646_v21 = vadd.s32 %v1645_v33, %v13873_v41  ;;  %vm1648_vm13 = vc.u32 %v1644_v9, 2454267026 }
 0x139   : > { %v1649_v48 = vsel %vm1648_vm13, 1, %v13790_v28  ;;  %v7925_v51 = vmul.f32 %v6941_v12, %v7918_v55  ;;  %v13367_v22 = vrot.slane %v7918_v55, 2  ;;  %v13366_v29 = vrot.slane %v7918_v55, 6 }
 0x13a   : > { %v4923_v1 = vadd.f32 %v4873_v53, %v4739_v32  ;;  %v1647_v3 = vadd.s32 %v1646_v21, %v13874_v19  ;;  %v7933_v39 = vmul.f32 %v6990_v50, %v7918_v55  ;;  %v7936_v9 = vadd.f32 %v571_v27, %v13875_v60 }
 0x13b   : > { %v13369_v33 = vrot.slane %v7925_v51, 1  ;;  %v3095_v62 = vsel %vm13590_vm6, %v13876_v14, %v13367_v22  ;;  %v3408_v53 = vsel %vm13591_vm14, %v13877_v37, %v13366_v29  ;;  %v4016_v32 = vsel %vm13392_vm15, %v7918_v55, 0.0 }
 0x13c   : > { %v7953_v27 = vmul.f32 %v7589_v44, %v4923_v1  ;;  %v1650_v40 = vadd.s32 %v1649_v48, %v1647_v3  ;;  %v3230_v41 = vsel %vm13414_vm10, %v3095_v62, 0.0  ;;  %v3549_v21 = vsel %vm2415_vm9, %v3408_v53, 0.0 }
 0x13d   : > { %v13879_v19 = vrot.slane %v7723_v18, 1  ;;  %v3282_v37 = vmul.f32 %v6984_v43, %v3230_v41  ;;  %v3601_v29 = vmul.f32 %v7086_v31, %v3549_v21  ;;  %v13370_v1 = vrot.slane %v7933_v39, 7 }
 0x13e   : > { %13878 = vst [vmem:[#allocation35_spill] sm:$0xff] %v7953_v27  ;;  %v1651_v22 = vshrl.u32 %v1650_v40, 3  ;;  %v13371_v3 = vrot.slane %v7918_v55, 4  ;;  %v7970_v62 = vmul.f32 %v13839_v10, %v7918_v55  ;;  %v13881_v18 = vrot.slane %v7729_v5, 7  ;;  %v644_v5 = vpop.f32.mrf.mxu1 }
 0x13f   : > { %v2767_v14 = vsel %vm13593_vm5, %v13879_v19, %v13369_v33  ;;  %v3651_v36 = vadd.f32 %v3601_v29, %v7785_v52  ;;  %v4068_v21 = vmul.f32 %v13842_v17, %v4016_v32  ;;  %v754_v19 = vmul.f32 %v704_v13, %v7776_v57 }
 0x140   : > { %v2902_v48 = vadd.f32 %v2767_v14, %v2548_v16  ;;  %13880 = vst [vmem:[#allocation31_spill] sm:$0xff] %v7970_v62  ;;  %v3823_v41 = vsel %vm13585_vm1, %v13881_v18, %v13370_v1  ;;  %v1652_v40 = vmul.u32 14, %v1651_v22  ;;  %v13882_v14 = vrot.slane %v7715_v46, 4 }
 0x141   : > { %v13373_v29 = vrot.slane %v7970_v62, 5  ;;  %v3964_v33 = vadd.f32 %v3823_v41, %v3651_v36  ;;  %v4822_v13 = vsel %vm2948_vm2, %v3408_v53, 0.0  ;;  %v804_v22 = vmul.f32 0.044715, %v754_v19 }
 0x142   : > { %v7980_v16 = vadd.f32 %v3282_v37, %v2902_v48  ;;  %v4184_v52 = vsel %vm13583_vm8, %v13882_v14, %v13371_v3  ;;  %v13884_v37 = vld [vmem:[#allocation32_spill] sm:$0xff]  ;;  %v13885_v46 = vrot.slane %v7783_v15, 5  ;;  %v705_v36 = vmul.f32 %v7936_v9, %v7936_v9  ;;  %v13887_v3 = vld [vmem:[#allocation3_spill] sm:$0xff] }
 0x143   : > { %v4325_v32 = vsel %vm2413_vm12, %v4184_v52, 0.0  ;;  %v1653_v48 = vsub.s32 %v13884_v37, %v1652_v40  ;;  %v8001_v41 = vadd.f32 %v4068_v21, %v3964_v33  ;;  %v854_v52 = vadd.f32 %v804_v22, %v7776_v57  ;;  %v437_v40 = vld [vmem:[%s6842_s26 + $0xb0] sm:$0xff]  ;;  %v13888_v37 = vld [vmem:[#allocation29_spill] sm:$0xff] }
 0x144   : > { %v4377_v1 = vmul.f32 %v13847_v54, %v4325_v32  ;;  %v4595_v14 = vsel %vm13533_vm3, %v13885_v46, %v13373_v29  ;;  %v8005_v53 = vadd.s32 56, %v13887_v3  ;;  %v8008_v19 = vadd.f32 %v644_v5, %v13813_v63  ;;  %v438_v32 = vld [vmem:[%s6842_s26 + $0xb8] sm:$0xff] }
 0x145   : > { %13886 = vst [vmem:[#allocation25_spill] sm:$0xff] %v8001_v41  ;;  %vm2238_vm4 = vcmp.ne.s32.totalorder %v1653_v48, 0  ;;  %vm2263_vm13 = vcmp.lt.s32.totalorder %v1653_v48, 0  ;;  %v2313_v15 = vadd.s32 14, %v1653_v48  ;;  %v904_v29 = vmul.f32 0.7978846, %v854_v52 }
 0x146   : > { %v4427_v46 = vadd.f32 %v4377_v1, %v13888_v37  ;;  %vm2288_vm11 = vmand %vm2263_vm13, %vm2238_vm4  ;;  %v755_v33 = vmul.f32 %v705_v36, %v7936_v9  ;;  %v1659_v21 = vand.u32 65535, %v8005_v53  ;;  %v1660_v22 = vshrl.u32 %v8005_v53, 16 }
 0x147   : > { %v8016_v26 = vsel %vm2288_vm11, %v2313_v15, %v1653_v48  ;;  %v4874_v5 = vmul.f32 %v13850_v56, %v4822_v13  ;;  %v451_v44 = vpack.c.bf16 %v438_v32, %v437_v40  ;;  %6447 = vtanh.f32 %v904_v29  ;;  %v573_v48 = vpop.f32.mrf.mxu0 }
 0x148   : > { %13889 = vst [vmem:[#allocation15_spill] sm:$0xff] %v8016_v26  ;;  %v4740_v27 = vadd.f32 %v4595_v14, %v4427_v46  ;;  %v805_v7 = vmul.f32 0.044715, %v755_v33  ;;  %v706_v41 = vmul.f32 %v8008_v19, %v8008_v19  ;;  %v1662_v52 = vmul.u32 9362, %v1659_v21 }
 0x149   : > { %v1663_v37 = vmul.u32 37449, %v1659_v21  ;;  %v1664_v36 = vmul.u32 9362, %v1660_v22  ;;  %vm13891_vm4 = vcmask 523264   ;;  %vm2417_vm11 = vcmp.ne.s32.totalorder %v8016_v26, 0 }
 0x14a   : > { %v8021_v1 = vadd.f32 %v4874_v5, %v4740_v27  ;;  %6300 = vmatmul.msk.bf16.gmra.mxu0 %vm13891_vm4, %v451_v44  ;;  %vm13892_vm13 = vmmov %vm13891_vm4  ;;  %v855_v13 = vadd.f32 %v805_v7, %v7936_v9  ;;  %v2497_v29 = vsel %vm2416_vm0, %v7807_v45, 0.0  ;;  %v1665_v14 = vmul.u32 37449, %v1660_v22 }
 0x14b   : > { %6313 = vmatmul.msk.bf16.gmra.mxu1 %vm13892_vm13, %v451_v44  ;;  %v1666_v40 = vshll.u32 %v1663_v37, 16  ;;  %v1668_v27 = vshll.u32 %v1664_v36, 16  ;;  %v756_v15 = vmul.f32 %v706_v41, %v8008_v19  ;;  %v8032_v46 = vadd.f32 %v573_v48, %v13875_v60  ;;  %v646_v60 = vpop.f32.mrf.mxu1 }
 0x14c   : > { %13890 = vst [vmem:[#allocation32_spill] sm:$0xff] %v8021_v1  ;;  %v905_v32 = vmul.f32 0.7978846, %v855_v13  ;;  %v8035_v44 = vadd.s32 64, %v13887_v3  ;;  %v2498_v7 = vsel %vm2417_vm11, %v7918_v55, 0.0  ;;  %v1667_v33 = vshrl.u32 %v1663_v37, 16 }
 0x14d   : > { %vm1670_vm4 = vc.u32 %v1662_v52, %v1666_v40  ;;  %v1672_v21 = vadd.s32 %v1666_v40, %v1662_v52  ;;  %v6448_v5 = vpop.eup %6447  ;;  %v806_v13 = vmul.f32 0.044715, %v756_v15  ;;  %v707_v41 = vmul.f32 %v8032_v46, %v8032_v46 }
 0x14e   : > { %13893 = vst [vmem:[#allocation29_spill] sm:$0xff] %v8035_v44  ;;  %6449 = vtanh.f32 %v905_v32  ;;  %v1671_v22 = vsel %vm1670_vm4, 1, %v13790_v28  ;;  %v1004_v48 = vadd.f32 1.0, %v6448_v5  ;;  %v1691_v52 = vand.u32 65535, %v8035_v44 }
 0x14f   : > { %v1673_v1 = vadd.s32 %v1671_v22, %v1665_v14  ;;  %vm1674_vm13 = vc.u32 %v1672_v21, %v1668_v27  ;;  %v1676_v3 = vadd.s32 %v1672_v21, %v1668_v27  ;;  %v856_v56 = vadd.f32 %v806_v13, %v8008_v19 }
 0x150   : > { %v1675_v20 = vsel %vm1674_vm13, 1, %v13790_v28  ;;  %v757_v37 = vmul.f32 %v707_v41, %v8032_v46  ;;  %v1054_v40 = vmul.f32 0.5, %v1004_v48  ;;  %v1669_v32 = vshrl.u32 %v1664_v36, 16 }
 0x151   : > { %v1677_v62 = vadd.s32 %v1675_v20, %v1673_v1  ;;  %v1692_v15 = vshrl.u32 %v8035_v44, 16  ;;  %vm1680_vm4 = vc.u32 %v1676_v3, 2454267026  ;;  %v906_v54 = vmul.f32 0.7978846, %v856_v56 }
 0x152   : > { %v807_v5 = vmul.f32 0.044715, %v757_v37  ;;  %v8049_v14 = vadd.f32 %v646_v60, %v13813_v63  ;;  %v8052_v27 = vmul.f32 %v1054_v40, %v7776_v57  ;;  %v8054_v22 = vmul.u32 37449, %v1691_v52 }
 0x153   : > { %v1678_v21 = vadd.s32 %v1677_v62, %v1667_v33  ;;  %v2549_v41 = vmul.f32 %v6998_v58, %v2497_v29  ;;  %v8058_v36 = vmul.f32 %v13866_v24, %v2498_v7  ;;  %v8061_v3 = vmul.u32 9362, %v1692_v15 }
 0x154   : > { %v6450_v13 = vpop.eup %6449  ;;  %v857_v20 = vadd.f32 %v807_v5, %v8032_v46  ;;  %v13382_v56 = vrot.slane %v8052_v27, 1  ;;  %v1681_v57 = vsel %vm1680_vm4, 1, %v13790_v28  ;;  %6451 = vtanh.f32 %v906_v54 }
 0x155   : > { %v1005_v60 = vadd.f32 1.0, %v6450_v13  ;;  %v1679_v1 = vadd.s32 %v1678_v21, %v1669_v32  ;;  %v8065_v62 = vmul.u32 9362, %v1691_v52  ;;  %v8067_v33 = vmul.u32 37449, %v1692_v15 }
 0x156   : > { %v8071_v29 = vmul.f32 %v8049_v14, %v8049_v14  ;;  %v13894_v7 = vrot.slane %v7719_v23, 1  ;;  %v907_v37 = vmul.f32 0.7978846, %v857_v20  ;;  %v13896_v54 = vrot.slane %v7807_v45, 2 }
 0x157   : > { %v1055_v13 = vmul.f32 0.5, %v1005_v60  ;;  %v1682_v20 = vadd.s32 %v1681_v57, %v1679_v1  ;;  %v13897_v5 = vrot.slane %v7807_v45, 6  ;;  %vm13431_vm13 = vcmp.ne.s32.totalorder %v8016_v26, 13 }
 0x158   : > { %v8078_v48 = vsel %vm13593_vm5, %v13894_v7, %v13382_v56  ;;  %v13901_v63 = vrot.slane %v7821_v2, 1  ;;  %6453 = vtanh.f32 %v907_v37 }
 0x159   : > { %v8084_v52 = vmul.f32 %v7001_v59, %v8078_v48  ;;  %v13383_v32 = vrot.slane %v8078_v48, 2  ;;  %v13384_v15 = vrot.slane %v8078_v48, 6  ;;  %v8091_v23 = vmul.f32 %v7062_v47, %v8078_v48 }
 0x15a   : > { %v4017_v21 = vsel %vm13392_vm15, %v8078_v48, 0.0  ;;  %v8136_v2 = vmul.f32 %v13864_v34, %v8078_v48 }
 0x15b   : > { %13895 = vst [vmem:[#allocation37_spill] sm:$0xff] %v8084_v52  ;;  %v3097_v56 = vsel %vm13590_vm6, %v13896_v54, %v13383_v32  ;;  %v3410_v40 = vsel %vm13591_vm14, %v13897_v5, %v13384_v15  ;;  %v13898_v54 = vrot.slane %v8078_v48, 4  ;;  %v13899_v32 = vrot.slane %v7807_v45, 4  ;;  %v6452_v5 = vpop.eup %6451 }
 0x15c   : > { %v3231_v60 = vsel %vm13414_vm10, %v3097_v56, 0.0  ;;  %v3550_v1 = vsel %vm2415_vm9, %v3410_v40, 0.0  ;;  %v13900_v15 = vrot.slane %v8084_v52, 1  ;;  %v13902_v45 = vrot.slane %v8091_v23, 7 }
 0x15d   : > { %v4186_v7 = vsel %vm13583_vm8, %v13899_v32, %v13898_v54  ;;  %v3283_v44 = vmul.f32 %v7015_v11, %v3231_v60  ;;  %v3602_v8 = vmul.f32 %v7089_v61, %v3550_v1  ;;  %v13903_v32 = vrot.slane %v7828_v38, 7 }
 0x15e   : > { %v2769_v56 = vsel %vm13593_vm5, %v13901_v63, %v13900_v15  ;;  %v4326_v57 = vsel %vm2413_vm12, %v4186_v7, 0.0  ;;  %v13904_v63 = vshll.u32 %v8054_v22, 16  ;;  %v4823_v38 = vsel %vm2948_vm2, %v3410_v40, 0.0 }
 0x15f   : > { %v2903_v47 = vadd.f32 %v2769_v56, %v2549_v41  ;;  %v3825_v54 = vsel %vm13585_vm1, %v13903_v32, %v13902_v45  ;;  %v4378_v52 = vmul.f32 %v7578_v42, %v4326_v57  ;;  %v3652_v41 = vadd.f32 %v3602_v8, %v7887_v25 }
 0x160   : > { %vm8141_vm4 = vc.u32 %v8065_v62, %v13904_v63  ;;  %v8149_v7 = vmul.f32 %v1055_v13, %v7936_v9  ;;  %v1683_v60 = vshrl.u32 %v1682_v20, 3  ;;  %v8154_v1 = vsel %vm2417_vm11, %v8078_v48, 0.0 }
 0x161   : > { %v8156_v57 = vadd.f32 %v3283_v44, %v2903_v47  ;;  %v4428_v56 = vadd.f32 %v4378_v52, %v7696_v4  ;;  %v13400_v45 = vrot.slane %v8136_v2, 5  ;;  %v3965_v32 = vadd.f32 %v3825_v54, %v3652_v41 }
 0x162   : > { %v4069_v8 = vmul.f32 %v7092_v30, %v4017_v21  ;;  %v13401_v25 = vrot.slane %v8149_v7, 1  ;;  %v1684_v18 = vmul.u32 14, %v1683_v60  ;;  %v13907_v9 = vrot.slane %v7882_v6, 5 }
 0x163   : > { %v4875_v13 = vmul.f32 %v7672_v49, %v4823_v38  ;;  %v1006_v47 = vadd.f32 1.0, %v6452_v5  ;;  %v13908_v52 = vrot.slane %v7891_v35, 1  ;;  %v13910_v41 = vrot.slane %v7918_v55, 2 }
 0x164   : > { %v4597_v40 = vsel %vm13533_vm3, %v13907_v9, %v13400_v45  ;;  %v8168_v44 = vadd.f32 %v4069_v8, %v3965_v32  ;;  %v1685_v20 = vsub.s32 %v8005_v53, %v1684_v18  ;;  %v13911_v60 = vrot.slane %v7918_v55, 6  ;;  %v13931_v45 = vld [vmem:[#allocation37_spill] sm:$0xff] }
 0x165   : > { %v4741_v4 = vadd.f32 %v4597_v40, %v4428_v56  ;;  %v8175_v21 = vsel %vm13593_vm5, %v13908_v52, %v13401_v25  ;;  %v13932_v25 = vrot.slane %v13931_v45, 1 }
 0x166   : > { %v8180_v6 = vmul.f32 %v6941_v12, %v8175_v21  ;;  %v13396_v54 = vrot.slane %v8175_v21, 2  ;;  %v13393_v37 = vrot.slane %v8175_v21, 6  ;;  %v8186_v5 = vmul.f32 %v6990_v50, %v8175_v21 }
 0x167   : > { %v8188_v63 = vadd.f32 %v4875_v13, %v4741_v4  ;;  %vm2239_vm12 = vcmp.ne.s32.totalorder %v1685_v20, 0  ;;  %vm2264_vm2 = vcmp.lt.s32.totalorder %v1685_v20, 0  ;;  %v2314_v35 = vadd.s32 14, %v1685_v20  ;;  %v6454_v13 = vpop.eup %6453 }
 0x168   : > { %vm2289_vm15 = vmand %vm2264_vm2, %vm2239_vm12  ;;  %v13395_v53 = vrot.slane %v8180_v6, 1  ;;  %v3099_v38 = vsel %vm13590_vm6, %v13910_v41, %v13396_v54  ;;  %v3412_v56 = vsel %vm13591_vm14, %v13911_v60, %v13393_v37  ;;  %v13394_v32 = vrot.slane %v8186_v5, 7 }
 0x169   : > { %13909 = vst [vmem:[#allocation38_spill] sm:$0xff] %v8188_v63  ;;  %v8202_v8 = vsel %vm2289_vm15, %v2314_v35, %v1685_v20  ;;  %v3232_v18 = vsel %vm13431_vm13, %v3099_v38, 0.0  ;;  %v3551_v9 = vsel %vm2416_vm0, %v3412_v56, 0.0  ;;  %v4018_v40 = vsel %vm13414_vm10, %v8175_v21, 0.0 }
 0x16a   : > { %13912 = vst [vmem:[#allocation39_spill] sm:$0xff] %v8202_v8  ;;  %vm2418_vm12 = vcmp.ne.s32.totalorder %v8202_v8, 0  ;;  %v13913_v4 = vrot.slane %v7925_v51, 1  ;;  %v3284_v20 = vmul.f32 %v6984_v43, %v3232_v18  ;;  %v3603_v35 = vmul.f32 %v7086_v31, %v3551_v9 }
 0x16b   : > { %v13914_v38 = vrot.slane %v7933_v39, 7  ;;  %v1703_v37 = vsel %vm8141_vm4, 1, %v13790_v28  ;;  %v13915_v51 = vshll.u32 %v8054_v22, 16  ;;  %v2500_v18 = vsel %vm2418_vm12, %v8175_v21, 0.0 }
 0x16c   : > { %v2771_v52 = vsel %vm13593_vm5, %v13913_v4, %v13395_v53  ;;  %v13397_v9 = vrot.slane %v8175_v21, 4  ;;  %v8238_v39 = vmul.f32 %v13839_v10, %v8175_v21  ;;  %v4070_v15 = vmul.f32 %v13842_v17, %v4018_v40 }
 0x16d   : > { %v2904_v41 = vadd.f32 %v2771_v52, %v8058_v36  ;;  %v3827_v60 = vsel %vm13585_vm1, %v13914_v38, %v13394_v32  ;;  %v1704_v4 = vadd.s32 %v13915_v51, %v8065_v62  ;;  %v3653_v36 = vadd.f32 %v3603_v35, %v7980_v16  ;;  %v13917_v35 = vld [vmem:[#allocation21_spill] sm:$0xff] }
 0x16e   : > { %v1056_v38 = vmul.f32 0.5, %v1006_v47  ;;  %v1007_v32 = vadd.f32 1.0, %v6454_v13  ;;  %v13916_v62 = vrot.slane %v7918_v55, 4  ;;  %v13398_v16 = vrot.slane %v8238_v39, 5 }
 0x16f   : > { %v8240_v52 = vadd.f32 %v3284_v20, %v2904_v41  ;;  %v3966_v53 = vadd.f32 %v3827_v60, %v3653_v36  ;;  %v4824_v54 = vsel %vm2949_vm7, %v3412_v56, 0.0  ;;  %vm13918_vm15 = vcmp.ne.s32.totalorder %v13917_v35, 0  ;;  %v13919_v60 = vld [vmem:[#allocation24_spill] sm:$0xff]  ;;  %v13920_v36 = vld [vmem:[#allocation31_spill] sm:$0xff] }
 0x170   : > { %v4188_v51 = vsel %vm13583_vm8, %v13916_v62, %v13397_v9  ;;  %v8254_v41 = vmul.f32 %v1056_v38, %v8008_v19  ;;  %v1057_v47 = vmul.f32 0.5, %v1007_v32  ;;  %v1705_v40 = vadd.s32 %v1703_v37, %v8067_v33  ;;  %v13924_v38 = vld [vmem:[#allocation8_spill] sm:$0xff] }
 0x171   : > { %v4327_v20 = vsel %vm13918_vm15, %v4188_v51, 0.0  ;;  %v8257_v13 = vadd.f32 %v4070_v15, %v3966_v53  ;;  %v13921_v62 = vrot.slane %v13920_v36, 5  ;;  %v13922_v56 = vshll.u32 %v8061_v3, 16 }
 0x172   : > { %v4379_v55 = vmul.f32 %v13919_v60, %v4327_v20  ;;  %v13399_v51 = vrot.slane %v8254_v41, 1  ;;  %v8269_v19 = vmul.f32 %v1057_v47, %v8032_v46  ;;  %v2551_v32 = vmul.f32 %v6998_v58, %v8154_v1 }
 0x173   : > { %v4599_v9 = vsel %vm13533_vm3, %v13921_v62, %v13398_v16  ;;  %vm1706_vm4 = vc.u32 %v1704_v4, %v13922_v56  ;;  %v13923_v37 = vmov %v13922_v56  ;;  %v2552_v15 = vmul.f32 %v13866_v24, %v2500_v18  ;;  %v13925_v62 = vld [vmem:[#allocation27_spill] sm:$0xff] }
 0x174   : > { %v1707_v33 = vsel %vm1706_vm4, 1, %v13790_v28  ;;  %v1708_v53 = vadd.s32 %v1704_v4, %v13923_v37  ;;  %v4429_v20 = vadd.f32 %v4379_v55, %v13924_v38  ;;  %v1701_v36 = vshrl.u32 %v8061_v3, 16 }
 0x175   : > { %v4876_v56 = vmul.f32 %v13925_v62, %v4824_v54  ;;  %v13926_v46 = vrot.slane %v8052_v27, 1  ;;  %v1709_v16 = vadd.s32 %v1707_v33, %v1705_v40  ;;  %v8289_v4 = vmul.f32 %v8071_v29, %v8049_v14  ;;  %v13927_v27 = vld [vmem:[#allocation14_spill] sm:$0xff] }
 0x176   : > { %v4742_v1 = vadd.f32 %v4599_v9, %v4429_v20  ;;  %vm1712_vm2 = vc.u32 %v1708_v53, 2454267026  ;;  %vm13532_vm15 = vcmp.ne.s32.totalorder %v8202_v8, 13  ;;  %v13929_v33 = vrot.slane %v8078_v48, 2 }
 0x177   : > { %v8285_v47 = vsel %vm13593_vm5, %v13926_v46, %v13399_v51  ;;  %v13930_v46 = vrot.slane %v8078_v48, 6  ;;  %v13933_v54 = vrot.slane %v8091_v23, 7  ;;  %vm13935_vm4 = vcmp.ne.s32.totalorder %v13917_v35, 0 }
 0x178   : > { %v8293_v18 = vmul.f32 %v7001_v59, %v8285_v47  ;;  %v13402_v3 = vrot.slane %v8285_v47, 2  ;;  %v13403_v55 = vrot.slane %v8285_v47, 6  ;;  %v8300_v37 = vmul.f32 %v13927_v27, %v8285_v47 }
 0x179   : > { %v4019_v29 = vsel %vm13414_vm10, %v8285_v47, 0.0  ;;  %v8306_v9 = vadd.f32 %v4876_v56, %v4742_v1  ;;  %v13412_v51 = vrot.slane %v8285_v47, 4  ;;  %v13937_v23 = vrot.slane %v8149_v7, 1 }
 0x17a   : > { %v13404_v40 = vrot.slane %v8293_v18, 1  ;;  %v3101_v38 = vsel %vm13590_vm6, %v13929_v33, %v13402_v3  ;;  %v4071_v20 = vmul.f32 %v7092_v30, %v4019_v29  ;;  %v3414_v56 = vsel %vm13591_vm14, %v13930_v46, %v13403_v55 }
 0x17b   : > { %13928 = vst [vmem:[#allocation21_spill] sm:$0xff] %v8306_v9  ;;  %v3233_v62 = vsel %vm13431_vm13, %v3101_v38, 0.0  ;;  %v13405_v1 = vrot.slane %v8300_v37, 7  ;;  %v3552_v38 = vsel %vm2416_vm0, %v3414_v56, 0.0  ;;  %v8334_v3 = vmul.f32 %v13864_v34, %v8285_v47 }
 0x17c   : > { %v2773_v33 = vsel %vm13593_vm5, %v13932_v25, %v13404_v40  ;;  %v3285_v29 = vmul.f32 %v7015_v11, %v3233_v62  ;;  %v3604_v55 = vmul.f32 %v7089_v61, %v3552_v38  ;;  %v13934_v25 = vrot.slane %v8078_v48, 4 }
 0x17d   : > { %v2905_v46 = vadd.f32 %v2773_v33, %v2551_v32  ;;  %v3829_v45 = vsel %vm13585_vm1, %v13933_v54, %v13405_v1  ;;  %v13411_v63 = vrot.slane %v8334_v3, 5  ;;  %v4825_v32 = vsel %vm2949_vm7, %v3414_v56, 0.0 }
 0x17e   : > { %v4190_v62 = vsel %vm13583_vm8, %v13934_v25, %v13412_v51  ;;  %v13936_v33 = vrot.slane %v8269_v19, 1  ;;  %v3654_v48 = vadd.f32 %v3604_v55, %v8156_v57  ;;  %v13938_v35 = vrot.slane %v8136_v2, 5  ;;  %v13940_v55 = vld [vmem:[#allocation23_spill] sm:$0xff] }
 0x17f   : > { %v4328_v40 = vsel %vm13935_vm4, %v4190_v62, 0.0  ;;  %v8359_v38 = vadd.f32 %v3285_v29, %v2905_v46  ;;  %v4877_v62 = vmul.f32 %v7672_v49, %v4825_v32  ;;  %v13939_v1 = vshrl.u32 %v8054_v22, 16 }
 0x180   : > { %v8357_v54 = vsel %vm13593_vm5, %v13937_v23, %v13936_v33  ;;  %v4380_v25 = vmul.f32 %v7578_v42, %v4328_v40  ;;  %v4601_v56 = vsel %vm13533_vm3, %v13938_v35, %v13411_v63  ;;  %v1713_v33 = vsel %vm1712_vm2, 1, %v13790_v28 }
 0x181   : > { %v1710_v7 = vadd.s32 %v1709_v16, %v13939_v1  ;;  %v8375_v29 = vmul.f32 %v6941_v12, %v8357_v54  ;;  %v3967_v57 = vadd.f32 %v3829_v45, %v3654_v48  ;;  %v13409_v49 = vrot.slane %v8357_v54, 2 }
 0x182   : > { %v4430_v40 = vadd.f32 %v4380_v25, %v13940_v55  ;;  %v13407_v46 = vrot.slane %v8357_v54, 6  ;;  %v8383_v22 = vmul.f32 %v6990_v50, %v8357_v54  ;;  %v4020_v16 = vsel %vm13431_vm13, %v8357_v54, 0.0  ;;  %v576_v25 = vpop.f32.mrf.mxu0 }
 0x183   : > { %v1711_v2 = vadd.s32 %v1710_v7, %v1701_v36  ;;  %v13406_v32 = vrot.slane %v8375_v29, 1  ;;  %v8388_v53 = vadd.f32 %v4071_v20, %v3967_v57  ;;  %v13942_v45 = vrot.slane %v8175_v21, 2 }
 0x184   : > { %v4743_v1 = vadd.f32 %v4601_v56, %v4430_v40  ;;  %v13943_v36 = vrot.slane %v8175_v21, 6  ;;  %v13945_v20 = vrot.slane %v8180_v6, 1  ;;  %v13410_v6 = vrot.slane %v8357_v54, 4 }
 0x185   : > { %13941 = vst [vmem:[#allocation31_spill] sm:$0xff] %v8388_v53  ;;  %v3103_v23 = vsel %vm13590_vm6, %v13942_v45, %v13409_v49  ;;  %v1714_v35 = vadd.s32 %v1713_v33, %v1711_v2  ;;  %v13952_v49 = vld [vmem:[#allocation3_spill] sm:$0xff] }
 0x186   : > { %v8400_v48 = vsel %vm13591_vm14, %v13943_v36, %v13407_v46  ;;  %v2775_v56 = vsel %vm13593_vm5, %v13945_v20, %v13406_v32  ;;  %v3234_v7 = vsel %vm13532_vm15, %v3103_v23, 0.0  ;;  %v8412_v55 = vadd.f32 %v4877_v62, %v4743_v1  ;;  %v13947_v20 = vld [vmem:[#allocation4_spill] sm:$0xff] }
 0x187   : > { %13944 = vst [vmem:[#allocation8_spill] sm:$0xff] %v8400_v48  ;;  %v3553_v57 = vsel %vm2417_vm11, %v8400_v48, 0.0  ;;  %v2906_v40 = vadd.f32 %v2775_v56, %v2552_v15  ;;  %v3286_v45 = vmul.f32 %v6984_v43, %v3234_v7  ;;  %v1715_v2 = vshrl.u32 %v1714_v35, 3  ;;  %v649_v7 = vpop.f32.mrf.mxu1 }
 0x188   : > { %13946 = vst [vmem:[#allocation27_spill] sm:$0xff] %v8412_v55  ;;  %v3605_v33 = vmul.f32 %v7086_v31, %v3553_v57  ;;  %v13408_v36 = vrot.slane %v8383_v22, 7  ;;  %v8419_v32 = vadd.f32 %v576_v25, %v13947_v20  ;;  %v8426_v62 = vmul.f32 %v13839_v10, %v8357_v54 }
 0x189   : > { %v8421_v23 = vadd.f32 %v3286_v45, %v2906_v40  ;;  %v1716_v15 = vmul.u32 14, %v1715_v2  ;;  %v13948_v1 = vrot.slane %v8186_v5, 7  ;;  %v4072_v56 = vmul.f32 %v13842_v17, %v4020_v16  ;;  %v13951_v2 = vld [vmem:[#allocation29_spill] sm:$0xff] }
 0x18a   : > { %v3655_v46 = vadd.f32 %v3605_v33, %v8240_v52  ;;  %v13949_v25 = vrot.slane %v8175_v21, 4  ;;  %v13413_v33 = vrot.slane %v8426_v62, 5  ;;  %v808_v5 = vmul.f32 0.044715, %v8289_v4 }
 0x18b   : > { %v3831_v35 = vsel %vm13585_vm1, %v13948_v1, %v13408_v36  ;;  %v1717_v1 = vsub.s32 %v13951_v2, %v1716_v15  ;;  %v709_v16 = vmul.f32 %v8419_v32, %v8419_v32  ;;  %v8448_v21 = vadd.s32 72, %v13952_v49 }
 0x18c   : > { %v4192_v52 = vsel %vm13583_vm8, %v13949_v25, %v13410_v6  ;;  %v3968_v57 = vadd.f32 %v3831_v35, %v3655_v46  ;;  %v13954_v46 = vrot.slane %v8238_v39, 5  ;;  %v858_v4 = vadd.f32 %v808_v5, %v8049_v14  ;;  %v13956_v6 = vld [vmem:[#allocation25_spill] sm:$0xff] }
 0x18d   : > { %v4329_v45 = vsel %vm2415_vm9, %v4192_v52, 0.0  ;;  %v13955_v52 = vld [vmem:[#allocation5_spill] sm:$0xff]  ;;  %vm2240_vm7 = vcmp.ne.s32.totalorder %v1717_v1, 0  ;;  %vm2265_vm2 = vcmp.lt.s32.totalorder %v1717_v1, 0  ;;  %v2315_v2 = vadd.s32 14, %v1717_v1 }
 0x18e   : > { %v4381_v36 = vmul.f32 %v13919_v60, %v4329_v45  ;;  %v8450_v25 = vadd.f32 %v4072_v56, %v3968_v57  ;;  %v4603_v35 = vsel %vm13533_vm3, %v13954_v46, %v13413_v33  ;;  %v8459_v15 = vadd.f32 %v649_v7, %v13955_v52  ;;  %v439_v45 = vld [vmem:[%s6842_s26 + $0xc0] sm:$0xf]  ;;  %vm2290_vm4 = vmand %vm2265_vm2, %vm2240_vm7 }
 0x18f   : > { %v908_v56 = vmul.f32 0.7978846, %v858_v4  ;;  %v759_v57 = vmul.f32 %v709_v16, %v8419_v32  ;;  %v1723_v51 = vand.u32 65535, %v8448_v21  ;;  %v1724_v39 = vshrl.u32 %v8448_v21, 16  ;;  %v578_v16 = vpop.f32.mrf.mxu0 }
 0x190   : > { %13953 = vst [vmem:[#allocation37_spill] sm:$0xff] %v8450_v25  ;;  %v4431_v63 = vadd.f32 %v4381_v36, %v13956_v6  ;;  %v710_v7 = vmul.f32 %v8459_v15, %v8459_v15  ;;  %v452_v5 = vpack.c.bf16 %v439_v45, %v439_v45  ;;  %v8470_v55 = vsel %vm2290_vm4, %v2315_v2, %v1717_v1 }
 0x191   : > { %6455 = vtanh.f32 %v908_v56  ;;  %v809_v33 = vmul.f32 0.044715, %v759_v57  ;;  %13958 = vst [vmem:[#allocation29_spill] sm:$0xff] %v8470_v55  ;;  %v1726_v9 = vmul.u32 9362, %v1723_v51  ;;  %v1727_v36 = vmul.u32 37449, %v1723_v51 }
 0x192   : > { %v8466_v46 = vadd.f32 %v4603_v35, %v4431_v63  ;;  %v1728_v6 = vmul.u32 9362, %v1724_v39  ;;  %vm13959_vm7 = vcmask 523264   ;;  %v760_v63 = vmul.f32 %v710_v7, %v8459_v15 }
 0x193   : > { %6301 = vmatmul.msk.bf16.gmra.mxu0 %vm13959_vm7, %v452_v5  ;;  %vm13960_vm2 = vmmov %vm13959_vm7  ;;  %v859_v4 = vadd.f32 %v809_v33, %v8419_v32  ;;  %v1729_v35 = vmul.u32 37449, %v1724_v39  ;;  %vm13554_vm10 = vcmp.ne.s32.totalorder %v8470_v55, 0  ;;  %v8478_v2 = vadd.f32 %v578_v16, %v13947_v20 }
 0x194   : > { %13957 = vst [vmem:[#allocation23_spill] sm:$0xff] %v8466_v46  ;;  %6314 = vmatmul.msk.bf16.gmra.mxu1 %vm13960_vm2, %v452_v5  ;;  %v1730_v46 = vshll.u32 %v1727_v36, 16  ;;  %v1732_v25 = vshll.u32 %v1728_v6, 16  ;;  %v810_v1 = vmul.f32 0.044715, %v760_v63  ;;  %v1731_v51 = vshrl.u32 %v1727_v36, 16 }
 0x195   : > { %v909_v45 = vmul.f32 0.7978846, %v859_v4  ;;  %v8481_v57 = vadd.s32 80, %v13952_v49  ;;  %v711_v7 = vmul.f32 %v8478_v2, %v8478_v2  ;;  %v1733_v48 = vshrl.u32 %v1728_v6, 16 }
 0x196   : > { %vm1734_vm4 = vc.u32 %v1726_v9, %v1730_v46  ;;  %v1736_v56 = vadd.s32 %v1730_v46, %v1726_v9  ;;  %v860_v39 = vadd.f32 %v810_v1, %v8459_v15  ;;  %v2502_v1 = vsel %vm13554_vm10, %v8357_v54, 0.0 }
 0x197   : > { %13961 = vst [vmem:[#allocation25_spill] sm:$0xff] %v8481_v57  ;;  %v6456_v5 = vpop.eup %6455  ;;  %6457 = vtanh.f32 %v909_v45  ;;  %v1735_v33 = vsel %vm1734_vm4, 1, %v13790_v28  ;;  %v761_v9 = vmul.f32 %v711_v7, %v8478_v2  ;;  %v2501_v45 = vsel %vm2418_vm12, %v8285_v47, 0.0 }
 0x198   : > { %v1008_v4 = vadd.f32 1.0, %v6456_v5  ;;  %v1737_v63 = vadd.s32 %v1735_v33, %v1729_v35  ;;  %vm1738_vm7 = vc.u32 %v1736_v56, %v1732_v25  ;;  %v1740_v16 = vadd.s32 %v1736_v56, %v1732_v25  ;;  %v651_v33 = vpop.f32.mrf.mxu1 }
 0x199   : > { %v1739_v36 = vsel %vm1738_vm7, 1, %v13790_v28  ;;  %v910_v20 = vmul.f32 0.7978846, %v860_v39  ;;  %v811_v5 = vmul.f32 0.044715, %v761_v9  ;;  %v1755_v56 = vand.u32 65535, %v8481_v57 }
 0x19a   : > { %v1058_v46 = vmul.f32 0.5, %v1008_v4  ;;  %v1741_v49 = vadd.s32 %v1739_v36, %v1737_v63  ;;  %vm1744_vm2 = vc.u32 %v1740_v16, 2454267026  ;;  %v2553_v53 = vmul.f32 %v6998_v58, %v2501_v45 }
 0x19b   : > { %v861_v7 = vadd.f32 %v811_v5, %v8478_v2  ;;  %v8503_v39 = vmul.f32 %v13866_v24, %v2502_v1  ;;  %6459 = vtanh.f32 %v910_v20  ;;  %v8517_v9 = vmul.u32 37449, %v1755_v56 }
 0x19c   : > { %v8496_v35 = vmul.f32 %v1058_v46, %v8049_v14  ;;  %v1742_v25 = vadd.s32 %v1741_v49, %v1731_v51  ;;  %v1745_v14 = vsel %vm1744_vm2, 1, %v13790_v28  ;;  %v8507_v49 = vadd.f32 %v651_v33, %v13955_v52 }
 0x19d   : > { %v6458_v6 = vpop.eup %6457  ;;  %v13962_v51 = vrot.slane %v8254_v41, 1  ;;  %v911_v5 = vmul.f32 0.7978846, %v861_v7  ;;  %v13965_v7 = vrot.slane %v8285_v47, 6  ;;  %vm13469_vm4 = vcmp.ne.s32.totalorder %v8470_v55, 13 }
 0x19e   : > { %v13418_v4 = vrot.slane %v8496_v35, 1  ;;  %v1009_v63 = vadd.f32 1.0, %v6458_v6  ;;  %v1743_v36 = vadd.s32 %v1742_v25, %v1733_v48  ;;  %v1756_v48 = vshrl.u32 %v8481_v57, 16 }
 0x19f   : > { %6461 = vtanh.f32 %v911_v5 }
 0x1a0   : > { %v8514_v16 = vsel %vm13593_vm5, %v13962_v51, %v13418_v4  ;;  %v1059_v20 = vmul.f32 0.5, %v1009_v63  ;;  %v1746_v33 = vadd.s32 %v1745_v14, %v1743_v36  ;;  %v13964_v51 = vrot.slane %v8285_v47, 2 }
 0x1a1   : > { %v8521_v46 = vmul.f32 %v7001_v59, %v8514_v16  ;;  %v13420_v45 = vrot.slane %v8514_v16, 2  ;;  %v13421_v1 = vrot.slane %v8514_v16, 6  ;;  %v8527_v41 = vmul.f32 %v13927_v27, %v8514_v16 }
 0x1a2   : > { %v13427_v25 = vrot.slane %v8514_v16, 4  ;;  %v4021_v63 = vsel %vm13431_vm13, %v8514_v16, 0.0 }
 0x1a3   : > { %13963 = vst [vmem:[#allocation40_spill] sm:$0xff] %v8521_v46  ;;  %v13429_v6 = vrot.slane %v8521_v46, 1  ;;  %v3105_v4 = vsel %vm13590_vm6, %v13964_v51, %v13420_v45  ;;  %v8541_v57 = vsel %vm13591_vm14, %v13965_v7, %v13421_v1  ;;  %v13967_v45 = vrot.slane %v8285_v47, 4 }
 0x1a4   : > { %13966 = vst [vmem:[#allocation41_spill] sm:$0xff] %v8541_v57  ;;  %v3235_v36 = vsel %vm13532_vm15, %v3105_v4, 0.0  ;;  %v3554_v14 = vsel %vm2417_vm11, %v8541_v57, 0.0  ;;  %v13968_v1 = vrot.slane %v8293_v18, 1  ;;  %v6460_v57 = vpop.eup %6459  ;;  %v13969_v47 = vrot.slane %v8527_v41, 7 }
 0x1a5   : > { %v4194_v7 = vsel %vm13583_vm8, %v13967_v45, %v13427_v25  ;;  %v3287_v52 = vmul.f32 %v7015_v11, %v3235_v36  ;;  %v3606_v26 = vmul.f32 %v7089_v61, %v3554_v14  ;;  %v13970_v45 = vrot.slane %v8300_v37, 7 }
 0x1a6   : > { %v2777_v4 = vsel %vm13593_vm5, %v13968_v1, %v13429_v6  ;;  %v4330_v51 = vsel %vm2415_vm9, %v4194_v7, 0.0  ;;  %v8575_v18 = vmul.f32 %v13864_v34, %v8514_v16  ;;  %v8579_v36 = vmul.f32 %v1059_v20, %v8419_v32 }
 0x1a7   : > { %v2907_v24 = vadd.f32 %v2777_v4, %v2553_v53  ;;  %v3833_v25 = vsel %vm13585_vm1, %v13970_v45, %v13969_v47  ;;  %v4382_v46 = vmul.f32 %v7578_v42, %v4330_v51  ;;  %v3656_v1 = vadd.f32 %v3606_v26, %v8359_v38 }
 0x1a8   : > { %v1747_v14 = vshrl.u32 %v1746_v33, 3  ;;  %v1758_v7 = vmul.u32 9362, %v1755_v56  ;;  %v13434_v37 = vrot.slane %v8575_v18, 5  ;;  %v8585_v47 = vmul.u32 9362, %v1756_v48 }
 0x1a9   : > { %v8581_v53 = vadd.f32 %v3287_v52, %v2907_v24  ;;  %v4432_v4 = vadd.f32 %v4382_v46, %v8168_v44  ;;  %v3969_v51 = vadd.f32 %v3833_v25, %v3656_v1  ;;  %v4073_v45 = vmul.f32 %v7092_v30, %v4021_v63 }
 0x1aa   : > { %v13435_v6 = vrot.slane %v8579_v36, 1  ;;  %v1748_v40 = vmul.u32 14, %v1747_v14  ;;  %v13971_v26 = vrot.slane %v8334_v3, 5  ;;  %v1761_v24 = vmul.u32 37449, %v1756_v48 }
 0x1ab   : > { %v1762_v44 = vshll.u32 %v8517_v9, 16  ;;  %v8595_v32 = vadd.f32 %v4073_v45, %v3969_v51  ;;  %v13974_v56 = vrot.slane %v8269_v19, 1  ;;  %v1764_v33 = vshll.u32 %v8585_v47, 16 }
 0x1ac   : > { %v4605_v38 = vsel %vm13533_vm3, %v13971_v26, %v13434_v37  ;;  %v1749_v25 = vsub.s32 %v8448_v21, %v1748_v40  ;;  %v13975_v40 = vrot.slane %v8357_v54, 2  ;;  %v13976_v1 = vrot.slane %v8357_v54, 6 }
 0x1ad   : > { %13972 = vst [vmem:[#allocation42_spill] sm:$0xff] %v8595_v32  ;;  %v8597_v52 = vadd.f32 %v4605_v38, %v4432_v4  ;;  %v8604_v46 = vsel %vm13593_vm5, %v13974_v56, %v13435_v6  ;;  %v1010_v26 = vadd.f32 1.0, %v6460_v57  ;;  %vm1766_vm13 = vc.u32 %v1758_v7, %v1762_v44  ;;  %v6462_v38 = vpop.eup %6461 }
 0x1ae   : > { %v8609_v3 = vmul.f32 %v6941_v12, %v8604_v46  ;;  %v13433_v48 = vrot.slane %v8604_v46, 2  ;;  %v13432_v5 = vrot.slane %v8604_v46, 6  ;;  %v8615_v20 = vmul.f32 %v6990_v50, %v8604_v46 }
 0x1af   : > { %13973 = vst [vmem:[#allocation43_spill] sm:$0xff] %v8597_v52  ;;  %vm2241_vm9 = vcmp.ne.s32.totalorder %v1749_v25, 0  ;;  %vm2266_vm7 = vcmp.lt.s32.totalorder %v1749_v25, 0  ;;  %v2316_v19 = vadd.s32 14, %v1749_v25  ;;  %v13977_v56 = vrot.slane %v8375_v29, 1  ;;  %v581_v52 = vpop.f32.mrf.mxu0 }
 0x1b0   : > { %v13436_v63 = vrot.slane %v8609_v3, 1  ;;  %v3107_v21 = vsel %vm13590_vm6, %v13975_v40, %v13433_v48  ;;  %v8629_v14 = vsel %vm13591_vm14, %v13976_v1, %v13432_v5  ;;  %v13442_v4 = vrot.slane %v8615_v20, 7  ;;  %vm2291_vm2 = vmand %vm2266_vm7, %vm2241_vm9 }
 0x1b1   : > { %v3236_v51 = vsel %vm13469_vm4, %v3107_v21, 0.0  ;;  %v3555_v45 = vsel %vm2418_vm12, %v8629_v14, 0.0  ;;  %v4022_v21 = vsel %vm13532_vm15, %v8604_v46, 0.0  ;;  %v13978_v57 = vrot.slane %v8383_v22, 7 }
 0x1b2   : > { %v2779_v40 = vsel %vm13593_vm5, %v13977_v56, %v13436_v63  ;;  %v3288_v1 = vmul.f32 %v6984_v43, %v3236_v51  ;;  %v3607_v5 = vmul.f32 %v7086_v31, %v3555_v45  ;;  %v13441_v29 = vrot.slane %v8604_v46, 4 }
 0x1b3   : > { %v2908_v48 = vadd.f32 %v2779_v40, %v8503_v39  ;;  %v3835_v37 = vsel %vm13585_vm1, %v13978_v57, %v13442_v4  ;;  %v1768_v6 = vadd.s32 %v1762_v44, %v1758_v7  ;;  %v8654_v56 = vsel %vm2291_vm2, %v2316_v19, %v1749_v25 }
 0x1b4   : > { %13979 = vst [vmem:[#allocation44_spill] sm:$0xff] %v8654_v56  ;;  %v3657_v51 = vadd.f32 %v3607_v5, %v8421_v23  ;;  %v8659_v45 = vmul.f32 %v13839_v10, %v8604_v46  ;;  %v1767_v63 = vsel %vm1766_vm13, 1, %v13790_v28  ;;  %v4074_v40 = vmul.f32 %v13842_v17, %v4022_v21 }
 0x1b5   : > { %v8662_v39 = vadd.f32 %v3288_v1, %v2908_v48  ;;  %v13980_v22 = vrot.slane %v8357_v54, 4  ;;  %v1060_v44 = vmul.f32 0.5, %v1010_v26  ;;  %v1011_v19 = vadd.f32 1.0, %v6462_v38 }
 0x1b6   : > { %v3970_v25 = vadd.f32 %v3835_v37, %v3657_v51  ;;  %v13440_v5 = vrot.slane %v8659_v45, 5  ;;  %vm1770_vm13 = vc.u32 %v1768_v6, %v1764_v33  ;;  %v2503_v54 = vsel %vm13554_vm10, %v8514_v16, 0.0 }
 0x1b7   : > { %v4196_v7 = vsel %vm13583_vm8, %v13980_v22, %v13441_v29  ;;  %v8675_v48 = vmul.f32 %v1060_v44, %v8459_v15  ;;  %vm13534_vm9 = vcmp.ne.s32.totalorder %v8654_v56, 0  ;;  %v13982_v37 = vrot.slane %v8426_v62, 5 }
 0x1b8   : > { %v4331_v23 = vsel %vm2416_vm0, %v4196_v7, 0.0  ;;  %v8681_v26 = vadd.f32 %v4074_v40, %v3970_v25  ;;  %v1061_v21 = vmul.f32 0.5, %v1011_v19  ;;  %v1769_v51 = vadd.s32 %v1767_v63, %v1761_v24 }
 0x1b9   : > { %v4383_v57 = vmul.f32 %v13919_v60, %v4331_v23  ;;  %v4607_v38 = vsel %vm13533_vm3, %v13982_v37, %v13440_v5  ;;  %v13439_v15 = vrot.slane %v8675_v48, 1  ;;  %v1763_v22 = vshrl.u32 %v8517_v9, 16 }
 0x1ba   : > { %13981 = vst [vmem:[#allocation45_spill] sm:$0xff] %v8681_v26  ;;  %v1765_v7 = vshrl.u32 %v8585_v47, 16  ;;  %v1771_v44 = vsel %vm1770_vm13, 1, %v13790_v28  ;;  %v712_v40 = vmul.f32 %v8507_v49, %v8507_v49  ;;  %v2555_v25 = vmul.f32 %v6998_v58, %v2503_v54 }
 0x1bb   : > { %v4433_v1 = vadd.f32 %v4383_v57, %v8257_v13  ;;  %v2504_v62 = vsel %vm13534_vm9, %v8604_v46, 0.0  ;;  %v13984_v24 = vrot.slane %v8496_v35, 1  ;;  %v1772_v19 = vadd.s32 %v1768_v6, %v1764_v33 }
 0x1bc   : > { %v8720_v35 = vmul.f32 %v1061_v21, %v8478_v2  ;;  %v1773_v37 = vadd.s32 %v1771_v44, %v1769_v51  ;;  %v13986_v6 = vrot.slane %v8514_v16, 6 }
 0x1bd   : > { %v8699_v13 = vadd.f32 %v4607_v38, %v4433_v1  ;;  %v8706_v9 = vsel %vm13593_vm5, %v13984_v24, %v13439_v15  ;;  %v13985_v1 = vrot.slane %v8514_v16, 2  ;;  %vm1776_vm7 = vc.u32 %v1772_v19, 2454267026 }
 0x1be   : > { %v8710_v47 = vmul.f32 %v7001_v59, %v8706_v9  ;;  %v13438_v63 = vrot.slane %v8706_v9, 2  ;;  %v13437_v23 = vrot.slane %v8706_v9, 6  ;;  %v8716_v57 = vmul.f32 %v13927_v27, %v8706_v9 }
 0x1bf   : > { %13983 = vst [vmem:[#allocation46_spill] sm:$0xff] %v8699_v13  ;;  %v13443_v54 = vrot.slane %v8706_v9, 4  ;;  %v4023_v2 = vsel %vm13532_vm15, %v8706_v9, 0.0  ;;  %v13997_v19 = vrot.slane %v8604_v46, 2 }
 0x1c0   : > { %v13444_v38 = vrot.slane %v8710_v47, 1  ;;  %v3109_v24 = vsel %vm13590_vm6, %v13985_v1, %v13438_v63  ;;  %v8733_v33 = vsel %vm13591_vm14, %v13986_v6, %v13437_v23  ;;  %v13445_v44 = vrot.slane %v8716_v57, 7  ;;  %v13988_v23 = vld [vmem:[#allocation40_spill] sm:$0xff] }
 0x1c1   : > { %v3237_v21 = vsel %vm13469_vm4, %v3109_v24, 0.0  ;;  %v3556_v51 = vsel %vm2418_vm12, %v8733_v33, 0.0  ;;  %v13987_v1 = vrot.slane %v8514_v16, 4  ;;  %v13989_v63 = vrot.slane %v13988_v23, 1 }
 0x1c2   : > { %v3289_v24 = vmul.f32 %v7015_v11, %v3237_v21  ;;  %v3608_v5 = vmul.f32 %v7089_v61, %v3556_v51  ;;  %v13990_v16 = vrot.slane %v8527_v41, 7  ;;  %v8766_v23 = vmul.f32 %v13864_v34, %v8706_v9 }
 0x1c3   : > { %v4198_v6 = vsel %vm13583_vm8, %v13987_v1, %v13443_v54  ;;  %v2781_v15 = vsel %vm13593_vm5, %v13989_v63, %v13444_v38  ;;  %v13991_v63 = vld [vmem:[#allocation7_spill] sm:$0xff]  ;;  %v13446_v38 = vrot.slane %v8720_v35, 1 }
 0x1c4   : > { %v4332_v29 = vsel %vm2416_vm0, %v4198_v6, 0.0  ;;  %v2909_v4 = vadd.f32 %v2781_v15, %v2555_v25  ;;  %v3837_v1 = vsel %vm13585_vm1, %v13990_v16, %v13445_v44  ;;  %v2556_v21 = vmul.f32 %v13991_v63, %v2504_v62  ;;  %v13992_v25 = vld [vmem:[#allocation31_spill] sm:$0xff] }
 0x1c5   : > { %v4384_v54 = vmul.f32 %v7578_v42, %v4332_v29  ;;  %v3658_v51 = vadd.f32 %v3608_v5, %v8581_v53  ;;  %vm13531_vm0 = vcmp.ne.s32.totalorder %v8654_v56, 13  ;;  %v13451_v6 = vrot.slane %v8766_v23, 5 }
 0x1c6   : > { %v8772_v15 = vadd.f32 %v3289_v24, %v2909_v4  ;;  %v762_v29 = vmul.f32 %v712_v40, %v8507_v49  ;;  %v4075_v44 = vmul.f32 %v7092_v30, %v4023_v2  ;;  %v13993_v62 = vrot.slane %v8579_v36, 1 }
 0x1c7   : > { %v4434_v41 = vadd.f32 %v4384_v54, %v13992_v25  ;;  %v3971_v16 = vadd.f32 %v3837_v1, %v3658_v51  ;;  %v1774_v5 = vadd.s32 %v1773_v37, %v1763_v22  ;;  %v13994_v4 = vrot.slane %v8575_v18, 5  ;;  %v13998_v25 = vld [vmem:[#allocation4_spill] sm:$0xff] }
 0x1c8   : > { %v8783_v53 = vsel %vm13593_vm5, %v13993_v62, %v13446_v38  ;;  %v812_v51 = vmul.f32 0.044715, %v762_v29  ;;  %v13999_v62 = vrot.slane %v8604_v46, 6  ;;  %v1777_v38 = vsel %vm1776_vm7, 1, %v13790_v28 }
 0x1c9   : > { %v4609_v54 = vsel %vm13533_vm3, %v13994_v4, %v13451_v6  ;;  %v8792_v40 = vmul.f32 %v6941_v12, %v8783_v53  ;;  %v13448_v2 = vrot.slane %v8783_v53, 2  ;;  %v8795_v24 = vadd.f32 %v4075_v44, %v3971_v16 }
 0x1ca   : > { %v8797_v36 = vadd.f32 %v4609_v54, %v4434_v41  ;;  %v13447_v22 = vrot.slane %v8783_v53, 6  ;;  %v8802_v37 = vmul.f32 %v6990_v50, %v8783_v53  ;;  %v8811_v44 = vadd.f32 %v581_v52, %v13998_v25 }
 0x1cb   : > { %13995 = vst [vmem:[#allocation40_spill] sm:$0xff] %v8795_v24  ;;  %v13450_v18 = vrot.slane %v8792_v40, 1  ;;  %v3111_v1 = vsel %vm13590_vm6, %v13997_v19, %v13448_v2  ;;  %v1775_v41 = vadd.s32 %v1774_v5, %v1765_v7  ;;  %v14001_v52 = vrot.slane %v8609_v3, 1 }
 0x1cc   : > { %13996 = vst [vmem:[#allocation31_spill] sm:$0xff] %v8797_v36  ;;  %v3238_v16 = vsel %vm13531_vm0, %v3111_v1, 0.0  ;;  %v8820_v4 = vsel %vm13591_vm14, %v13999_v62, %v13447_v22  ;;  %v13449_v54 = vrot.slane %v8802_v37, 7  ;;  %v14002_v62 = vrot.slane %v8615_v20, 7 }
 0x1cd   : > { %14000 = vst [vmem:[#allocation4_spill] sm:$0xff] %v8820_v4  ;;  %v2783_v7 = vsel %vm13593_vm5, %v14001_v52, %v13450_v18  ;;  %v3290_v29 = vmul.f32 %v6984_v43, %v3238_v16  ;;  %v3557_v5 = vsel %vm13554_vm10, %v8820_v4, 0.0  ;;  %v13452_v2 = vrot.slane %v8783_v53, 4 }
 0x1ce   : > { %v2910_v19 = vadd.f32 %v2783_v7, %v2556_v21  ;;  %v3609_v1 = vmul.f32 %v7086_v31, %v3557_v5  ;;  %v3839_v22 = vsel %vm13585_vm1, %v14002_v62, %v13449_v54  ;;  %v4024_v3 = vsel %vm13469_vm4, %v8783_v53, 0.0  ;;  %v654_v54 = vpop.f32.mrf.mxu1 }
 0x1cf   : > { %v8845_v16 = vmul.f32 %v13839_v10, %v8783_v53  ;;  %v862_v21 = vadd.f32 %v812_v51, %v8507_v49  ;;  %v14004_v20 = vrot.slane %v8604_v46, 4  ;;  %v713_v62 = vmul.f32 %v8811_v44, %v8811_v44  ;;  %v14006_v46 = vld [vmem:[#allocation5_spill] sm:$0xff] }
 0x1d0   : > { %v8848_v52 = vadd.f32 %v3290_v29, %v2910_v19  ;;  %v3659_v7 = vadd.f32 %v3609_v1, %v8662_v39  ;;  %v1778_v18 = vadd.s32 %v1777_v38, %v1775_v41  ;;  %v4076_v36 = vmul.f32 %v13842_v17, %v4024_v3  ;;  %v14005_v19 = vld [vmem:[#allocation3_spill] sm:$0xff] }
 0x1d1   : > { %14003 = vst [vmem:[#allocation47_spill] sm:$0xff] %v8845_v16  ;;  %v8856_v5 = vsel %vm13583_vm8, %v14004_v20, %v13452_v2  ;;  %v13453_v51 = vrot.slane %v8845_v16, 5  ;;  %v912_v29 = vmul.f32 0.7978846, %v862_v21  ;;  %v763_v39 = vmul.f32 %v713_v62, %v8811_v44  ;;  %v583_v20 = vpop.f32.mrf.mxu0 }
 0x1d2   : > { %v3972_v6 = vadd.f32 %v3839_v22, %v3659_v7  ;;  %v8864_v1 = vadd.s32 88, %v14005_v19  ;;  %v8867_v24 = vadd.f32 %v654_v54, %v14006_v46  ;;  %v14008_v38 = vrot.slane %v8659_v45, 5 }
 0x1d3   : > { %6463 = vtanh.f32 %v912_v29  ;;  %v813_v41 = vmul.f32 0.044715, %v763_v39  ;;  %v1779_v7 = vshrl.u32 %v1778_v18, 3 }
 0x1d4   : > { %v8869_v2 = vadd.f32 %v4076_v36, %v3972_v6  ;;  %v8876_v22 = vsel %vm13533_vm3, %v14008_v38, %v13453_v51  ;;  %v1787_v3 = vand.u32 65535, %v8864_v1  ;;  %v1788_v21 = vshrl.u32 %v8864_v1, 16 }
 0x1d5   : > { %14009 = vst [vmem:[#allocation48_spill] sm:$0xff] %v8876_v22  ;;  %v714_v54 = vmul.f32 %v8867_v24, %v8867_v24  ;;  %v8883_v6 = vadd.f32 %v583_v20, %v13998_v25  ;;  %v863_v36 = vadd.f32 %v813_v41, %v8811_v44  ;;  %v1780_v20 = vmul.u32 14, %v1779_v7 }
 0x1d6   : > { %14007 = vst [vmem:[#allocation5_spill] sm:$0xff] %v8869_v2  ;;  %v1790_v62 = vmul.u32 9362, %v1787_v3  ;;  %v1791_v45 = vmul.u32 37449, %v1787_v3  ;;  %v1792_v32 = vmul.u32 9362, %v1788_v21  ;;  %v1793_v51 = vmul.u32 37449, %v1788_v21 }
 0x1d7   : > { %v764_v38 = vmul.f32 %v714_v54, %v8867_v24  ;;  %v715_v29 = vmul.f32 %v8883_v6, %v8883_v6  ;;  %v913_v39 = vmul.f32 0.7978846, %v863_v36 }
 0x1d8   : > { %v1794_v42 = vshll.u32 %v1791_v45, 16  ;;  %v1796_v18 = vshll.u32 %v1792_v32, 16  ;;  %v1795_v36 = vshrl.u32 %v1791_v45, 16 }
 0x1d9   : > { %v6464_v13 = vpop.eup %6463  ;;  %v814_v22 = vmul.f32 0.044715, %v764_v38  ;;  %v765_v16 = vmul.f32 %v715_v29, %v8883_v6  ;;  %6465 = vtanh.f32 %v913_v39  ;;  %v1797_v39 = vshrl.u32 %v1792_v32, 16 }
 0x1da   : > { %v1012_v2 = vadd.f32 1.0, %v6464_v13  ;;  %vm1798_vm2 = vc.u32 %v1790_v62, %v1794_v42  ;;  %v1800_v41 = vadd.s32 %v1794_v42, %v1790_v62  ;;  %v2505_v42 = vsel %vm13534_vm9, %v8706_v9, 0.0  ;;  %v14010_v13 = vld [vmem:[#allocation25_spill] sm:$0xff] }
 0x1db   : > { %v1799_v3 = vsel %vm1798_vm2, 1, %v13790_v28  ;;  %v864_v54 = vadd.f32 %v814_v22, %v8867_v24  ;;  %v815_v26 = vmul.f32 0.044715, %v765_v16  ;;  %v1781_v7 = vsub.s32 %v14010_v13, %v1780_v20 }
 0x1dc   : > { %v1062_v8 = vmul.f32 0.5, %v1012_v2  ;;  %v1801_v43 = vadd.s32 %v1799_v3, %v1793_v51  ;;  %vm1802_vm13 = vc.u32 %v1800_v41, %v1796_v18  ;;  %v1804_v21 = vadd.s32 %v1800_v41, %v1796_v18 }
 0x1dd   : > { %v1803_v4 = vsel %vm1802_vm13, 1, %v13790_v28  ;;  %v914_v38 = vmul.f32 0.7978846, %v864_v54  ;;  %v865_v29 = vadd.f32 %v815_v26, %v8883_v6  ;;  %v2557_v45 = vmul.f32 %v6998_v58, %v2505_v42  ;;  %v5618_v54 = vld [vmem:[%s13286_s6 + $0x78] sm:$0xff] }
 0x1de   : > { %v8899_v62 = vmul.f32 %v1062_v8, %v8507_v49  ;;  %v1805_v16 = vadd.s32 %v1803_v4, %v1801_v43  ;;  %vm1808_vm7 = vc.u32 %v1804_v21, 2454267026  ;;  %vm2242_vm2 = vcmp.ne.s32.totalorder %v1781_v7, 0  ;;  %v5634_v21 = vld [vmem:[%s13286_s6 + $0xf8] sm:$0xff]  ;;  %5636 = vmatpush.msrb.mxu0 %v5618_v54 }
 0x1df   : > { %v915_v51 = vmul.f32 0.7978846, %v865_v29  ;;  %v6466_v22 = vpop.eup %6465  ;;  %6467 = vtanh.f32 %v914_v38  ;;  %vm2267_vm13 = vcmp.lt.s32.totalorder %v1781_v7, 0  ;;  %v2317_v26 = vadd.s32 14, %v1781_v7  ;;  %5656 = vmatpush.msrb.mxu1 %v5634_v21 }
 0x1e0   : > { %v13467_v2 = vrot.slane %v8899_v62, 1  ;;  %v1806_v18 = vadd.s32 %v1805_v16, %v1795_v36  ;;  %v14011_v20 = vrot.slane %v8675_v48, 1  ;;  %v1809_v4 = vsel %vm1808_vm7, 1, %v13790_v28  ;;  %vm2292_vm7 = vmand %vm2267_vm13, %vm2242_vm2 }
 0x1e1   : > { %v1013_v48 = vadd.f32 1.0, %v6466_v22  ;;  %6469 = vtanh.f32 %v915_v51  ;;  %v14012_v38 = vrot.slane %v8706_v9, 2  ;;  %v14013_v42 = vrot.slane %v8706_v9, 6 }
 0x1e2   : > { %v8908_v8 = vsel %vm13593_vm5, %v14011_v20, %v13467_v2  ;;  %v1807_v16 = vadd.s32 %v1806_v18, %v1797_v39  ;;  %v14016_v54 = vrot.slane %v8710_v47, 1 }
 0x1e3   : > { %v8912_v43 = vmul.f32 %v7001_v59, %v8908_v8  ;;  %v13463_v49 = vrot.slane %v8908_v8, 2  ;;  %v13462_v32 = vrot.slane %v8908_v8, 6  ;;  %v8919_v41 = vmul.f32 %v13927_v27, %v8908_v8 }
 0x1e4   : > { %v13464_v3 = vrot.slane %v8908_v8, 4  ;;  %v8973_v47 = vmul.f32 %v13864_v34, %v8908_v8 }
 0x1e5   : > { %v13466_v36 = vrot.slane %v8912_v43, 1  ;;  %v3113_v29 = vsel %vm13590_vm6, %v14012_v38, %v13463_v49  ;;  %v8939_v13 = vsel %vm13591_vm14, %v14013_v42, %v13462_v32  ;;  %v13465_v20 = vrot.slane %v8919_v41, 7  ;;  %v6468_v18 = vpop.eup %6467 }
 0x1e6   : > { %14014 = vst [vmem:[#allocation25_spill] sm:$0xff] %v8939_v13  ;;  %v3239_v51 = vsel %vm13531_vm0, %v3113_v29, 0.0  ;;  %v3558_v22 = vsel %vm13554_vm10, %v8939_v13, 0.0  ;;  %v14015_v38 = vrot.slane %v8706_v9, 4  ;;  %v14017_v49 = vrot.slane %v8716_v57, 7 }
 0x1e7   : > { %v2785_v21 = vsel %vm13593_vm5, %v14016_v54, %v13466_v36  ;;  %v3291_v29 = vmul.f32 %v7015_v11, %v3239_v51  ;;  %v3610_v42 = vmul.f32 %v7089_v61, %v3558_v22  ;;  %14018 = vst [vmem:[#allocation49_spill] sm:$0xff] %v8973_v47  ;;  %v8975_v54 = vsel %vm2292_vm7, %v2317_v26, %v1781_v7 }
 0x1e8   : > { %v8954_v39 = vsel %vm13583_vm8, %v14015_v38, %v13464_v3  ;;  %v2911_v32 = vadd.f32 %v2785_v21, %v2557_v45  ;;  %v3841_v9 = vsel %vm13585_vm1, %v14017_v49, %v13465_v20  ;;  %v4025_v38 = vsel %vm13469_vm4, %v8908_v8, 0.0  ;;  %14019 = vst [vmem:[#allocation50_spill] sm:$0xff] %v8975_v54  ;;  %v6470_v21 = vpop.eup %6469 }
 0x1e9   : > { %v3660_v51 = vadd.f32 %v3610_v42, %v8772_v15  ;;  %v1063_v22 = vmul.f32 0.5, %v1013_v48  ;;  %v1810_v45 = vadd.s32 %v1809_v4, %v1807_v16  ;;  %v13470_v57 = vrot.slane %v8973_v47, 5 }
 0x1ea   : > { %v8978_v3 = vadd.f32 %v3291_v29, %v2911_v32  ;;  %v1014_v49 = vadd.f32 1.0, %v6468_v18  ;;  %v4077_v36 = vmul.f32 %v7092_v30, %v4025_v38  ;;  %vm13589_vm2 = vcmp.ne.s32.totalorder %v8975_v54, 0 }
 0x1eb   : > { %v3973_v20 = vadd.f32 %v3841_v9, %v3660_v51  ;;  %v8983_v2 = vmul.f32 %v1063_v22, %v8811_v44  ;;  %v1811_v13 = vshrl.u32 %v1810_v45, 3  ;;  %v14020_v15 = vrot.slane %v8766_v23, 5 }
 0x1ec   : > { %v1064_v48 = vmul.f32 0.5, %v1014_v49  ;;  %v2506_v44 = vsel %vm13589_vm2, %v8783_v53, 0.0  ;;  %v14023_v16 = vrot.slane %v8720_v35, 1  ;;  %v1015_v29 = vadd.f32 1.0, %v6470_v21 }
 0x1ed   : > { %v8991_v7 = vsel %vm13533_vm3, %v14020_v15, %v13470_v57  ;;  %v8993_v26 = vadd.f32 %v4077_v36, %v3973_v20  ;;  %v1242_v32 = vrot.slane %v8983_v2, 1  ;;  %v1812_v4 = vmul.u32 14, %v1811_v13 }
 0x1ee   : > { %14021 = vst [vmem:[#allocation51_spill] sm:$0xff] %v8991_v7  ;;  %v9016_v35 = vmul.f32 %v1064_v48, %v8867_v24  ;;  %v14027_v38 = vrot.slane %v8783_v53, 6  ;;  %v2558_v24 = vmul.f32 %v13991_v63, %v2506_v44  ;;  %v1065_v21 = vmul.f32 0.5, %v1015_v29 }
 0x1ef   : > { %14022 = vst [vmem:[#allocation52_spill] sm:$0xff] %v8993_v26  ;;  %v9002_v18 = vsel %vm13593_vm5, %v14023_v16, %v1242_v32  ;;  %v1813_v23 = vsub.s32 %v8864_v1, %v1812_v4  ;;  %v14026_v1 = vrot.slane %v8783_v53, 2  ;;  %v14029_v49 = vrot.slane %v8792_v40, 1 }
 0x1f0   : > { %14024 = vst [vmem:[#allocation53_spill] sm:$0xff] %v9002_v18  ;;  %v9007_v36 = vmul.f32 %v6941_v12, %v9002_v18  ;;  %v13476_v2 = vrot.slane %v9002_v18, 2  ;;  %v13472_v13 = vrot.slane %v9002_v18, 6  ;;  %v9013_v20 = vmul.f32 %v6990_v50, %v9002_v18 }
 0x1f1   : > { %vm2243_vm13 = vcmp.ne.s32.totalorder %v1813_v23, 0  ;;  %vm2268_vm7 = vcmp.lt.s32.totalorder %v1813_v23, 0  ;;  %v14031_v44 = vrot.slane %v8802_v37, 7  ;;  %v4026_v29 = vsel %vm13531_vm0, %v9002_v18, 0.0 }
 0x1f2   : > { %14025 = vst [vmem:[#allocation54_spill] sm:$0xff] %v9013_v20  ;;  %v13474_v42 = vrot.slane %v9007_v36, 1  ;;  %v9024_v9 = vsel %vm13590_vm6, %v14026_v1, %v13476_v2  ;;  %v9031_v51 = vsel %vm13591_vm14, %v14027_v38, %v13472_v13  ;;  %v13471_v22 = vrot.slane %v9013_v20, 7  ;;  %vm2293_vm4 = vmand %vm2268_vm7, %vm2243_vm13 }
 0x1f3   : > { %14028 = vst [vmem:[#allocation55_spill] sm:$0xff] %v9031_v51  ;;  %v3559_v45 = vsel %vm13534_vm9, %v9031_v51, 0.0  ;;  %v4203_v1 = vrot.slane %v9002_v18, 4  ;;  %v2318_v38 = vadd.s32 14, %v1813_v23  ;;  %v9063_v37 = vmul.f32 %v1065_v21, %v8883_v6 }
 0x1f4   : > { %v2787_v15 = vsel %vm13593_vm5, %v14029_v49, %v13474_v42  ;;  %v3611_v4 = vmul.f32 %v7086_v31, %v3559_v45  ;;  %v3843_v16 = vsel %vm13585_vm1, %v14031_v44, %v13471_v22  ;;  %v13473_v49 = vrot.slane %v9016_v35, 1 }
 0x1f5   : > { %v9044_v48 = vadd.f32 %v2787_v15, %v2558_v24  ;;  %v14032_v24 = vrot.slane %v8783_v53, 4  ;;  %v656_v15 = vpop.f32.mrf.mxu1  ;;  %v4078_v57 = vmul.f32 %v13842_v17, %v4026_v29  ;;  %v14033_v22 = vrot.slane %v8899_v62, 1  ;;  %v586_v29 = vpop.f32.mrf.mxu0 }
 0x1f6   : > { %v3661_v40 = vadd.f32 %v3611_v4, %v8848_v52  ;;  %v2507_v53 = vsel %vm13589_vm2, %v8908_v8, 0.0  ;;  %v9082_v4 = vsel %vm2293_vm4, %v2318_v38, %v1813_v23  ;;  %v14042_v2 = vrot.slane %v8908_v8, 4 }
 0x1f7   : > { %14030 = vst [vmem:[#allocation56_spill] sm:$0xff] %v9044_v48  ;;  %v9060_v45 = vsel %vm13583_vm8, %v14032_v24, %v4203_v1  ;;  %v9071_v52 = vsel %vm13593_vm5, %v14033_v22, %v13473_v49  ;;  %v14038_v24 = vrot.slane %v8908_v8, 2  ;;  %v2559_v38 = vmul.f32 %v6998_v58, %v2507_v53 }
 0x1f8   : > { %v3974_v44 = vadd.f32 %v3843_v16, %v3661_v40  ;;  %14034 = vst [vmem:[#allocation57_spill] sm:$0xff] %v9071_v52  ;;  %v9079_v6 = vmul.f32 %v7001_v59, %v9071_v52  ;;  %v13475_v21 = vrot.slane %v9071_v52, 2  ;;  %v13477_v62 = vrot.slane %v9071_v52, 6 }
 0x1f9   : > { %1375 = vst [vmem:[#allocation2 + $0x140] sm:$0xff] %v9071_v52  ;;  %v9089_v22 = vmul.f32 %v13927_v27, %v9071_v52  ;;  %v13481_v23 = vrot.slane %v9071_v52, 4  ;;  %vm13588_vm4 = vcmp.ne.s32.totalorder %v9082_v4, 0  ;;  %vm13563_vm3 = vcmp.ne.s32.totalorder %v9082_v4, 13 }
 0x1fa   : > { %14035 = vst [vmem:[#allocation58_spill] sm:$0xff] %v9082_v4  ;;  %v9084_v16 = vadd.f32 %v4078_v57, %v3974_v44  ;;  %v13478_v40 = vrot.slane %v9079_v6, 1  ;;  %v9097_v13 = vsel %vm13590_vm6, %v14038_v24, %v13475_v21  ;;  %v14039_v44 = vrot.slane %v8908_v8, 6 }
 0x1fb   : > { %14037 = vst [vmem:[#allocation60_spill] sm:$0xff] %v9089_v22  ;;  %v13480_v42 = vrot.slane %v9089_v22, 7  ;;  %v14041_v24 = vrot.slane %v8912_v43, 1  ;;  %v14044_v43 = vrot.slane %v8919_v41, 7 }
 0x1fc   : > { %14036 = vst [vmem:[#allocation59_spill] sm:$0xff] %v9084_v16  ;;  %v9107_v49 = vsel %vm13591_vm14, %v14039_v44, %v13477_v62  ;;  %v9124_v44 = vsel %vm13583_vm8, %v14042_v2, %v13481_v23  ;;  %v2508_v2 = vsel %vm13588_vm4, %v9002_v18, 0.0  ;;  %v9157_v23 = vadd.f32 %v656_v15, %v14006_v46 }
 0x1fd   : > { %14040 = vst [vmem:[#allocation61_spill] sm:$0xff] %v9107_v49  ;;  %v2789_v21 = vsel %vm13593_vm5, %v14041_v24, %v13478_v40  ;;  %v3560_v53 = vsel %vm13534_vm9, %v9107_v49, 0.0  ;;  %v3845_v24 = vsel %vm13585_vm1, %v14044_v43, %v13480_v42  ;;  %v4027_v40 = vsel %vm13531_vm0, %v9071_v52, 0.0  ;;  %v659_v43 = vpop.f32.mrf.mxu1 }
 0x1fe   : > { %v9126_v62 = vadd.f32 %v2789_v21, %v2559_v38  ;;  %v3612_v57 = vmul.f32 %v7089_v61, %v3560_v53  ;;  %v14045_v49 = vrot.slane %v9063_v37, 1  ;;  %v9147_v38 = vadd.s32 96, %v14005_v19 }
 0x1ff   : > { %v14049_v15 = vrot.slane %v9007_v36, 1 }
 0x200   : > { %14043 = vst [vmem:[#allocation62_spill] sm:$0xff] %v9126_v62  ;;  %v9140_v8 = vsel %vm13593_vm5, %v1242_v32, %v14045_v49  ;;  %v3662_v21 = vadd.f32 %v3612_v57, %v8978_v3  ;;  %v4079_v32 = vmul.f32 %v7092_v30, %v4027_v40  ;;  %v2560_v3 = vmul.f32 %v13991_v63, %v2508_v2  ;;  %v588_v2 = vpop.f32.mrf.mxu0 }
 0x201   : > { %14046 = vst [vmem:[#allocation63_spill] sm:$0xff] %v9140_v8  ;;  %v9151_v41 = vmul.f32 %v6941_v12, %v9140_v8  ;;  %v13483_v53 = vrot.slane %v9140_v8, 2  ;;  %v14047_v57 = vrot.slane %v9002_v18, 2  ;;  %v13485_v47 = vrot.slane %v9140_v8, 4 }
 0x202   : > { %v3975_v42 = vadd.f32 %v3845_v24, %v3662_v21  ;;  %v1819_v40 = vand.u32 65535, %v9147_v38  ;;  %v9191_v36 = vadd.f32 %v588_v2, %v13998_v25 }
 0x203   : > { %v13484_v49 = vrot.slane %v9151_v41, 1  ;;  %v9165_v7 = vsel %vm13590_vm6, %v14047_v57, %v13483_v53  ;;  %v9181_v57 = vsel %vm13583_vm8, %v4203_v1, %v13485_v47  ;;  %v1820_v53 = vshrl.u32 %v9147_v38, 16 }
 0x204   : > { %v9168_v26 = vadd.f32 %v4079_v32, %v3975_v42  ;;  %v716_v42 = vmul.f32 %v9157_v23, %v9157_v23  ;;  %v587_v32 = vadd.f32 %v586_v29, %v13998_v25  ;;  %v719_v29 = vmul.f32 %v9191_v36, %v9191_v36 }
 0x205   : > { %v2791_v24 = vsel %vm13593_vm5, %v14049_v15, %v13484_v49  ;;  %v9198_v30 = vmul.u32 9362, %v1820_v53  ;;  %v661_v34 = vpop.f32.mrf.mxu1 }
 0x206   : > { %14048 = vst [vmem:[#allocation64_spill] sm:$0xff] %v9168_v26  ;;  %v9176_v21 = vadd.f32 %v2791_v24, %v2560_v3  ;;  %v9188_v26 = vadd.f32 %v659_v43, %v14006_v46  ;;  %v1823_v3 = vmul.u32 37449, %v1819_v40  ;;  %v766_v15 = vmul.f32 %v716_v42, %v9157_v23 }
 0x207   : > { %v717_v24 = vmul.f32 %v587_v32, %v587_v32  ;;  %v1822_v43 = vmul.u32 9362, %v1819_v40  ;;  %v769_v42 = vmul.f32 %v719_v29, %v9191_v36 }
 0x208   : > { %14050 = vst [vmem:[#allocation65_spill] sm:$0xff] %v9176_v21  ;;  %v718_v1 = vmul.f32 %v9188_v26, %v9188_v26  ;;  %v816_v49 = vmul.f32 0.044715, %v766_v15  ;;  %v1826_v22 = vshll.u32 %v1823_v3, 16  ;;  %v1828_v15 = vshll.u32 %v9198_v30, 16 }
 0x209   : > { %v767_v47 = vmul.f32 %v717_v24, %v587_v32  ;;  %v819_v31 = vmul.f32 0.044715, %v769_v42  ;;  %v1825_v21 = vmul.u32 37449, %v1820_v53  ;;  %v1827_v48 = vshrl.u32 %v1823_v3, 16 }
 0x20a   : > { %v866_v2 = vadd.f32 %v816_v49, %v9157_v23  ;;  %v768_v62 = vmul.f32 %v718_v1, %v9188_v26  ;;  %vm1830_vm13 = vc.u32 %v1822_v43, %v1826_v22  ;;  %v1832_v24 = vadd.s32 %v1826_v22, %v1822_v43  ;;  %v5617_v49 = vld [vmem:[%s13286_s6 + $0x70] sm:$0xff] }
 0x20b   : > { %v817_v61 = vmul.f32 0.044715, %v767_v47  ;;  %v1831_v40 = vsel %vm1830_vm13, 1, %v13790_v28  ;;  %5637 = vmatpush.msrb.mxu0 %v5617_v49 }
 0x20c   : > { %v916_v51 = vmul.f32 0.7978846, %v866_v2  ;;  %v818_v20 = vmul.f32 0.044715, %v768_v62  ;;  %vm1834_vm7 = vc.u32 %v1832_v24, %v1828_v15  ;;  %v1833_v22 = vadd.s32 %v1831_v40, %v1825_v21  ;;  %v14052_v40 = vld [vmem:[#allocation8_spill] sm:$0xff] }
 0x20d   : > { %v867_v16 = vadd.f32 %v817_v61, %v587_v32  ;;  %v5633_v61 = vld [vmem:[%s13286_s6 + $0xf0] sm:$0xff]  ;;  %v9213_v62 = vpop.f32.mrf.mxu1  ;;  %v1835_v53 = vsel %vm1834_vm7, 1, %v13790_v28  ;;  %v1836_v27 = vadd.s32 %v1832_v24, %v1828_v15  ;;  %v1829_v15 = vshrl.u32 %v9198_v30, 16 }
 0x20e   : > { %6471 = vtanh.f32 %v916_v51  ;;  %v868_v47 = vadd.f32 %v818_v20, %v9188_v26  ;;  %5657 = vmatpush.msrb.mxu1 %v5633_v61  ;;  %v869_v51 = vadd.f32 %v819_v31, %v9191_v36  ;;  %v1837_v63 = vadd.s32 %v1835_v53, %v1833_v22  ;;  %v6639_v61 = vld [vmem:[%s13284_s4] sm:$0x3] }
 0x20f   : > { %v917_v56 = vmul.f32 0.7978846, %v867_v16  ;;  %v591_v16 = vpop.f32.mrf.mxu0  ;;  %v9222_v21 = vperm.slane %v6639_v61, 0  ;;  %vm1840_vm7 = vc.u32 %v1836_v27, 2454267026  ;;  %v14055_v22 = vrot.slane %v9016_v35, 1 }
 0x210   : > { %v918_v29 = vmul.f32 0.7978846, %v868_v47  ;;  %v919_v42 = vmul.f32 0.7978846, %v869_v51  ;;  %v1838_v24 = vadd.s32 %v1837_v63, %v1827_v48  ;;  %v14057_v63 = vld [vmem:[#allocation30_spill] sm:$0xff] }
 0x211   : > { %6473 = vtanh.f32 %v917_v56  ;;  %14051 = vst [vmem:[#allocation66_spill] sm:$0xff] %v9222_v21  ;;  %v9254_v48 = vmul.f32 %v9222_v21, %v14057_v63 }
 0x212   : > { %6475 = vtanh.f32 %v918_v29  ;;  %v1839_v63 = vadd.s32 %v1838_v24, %v1829_v15  ;;  %v14067_v15 = vrot.slane %v9063_v37, 1  ;;  %v14073_v37 = vrot.slane %v9079_v6, 1 }
 0x213   : > { %6477 = vtanh.f32 %v919_v42  ;;  %v6640_v42 = vld [vmem:[%s13283_s3 + $0x10] ss:$0 sm:$0xff] }
 0x214   : > { %v6472_v56 = vpop.eup %6471 }
 0x215   : > { %v1016_v20 = vadd.f32 1.0, %v6472_v56  ;;  %v14053_v56 = vld [vmem:[#allocation28_spill] sm:$0xff]  ;;  %v9250_v30 = vpop.f32.mrf.mxu1 }
 0x216   : > { %vm14054_vm13 = vcmp.ne.s32.totalorder %v14053_v56, 13  ;;  %14058 = vst [vmem:[#allocation28_spill] sm:$0xff] %v9254_v48 }
 0x217   : > { %v6474_v1 = vpop.eup %6473  ;;  %v1066_v43 = vmul.f32 0.5, %v1016_v20  ;;  %v4826_v47 = vsel %vm14054_vm13, %v14052_v40, 0.0  ;;  %v9248_v29 = vpop.f32.mrf.mxu0 }
 0x218   : > { %v1017_v2 = vadd.f32 1.0, %v6474_v1  ;;  %v9246_v1 = vadd.f32 %v661_v34, %v14006_v46 }
 0x219   : > { %v9217_v49 = vmul.f32 %v1066_v43, %v9157_v23  ;;  %v2509_v23 = vsel %vm13588_vm4, %v9071_v52, 0.0 }
 0x21a   : > { %v1067_v31 = vmul.f32 0.5, %v1017_v2  ;;  %v14059_v2 = vld [vmem:[#allocation26_spill] sm:$0xff]  ;;  %v2561_v61 = vmul.f32 %v6998_v58, %v2509_v23  ;;  %v14064_v23 = vrot.slane %v9071_v52, 4 }
 0x21b   : > { %v13500_v51 = vrot.slane %v9217_v49, 1  ;;  %v9264_v34 = vmul.f32 %v9222_v21, %v14059_v2  ;;  %v14062_v2 = vrot.slane %v9071_v52, 2 }
 0x21c   : > { %v9228_v3 = vmul.f32 %v1067_v31, %v587_v32  ;;  %v9243_v32 = vadd.s32 104, %v14005_v19  ;;  %v9269_v31 = vmul.f32 %v6640_v42, %v4826_v47 }
 0x21d   : > { %v9239_v53 = vsel %vm13593_vm5, %v14055_v22, %v13500_v51  ;;  %14060 = vst [vmem:[#allocation30_spill] sm:$0xff] %v9264_v34  ;;  %v6476_v22 = vpop.eup %6475  ;;  %v1841_v51 = vsel %vm1840_vm7, 1, %v13790_v28  ;;  %vm14071_vm7 = vcmp.ne.s32.totalorder %v7745_v0, 13  ;;  %v14082_v0 = vld [vmem:[#allocation15_spill] sm:$0xff] }
 0x21e   : > { %14056 = vst [vmem:[#allocation8_spill] sm:$0xff] %v9239_v53  ;;  %v9259_v35 = vmul.f32 %v7001_v59, %v9239_v53  ;;  %v13501_v43 = vrot.slane %v9239_v53, 2  ;;  %v13504_v40 = vrot.slane %v9239_v53, 4  ;;  %v6478_v47 = vpop.eup %6477  ;;  %v14066_v27 = vrot.slane %v9228_v3, 1 }
 0x21f   : > { %1377 = vst [vmem:[#allocation2 + $0x70] sm:$0xff] %v9239_v53  ;;  %v1851_v20 = vand.u32 65535, %v9243_v32 }
 0x220   : > { %14061 = vst [vmem:[#allocation26_spill] sm:$0xff] %v9269_v31  ;;  %v9281_v34 = vsel %vm13590_vm6, %v14062_v2, %v13501_v43  ;;  %v9288_v48 = vsel %vm13583_vm8, %v14064_v23, %v13504_v40  ;;  %v9295_v24 = vsel %vm13593_vm5, %v14067_v15, %v14066_v27  ;;  %v720_v2 = vmul.f32 %v9246_v1, %v9246_v1  ;;  %v14069_v43 = vld [vmem:[#allocation41_spill] sm:$0xff] }
 0x221   : > { %14063 = vst [vmem:[#allocation67_spill] sm:$0xff] %v9281_v34  ;;  %v9303_v21 = vsel %vm14054_vm13, %v14069_v43, 0.0  ;;  %v4828_v23 = vsel %vm14071_vm7, %v8629_v14, 0.0  ;;  %v14072_v40 = vrot.slane %v9259_v35, 1  ;;  %v9315_v15 = vadd.f32 %v591_v16, %v13998_v25 }
 0x222   : > { %14065 = vst [vmem:[#allocation68_spill] sm:$0xff] %v9288_v48  ;;  %v9321_v56 = vmul.f32 %v6941_v12, %v9295_v24  ;;  %v13506_v43 = vrot.slane %v9295_v24, 2  ;;  %v1018_v14 = vadd.f32 1.0, %v6476_v22  ;;  %vm13582_vm13 = vcmp.ne.s32.totalorder %v8975_v54, 13 }
 0x223   : > { %14068 = vst [vmem:[#allocation69_spill] sm:$0xff] %v9295_v24  ;;  %v2793_v27 = vsel %vm13593_vm5, %v14073_v37, %v14072_v40  ;;  %v13507_v6 = vrot.slane %v9295_v24, 4  ;;  %v1019_v40 = vadd.f32 1.0, %v6478_v47  ;;  %v9326_v37 = vmul.f32 %v6640_v42, %v4828_v23 }
 0x224   : > { %14070 = vst [vmem:[#allocation41_spill] sm:$0xff] %v9303_v21  ;;  %v9317_v48 = vadd.f32 %v2793_v27, %v2561_v61  ;;  %v1842_v21 = vadd.s32 %v1841_v51, %v1839_v63  ;;  %v9328_v52 = vmul.u32 37449, %v1851_v20  ;;  %v13508_v16 = vrot.slane %v9321_v56, 1  ;;  %v9332_v27 = vpop.f32.mrf.mxu0 }
 0x225   : > { %1378 = vst [vmem:[#allocation2 + $0x118] sm:$0xff] %v9295_v24  ;;  %v770_v61 = vmul.f32 %v720_v2, %v9246_v1  ;;  %v9339_v22 = vsel %vm14071_vm7, %v8733_v33, 0.0  ;;  %v14078_v51 = vrot.slane %v9140_v8, 2  ;;  %v14080_v63 = vrot.slane %v9140_v8, 4 }
 0x226   : > { %14074 = vst [vmem:[#allocation70_spill] sm:$0xff] %v9317_v48  ;;  %v9334_v48 = vpop.f32.mrf.mxu1  ;;  %v721_v2 = vmul.f32 %v9315_v15, %v9315_v15  ;;  %v4333_v33 = vsel %vm2417_vm11, %v8856_v5, 0.0  ;;  %v3240_v23 = vsel %vm13582_vm13, %v9024_v9, 0.0  ;;  %v1069_v5 = vmul.f32 0.5, %v1019_v40 }
 0x227   : > { %14075 = vst [vmem:[#allocation71_spill] sm:$0xff] %v9321_v56  ;;  %v9346_v42 = vsel %vm13590_vm6, %v14078_v51, %v13506_v43  ;;  %v9353_v47 = vsel %vm13583_vm8, %v14080_v63, %v13507_v6  ;;  %v14083_v51 = vrot.slane %v9151_v41, 1  ;;  %v1068_v63 = vmul.f32 0.5, %v1018_v14 }
 0x228   : > { %14076 = vst [vmem:[#allocation72_spill] sm:$0xff] %v9326_v37  ;;  %v9372_v6 = vmul.f32 %v13839_v10, %v9002_v18  ;;  %v1852_v37 = vshrl.u32 %v9243_v32, 16  ;;  %v1854_v31 = vmul.u32 9362, %v1851_v20  ;;  %v9380_v41 = vmul.f32 %v13919_v60, %v4333_v33  ;;  %v5616_v20 = vld [vmem:[%s13286_s6 + $0x68] sm:$0xff] }
 0x229   : > { %14077 = vst [vmem:[#allocation73_spill] sm:$0xff] %v9339_v22  ;;  %v9368_v43 = vsel %vm13593_vm5, %v14083_v51, %v13508_v16  ;;  %v1843_v22 = vshrl.u32 %v1842_v21, 3  ;;  %v9377_v9 = vmul.f32 %v1068_v63, %v9188_v26  ;;  %v14087_v51 = vld [vmem:[#allocation4_spill] sm:$0xff]  ;;  %vm14088_vm7 = vcmp.ne.s32.totalorder %v14082_v0, 13  ;;  %5638 = vmatpush.msrb.mxu0 %v5616_v20 }
 0x22a   : > { %14079 = vst [vmem:[#allocation74_spill] sm:$0xff] %v9346_v42  ;;  %v820_v42 = vmul.f32 0.044715, %v770_v61  ;;  %v9385_v14 = vsel %vm14088_vm7, %v14087_v51, 0.0  ;;  %v9388_v21 = vmul.f32 %v1069_v5, %v9191_v36  ;;  %v771_v40 = vmul.f32 %v721_v2, %v9315_v15  ;;  %v14091_v61 = vld [vmem:[#allocation9_spill] sm:$0xff] }
 0x22b   : > { %14081 = vst [vmem:[#allocation75_spill] sm:$0xff] %v9353_v47  ;;  %v1858_v47 = vshll.u32 %v9328_v52, 16  ;;  %v9397_v26 = vsel %vm2417_vm11, %v8954_v39, 0.0  ;;  %v9400_v33 = vmul.f32 %v14091_v61, %v3240_v23  ;;  %v4335_v51 = vsel %vm2418_vm12, %v9060_v45, 0.0 }
 0x22c   : > { %14084 = vst [vmem:[#allocation76_spill] sm:$0xff] %v9368_v43  ;;  %v13512_v36 = vrot.slane %v9377_v9, 1  ;;  %v3241_v2 = vsel %vm13582_vm13, %v9097_v13, 0.0  ;;  %v1844_v16 = vmul.u32 14, %v1843_v22  ;;  %v9410_v0 = vmul.u32 9362, %v1852_v37 }
 0x22d   : > { %14085 = vst [vmem:[#allocation77_spill] sm:$0xff] %v9372_v6  ;;  %vm9412_vm11 = vc.u32 %v1854_v31, %v1858_v47  ;;  %v14096_v45 = vrot.slane %v9217_v49, 1  ;;  %v870_v5 = vadd.f32 %v820_v42, %v9246_v1  ;;  %v821_v6 = vmul.f32 0.044715, %v771_v40 }
 0x22e   : > { %14086 = vst [vmem:[#allocation78_spill] sm:$0xff] %v9380_v41  ;;  %v9425_v13 = vpop.f32.mrf.mxu1  ;;  %v9435_v49 = vadd.f32 %v9213_v62, %v14006_v46  ;;  %v9439_v42 = vadd.s32 112, %v14005_v19  ;;  %v9443_v20 = vadd.f32 %v9248_v29, %v13998_v25  ;;  %v1860_v41 = vshll.u32 %v9410_v0, 16 }
 0x22f   : > { %14089 = vst [vmem:[#allocation4_spill] sm:$0xff] %v9385_v14  ;;  %v9421_v23 = vsel %vm13593_vm5, %v14096_v45, %v13512_v36  ;;  %v1857_v45 = vmul.u32 37449, %v1852_v37  ;;  %v1863_v40 = vsel %vm9412_vm11, 1, %v13790_v28  ;;  %v14100_v37 = vrot.slane %v9239_v53, 2 }
 0x230   : > { %14090 = vst [vmem:[#allocation79_spill] sm:$0xff] %v9397_v26  ;;  %v598_v26 = vpop.f32.mrf.mxu0  ;;  %v9430_v22 = vmul.f32 %v7001_v59, %v9421_v23  ;;  %v14099_v62 = vrot.slane %v9421_v23, 2  ;;  %v1864_v18 = vadd.s32 %v1858_v47, %v1854_v31  ;;  %v14103_v29 = vrot.slane %v9239_v53, 4 }
 0x231   : > { %14092 = vst [vmem:[#allocation9_spill] sm:$0xff] %v9400_v33  ;;  %v14102_v33 = vrot.slane %v9421_v23, 4  ;;  %v14105_v39 = vrot.slane %v9388_v21, 1  ;;  %v14106_v56 = vrot.slane %v9228_v3, 1  ;;  %v920_v59 = vmul.f32 0.7978846, %v870_v5 }
 0x232   : > { %14097 = vst [vmem:[#allocation80_spill] sm:$0xff] %v9421_v23  ;;  %v9455_v36 = vsel %vm13590_vm6, %v14100_v37, %v14099_v62  ;;  %v14108_v12 = vrot.slane %v9430_v22, 1  ;;  %v14109_v62 = vrot.slane %v9259_v35, 1  ;;  %v722_v37 = vmul.f32 %v9435_v49, %v9435_v49  ;;  %v5632_v35 = vld [vmem:[%s13286_s6 + $0xe8] sm:$0xff] }
 0x233   : > { %1379 = vst [vmem:[#allocation2 + $0x28] sm:$0xff] %v9421_v23  ;;  %v9462_v43 = vsel %vm13583_vm8, %v14103_v29, %v14102_v33  ;;  %v9469_v14 = vsel %vm13593_vm5, %v14106_v56, %v14105_v39  ;;  %v871_v33 = vadd.f32 %v821_v6, %v9315_v15  ;;  %v9483_v3 = vmul.f32 %v13919_v60, %v4335_v51 }
 0x234   : > { %14098 = vst [vmem:[#allocation81_spill] sm:$0xff] %v9430_v22  ;;  %v9476_v31 = vsel %vm13593_vm5, %v14109_v62, %v14108_v12  ;;  %v13520_v47 = vrot.slane %v9469_v14, 2  ;;  %v9486_v56 = vmul.f32 %v7015_v11, %v3241_v2  ;;  %v723_v12 = vmul.f32 %v9443_v20, %v9443_v20  ;;  %5658 = vmatpush.msrb.mxu1 %v5632_v35 }
 0x235   : > { %14101 = vst [vmem:[#allocation82_spill] sm:$0xff] %v9455_v36  ;;  %v9495_v5 = vadd.f32 %v9250_v30, %v14006_v46  ;;  %v9498_v6 = vsub.s32 %v9147_v38, %v1844_v16  ;;  %v1883_v29 = vand.u32 65535, %v9439_v42  ;;  %v14113_v2 = vrot.slane %v9295_v24, 2 }
 0x236   : > { %14104 = vst [vmem:[#allocation83_spill] sm:$0xff] %v9462_v43  ;;  %v1865_v43 = vadd.s32 %v1863_v40, %v1857_v45  ;;  %vm1866_vm7 = vc.u32 %v1864_v18, %v1860_v41  ;;  %v1884_v30 = vshrl.u32 %v9439_v42, 16  ;;  %v9511_v16 = vpop.f32.mrf.mxu1  ;;  %6479 = vtanh.f32 %v920_v59  ;;  %v5615_v45 = vld [vmem:[%s13286_s6 + $0x60] sm:$0xff] }
 0x237   : > { %14107 = vst [vmem:[#allocation84_spill] sm:$0xff] %v9469_v14  ;;  %v9507_v39 = vsel %vm13590_vm6, %v14113_v2, %v13520_v47  ;;  %v9513_v51 = vmul.u32 9362, %v1883_v29  ;;  %v921_v36 = vmul.f32 0.7978846, %v871_v33  ;;  %v772_v22 = vmul.f32 %v722_v37, %v9435_v49  ;;  %v5631_v40 = vld [vmem:[%s13286_s6 + $0xe0] sm:$0xff]  ;;  %5639 = vmatpush.msrb.mxu0 %v5615_v45 }
 0x238   : > { %14110 = vst [vmem:[#allocation85_spill] sm:$0xff] %v9476_v31  ;;  %v601_v38 = vpop.f32.mrf.mxu0  ;;  %v9516_v31 = vadd.s32 %v1864_v18, %v1860_v41  ;;  %v773_v2 = vmul.f32 %v723_v12, %v9443_v20  ;;  %v724_v35 = vmul.f32 %v9495_v5, %v9495_v5  ;;  %v9529_v59 = vadd.f32 %v9332_v27, %v13998_v25 }
 0x239   : > { %14111 = vst [vmem:[#allocation86_spill] sm:$0xff] %v9483_v3  ;;  %v1867_v18 = vsel %vm1866_vm7, 1, %v13790_v28  ;;  %6481 = vtanh.f32 %v921_v36  ;;  %v822_v41 = vmul.f32 0.044715, %v772_v22  ;;  %5659 = vmatpush.msrb.mxu1 %v5631_v40  ;;  %v9534_v33 = vadd.f32 %v9334_v48, %v14006_v46 }
 0x23a   : > { %14112 = vst [vmem:[#allocation87_spill] sm:$0xff] %v9486_v56  ;;  %v9536_v37 = vmul.u32 37449, %v1883_v29  ;;  %v823_v12 = vmul.f32 0.044715, %v773_v2  ;;  %v774_v47 = vmul.f32 %v724_v35, %v9495_v5  ;;  %v725_v62 = vmul.f32 %v9529_v59, %v9529_v59 }
 0x23b   : > { %14114 = vst [vmem:[#allocation88_spill] sm:$0xff] %v9507_v39  ;;  %v9541_v27 = vmul.u32 9362, %v1884_v30  ;;  %v872_v56 = vadd.f32 %v822_v41, %v9435_v49  ;;  %v726_v36 = vmul.f32 %v9534_v33, %v9534_v33  ;;  %v9547_v22 = vadd.f32 %v598_v26, %v13998_v25 }
 0x23c   : > { %v873_v48 = vadd.f32 %v823_v12, %v9443_v20  ;;  %v824_v29 = vmul.f32 0.044715, %v774_v47  ;;  %v775_v2 = vmul.f32 %v725_v62, %v9529_v59  ;;  %v9553_v35 = vadd.f32 %v9425_v13, %v14006_v46  ;;  %v6480_v45 = vpop.eup %6479 }
 0x23d   : > { %v9555_v40 = vmul.u32 37449, %v1884_v30  ;;  %v922_v3 = vmul.f32 0.7978846, %v872_v56  ;;  %v776_v41 = vmul.f32 %v726_v36, %v9534_v33  ;;  %v727_v60 = vmul.f32 %v9547_v22, %v9547_v22 }
 0x23e   : > { %v1020_v26 = vadd.f32 1.0, %v6480_v45  ;;  %v923_v39 = vmul.f32 0.7978846, %v873_v48  ;;  %v874_v12 = vadd.f32 %v824_v29, %v9495_v5  ;;  %v825_v47 = vmul.f32 0.044715, %v775_v2  ;;  %v9563_v62 = vpop.f32.mrf.mxu1 }
 0x23f   : > { %v6482_v13 = vpop.eup %6481  ;;  %6483 = vtanh.f32 %v922_v3  ;;  %v826_v11 = vmul.f32 0.044715, %v776_v41  ;;  %v777_v30 = vmul.f32 %v727_v60, %v9547_v22  ;;  %v728_v56 = vmul.f32 %v9553_v35, %v9553_v35 }
 0x240   : > { %v9561_v14 = vpop.f32.mrf.mxu0  ;;  %v1869_v36 = vadd.s32 %v1867_v18, %v1865_v43  ;;  %v1070_v24 = vmul.f32 0.5, %v1020_v26  ;;  %v1021_v34 = vadd.f32 1.0, %v6482_v13  ;;  %v924_v45 = vmul.f32 0.7978846, %v874_v12 }
 0x241   : > { %v1890_v48 = vshll.u32 %v9536_v37, 16  ;;  %v875_v29 = vadd.f32 %v825_v47, %v9529_v59  ;;  %v876_v2 = vadd.f32 %v826_v11, %v9534_v33  ;;  %v827_v19 = vmul.f32 0.044715, %v777_v30 }
 0x242   : > { %v9572_v58 = vmul.f32 %v1070_v24, %v9246_v1  ;;  %v1071_v3 = vmul.f32 0.5, %v1021_v34  ;;  %6485 = vtanh.f32 %v923_v39  ;;  %v778_v60 = vmul.f32 %v728_v56, %v9553_v35  ;;  %v5614_v1 = vld [vmem:[%s13286_s6 + $0x58] sm:$0xff] }
 0x243   : > { %6487 = vtanh.f32 %v924_v45  ;;  %v925_v41 = vmul.f32 0.7978846, %v875_v29  ;;  %v926_v43 = vmul.f32 0.7978846, %v876_v2  ;;  %v9576_v18 = vadd.f32 %v601_v38, %v13998_v25  ;;  %v5630_v34 = vld [vmem:[%s13286_s6 + $0xd8] sm:$0xff]  ;;  %5640 = vmatpush.msrb.mxu0 %v5614_v1 }
 0x244   : > { %vm1872_vm11 = vc.u32 %v9516_v31, 2454267026  ;;  %v13537_v26 = vshll.u32 %v9541_v27, 16  ;;  %v13535_v11 = vrot.slane %v9572_v58, 1  ;;  %v9582_v12 = vmul.f32 %v1071_v3, %v9315_v15  ;;  %5660 = vmatpush.msrb.mxu1 %v5630_v34 }
 0x245   : > { %v6484_v24 = vpop.eup %6483  ;;  %vm9591_vm7 = vc.u32 %v9513_v51, %v1890_v48  ;;  %v1896_v38 = vadd.s32 %v1890_v48, %v9513_v51  ;;  %6489 = vtanh.f32 %v925_v41  ;;  %v877_v15 = vadd.f32 %v827_v19, %v9547_v22 }
 0x246   : > { %v14117_v47 = vrot.slane %v9377_v9, 1  ;;  %v13538_v30 = vrot.slane %v9582_v12, 1  ;;  %6491 = vtanh.f32 %v926_v43  ;;  %v828_v56 = vmul.f32 0.044715, %v778_v60  ;;  %v9607_v29 = vpop.f32.mrf.mxu1 }
 0x247   : > { %v14119_v51 = vshrl.u32 %v9328_v52, 16  ;;  %v1022_v2 = vadd.f32 1.0, %v6484_v24  ;;  %v729_v9 = vmul.f32 %v9576_v18, %v9576_v18  ;;  %vm2244_vm0 = vcmp.ne.s32.totalorder %v9498_v6, 0 }
 0x248   : > { %v9602_v13 = vsel %vm13593_vm5, %v14117_v47, %v13535_v11  ;;  %v9605_v45 = vpop.f32.mrf.mxu0  ;;  %v6486_v3 = vpop.eup %6485  ;;  %vm2269_vm15 = vcmp.lt.s32.totalorder %v9498_v6, 0  ;;  %v9619_v60 = vmul.f32 %v6990_v50, %v9140_v8  ;;  %v1895_v52 = vsel %vm9591_vm7, 1, %v13790_v28 }
 0x249   : > { %14118 = vst [vmem:[#allocation89_spill] sm:$0xff] %v9602_v13  ;;  %v1870_v19 = vadd.s32 %v1869_v36, %v14119_v51  ;;  %v13536_v48 = vrot.slane %v9602_v13, 2  ;;  %v6488_v36 = vpop.eup %6487  ;;  %vm1898_vm9 = vc.u32 %v1896_v38, %v13537_v26  ;;  %v14121_v41 = vrot.slane %v9421_v23, 2 }
 0x24a   : > { %1381 = vst [vmem:[#allocation2 + $0x148] sm:$0xff] %v9602_v13  ;;  %v14123_v1 = vrot.slane %v9388_v21, 1  ;;  %v927_v24 = vmul.f32 0.7978846, %v877_v15  ;;  %v2319_v39 = vadd.s32 14, %v9498_v6  ;;  %v1873_v47 = vsel %vm1872_vm11, 1, %v13790_v28 }
 0x24b   : > { %14120 = vst [vmem:[#allocation90_spill] sm:$0xff] %v9619_v60  ;;  %v9632_v43 = vsel %vm13590_vm6, %v14121_v41, %v13536_v48  ;;  %v1891_v51 = vshrl.u32 %v9536_v37, 16  ;;  %v878_v11 = vadd.f32 %v828_v56, %v9553_v35  ;;  %v6490_v41 = vpop.eup %6489  ;;  %v14124_v48 = vshrl.u32 %v9410_v0, 16 }
 0x24c   : > { %14122 = vst [vmem:[#allocation91_spill] sm:$0xff] %v9632_v43  ;;  %v1259_v34 = vsel %vm13593_vm5, %v14123_v1, %v13538_v30  ;;  %v1897_v21 = vadd.s32 %v1895_v52, %v9555_v40  ;;  %v1072_v43 = vmul.f32 0.5, %v1022_v2  ;;  %v779_v15 = vmul.f32 %v729_v9, %v9576_v18  ;;  %v6492_v1 = vpop.eup %6491 }
 0x24d   : > { %1382 = vst [vmem:[#allocation2 + $0x170] sm:$0xff] %v1259_v34  ;;  %v1871_v26 = vadd.s32 %v1870_v19, %v14124_v48  ;;  %v1899_v30 = vsel %vm1898_vm9, 1, %v13790_v28  ;;  %v1023_v13 = vadd.f32 1.0, %v6486_v3  ;;  %v1024_v31 = vadd.f32 1.0, %v6488_v36  ;;  %vm9663_vm9 = vmand %vm2269_vm15, %vm2244_vm0 }
 0x24e   : > { %v1025_v23 = vadd.f32 1.0, %v6490_v41  ;;  %v1122_v37 = vmul.f32 %v1072_v43, %v9435_v49  ;;  %v1026_v34 = vadd.f32 1.0, %v6492_v1  ;;  %6493 = vtanh.f32 %v927_v24  ;;  %v9657_v9 = vpop.f32.mrf.mxu1  ;;  %v5613_v41 = vld [vmem:[%s13286_s6 + $0x50] sm:$0xff] }
 0x24f   : > { %v9653_v56 = vadd.f32 %v9511_v16, %v14006_v46  ;;  %v1073_v0 = vmul.f32 0.5, %v1023_v13  ;;  %v1074_v19 = vmul.f32 0.5, %v1024_v31  ;;  %v928_v48 = vmul.f32 0.7978846, %v878_v11  ;;  %5641 = vmatpush.msrb.mxu0 %v5613_v41 }
 0x250   : > { %v1075_v40 = vmul.f32 0.5, %v1025_v23  ;;  %v9655_v2 = vpop.f32.mrf.mxu0  ;;  %v1901_v3 = vadd.s32 %v1899_v30, %v1897_v21  ;;  %v1260_v52 = vrot.slane %v1122_v37, 1  ;;  %v1076_v16 = vmul.f32 0.5, %v1026_v34  ;;  %v5629_v30 = vld [vmem:[%s13286_s6 + $0xd0] sm:$0xff] }
 0x251   : > { %v829_v36 = vmul.f32 0.044715, %v779_v15  ;;  %v14127_v13 = vshll.u32 %v9541_v27, 16  ;;  %v1123_v11 = vmul.f32 %v1073_v0, %v9443_v20  ;;  %v1124_v43 = vmul.f32 %v1074_v19, %v9495_v5  ;;  %5661 = vmatpush.msrb.mxu1 %v5629_v30 }
 0x252   : > { %v9672_v24 = vmul.f32 %v1075_v40, %v9529_v59  ;;  %v1874_v21 = vadd.s32 %v1873_v47, %v1871_v26  ;;  %v14128_v15 = vrot.slane %v9572_v58, 1  ;;  %v9684_v20 = vmul.f32 %v1076_v16, %v9534_v33 }
 0x253   : > { %v1900_v23 = vadd.s32 %v1896_v38, %v14127_v13  ;;  %6495 = vtanh.f32 %v928_v48  ;;  %v9689_v5 = vsel %vm9663_vm9, %v2319_v39, %v9498_v6  ;;  %v1893_v59 = vshrl.u32 %v9541_v27, 16 }
 0x254   : > { %v1261_v38 = vsel %vm13593_vm5, %v14128_v15, %v1260_v52  ;;  %14129 = vst [vmem:[#allocation92_spill] sm:$0xff] %v9689_v5  ;;  %v879_v1 = vadd.f32 %v829_v36, %v9576_v18  ;;  %v730_v58 = vmul.f32 %v9653_v56, %v9653_v56  ;;  %v6494_v26 = vpop.eup %6493  ;;  %v1902_v47 = vadd.s32 %v1901_v3, %v1891_v51 }
 0x255   : > { %1383 = vst [vmem:[#allocation2 + $0x58] sm:$0xff] %v1261_v38  ;;  %v1262_v33 = vrot.slane %v1123_v11, 1  ;;  %v1264_v31 = vrot.slane %v1124_v43, 1  ;;  %v1266_v37 = vrot.slane %v9672_v24, 1  ;;  %v3242_v6 = vsel %vm13563_vm3, %v9165_v7, 0.0 }
 0x256   : > { %v4028_v27 = vsel %vm13582_vm13, %v9140_v8, 0.0  ;;  %vm1904_vm15 = vc.u32 %v1900_v23, 2454267026  ;;  %v1268_v39 = vrot.slane %v9684_v20, 1  ;;  %v1875_v34 = vshrl.u32 %v1874_v21, 3  ;;  %v9714_v16 = vpop.f32.mrf.mxu1  ;;  %v5612_v23 = vld [vmem:[%s13286_s6 + $0x48] sm:$0xff] }
 0x257   : > { %v14130_v0 = vrot.slane %v9582_v12, 1  ;;  %v1265_v19 = vsel %vm13593_vm5, %v1260_v52, %v1264_v31  ;;  %v1267_v40 = vsel %vm13593_vm5, %v1262_v33, %v1266_v37  ;;  %vm13587_vm0 = vcmp.ne.s32.totalorder %v9689_v5, 0  ;;  %5642 = vmatpush.msrb.mxu0 %v5612_v23 }
 0x258   : > { %v1027_v7 = vadd.f32 1.0, %v6494_v26  ;;  %v929_v48 = vmul.f32 0.7978846, %v879_v1  ;;  %v780_v49 = vmul.f32 %v730_v58, %v9653_v56  ;;  %v9712_v3 = vpop.f32.mrf.mxu0  ;;  %v9719_v52 = vsel %vm2418_vm12, %v9124_v44, 0.0  ;;  %1385 = vst [vmem:[#allocation2 + $0x130] sm:$0xff] %v1265_v19 }
 0x259   : > { %v1263_v51 = vsel %vm13593_vm5, %v14130_v0, %v1262_v33  ;;  %v6496_v12 = vpop.eup %6495  ;;  %14131 = vst [vmem:[#allocation93_spill] sm:$0xff] %v9719_v52  ;;  %v1903_v13 = vadd.s32 %v1902_v47, %v1893_v59  ;;  %v9724_v11 = vadd.f32 %v9561_v14, %v13998_v25  ;;  %v9728_v41 = vmul.f32 %v13842_v17, %v4028_v27  ;;  %v5628_v59 = vld [vmem:[%s13286_s6 + $0xc8] sm:$0xff] }
 0x25a   : > { %1384 = vst [vmem:[#allocation2 + $0x168] sm:$0xff] %v1263_v51  ;;  %v1905_v30 = vsel %vm1904_vm15, 1, %v13790_v28  ;;  %v1269_v44 = vsel %vm13593_vm5, %v1264_v31, %v1268_v39  ;;  %v9738_v21 = vsel %vm13587_vm0, %v9140_v8, 0.0  ;;  %v9741_v14 = vmul.f32 %v14091_v61, %v3242_v6  ;;  %5662 = vmatpush.msrb.mxu1 %v5628_v59 }
 0x25b   : > { %14132 = vst [vmem:[#allocation94_spill] sm:$0xff] %v9728_v41  ;;  %v9745_v15 = vmul.f32 %v13839_v10, %v9140_v8  ;;  %v1876_v38 = vmul.u32 14, %v1875_v34  ;;  %v1077_v1 = vmul.f32 0.5, %v1027_v7  ;;  %v1028_v58 = vadd.f32 1.0, %v6496_v12 }
 0x25c   : > { %1386 = vst [vmem:[#allocation2 + $0xc8] sm:$0xff] %v1267_v40  ;;  %6497 = vtanh.f32 %v929_v48  ;;  %v830_v26 = vmul.f32 0.044715, %v780_v49  ;;  %v9753_v47 = vadd.s32 %v1905_v30, %v1903_v13  ;;  %v731_v33 = vmul.f32 %v9724_v11, %v9724_v11 }
 0x25d   : > { %14133 = vst [vmem:[#allocation95_spill] sm:$0xff] %v9741_v14  ;;  %v9759_v31 = vadd.f32 %v9563_v62, %v14006_v46  ;;  %v9763_v6 = vadd.f32 %v9605_v45, %v13998_v25  ;;  %v9766_v27 = vmul.f32 %v1077_v1, %v9547_v22  ;;  %v1078_v34 = vmul.f32 0.5, %v1028_v58  ;;  %v5611_v58 = vld [vmem:[%s13286_s6 + $0x40] sm:$0xff] }
 0x25e   : > { %14134 = vst [vmem:[#allocation96_spill] sm:$0xff] %v9745_v15  ;;  %v880_v0 = vadd.f32 %v830_v26, %v9653_v56  ;;  %v9771_v51 = vadd.f32 %v9607_v29, %v14006_v46  ;;  %v781_v19 = vmul.f32 %v731_v33, %v9724_v11  ;;  %v9780_v45 = vadd.f32 %v9655_v2, %v13998_v25  ;;  %v9788_v12 = vpop.f32.mrf.mxu1 }
 0x25f   : > { %1387 = vst [vmem:[#allocation2 + $0x40] sm:$0xff] %v1269_v44  ;;  %v732_v62 = vmul.f32 %v9759_v31, %v9759_v31  ;;  %v733_v40 = vmul.f32 %v9763_v6, %v9763_v6  ;;  %v1270_v22 = vrot.slane %v9766_v27, 1  ;;  %v9784_v7 = vmul.f32 %v1078_v34, %v9553_v35  ;;  %5643 = vmatpush.msrb.mxu0 %v5611_v58 }
 0x260   : > { %v930_v48 = vmul.f32 0.7978846, %v880_v0  ;;  %v734_v29 = vmul.f32 %v9771_v51, %v9771_v51  ;;  %v613_v49 = vpop.f32.mrf.mxu0  ;;  %v831_v13 = vmul.f32 0.044715, %v781_v19  ;;  %v735_v2 = vmul.f32 %v9780_v45, %v9780_v45 }
 0x261   : > { %v782_v30 = vmul.f32 %v732_v62, %v9759_v31  ;;  %v783_v44 = vmul.f32 %v733_v40, %v9763_v6  ;;  %v1271_v35 = vsel %vm13593_vm5, %v1266_v37, %v1270_v22  ;;  %v1272_v59 = vrot.slane %v9784_v7, 1 }
 0x262   : > { %v6498_v23 = vpop.eup %6497  ;;  %6499 = vtanh.f32 %v930_v48  ;;  %v784_v1 = vmul.f32 %v734_v29, %v9771_v51  ;;  %v9803_v26 = vsub.s32 %v9243_v32, %v1876_v38  ;;  %1388 = vst [vmem:[#allocation2 + $0x1b8] sm:$0xff] %v1271_v35  ;;  %v881_v27 = vadd.f32 %v831_v13, %v9724_v11 }
 0x263   : > { %v1029_v33 = vadd.f32 1.0, %v6498_v23  ;;  %v832_v34 = vmul.f32 0.044715, %v782_v30  ;;  %v1273_v24 = vsel %vm13593_vm5, %v1268_v39, %v1272_v59  ;;  %v833_v37 = vmul.f32 0.044715, %v783_v44 }
 0x264   : > { %v834_v0 = vmul.f32 0.044715, %v784_v1  ;;  %v785_v19 = vmul.f32 %v735_v2, %v9780_v45  ;;  %v1907_v62 = vshrl.u32 %v9753_v47, 3  ;;  %1389 = vst [vmem:[#allocation2 + $0x98] sm:$0xff] %v1273_v24  ;;  %v931_v38 = vmul.f32 0.7978846, %v881_v27 }
 0x265   : > { %v1079_v32 = vmul.f32 0.5, %v1029_v33  ;;  %v882_v40 = vadd.f32 %v832_v34, %v9759_v31  ;;  %v883_v48 = vadd.f32 %v833_v37, %v9763_v6  ;;  %v9818_v20 = vadd.f32 %v9657_v9, %v14006_v46  ;;  %v5627_v2 = vld [vmem:[%s13286_s6 + $0xc0] sm:$0xff]  ;;  %v5625_v47 = vld [vmem:[%s13286_s6 + $0xb0] sm:$0xff] }
 0x266   : > { %v884_v29 = vadd.f32 %v834_v0, %v9771_v51  ;;  %v835_v13 = vmul.f32 0.044715, %v785_v19  ;;  %6501 = vtanh.f32 %v931_v38  ;;  %v9825_v44 = vadd.f32 %v9712_v3, %v13998_v25  ;;  %5663 = vmatpush.msrb.mxu1 %v5627_v2  ;;  %v9833_v33 = vpop.f32.mrf.mxu1 }
 0x267   : > { %v9821_v39 = vmul.f32 %v1079_v32, %v9576_v18  ;;  %v932_v30 = vmul.f32 0.7978846, %v882_v40  ;;  %v933_v35 = vmul.f32 0.7978846, %v883_v48  ;;  %v736_v9 = vmul.f32 %v9818_v20, %v9818_v20 }
 0x268   : > { %v6500_v23 = vpop.eup %6499  ;;  %v934_v1 = vmul.f32 0.7978846, %v884_v29  ;;  %v885_v58 = vadd.f32 %v835_v13, %v9780_v45  ;;  %v616_v18 = vpop.f32.mrf.mxu0  ;;  %v737_v34 = vmul.f32 %v9825_v44, %v9825_v44  ;;  %v9841_v0 = vadd.f32 %v9714_v16, %v14006_v46 }
 0x269   : > { %v1274_v27 = vrot.slane %v9821_v39, 1  ;;  %v1030_v3 = vadd.f32 1.0, %v6500_v23  ;;  %6503 = vtanh.f32 %v932_v30  ;;  %v786_v37 = vmul.f32 %v736_v9, %v9818_v20 }
 0x26a   : > { %6505 = vtanh.f32 %v933_v35  ;;  %v935_v24 = vmul.f32 0.7978846, %v885_v58  ;;  %v787_v38 = vmul.f32 %v737_v34, %v9825_v44  ;;  %v738_v48 = vmul.f32 %v9841_v0, %v9841_v0 }
 0x26b   : > { %v1275_v19 = vsel %vm13593_vm5, %v1270_v22, %v1274_v27  ;;  %v1080_v32 = vmul.f32 0.5, %v1030_v3  ;;  %6507 = vtanh.f32 %v934_v1  ;;  %v836_v40 = vmul.f32 0.044715, %v786_v37 }
 0x26c   : > { %1390 = vst [vmem:[#allocation2 + $0x1a0] sm:$0xff] %v1275_v19  ;;  %6509 = vtanh.f32 %v935_v24  ;;  %v9850_v29 = vadd.f32 %v613_v49, %v13998_v25  ;;  %v6502_v13 = vpop.eup %6501  ;;  %v837_v30 = vmul.f32 0.044715, %v787_v38  ;;  %v9855_v22 = vadd.f32 %v9788_v12, %v14006_v46 }
 0x26d   : > { %v1130_v16 = vmul.f32 %v1080_v32, %v9653_v56  ;;  %v9858_v2 = vadd.f32 %v616_v18, %v13998_v25  ;;  %v1031_v23 = vadd.f32 1.0, %v6502_v13  ;;  %v886_v35 = vadd.f32 %v836_v40, %v9818_v20 }
 0x26e   : > { %v788_v1 = vmul.f32 %v738_v48, %v9841_v0  ;;  %v739_v49 = vmul.f32 %v9850_v29, %v9850_v29  ;;  %v887_v56 = vadd.f32 %v837_v30, %v9825_v44  ;;  %v740_v3 = vmul.f32 %v9855_v22, %v9855_v22  ;;  %v691_v32 = vpop.f32.mrf.mxu1 }
 0x26f   : > { %v6504_v58 = vpop.eup %6503  ;;  %v1276_v9 = vrot.slane %v1130_v16, 1  ;;  %v741_v12 = vmul.f32 %v9858_v2, %v9858_v2  ;;  %v1081_v18 = vmul.f32 0.5, %v1031_v23  ;;  %v936_v24 = vmul.f32 0.7978846, %v886_v35 }
 0x270   : > { %v6506_v25 = vpop.eup %6505  ;;  %v1032_v34 = vadd.f32 1.0, %v6504_v58  ;;  %v838_v37 = vmul.f32 0.044715, %v788_v1  ;;  %v618_v19 = vpop.f32.mrf.mxu0  ;;  %v937_v13 = vmul.f32 0.7978846, %v887_v56  ;;  %v789_v16 = vmul.f32 %v739_v49, %v9850_v29 }
 0x271   : > { %v6508_v38 = vpop.eup %6507  ;;  %v1277_v40 = vsel %vm13593_vm5, %v1272_v59, %v1276_v9  ;;  %v1033_v48 = vadd.f32 1.0, %v6506_v25  ;;  %v1131_v43 = vmul.f32 %v1081_v18, %v9724_v11  ;;  %6511 = vtanh.f32 %v936_v24  ;;  %v5610_v11 = vld [vmem:[%s13286_s6 + $0x38] sm:$0xff] }
 0x272   : > { %v6510_v30 = vpop.eup %6509  ;;  %1391 = vst [vmem:[#allocation2 + $0x1b0] sm:$0xff] %v1277_v40  ;;  %v1082_v36 = vmul.f32 0.5, %v1032_v34  ;;  %v1034_v23 = vadd.f32 1.0, %v6508_v38  ;;  %6513 = vtanh.f32 %v937_v13  ;;  %v888_v58 = vadd.f32 %v838_v37, %v9841_v0  ;;  %v5626_v18 = vld [vmem:[%s13286_s6 + $0xb8] sm:$0xff]  ;;  %5644 = vmatpush.msrb.mxu0 %v5610_v11 }
 0x273   : > { %v1083_v35 = vmul.f32 0.5, %v1033_v48  ;;  %v1035_v1 = vadd.f32 1.0, %v6510_v30  ;;  %v1278_v19 = vrot.slane %v1131_v43, 1  ;;  %v839_v25 = vmul.f32 0.044715, %v789_v16  ;;  %5664 = vmatpush.msrb.mxu1 %v5626_v18 }
 0x274   : > { %v1132_v7 = vmul.f32 %v1082_v36, %v9759_v31  ;;  %v1084_v59 = vmul.f32 0.5, %v1034_v23  ;;  %v938_v32 = vmul.f32 0.7978846, %v888_v58  ;;  %v790_v40 = vmul.f32 %v740_v3, %v9855_v22 }
 0x275   : > { %v1133_v56 = vmul.f32 %v1083_v35, %v9763_v6  ;;  %v1085_v49 = vmul.f32 0.5, %v1035_v1  ;;  %v1279_v36 = vsel %vm13593_vm5, %v1274_v27, %v1278_v19  ;;  %v889_v6 = vadd.f32 %v839_v25, %v9850_v29  ;;  %5665 = vmatpush.msrb.mxu1 %v5625_v47 }
 0x276   : > { %v1280_v43 = vrot.slane %v1132_v7, 1  ;;  %v1134_v31 = vmul.f32 %v1084_v59, %v9771_v51  ;;  %1392 = vst [vmem:[#allocation2 + $0x38] sm:$0xff] %v1279_v36  ;;  %6515 = vtanh.f32 %v938_v32  ;;  %v840_v24 = vmul.f32 0.044715, %v790_v40  ;;  %v14136_v32 = vld [vmem:[#allocation7_spill] sm:$0xff] }
 0x277   : > { %v1282_v3 = vrot.slane %v1133_v56, 1  ;;  %v9890_v34 = vmul.f32 %v1085_v49, %v9780_v45  ;;  %v6512_v37 = vpop.eup %6511  ;;  %v939_v48 = vmul.f32 0.7978846, %v889_v6  ;;  %v791_v27 = vmul.f32 %v741_v12, %v9858_v2 }
 0x278   : > { %v1281_v38 = vsel %vm13593_vm5, %v1276_v9, %v1280_v43  ;;  %v1284_v39 = vrot.slane %v1134_v31, 1  ;;  %v6514_v13 = vpop.eup %6513  ;;  %v1036_v30 = vadd.f32 1.0, %v6512_v37  ;;  %v890_v23 = vadd.f32 %v840_v24, %v9855_v22 }
 0x279   : > { %1393 = vst [vmem:[#allocation2 + $0x48] sm:$0xff] %v1281_v38  ;;  %v1283_v51 = vsel %vm13593_vm5, %v1278_v19, %v1282_v3  ;;  %v1286_v16 = vrot.slane %v9890_v34, 1  ;;  %v1037_v35 = vadd.f32 1.0, %v6514_v13  ;;  %6517 = vtanh.f32 %v939_v48  ;;  %v5624_v34 = vld [vmem:[%s13286_s6 + $0xa8] sm:$0xff]  ;;  %v5623_v13 = vld [vmem:[%s13286_s6 + $0xa0] sm:$0xff] }
 0x27a   : > { %1394 = vst [vmem:[#allocation2 + $0xa0] sm:$0xff] %v1283_v51  ;;  %v1285_v45 = vsel %vm13593_vm5, %v1280_v43, %v1284_v39  ;;  %v841_v1 = vmul.f32 0.044715, %v791_v27  ;;  %v1086_v12 = vmul.f32 0.5, %v1036_v30  ;;  %v940_v58 = vmul.f32 0.7978846, %v890_v23  ;;  %5666 = vmatpush.msrb.mxu1 %v5624_v34 }
 0x27b   : > { %1395 = vst [vmem:[#allocation2 + $0x60] sm:$0xff] %v1285_v45  ;;  %v9899_v9 = vsel %vm13593_vm5, %v1282_v3, %v1286_v16  ;;  %v9903_v19 = vadd.f32 %v9833_v33, %v14006_v46  ;;  %v9908_v7 = vsel %vm13554_vm10, %v9181_v57, 0.0  ;;  %v1087_v25 = vmul.f32 0.5, %v1037_v35  ;;  %v5607_v27 = vld [vmem:[%s13286_s6 + $0x20] sm:$0xff]  ;;  %v14139_v35 = vld [vmem:[#allocation11_spill] sm:$0xff]  ;;  %v10028_v51 = vld [vmem:[#allocation2 + $0x118] sm:$0xff] }
 0x27c   : > { %14135 = vst [vmem:[#allocation97_spill] sm:$0xff] %v9908_v7  ;;  %v891_v56 = vadd.f32 %v841_v1, %v9858_v2  ;;  %v6516_v49 = vpop.eup %6515  ;;  %v9915_v40 = vmul.f32 %v14136_v32, %v9738_v21  ;;  %v1136_v46 = vmul.f32 %v1086_v12, %v9818_v20  ;;  %6519 = vtanh.f32 %v940_v58  ;;  %v5609_v20 = vld [vmem:[%s13286_s6 + $0x30] sm:$0xff]  ;;  %5667 = vmatpush.msrb.mxu1 %v5623_v13 }
 0x27d   : > { %1396 = vst [vmem:[#allocation2 + $0x88] sm:$0xff] %v9899_v9  ;;  %v742_v33 = vmul.f32 %v9903_v19, %v9903_v19  ;;  %v1908_v57 = vmul.u32 14, %v1907_v62  ;;  %v9923_v11 = vmul.f32 %v1087_v25, %v9825_v44  ;;  %v1038_v18 = vadd.f32 1.0, %v6516_v49  ;;  %v5608_v62 = vld [vmem:[%s13286_s6 + $0x28] sm:$0xff]  ;;  %5645 = vmatpush.msrb.mxu0 %v5609_v20 }
 0x27e   : > { %v941_v36 = vmul.f32 0.7978846, %v891_v56  ;;  %vm2245_vm12 = vcmp.ne.s32.totalorder %v9803_v26, 0  ;;  %vm2270_vm11 = vcmp.lt.s32.totalorder %v9803_v26, 0  ;;  %v1288_v21 = vrot.slane %v1136_v46, 1  ;;  %v14141_v25 = vld [vmem:[#allocation14_spill] sm:$0xff] }
 0x27f   : > { %v792_v43 = vmul.f32 %v742_v33, %v9903_v19  ;;  %v6518_v44 = vpop.eup %6517  ;;  %v2511_v31 = vsel %vm13587_vm0, %v9239_v53, 0.0  ;;  %v1290_v6 = vrot.slane %v9923_v11, 1  ;;  %v1088_v3 = vmul.f32 0.5, %v1038_v18  ;;  %vm9956_vm7 = vmand %vm2270_vm11, %vm2245_vm12  ;;  %5646 = vmatpush.msrb.mxu0 %v5608_v62  ;;  %v14143_v33 = vld [vmem:[#allocation3_spill] sm:$0xff]  ;;  %14148 = vst [vmem:[#allocation99_spill] sm:$0xff] %v10028_v51 }
 0x280   : > { %6521 = vtanh.f32 %v941_v36  ;;  %v2320_v24 = vadd.s32 14, %v9803_v26  ;;  %v1289_v37 = vsel %vm13593_vm5, %v1284_v39, %v1288_v21  ;;  %v1039_v38 = vadd.f32 1.0, %v6518_v44  ;;  %v14144_v18 = vld [vmem:[#allocation67_spill] sm:$0xff] }
 0x281   : > { %v842_v48 = vmul.f32 0.044715, %v792_v43  ;;  %v9961_v39 = vsub.s32 %v9439_v42, %v1908_v57  ;;  %1397 = vst [vmem:[#allocation2 + $0x190] sm:$0xff] %v1289_v37  ;;  %v9966_v30 = vsel %vm13593_vm5, %v1286_v16, %v1290_v6  ;;  %v9969_v23 = vmul.f32 %v1088_v3, %v9841_v0  ;;  %v5606_v16 = vld [vmem:[%s13286_s6 + $0x18] sm:$0xff]  ;;  %5647 = vmatpush.msrb.mxu0 %v5607_v27  ;;  %v5605_v62 = vld [vmem:[%s13286_s6 + $0x10] sm:$0xff] }
 0x282   : > { %v6520_v45 = vpop.eup %6519  ;;  %v9972_v1 = vmul.f32 %v14139_v35, %v2511_v31  ;;  %1398 = vst [vmem:[#allocation2] sm:$0xff] %v9966_v30  ;;  %v1089_v42 = vmul.f32 0.5, %v1039_v38  ;;  %v5622_v0 = vld [vmem:[%s13286_s6 + $0x98] sm:$0xff]  ;;  %v9985_v56 = vmul.f32 %v14141_v25, %v9239_v53  ;;  %v9989_v57 = vadd.s32 120, %v14143_v33  ;;  %v5621_v44 = vld [vmem:[%s13286_s6 + $0x90] sm:$0xff]  ;;  %v5604_v38 = vld [vmem:[%s13286_s6 + $0x8] sm:$0xff] }
 0x283   : > { %v892_v58 = vadd.f32 %v842_v48, %v9903_v19  ;;  %v1292_v49 = vrot.slane %v9969_v23, 1  ;;  %v1040_v46 = vadd.f32 1.0, %v6520_v45  ;;  %v3243_v36 = vsel %vm13563_vm3, %v14144_v18, 0.0  ;;  %5648 = vmatpush.msrb.mxu0 %v5606_v16  ;;  %5668 = vmatpush.msrb.mxu1 %v5622_v0  ;;  %v5619_v16 = vld [vmem:[%s13286_s6 + $0x80] sm:$0xff] }
 0x284   : > { %14140 = vst [vmem:[#allocation7_spill] sm:$0xff] %v9972_v1  ;;  %v9997_v43 = vsel %vm9956_vm7, %v2320_v24, %v9803_v26  ;;  %v10000_v20 = vmul.f32 %v1089_v42, %v9850_v29  ;;  %vm2246_vm9 = vcmp.ne.s32.totalorder %v9961_v39, 0  ;;  %vm2271_vm15 = vcmp.lt.s32.totalorder %v9961_v39, 0  ;;  %v14146_v29 = vld [vmem:[#allocation69_spill] sm:$0xff] }
 0x285   : > { %14142 = vst [vmem:[#allocation98_spill] sm:$0xff] %v9985_v56  ;;  %v942_v47 = vmul.f32 0.7978846, %v892_v58  ;;  %v1293_v26 = vsel %vm13593_vm5, %v1288_v21, %v1292_v49  ;;  %v1090_v3 = vmul.f32 0.5, %v1040_v46  ;;  %v10013_v34 = vmul.f32 %v6990_v50, %v14146_v29  ;;  %v5620_v21 = vld [vmem:[%s13286_s6 + $0x88] sm:$0xff]  ;;  %5649 = vmatpush.msrb.mxu0 %v5605_v62  ;;  %5669 = vmatpush.msrb.mxu1 %v5621_v44  ;;  %vm10038_vm11 = vmand %vm2271_vm15, %vm2246_vm9  ;;  %v5603_v58 = vld [vmem:[%s13286_s6] sm:$0xff] }
 0x286   : > { %14145 = vst [vmem:[#allocation3_spill] sm:$0xff] %v9997_v43  ;;  %v6522_v31 = vpop.eup %6521  ;;  %v1294_v24 = vrot.slane %v10000_v20, 1  ;;  %vm13586_vm12 = vcmp.ne.s32.totalorder %v9997_v43, 0  ;;  %v2321_v48 = vadd.s32 14, %v9961_v39  ;;  %v1915_v13 = vand.u32 65535, %v9989_v57  ;;  %v14152_v46 = vld [vmem:[#allocation13_spill] sm:$0xff] }
 0x287   : > { %14147 = vst [vmem:[#allocation67_spill] sm:$0xff] %v10013_v34  ;;  %v1041_v37 = vadd.f32 1.0, %v6522_v31  ;;  %6523 = vtanh.f32 %v942_v47  ;;  %v10025_v27 = vmul.f32 %v1090_v3, %v9855_v22  ;;  %v10032_v23 = vmul.f32 %v10028_v51, %v13839_v10  ;;  %5650 = vmatpush.msrb.mxu0 %v5604_v38  ;;  %5670 = vmatpush.msrb.mxu1 %v5620_v21 }
 0x288   : > { %1399 = vst [vmem:[#allocation2 + $0x160] sm:$0xff] %v1293_v26  ;;  %v1295_v22 = vsel %vm13593_vm5, %v1290_v6, %v1294_v24  ;;  %v10052_v0 = vadd.s32 128, %v14143_v33  ;;  %v10055_v18 = vmul.f32 %v14152_v46, %v3243_v36  ;;  %v4030_v11 = vsel %vm13563_vm3, %v10028_v51, 0.0 }
 0x289   : > { %14149 = vst [vmem:[#allocation100_spill] sm:$0xff] %v10032_v23  ;;  %v1091_v42 = vmul.f32 0.5, %v1041_v37  ;;  %vm13592_vm7 = vcmp.ne.s32.totalorder %v9689_v5, 13  ;;  %v1296_v6 = vrot.slane %v10025_v27, 1  ;;  %v2512_v47 = vsel %vm13586_vm12, %v10028_v51, 0.0  ;;  %5651 = vmatpush.msrb.mxu0 %v5603_v58  ;;  %5671 = vmatpush.msrb.mxu1 %v5619_v16  ;;  %v14158_v58 = vld [vmem:[#allocation84_spill] sm:$0xff] }
 0x28a   : > { %14153 = vst [vmem:[#allocation101_spill] sm:$0xff] %v10055_v18  ;;  %v10072_v31 = vsel %vm10038_vm11, %v2321_v48, %v9961_v39  ;;  %v1916_v3 = vshrl.u32 %v9989_v57, 16  ;;  %v10076_v37 = vmul.u32 37449, %v1915_v13  ;;  %v10079_v21 = vmul.f32 %v13842_v17, %v4030_v11  ;;  %v14159_v16 = vld [vmem:[#allocation6_spill] sm:$0xff] }
 0x28b   : > { %1400 = vst [vmem:[#allocation2 + $0x198] sm:$0xff] %v1295_v22  ;;  %v1141_v44 = vmul.f32 %v1091_v42, %v9858_v2  ;;  %v1297_v26 = vsel %vm13593_vm5, %v1292_v49, %v1296_v6  ;;  %v1947_v45 = vand.u32 65535, %v10052_v0  ;;  %v10084_v39 = vmul.f32 %v14136_v32, %v2512_v47  ;;  %v14156_v49 = vld [vmem:[#allocation80_spill] sm:$0xff] }
 0x28c   : > { %14154 = vst [vmem:[#allocation102_spill] sm:$0xff] %v10072_v31  ;;  %v2513_v48 = vsel %vm13586_vm12, %v14156_v49, 0.0  ;;  %v10091_v22 = vmul.f32 %v14141_v25, %v14156_v49  ;;  %vm13584_vm9 = vcmp.ne.s32.totalorder %v10072_v31, 0  ;;  %v10096_v11 = vmul.f32 %v14159_v16, %v14158_v58 }
 0x28d   : > { %v6524_v38 = vpop.eup %6523  ;;  %14155 = vst [vmem:[#allocation103_spill] sm:$0xff] %v10079_v21  ;;  %v1298_v2 = vrot.slane %v1141_v44, 1  ;;  %v10100_v47 = vadd.s32 136, %v14143_v33  ;;  %v1918_v20 = vmul.u32 9362, %v1915_v13  ;;  %v10102_v12 = vmul.u32 9362, %v1916_v3 }
 0x28e   : > { %1401 = vst [vmem:[#allocation2 + $0x1c0] sm:$0xff] %v1297_v26  ;;  %v1042_v42 = vadd.f32 1.0, %v6524_v38  ;;  %v1922_v27 = vshll.u32 %v10076_v37, 16  ;;  %v10106_v38 = vmul.f32 %v14139_v35, %v2513_v48  ;;  %v1948_v62 = vshrl.u32 %v10052_v0, 16 }
 0x28f   : > { %14157 = vst [vmem:[#allocation104_spill] sm:$0xff] %v10091_v22  ;;  %v1299_v44 = vsel %vm13593_vm5, %v1294_v24, %v1298_v2  ;;  %v10110_v36 = vmul.u32 37449, %v1947_v45  ;;  %v10116_v13 = vmul.f32 %v6990_v50, %v14158_v58  ;;  %v2514_v48 = vsel %vm13584_vm9, %v14158_v58, 0.0 }
 0x290   : > { %1404 = vst [vmem:[#allocation2 + $0x20] sm:$0x7] %v1298_v2  ;;  %v1092_v26 = vmul.f32 0.5, %v1042_v42  ;;  %v10126_v59 = vsel %vm13592_vm7, %v14158_v58, 0.0  ;;  %v10130_v24 = vmul.f32 %v13839_v10, %v14158_v58  ;;  %v1924_v2 = vshll.u32 %v10102_v12, 16 }
 0x291   : > { %1402 = vst [vmem:[#allocation2 + $0xb8] sm:$0xff] %v1299_v44  ;;  %vm10133_vm15 = vc.u32 %v1918_v20, %v1922_v27  ;;  %v1950_v44 = vmul.u32 9362, %v1947_v45  ;;  %v10138_v22 = vmul.u32 9362, %v1948_v62  ;;  %v1954_v56 = vshll.u32 %v10110_v36, 16  ;;  %v14168_v45 = vld [vmem:[#allocation12_spill] sm:$0xff] }
 0x292   : > { %14160 = vst [vmem:[#allocation6_spill] sm:$0xff] %v10106_v38  ;;  %v1142_v42 = vmul.f32 %v1092_v26, %v9903_v19  ;;  %v1928_v19 = vadd.s32 %v1922_v27, %v1918_v20  ;;  %v1979_v26 = vand.u32 65535, %v10100_v47  ;;  %v10144_v18 = vadd.s32 144, %v14143_v33  ;;  %v14167_v27 = vld [vmem:[#allocation89_spill] sm:$0xff] }
 0x293   : > { %14161 = vst [vmem:[#allocation105_spill] sm:$0xff] %v10116_v13  ;;  %v1980_v46 = vshrl.u32 %v10100_v47, 16  ;;  %v10148_v38 = vmul.f32 %v14136_v32, %v2514_v48  ;;  %v1921_v53 = vmul.u32 37449, %v1916_v3  ;;  %v1927_v55 = vsel %vm10133_vm15, 1, %v13790_v28 }
 0x294   : > { %14162 = vst [vmem:[#allocation106_spill] sm:$0xff] %v10126_v59  ;;  %v1300_v52 = vrot.slane %v1142_v42, 1  ;;  %v10153_v42 = vmul.f32 %v14168_v45, %v14167_v27  ;;  %v10160_v63 = vmul.u32 37449, %v1979_v26  ;;  %vm1930_vm11 = vc.u32 %v1928_v19, %v1924_v2 }
 0x295   : > { %14163 = vst [vmem:[#allocation107_spill] sm:$0xff] %v10130_v24  ;;  %v1956_v48 = vshll.u32 %v10138_v22, 16  ;;  %vm1958_vm10 = vc.u32 %v1950_v44, %v1954_v56  ;;  %v1960_v20 = vadd.s32 %v1954_v56, %v1950_v44  ;;  %v1982_v45 = vmul.u32 9362, %v1979_v26 }
 0x296   : > { %14166 = vst [vmem:[#allocation108_spill] sm:$0xff] %v10148_v38  ;;  %v1301_v1 = vsel %vm13593_vm5, %v1296_v6, %v1300_v52  ;;  %v10163_v24 = vmul.u32 9362, %v1980_v46  ;;  %v2011_v6 = vand.u32 65535, %v10144_v18  ;;  %v10171_v35 = vadd.s32 160, %v14143_v33 }
 0x297   : > { %14169 = vst [vmem:[#allocation109_spill] sm:$0xff] %v10153_v42  ;;  %v1953_v3 = vmul.u32 37449, %v1948_v62  ;;  %v2012_v49 = vshrl.u32 %v10144_v18, 16  ;;  %v10175_v27 = vadd.s32 168, %v14143_v33  ;;  %v1929_v56 = vadd.s32 %v1927_v55, %v1921_v53  ;;  %v14231_v42 = vld [vmem:[#allocation95_spill] sm:$0xff] }
 0x298   : > { %1405 = vst [vmem:[#allocation2 + $0x138] sm:$0x7] %v1300_v52  ;;  %v1986_v52 = vshll.u32 %v10160_v63, 16  ;;  %v1931_v44 = vsel %vm1930_vm11, 1, %v13790_v28  ;;  %v1959_v26 = vsel %vm1958_vm10, 1, %v13790_v28  ;;  %vm1962_vm15 = vc.u32 %v1960_v20, %v1956_v48 }
 0x299   : > { %1403 = vst [vmem:[#allocation2 + $0xd0] sm:$0xff] %v1301_v1  ;;  %v10168_v1 = vadd.s32 152, %v14143_v33  ;;  %v2014_v23 = vmul.u32 9362, %v2011_v6  ;;  %v10179_v15 = vmul.u32 37449, %v2011_v6  ;;  %v10181_v10 = vmul.u32 9362, %v2012_v49 }
 0x29a   : > { %v10184_v7 = vadd.s32 176, %v14143_v33  ;;  %v1988_v62 = vshll.u32 %v10163_v24, 16  ;;  %vm1990_vm3 = vc.u32 %v1982_v45, %v1986_v52  ;;  %v1992_v29 = vadd.s32 %v1986_v52, %v1982_v45 }
 0x29b   : > { %v1923_v21 = vshrl.u32 %v10076_v37, 16  ;;  %v1961_v55 = vadd.s32 %v1959_v26, %v1953_v3  ;;  %v2018_v53 = vshll.u32 %v10179_v15, 16  ;;  %v2043_v41 = vand.u32 65535, %v10168_v1 }
 0x29c   : > { %v1932_v17 = vadd.s32 %v1928_v19, %v1924_v2  ;;  %v1933_v59 = vadd.s32 %v1931_v44, %v1929_v56  ;;  %v1963_v6 = vsel %vm1962_vm15, 1, %v13790_v28  ;;  %v1985_v13 = vmul.u32 37449, %v1980_v46 }
 0x29d   : > { %v1955_v34 = vshrl.u32 %v10110_v36, 16  ;;  %v1991_v60 = vsel %vm1990_vm3, 1, %v13790_v28  ;;  %v2020_v4 = vshll.u32 %v10181_v10, 16  ;;  %vm2022_vm10 = vc.u32 %v2014_v23, %v2018_v53 }
 0x29e   : > { %v1964_v45 = vadd.s32 %v1960_v20, %v1956_v48  ;;  %vm1994_vm11 = vc.u32 %v1992_v29, %v1988_v62  ;;  %v2017_v37 = vmul.u32 37449, %v2012_v49  ;;  %v2024_v52 = vadd.s32 %v2018_v53, %v2014_v23 }
 0x29f   : > { %v1965_v3 = vadd.s32 %v1963_v6, %v1961_v55  ;;  %v2023_v26 = vsel %vm2022_vm10, 1, %v13790_v28  ;;  %v2044_v2 = vshrl.u32 %v10168_v1, 16  ;;  %v10196_v19 = vmul.u32 37449, %v2043_v41 }
 0x2a0   : > { %v1925_v46 = vshrl.u32 %v10102_v12, 16  ;;  %v1934_v56 = vadd.s32 %v1933_v59, %v1923_v21  ;;  %v1993_v36 = vadd.s32 %v1991_v60, %v1985_v13  ;;  %vm2026_vm15 = vc.u32 %v2024_v52, %v2020_v4 }
 0x2a1   : > { %v1995_v44 = vsel %vm1994_vm11, 1, %v13790_v28  ;;  %v2046_v54 = vmul.u32 9362, %v2043_v41  ;;  %v10200_v58 = vmul.u32 9362, %v2044_v2  ;;  %v2050_v49 = vshll.u32 %v10196_v19, 16 }
 0x2a2   : > { %v10204_v23 = vadd.s32 184, %v14143_v33  ;;  %v10207_v20 = vadd.s32 192, %v14143_v33  ;;  %vm1936_vm3 = vc.u32 %v1932_v17, 2454267026  ;;  %v2025_v48 = vadd.s32 %v2023_v26, %v2017_v37 }
 0x2a3   : > { %v1957_v12 = vshrl.u32 %v10138_v22, 16  ;;  %v1966_v59 = vadd.s32 %v1965_v3, %v1955_v34  ;;  %vm1968_vm10 = vc.u32 %v1964_v45, 2454267026  ;;  %v2027_v60 = vsel %vm2026_vm15, 1, %v13790_v28 }
 0x2a4   : > { %v1935_v21 = vadd.s32 %v1934_v56, %v1925_v46  ;;  %v1987_v41 = vshrl.u32 %v10160_v63, 16  ;;  %v1996_v13 = vadd.s32 %v1992_v29, %v1988_v62  ;;  %v1997_v55 = vadd.s32 %v1995_v44, %v1993_v36 }
 0x2a5   : > { %v2052_v53 = vshll.u32 %v10200_v58, 16  ;;  %vm2054_vm11 = vc.u32 %v2046_v54, %v2050_v49  ;;  %v2056_v6 = vadd.s32 %v2050_v49, %v2046_v54  ;;  %v2075_v33 = vand.u32 65535, %v10171_v35 }
 0x2a6   : > { %v1937_v17 = vsel %vm1936_vm3, 1, %v13790_v28  ;;  %v1969_v37 = vsel %vm1968_vm10, 1, %v13790_v28  ;;  %v2019_v34 = vshrl.u32 %v10179_v15, 16  ;;  %v2029_v22 = vadd.s32 %v2027_v60, %v2025_v48 }
 0x2a7   : > { %v1967_v45 = vadd.s32 %v1966_v59, %v1957_v12  ;;  %v2049_v3 = vmul.u32 37449, %v2044_v2  ;;  %v2076_v26 = vshrl.u32 %v10171_v35, 16  ;;  %v10218_v63 = vmul.u32 37449, %v2075_v33 }
 0x2a8   : > { %v1989_v29 = vshrl.u32 %v10163_v24, 16  ;;  %v1998_v62 = vadd.s32 %v1997_v55, %v1987_v41  ;;  %v2055_v54 = vsel %vm2054_vm11, 1, %v13790_v28  ;;  %v2107_v46 = vand.u32 65535, %v10175_v27 }
 0x2a9   : > { %v10223_v56 = vadd.s32 %v1937_v17, %v1935_v21  ;;  %vm2000_vm15 = vc.u32 %v1996_v13, 2454267026  ;;  %v2028_v36 = vadd.s32 %v2024_v52, %v2020_v4  ;;  %vm2058_vm3 = vc.u32 %v2056_v6, %v2052_v53 }
 0x2aa   : > { %v2021_v15 = vshrl.u32 %v10181_v10, 16  ;;  %v2030_v44 = vadd.s32 %v2029_v22, %v2019_v34  ;;  %v2078_v2 = vmul.u32 9362, %v2075_v33  ;;  %v2082_v49 = vshll.u32 %v10218_v63, 16 }
 0x2ab   : > { %v10227_v48 = vadd.s32 %v1969_v37, %v1967_v45  ;;  %v2057_v12 = vadd.s32 %v2055_v54, %v2049_v3  ;;  %v10229_v24 = vmul.u32 9362, %v2076_v26  ;;  %v2108_v59 = vshrl.u32 %v10175_v27, 16 }
 0x2ac   : > { %v1999_v60 = vadd.s32 %v1998_v62, %v1989_v29  ;;  %v2059_v21 = vsel %vm2058_vm3, 1, %v13790_v28  ;;  %v2060_v41 = vadd.s32 %v2056_v6, %v2052_v53  ;;  %v10233_v55 = vmul.u32 37449, %v2107_v46 }
 0x2ad   : > { %v2001_v10 = vsel %vm2000_vm15, 1, %v13790_v28  ;;  %vm2032_vm10 = vc.u32 %v2028_v36, 2454267026  ;;  %v2051_v52 = vshrl.u32 %v10196_v19, 16  ;;  %v2031_v33 = vadd.s32 %v2030_v44, %v2021_v15 }
 0x2ae   : > { %vm2086_vm11 = vc.u32 %v2078_v2, %v2082_v49  ;;  %v2110_v17 = vmul.u32 9362, %v2107_v46  ;;  %v10239_v37 = vmul.u32 9362, %v2108_v59  ;;  %v2061_v34 = vadd.s32 %v2059_v21, %v2057_v12 }
 0x2af   : > { %v2084_v22 = vshll.u32 %v10229_v24, 16  ;;  %v2088_v45 = vadd.s32 %v2082_v49, %v2078_v2  ;;  %v2114_v53 = vshll.u32 %v10233_v55, 16  ;;  %v10244_v3 = vadd.s32 %v2001_v10, %v1999_v60 }
 0x2b0   : > { %v2033_v13 = vsel %vm2032_vm10, 1, %v13790_v28  ;;  %vm2064_vm15 = vc.u32 %v2060_v41, 2454267026  ;;  %v2053_v19 = vshrl.u32 %v10200_v58, 16  ;;  %v2081_v29 = vmul.u32 37449, %v2076_v26 }
 0x2b1   : > { %v2087_v62 = vsel %vm2086_vm11, 1, %v13790_v28  ;;  %v2139_v54 = vand.u32 65535, %v10184_v7  ;;  %v2116_v46 = vshll.u32 %v10239_v37, 16  ;;  %vm2118_vm3 = vc.u32 %v2110_v17, %v2114_v53 }
 0x2b2   : > { %v2120_v36 = vadd.s32 %v2114_v53, %v2110_v17  ;;  %v2140_v15 = vshrl.u32 %v10184_v7, 16  ;;  %v10252_v44 = vadd.s32 %v2033_v13, %v2031_v33  ;;  %v2062_v2 = vadd.s32 %v2061_v34, %v2051_v52 }
 0x2b3   : > { %v2065_v49 = vsel %vm2064_vm15, 1, %v13790_v28  ;;  %vm2090_vm10 = vc.u32 %v2088_v45, %v2084_v22  ;;  %v2083_v12 = vshrl.u32 %v10218_v63, 16  ;;  %v2113_v58 = vmul.u32 37449, %v2108_v59 }
 0x2b4   : > { %v2142_v26 = vmul.u32 9362, %v2139_v54  ;;  %v2143_v60 = vmul.u32 37449, %v2139_v54  ;;  %v2089_v21 = vadd.s32 %v2087_v62, %v2081_v29  ;;  %v2119_v41 = vsel %vm2118_vm3, 1, %v13790_v28 }
 0x2b5   : > { %v10257_v10 = vmul.u32 9362, %v2140_v15  ;;  %v2171_v17 = vand.u32 65535, %v10204_v23  ;;  %v2091_v53 = vsel %vm2090_vm10, 1, %v13790_v28  ;;  %vm2122_vm11 = vc.u32 %v2120_v36, %v2116_v46 }
 0x2b6   : > { %v2145_v33 = vmul.u32 37449, %v2140_v15  ;;  %v2146_v52 = vshll.u32 %v2143_v60, 16  ;;  %v2063_v34 = vadd.s32 %v2062_v2, %v2053_v19  ;;  %v2085_v13 = vshrl.u32 %v10229_v24, 16 }
 0x2b7   : > { %v2092_v6 = vadd.s32 %v2088_v45, %v2084_v22  ;;  %v2148_v63 = vshll.u32 %v10257_v10, 16  ;;  %v2121_v59 = vadd.s32 %v2119_v41, %v2113_v58  ;;  %v2172_v62 = vshrl.u32 %v10204_v23, 16 }
 0x2b8   : > { %vm2150_vm15 = vc.u32 %v2142_v26, %v2146_v52  ;;  %v2152_v29 = vadd.s32 %v2146_v52, %v2142_v26  ;;  %v2093_v54 = vadd.s32 %v2091_v53, %v2089_v21  ;;  %v2123_v4 = vsel %vm2122_vm11, 1, %v13790_v28 }
 0x2b9   : > { %v2151_v51 = vsel %vm2150_vm15, 1, %v13790_v28  ;;  %v2175_v8 = vmul.u32 37449, %v2171_v17  ;;  %v2174_v15 = vmul.u32 9362, %v2171_v17  ;;  %v2176_v19 = vmul.u32 9362, %v2172_v62 }
 0x2ba   : > { %v2153_v31 = vadd.s32 %v2151_v51, %v2145_v33  ;;  %vm2154_vm3 = vc.u32 %v2152_v29, %v2148_v63  ;;  %v10266_v2 = vadd.s32 %v2065_v49, %v2063_v34  ;;  %vm2096_vm10 = vc.u32 %v2092_v6, 2454267026 }
 0x2bb   : > { %v2124_v24 = vadd.s32 %v2120_v36, %v2116_v46  ;;  %v2155_v22 = vsel %vm2154_vm3, 1, %v13790_v28  ;;  %v2115_v45 = vshrl.u32 %v10233_v55, 16  ;;  %v2125_v58 = vadd.s32 %v2123_v4, %v2121_v59 }
 0x2bc   : > { %v2177_v26 = vmul.u32 37449, %v2172_v62  ;;  %v2178_v21 = vshll.u32 %v2175_v8, 16  ;;  %v2094_v41 = vadd.s32 %v2093_v54, %v2083_v12  ;;  %v2117_v53 = vshrl.u32 %v10239_v37, 16 }
 0x2bd   : > { %v2147_v52 = vshrl.u32 %v2143_v60, 16  ;;  %v2180_v14 = vshll.u32 %v2176_v19, 16  ;;  %v2157_v51 = vadd.s32 %v2155_v22, %v2153_v31  ;;  %v2203_v49 = vand.u32 65535, %v10207_v20 }
 0x2be   : > { %vm2182_vm11 = vc.u32 %v2174_v15, %v2178_v21  ;;  %v2184_v17 = vadd.s32 %v2178_v21, %v2174_v15  ;;  %vm2128_vm15 = vc.u32 %v2124_v24, 2454267026  ;;  %v2156_v33 = vadd.s32 %v2152_v29, %v2148_v63 }
 0x2bf   : > { %v2183_v46 = vsel %vm2182_vm11, 1, %v13790_v28  ;;  %v2204_v36 = vshrl.u32 %v10207_v20, 16  ;;  %v2126_v55 = vadd.s32 %v2125_v58, %v2115_v45  ;;  %v2179_v4 = vshrl.u32 %v2175_v8, 16 }
 0x2c0   : > { %v2185_v34 = vadd.s32 %v2183_v46, %v2177_v26  ;;  %vm2186_vm3 = vc.u32 %v2184_v17, %v2180_v14  ;;  %v2149_v12 = vshrl.u32 %v10257_v10, 16  ;;  %v2206_v60 = vmul.u32 9362, %v2203_v49 }
 0x2c1   : > { %v2187_v37 = vsel %vm2186_vm3, 1, %v13790_v28  ;;  %v2207_v31 = vmul.u32 37449, %v2203_v49  ;;  %v2158_v59 = vadd.s32 %v2157_v51, %v2147_v52  ;;  %v2188_v62 = vadd.s32 %v2184_v17, %v2180_v14 }
 0x2c2   : > { %v2189_v54 = vadd.s32 %v2187_v37, %v2185_v34  ;;  %v2208_v15 = vmul.u32 9362, %v2204_v36  ;;  %v2095_v22 = vadd.s32 %v2094_v41, %v2085_v13  ;;  %vm2160_vm13 = vc.u32 %v2156_v33, 2454267026  ;;  %v10289_v37 = vld [vmem:[#allocation2 + $0x170] sm:$0xff] }
 0x2c3   : > { %v2209_v63 = vmul.u32 37449, %v2204_v36  ;;  %v2210_v29 = vshll.u32 %v2207_v31, 16  ;;  %v2127_v21 = vadd.s32 %v2126_v55, %v2117_v53  ;;  %v2181_v38 = vshrl.u32 %v2176_v19, 16  ;;  %v6642_v55 = vld [vmem:[#allocation2 + $0x148] sm:$0xff]  ;;  %14171 = vst [vmem:[#allocation111_spill] sm:$0xff] %v10289_v37  ;;  %v10428_v36 = vld [vmem:[#allocation2 + $0x1b8] sm:$0xff] }
 0x2c4   : > { %v2190_v45 = vadd.s32 %v2189_v54, %v2179_v4  ;;  %v2212_v8 = vshll.u32 %v2208_v15, 16  ;;  %v2097_v58 = vsel %vm2096_vm10, 1, %v13790_v28  ;;  %v2129_v10 = vsel %vm2128_vm15, 1, %v13790_v28 }
 0x2c5   : > { %vm2214_vm11 = vc.u32 %v2206_v60, %v2210_v29  ;;  %v2216_v26 = vadd.s32 %v2210_v29, %v2206_v60  ;;  %v2159_v52 = vadd.s32 %v2158_v59, %v2149_v12  ;;  %v2161_v14 = vsel %vm2160_vm13, 1, %v13790_v28 }
 0x2c6   : > { %vm2192_vm3 = vc.u32 %v2188_v62, 2454267026  ;;  %v2215_v13 = vsel %vm2214_vm11, 1, %v13790_v28  ;;  %v2211_v41 = vshrl.u32 %v2207_v31, 16  ;;  %v2098_v53 = vadd.s32 %v2097_v58, %v2095_v22 }
 0x2c7   : > { %v2217_v51 = vadd.s32 %v2215_v13, %v2209_v63  ;;  %vm2218_vm8 = vc.u32 %v2216_v26, %v2212_v8  ;;  %v2220_v19 = vadd.s32 %v2216_v26, %v2212_v8  ;;  %v2130_v17 = vadd.s32 %v2129_v10, %v2127_v21 }
 0x2c8   : > { %v2191_v49 = vadd.s32 %v2190_v45, %v2181_v38  ;;  %v2219_v6 = vsel %vm2218_vm8, 1, %v13790_v28  ;;  %v2193_v24 = vsel %vm2192_vm3, 1, %v13790_v28  ;;  %v2213_v33 = vshrl.u32 %v2208_v15, 16 }
 0x2c9   : > { %v2221_v46 = vadd.s32 %v2219_v6, %v2217_v51  ;;  %vm2224_vm10 = vc.u32 %v2220_v19, 2454267026  ;;  %v10286_v4 = vmul.f32 %v6642_v55, %v14141_v25  ;;  %v2003_v34 = vshrl.u32 %v10244_v3, 3 }
 0x2ca   : > { %v2162_v12 = vadd.s32 %v2161_v14, %v2159_v52  ;;  %v10293_v38 = vmul.f32 %v10289_v37, %v14159_v16  ;;  %v10297_v60 = vmul.f32 %v10289_v37, %v6990_v50  ;;  %v2035_v31 = vshrl.u32 %v10252_v44, 3  ;;  %v10434_v52 = vld [vmem:[#allocation2 + $0x198] sm:$0x3f] }
 0x2cb   : > { %14170 = vst [vmem:[#allocation110_spill] sm:$0xff] %v10286_v4  ;;  %v2222_v59 = vadd.s32 %v2221_v46, %v2211_v41  ;;  %v14172_v62 = vshrl.u32 %v10223_v56, 3  ;;  %v2067_v15 = vshrl.u32 %v10266_v2, 3  ;;  %v2194_v3 = vadd.s32 %v2193_v24, %v2191_v49  ;;  %v10318_v49 = vld [vmem:[#allocation2 + $0x58] sm:$0xff]  ;;  %v10321_v24 = vld [vmem:[#allocation2 + $0x168] sm:$0xff] }
 0x2cc   : > { %v2225_v22 = vsel %vm2224_vm10, 1, %v13790_v28  ;;  %v14173_v63 = vshrl.u32 %v10227_v48, 3  ;;  %v2099_v21 = vshrl.u32 %v2098_v53, 3  ;;  %v2131_v45 = vshrl.u32 %v2130_v17, 3  ;;  %14174 = vst [vmem:[#allocation112_spill] sm:$0xff] %v10318_v49 }
 0x2cd   : > { %v1940_v54 = vmul.u32 14, %v14172_v62  ;;  %v2223_v8 = vadd.s32 %v2222_v59, %v2213_v33  ;;  %v2004_v44 = vmul.u32 14, %v2003_v34  ;;  %v2163_v26 = vshrl.u32 %v2162_v12, 3 }
 0x2ce   : > { %v1972_v29 = vmul.u32 14, %v14173_v63  ;;  %v2036_v2 = vmul.u32 14, %v2035_v31  ;;  %v2068_v13 = vmul.u32 14, %v2067_v15  ;;  %v2195_v41 = vshrl.u32 %v2194_v3, 3 }
 0x2cf   : > { %v2226_v14 = vadd.s32 %v2225_v22, %v2223_v8  ;;  %v10312_v48 = vsub.s32 %v9989_v57, %v1940_v54  ;;  %v2100_v53 = vmul.u32 14, %v2099_v21  ;;  %v2132_v17 = vmul.u32 14, %v2131_v45  ;;  %v2640_v45 = vld [vmem:[#allocation2 + $0x198] sm:$0x1f] }
 0x2d0   : > { %v10316_v19 = vsub.s32 %v10052_v0, %v1972_v29  ;;  %v10325_v33 = vmul.f32 %v10321_v24, %v14159_v16  ;;  %v10328_v57 = vsub.s32 %v10100_v47, %v2004_v44  ;;  %v2164_v46 = vmul.u32 14, %v2163_v26  ;;  %v3695_v29 = vld [vmem:[#allocation2 + $0x20] sm:$0x7] }
 0x2d1   : > { %v10333_v34 = vsub.s32 %v10144_v18, %v2036_v2  ;;  %v2227_v12 = vshrl.u32 %v2226_v14, 3  ;;  %v10336_v31 = vsub.s32 %v10168_v1, %v2068_v13  ;;  %v2196_v59 = vmul.u32 14, %v2195_v41  ;;  %v10346_v18 = vld [vmem:[#allocation2 + $0xc8] sm:$0xff]  ;;  %v10532_v13 = vld [vmem:[#allocation2 + $0xa0] sm:$0xff] }
 0x2d2   : > { %vm2247_vm8 = vcmp.ne.s32.totalorder %v10312_v48, 0  ;;  %vm2272_vm13 = vcmp.lt.s32.totalorder %v10312_v48, 0  ;;  %v2101_v47 = vsub.s32 %v10171_v35, %v2100_v53  ;;  %v10342_v62 = vsub.s32 %v10175_v27, %v2132_v17 }
 0x2d3   : > { %vm2248_vm15 = vcmp.ne.s32.totalorder %v10316_v19, 0  ;;  %vm2273_vm11 = vcmp.lt.s32.totalorder %v10316_v19, 0  ;;  %v10350_v1 = vmul.f32 %v10346_v18, %v14159_v16  ;;  %v2165_v54 = vsub.s32 %v10184_v7, %v2164_v46  ;;  %vm10360_vm12 = vmand %vm2272_vm13, %vm2247_vm8 }
 0x2d4   : > { %vm2249_vm3 = vcmp.ne.s32.totalorder %v10328_v57, 0  ;;  %vm2274_vm10 = vcmp.lt.s32.totalorder %v10328_v57, 0  ;;  %v2228_v27 = vmul.u32 14, %v2227_v12  ;;  %vm2250_vm9 = vcmp.ne.s32.totalorder %v10333_v34, 0  ;;  %vm10372_vm2 = vmand %vm2273_vm11, %vm2248_vm15 }
 0x2d5   : > { %vm2275_vm1 = vcmp.lt.s32.totalorder %v10333_v34, 0  ;;  %v2197_v7 = vsub.s32 %v10204_v23, %v2196_v59  ;;  %vm2251_vm0 = vcmp.ne.s32.totalorder %v10336_v31, 0  ;;  %vm2276_vm4 = vcmp.lt.s32.totalorder %v10336_v31, 0  ;;  %vm10382_vm14 = vmand %vm2274_vm10, %vm2249_vm3  ;;  %v10478_v23 = vld [vmem:[#allocation2 + $0x20] sm:$0x3] }
 0x2d6   : > { %vm2252_vm8 = vcmp.ne.s32.totalorder %v2101_v47, 0  ;;  %vm2253_vm13 = vcmp.ne.s32.totalorder %v10342_v62, 0  ;;  %vm2277_vm6 = vcmp.lt.s32.totalorder %v2101_v47, 0  ;;  %vm2254_vm7 = vcmp.ne.s32.totalorder %v2165_v54, 0  ;;  %vm10391_vm5 = vmand %vm2275_vm1, %vm2250_vm9 }
 0x2d7   : > { %vm2278_vm15 = vcmp.lt.s32.totalorder %v10342_v62, 0  ;;  %vm2279_vm11 = vcmp.lt.s32.totalorder %v2165_v54, 0  ;;  %v2322_v21 = vadd.s32 14, %v10312_v48  ;;  %v2229_v8 = vsub.s32 %v10207_v20, %v2228_v27  ;;  %vm10399_vm3 = vmand %vm2276_vm4, %vm2251_vm0  ;;  %v14190_v27 = vld [vmem:[#allocation71_spill] sm:$0xff] }
 0x2d8   : > { %v2323_v26 = vadd.s32 14, %v10316_v19  ;;  %v2324_v2 = vadd.s32 14, %v10328_v57  ;;  %v2325_v14 = vadd.s32 14, %v10333_v34  ;;  %vm2255_vm1 = vcmp.ne.s32.totalorder %v2197_v7, 0  ;;  %vm10408_vm10 = vmand %vm2277_vm6, %vm2252_vm8 }
 0x2d9   : > { %vm2280_vm9 = vcmp.lt.s32.totalorder %v2197_v7, 0  ;;  %v2326_v20 = vadd.s32 14, %v10336_v31  ;;  %v2327_v41 = vadd.s32 14, %v2101_v47  ;;  %vm10418_vm4 = vmand %vm2278_vm15, %vm2253_vm13  ;;  %v2328_v46 = vadd.s32 14, %v10342_v62 }
 0x2da   : > { %v2329_v12 = vadd.s32 14, %v2165_v54  ;;  %v14189_v59 = vrot.slane %v10096_v11, 1  ;;  %v14191_v58 = vrot.slane %v14190_v27, 1  ;;  %vm14192_vm6 = vcmask 1046528   ;;  %vm10438_vm0 = vmand %vm2279_vm11, %vm2254_vm7 }
 0x2db   : > { %v10432_v0 = vmul.f32 %v14159_v16, %v2640_v45  ;;  %v2330_v56 = vadd.s32 14, %v2197_v7  ;;  %vm2256_vm8 = vcmp.ne.s32.totalorder %v2229_v8, 0  ;;  %vm2281_vm13 = vcmp.lt.s32.totalorder %v2229_v8, 0  ;;  %vm2305_vm15 = vmand %vm2280_vm9, %vm2255_vm1 }
 0x2dc   : > { %v2799_v6 = vsel %vm14192_vm6, %v14191_v58, %v14189_v59  ;;  %v10445_v58 = vsel %vm10360_vm12, %v2322_v21, %v10312_v48  ;;  %v10452_v45 = vsel %vm10372_vm2, %v2323_v26, %v10316_v19  ;;  %v10457_v59 = vsel %vm10382_vm14, %v2324_v2, %v10328_v57  ;;  %v14201_v19 = vld [vmem:[#allocation76_spill] sm:$0xff] }
 0x2dd   : > { %14195 = vst [vmem:[#allocation71_spill] sm:$0xff] %v10445_v58  ;;  %v10462_v48 = vsel %vm10391_vm5, %v2325_v14, %v10333_v34  ;;  %v10467_v15 = vsel %vm10399_vm3, %v2326_v20, %v10336_v31  ;;  %v10471_v22 = vsel %vm10408_vm10, %v2327_v41, %v2101_v47  ;;  %v10475_v21 = vadd.f32 %v14201_v19, %v9915_v40  ;;  %vm2306_vm5 = vmand %vm2281_vm13, %vm2256_vm8  ;;  %v10527_v2 = vld [vmem:[#allocation2 + $0x38] sm:$0xff] }
 0x2de   : > { %14196 = vst [vmem:[#allocation113_spill] sm:$0xff] %v10452_v45  ;;  %v2331_v34 = vadd.s32 14, %v2229_v8  ;;  %v10483_v44 = vsel %vm10418_vm4, %v2328_v46, %v10342_v62  ;;  %v10487_v31 = vsel %vm10438_vm0, %v2329_v12, %v2165_v54  ;;  %v10490_v47 = vsel %vm2305_vm15, %v2330_v56, %v2197_v7  ;;  %v2409_v12 = vld [vmem:[#allocation2 + $0x198] sm:$0xf] }
 0x2df   : > { %14197 = vst [vmem:[#allocation114_spill] sm:$0xff] %v10457_v59  ;;  %vm13611_vm14 = vcmp.ne.s32.totalorder %v10445_v58, 0  ;;  %vm13609_vm2 = vcmp.ne.s32.totalorder %v10452_v45, 0  ;;  %v10495_v40 = vadd.f32 %v2799_v6, %v10084_v39  ;;  %vm13608_vm12 = vcmp.ne.s32.totalorder %v10457_v59, 0 }
 0x2e0   : > { %14198 = vst [vmem:[#allocation115_spill] sm:$0xff] %v10462_v48  ;;  %vm13607_vm7 = vcmp.ne.s32.totalorder %v10462_v48, 0  ;;  %vm13606_vm11 = vcmp.ne.s32.totalorder %v10467_v15, 0  ;;  %vm13605_vm3 = vcmp.ne.s32.totalorder %v10471_v22, 0  ;;  %v10503_v56 = vmul.f32 %v6990_v50, %v3695_v29 }
 0x2e1   : > { %14199 = vst [vmem:[#allocation116_spill] sm:$0xff] %v10467_v15  ;;  %vm13604_vm1 = vcmp.ne.s32.totalorder %v10483_v44, 0  ;;  %vm13603_vm9 = vcmp.ne.s32.totalorder %v10487_v31, 0  ;;  %v10507_v62 = vsel %vm2306_vm5, %v2331_v34, %v2229_v8  ;;  %vm13600_vm10 = vcmp.ne.s32.totalorder %v10490_v47, 0  ;;  %v10522_v8 = vld [vmem:[#allocation2 + $0x1a0] sm:$0xff] }
 0x2e2   : > { %14200 = vst [vmem:[#allocation117_spill] sm:$0xff] %v10471_v22  ;;  %v2516_v39 = vsel %vm13611_vm14, %v10289_v37, 0.0  ;;  %v2518_v6 = vsel %vm13609_vm2, %v10321_v24, 0.0  ;;  %v2520_v54 = vsel %vm13608_vm12, %v10346_v18, 0.0  ;;  %v2522_v7 = vsel %vm13607_vm7, %v10428_v36, 0.0 }
 0x2e3   : > { %14202 = vst [vmem:[#allocation76_spill] sm:$0xff] %v10483_v44  ;;  %v2524_v26 = vsel %vm13606_vm11, %v10522_v8, 0.0  ;;  %v2526_v14 = vsel %vm13605_vm3, %v10527_v2, 0.0  ;;  %v2528_v20 = vsel %vm13604_vm1, %v10532_v13, 0.0  ;;  %v2530_v41 = vsel %vm13603_vm9, %v9899_v9, 0.0 }
 0x2e4   : > { %14203 = vst [vmem:[#allocation118_spill] sm:$0xff] %v10487_v31  ;;  %v2680_v17 = vmul.f32 %v10428_v36, %v14159_v16  ;;  %v2682_v46 = vmul.f32 %v10522_v8, %v14159_v16  ;;  %vm13599_vm4 = vcmp.ne.s32.totalorder %v10507_v62, 0  ;;  %v2532_v27 = vsel %vm13600_vm10, %v9966_v30, 0.0 }
 0x2e5   : > { %14204 = vst [vmem:[#allocation119_spill] sm:$0xff] %v10490_v47  ;;  %v2684_v19 = vmul.f32 %v10527_v2, %v14159_v16  ;;  %v2686_v29 = vmul.f32 %v10532_v13, %v14159_v16  ;;  %v2568_v34 = vmul.f32 %v14136_v32, %v2516_v39  ;;  %v2688_v51 = vmul.f32 %v14159_v16, %v9899_v9 }
 0x2e6   : > { %14205 = vst [vmem:[#allocation120_spill] sm:$0xff] %v10503_v56  ;;  %v2690_v57 = vmul.f32 %v14159_v16, %v9966_v30  ;;  %vm13598_vm6 = vcmp.ne.s32.totalorder %v9997_v43, 13  ;;  %v2570_v63 = vmul.f32 %v14136_v32, %v2518_v6  ;;  %v2572_v35 = vmul.f32 %v14136_v32, %v2520_v54  ;;  %v14207_v30 = vld [vmem:[#allocation74_spill] sm:$0xff]  ;;  %v14209_v6 = vld [vmem:[#allocation88_spill] sm:$0xff] }
 0x2e7   : > { %14206 = vst [vmem:[#allocation121_spill] sm:$0xff] %v10507_v62  ;;  %v2574_v55 = vmul.f32 %v14136_v32, %v2522_v7  ;;  %v2576_v10 = vmul.f32 %v14136_v32, %v2524_v26  ;;  %v2534_v53 = vsel %vm13599_vm4, %v2409_v12, 0.0  ;;  %v2578_v39 = vmul.f32 %v14136_v32, %v2526_v14 }
 0x2e8   : > { %v2814_v3 = vrot.slane %v2680_v17, 1  ;;  %v2818_v9 = vrot.slane %v2682_v46, 1  ;;  %v2822_v28 = vrot.slane %v2684_v19, 1  ;;  %v2826_v4 = vrot.slane %v2686_v29, 1 }
 0x2e9   : > { %vm14208_vm0 = vcmp.ne.s32.totalorder %v9689_v5, 13  ;;  %v3246_v54 = vsel %vm13598_vm6, %v14209_v6, 0.0  ;;  %v2580_v7 = vmul.f32 %v14136_v32, %v2528_v20  ;;  %v2830_v26 = vrot.slane %v2688_v51, 1 }
 0x2ea   : > { %v3244_v16 = vsel %vm14208_vm0, %v14207_v30, 0.0  ;;  %v2834_v49 = vrot.slane %v2690_v57, 1  ;;  %v2838_v12 = vrot.slane %v10432_v0, 1  ;;  %v2582_v14 = vmul.f32 %v14136_v32, %v2530_v41 }
 0x2eb   : > { %v2584_v17 = vmul.f32 %v14136_v32, %v2532_v27  ;;  %v2586_v46 = vmul.f32 %v14136_v32, %v2534_v53  ;;  %v14210_v19 = vrot.slane %v10293_v38, 1  ;;  %v14211_v29 = vrot.slane %v10096_v11, 1 }
 0x2ec   : > { %vm14212_vm8 = vcmask 1046528   ;;  %v14213_v6 = vrot.slane %v10325_v33, 1  ;;  %v14216_v0 = vrot.slane %v10350_v1, 1  ;;  %v3296_v32 = vmul.f32 %v14091_v61, %v3244_v16 }
 0x2ed   : > { %v2803_v30 = vsel %vm14212_vm8, %v14211_v29, %v14210_v19  ;;  %v14214_v20 = vmov %v14210_v19  ;;  %vm14215_vm13 = vmmov %vm14212_vm8  ;;  %v3298_v53 = vmul.f32 %v14091_v61, %v3246_v54  ;;  %vm13648_vm9 = vcmp.ne.s32.totalorder %v10487_v31, 13 }
 0x2ee   : > { %v2807_v57 = vsel %vm14215_vm13, %v14214_v20, %v14213_v6  ;;  %v14217_v51 = vmov %v14213_v6  ;;  %vm14218_vm15 = vmmov %vm14212_vm8  ;;  %v14219_v11 = vmov %v14216_v0  ;;  %vm14253_vm1 = vcmask 1045504  }
 0x2ef   : > { %v2811_v41 = vsel %vm14218_vm15, %v14217_v51, %v14216_v0  ;;  %vm14220_vm5 = vmmov %vm14212_vm8  ;;  %v14227_v0 = vld [vmem:[#allocation108_spill] sm:$0xff]  ;;  %v10605_v54 = vadd.f32 %v2807_v57, %v2568_v34  ;;  %v10625_v34 = vadd.f32 %v3298_v53, %v10495_v40  ;;  %vm14238_vm15 = vcmask 1041408  }
 0x2f0   : > { %v2815_v27 = vsel %vm14220_vm5, %v14219_v11, %v2814_v3  ;;  %vm14221_vm0 = vmmov %vm14220_vm5  ;;  %v10603_v16 = vadd.f32 %v2803_v30, %v14227_v0  ;;  %v10607_v1 = vadd.f32 %v2811_v41, %v2570_v63  ;;  %v14228_v51 = vld [vmem:[#allocation56_spill] sm:$0xff]  ;;  %v14229_v11 = vld [vmem:[#allocation9_spill] sm:$0xff] }
 0x2f1   : > { %v2819_v19 = vsel %vm14221_vm0, %v2814_v3, %v2818_v9  ;;  %vm14222_vm8 = vmmov %vm14221_vm0  ;;  %v10611_v3 = vadd.f32 %v14229_v11, %v14228_v51  ;;  %v10672_v0 = vld [vmem:[#allocation2] sm:$0xff]  ;;  %v14251_v11 = vrot.slane %v10289_v37, 2 }
 0x2f2   : > { %v2823_v38 = vsel %vm14222_vm8, %v2818_v9, %v2822_v28  ;;  %vm14223_vm6 = vmmov %vm14221_vm0  ;;  %v14230_v9 = vld [vmem:[#allocation65_spill] sm:$0xff]  ;;  %vm2963_vm8 = vcmp.ne.s32.totalorder %v10457_v59, 13  ;;  %14250 = vst [vmem:[#allocation9_spill] sm:$0xff] %v10672_v0  ;;  %v3162_v51 = vrot.slane %v10672_v0, 2 }
 0x2f3   : > { %v2827_v29 = vsel %vm14223_vm6, %v2822_v28, %v2826_v4  ;;  %vm14224_vm13 = vmmov %vm14221_vm0  ;;  %v10615_v28 = vadd.f32 %v14231_v42, %v14230_v9  ;;  %v10627_v63 = vadd.f32 %v2823_v38, %v2576_v10  ;;  %vm2962_vm6 = vcmp.ne.s32.totalorder %v10452_v45, 13  ;;  %v14236_v10 = vld [vmem:[#allocation53_spill] sm:$0xff] }
 0x2f4   : > { %v2831_v6 = vsel %vm14224_vm13, %v2826_v4, %v2830_v26  ;;  %vm14225_vm4 = vmmov %vm14221_vm0  ;;  %v10617_v4 = vadd.f32 %v2815_v27, %v2572_v35  ;;  %v10629_v30 = vadd.f32 %v2827_v29, %v2578_v39  ;;  %v10637_v35 = vadd.f32 %v2838_v12, %v2586_v46  ;;  %v14245_v46 = vld [vmem:[#allocation84_spill] sm:$0xff] }
 0x2f5   : > { %v2835_v33 = vsel %vm14225_vm4, %v2830_v26, %v2834_v49  ;;  %vm14226_vm10 = vmmov %vm14221_vm0  ;;  %v10619_v26 = vadd.f32 %v2819_v19, %v2574_v55  ;;  %v10631_v57 = vadd.f32 %v2831_v6, %v2580_v7  ;;  %v14233_v55 = vld [vmem:[#allocation102_spill] sm:$0xff]  ;;  %vm2961_vm4 = vcmp.ne.s32.totalorder %v10445_v58, 13  ;;  %v14240_v7 = vld [vmem:[#allocation99_spill] sm:$0xff] }
 0x2f6   : > { %v2839_v20 = vsel %vm14226_vm10, %v2834_v49, %v2838_v12  ;;  %v10622_v49 = vadd.f32 %v3296_v32, %v10475_v21  ;;  %v10633_v41 = vadd.f32 %v2835_v33, %v2582_v14  ;;  %14232 = vst [vmem:[#allocation74_spill] sm:$0xff] %v10637_v35  ;;  %vm2960_vm10 = vcmp.ne.s32.totalorder %v14233_v55, 13  ;;  %v14234_v21 = vld [vmem:[#allocation63_spill] sm:$0xff]  ;;  %vm14243_vm5 = vmmov %vm14238_vm15  ;;  %v10669_v33 = vld [vmem:[#allocation2 + $0x88] sm:$0xff] }
 0x2f7   : > { %v10635_v42 = vadd.f32 %v2839_v20, %v2584_v17  ;;  %v14235_v40 = vrot.slane %v14234_v21, 6  ;;  %v14237_v32 = vrot.slane %v14236_v10, 6  ;;  %v14241_v14 = vrot.slane %v14240_v7, 6  ;;  %vm14248_vm0 = vmmov %vm14243_vm5 }
 0x2f8   : > { %v14246_v53 = vrot.slane %v14245_v46, 6  ;;  %vm2964_vm13 = vcmp.ne.s32.totalorder %v10462_v48, 13  ;;  %v3146_v38 = vrot.slane %v10522_v8, 2  ;;  %v3150_v29 = vrot.slane %v10527_v2, 2  ;;  %vm14256_vm7 = vmmov %vm14253_vm1 }
 0x2f9   : > { %v10647_v39 = vsel %vm14238_vm15, %v14237_v32, %v14235_v40  ;;  %v14242_v17 = vmov %v14235_v40  ;;  %v14247_v27 = vmov %v14241_v14  ;;  %vm2965_vm15 = vcmp.ne.s32.totalorder %v10467_v15, 13  ;;  %vm14259_vm12 = vmmov %vm14253_vm1 }
 0x2fa   : > { %14239 = vst [vmem:[#allocation88_spill] sm:$0xff] %v10647_v39  ;;  %v10654_v12 = vsel %vm14243_vm5, %v14242_v17, %v14241_v14  ;;  %v10661_v19 = vsel %vm14248_vm0, %v14247_v27, %v14246_v53  ;;  %v3154_v6 = vrot.slane %v10532_v13, 2  ;;  %v3158_v20 = vrot.slane %v10669_v33, 2  ;;  %vm14263_vm2 = vmmov %vm14253_vm1 }
 0x2fb   : > { %14244 = vst [vmem:[#allocation108_spill] sm:$0xff] %v10654_v12  ;;  %vm2966_vm5 = vcmp.ne.s32.totalorder %v10471_v22, 13  ;;  %vm13649_vm0 = vcmp.ne.s32.totalorder %v10483_v44, 13  ;;  %v14252_v9 = vrot.slane %v14245_v46, 2  ;;  %v14254_v40 = vrot.slane %v10321_v24, 2  ;;  %vm14264_vm14 = vmmov %vm14253_vm1 }
 0x2fc   : > { %14249 = vst [vmem:[#allocation56_spill] sm:$0xff] %v10661_v19  ;;  %v14255_v10 = vmov %v14251_v11  ;;  %v14257_v7 = vrot.slane %v10346_v18, 2  ;;  %v14260_v53 = vrot.slane %v10428_v36, 2  ;;  %v3151_v56 = vsel %vm14264_vm14, %v3146_v38, %v3150_v29  ;;  %vm14270_vm11 = vmmov %vm14253_vm1 }
 0x2fd   : > { %v3131_v21 = vsel %vm14253_vm1, %v14252_v9, %v14251_v11  ;;  %v3135_v32 = vsel %vm14256_vm7, %v14255_v10, %v14254_v40  ;;  %v14258_v14 = vmov %v14254_v40  ;;  %v14265_v40 = vrot.slane %v10289_v37, 6  ;;  %vm14271_vm3 = vmmov %vm14253_vm1 }
 0x2fe   : > { %v3139_v17 = vsel %vm14259_vm12, %v14258_v14, %v14257_v7  ;;  %v14261_v27 = vmov %v14257_v7  ;;  %v14262_v9 = vmov %v14260_v53  ;;  %v14266_v10 = vrot.slane %v14245_v46, 6  ;;  %vm14269_vm12 = vmmov %vm14253_vm1 }
 0x2ff   : > { %v3143_v11 = vsel %vm14253_vm1, %v14261_v27, %v14260_v53  ;;  %v3147_v25 = vsel %vm14263_vm2, %v14262_v9, %v3146_v38  ;;  %vm14267_vm7 = vcmask 1041408   ;;  %v3155_v7 = vsel %vm14269_vm12, %v3150_v29, %v3154_v6  ;;  %vm14273_vm2 = vmmov %vm14253_vm1  ;;  %v14274_v9 = vld [vmem:[#allocation50_spill] sm:$0xff] }
 0x300   : > { %v10709_v50 = vsel %vm14267_vm7, %v14266_v10, %v14265_v40  ;;  %v3159_v14 = vsel %vm14270_vm11, %v3154_v6, %v3158_v20  ;;  %v3163_v35 = vsel %vm14271_vm3, %v3158_v20, %v3162_v51  ;;  %v3248_v53 = vsel %vm2960_vm10, %v3131_v21, 0.0  ;;  %v14276_v40 = vld [vmem:[#allocation58_spill] sm:$0xff] }
 0x301   : > { %14268 = vst [vmem:[#allocation65_spill] sm:$0xff] %v10709_v50  ;;  %v14272_v27 = vrot.slane %v10434_v52, 2  ;;  %vm14275_vm14 = vcmp.ne.s32.totalorder %v14274_v9, 0  ;;  %vm14277_vm1 = vcmp.ne.s32.totalorder %v14276_v40, 0  ;;  %vm14278_vm11 = vcmp.ne.s32.totalorder %v9689_v5, 0 }
 0x302   : > { %v3561_v46 = vsel %vm14275_vm14, %v10647_v39, 0.0  ;;  %v3563_v10 = vsel %vm14277_vm1, %v10654_v12, 0.0  ;;  %v3565_v29 = vsel %vm14278_vm11, %v10661_v19, 0.0  ;;  %v3250_v6 = vsel %vm2961_vm4, %v3135_v32, 0.0 }
 0x303   : > { %v3167_v38 = vsel %vm14273_vm2, %v3162_v51, %v14272_v27  ;;  %v3252_v20 = vsel %vm2962_vm6, %v3139_v17, 0.0  ;;  %v3254_v51 = vsel %vm2963_vm8, %v3143_v11, 0.0  ;;  %vm14279_vm3 = vcmp.ne.s32.totalorder %v9997_v43, 0  ;;  %v14280_v11 = vld [vmem:[#allocation17_spill] sm:$0xff] }
 0x304   : > { %v3567_v21 = vsel %vm14279_vm3, %v10709_v50, 0.0  ;;  %v3256_v27 = vsel %vm2964_vm13, %v3147_v25, 0.0  ;;  %v3258_v12 = vsel %vm2965_vm15, %v3151_v56, 0.0  ;;  %v3260_v19 = vsel %vm2966_vm5, %v3155_v7, 0.0 }
 0x305   : > { %v3262_v32 = vsel %vm13649_vm0, %v3159_v14, 0.0  ;;  %v3264_v17 = vsel %vm13648_vm9, %v3163_v35, 0.0  ;;  %v3613_v39 = vmul.f32 %v14280_v11, %v3561_v46  ;;  %v3615_v5 = vmul.f32 %v14280_v11, %v3563_v10 }
 0x306   : > { %v3617_v50 = vmul.f32 %v14280_v11, %v3565_v29  ;;  %vm14281_vm7 = vcmp.ne.s32.totalorder %v10490_v47, 13  ;;  %v14282_v56 = vrot.slane %v10434_v52, 2  ;;  %vm14283_vm12 = vcmp.ne.s32.totalorder %v10507_v62, 13 }
 0x307   : > { %v3266_v25 = vsel %vm14281_vm7, %v3167_v38, 0.0  ;;  %v3300_v40 = vmul.f32 %v14091_v61, %v3248_v53  ;;  %v3619_v14 = vmul.f32 %v14280_v11, %v3567_v21  ;;  %v3302_v35 = vmul.f32 %v14091_v61, %v3250_v6 }
 0x308   : > { %v3268_v7 = vsel %vm14283_vm12, %v14282_v56, 0.0  ;;  %v3304_v46 = vmul.f32 %v14091_v61, %v3252_v20  ;;  %v3306_v10 = vmul.f32 %v14091_v61, %v3254_v51  ;;  %v3308_v29 = vmul.f32 %v14091_v61, %v3256_v27 }
 0x309   : > { %v3310_v9 = vmul.f32 %v14091_v61, %v3258_v12  ;;  %v3312_v38 = vmul.f32 %v14091_v61, %v3260_v19  ;;  %v3314_v52 = vmul.f32 %v14091_v61, %v3262_v32  ;;  %v3316_v56 = vmul.f32 %v14091_v61, %v3264_v17 }
 0x30a   : > { %v3663_v53 = vadd.f32 %v3613_v39, %v10611_v3  ;;  %v3665_v21 = vadd.f32 %v3615_v5, %v10615_v28  ;;  %v3667_v6 = vadd.f32 %v3617_v50, %v10622_v49  ;;  %v3669_v20 = vadd.f32 %v3619_v14, %v10625_v34  ;;  %v10795_v39 = vld [vmem:[#allocation2 + $0x198] sm:$0xff] }
 0x30b   : > { %v3318_v51 = vmul.f32 %v14091_v61, %v3266_v25  ;;  %v3320_v27 = vmul.f32 %v14091_v61, %v3268_v7  ;;  %v10773_v12 = vadd.f32 %v3300_v40, %v10603_v16  ;;  %v3447_v19 = vrot.slane %v10321_v24, 6  ;;  %14284 = vst [vmem:[#allocation95_spill] sm:$0xff] %v10795_v39 }
 0x30c   : > { %v10777_v32 = vadd.f32 %v3302_v35, %v10605_v54  ;;  %v10780_v3 = vadd.f32 %v3304_v46, %v10607_v1  ;;  %v10783_v5 = vadd.f32 %v3306_v10, %v10617_v4  ;;  %v3451_v50 = vrot.slane %v10346_v18, 6  ;;  %v14293_v46 = vld [vmem:[#allocation90_spill] sm:$0xff] }
 0x30d   : > { %v3455_v28 = vrot.slane %v10428_v36, 6  ;;  %v3459_v61 = vrot.slane %v10522_v8, 6  ;;  %v3463_v16 = vrot.slane %v10527_v2, 6  ;;  %v3467_v49 = vrot.slane %v10532_v13, 6 }
 0x30e   : > { %v10791_v34 = vadd.f32 %v3308_v29, %v10619_v26  ;;  %v3471_v54 = vrot.slane %v10669_v33, 6  ;;  %v3475_v1 = vrot.slane %v10672_v0, 6  ;;  %v3479_v4 = vrot.slane %v10795_v39, 6  ;;  %v10807_v26 = vld [vmem:[#allocation2 + $0xb8] sm:$0xff]  ;;  %v14295_v29 = vld [vmem:[#allocation54_spill] sm:$0xff] }
 0x30f   : > { %v3360_v40 = vadd.f32 %v3310_v9, %v10627_v63  ;;  %v10800_v17 = vadd.f32 %v3312_v38, %v10629_v30  ;;  %v14286_v25 = vrot.slane %v10289_v37, 6  ;;  %vm14287_vm2 = vcmask 1041408   ;;  %14289 = vst [vmem:[#allocation99_spill] sm:$0xff] %v10807_v26  ;;  %v14298_v9 = vld [vmem:[#allocation67_spill] sm:$0xff]  ;;  %v14302_v37 = vld [vmem:[#allocation105_spill] sm:$0xff] }
 0x310   : > { %v10810_v14 = vrot.slane %v10807_v26, 6  ;;  %vm14291_vm14 = vmmov %vm14287_vm2  ;;  %v14294_v10 = vrot.slane %v14293_v46, 7  ;;  %v14296_v63 = vrot.slane %v14295_v29, 7  ;;  %vm14297_vm1 = vcmask 1040384  }
 0x311   : > { %14285 = vst [vmem:[#allocation63_spill] sm:$0xff] %v10800_v17  ;;  %v10805_v7 = vsel %vm14287_vm2, %v14286_v25, %v3447_v19  ;;  %v10813_v35 = vsel %vm14291_vm14, %v3447_v19, %v3451_v50  ;;  %v14299_v38 = vrot.slane %v14298_v9, 7  ;;  %vm14301_vm11 = vmmov %vm14297_vm1  ;;  %v14303_v17 = vrot.slane %v14302_v37, 7 }
 0x312   : > { %14288 = vst [vmem:[#allocation53_spill] sm:$0xff] %v10805_v7  ;;  %v3847_v30 = vsel %vm14297_vm1, %v14296_v63, %v14294_v10  ;;  %v14300_v43 = vmov %v14294_v10  ;;  %vm14305_vm3 = vmmov %vm14297_vm1  ;;  %v10837_v10 = vsel %vm14287_vm2, %v3459_v61, %v3463_v16  ;;  %v14332_v9 = vrot.slane %v10297_v60, 7 }
 0x313   : > { %14290 = vst [vmem:[#allocation17_spill] sm:$0xff] %v10810_v14  ;;  %v3851_v25 = vsel %vm14301_vm11, %v14300_v43, %v14299_v38  ;;  %v14304_v26 = vmov %v14299_v38  ;;  %vm14306_vm7 = vmmov %vm14287_vm2  ;;  %v10843_v43 = vadd.f32 %v3314_v52, %v10631_v57  ;;  %v14333_v38 = vrot.slane %v14302_v37, 7 }
 0x314   : > { %14292 = vst [vmem:[#allocation122_spill] sm:$0xff] %v10813_v35  ;;  %v3855_v39 = vsel %vm14305_vm3, %v14304_v26, %v14303_v17  ;;  %v10831_v19 = vsel %vm14306_vm7, %v3451_v50, %v3455_v28  ;;  %vm14308_vm12 = vmmov %vm14287_vm2  ;;  %v3366_v37 = vadd.f32 %v3316_v56, %v10633_v41 }
 0x315   : > { %14307 = vst [vmem:[#allocation90_spill] sm:$0xff] %v10831_v19  ;;  %v10834_v0 = vsel %vm14308_vm12, %v3455_v28, %v3459_v61  ;;  %vm14311_vm14 = vmmov %vm14287_vm2  ;;  %v14321_v61 = vrot.slane %v10478_v23, 6 }
 0x316   : > { %14309 = vst [vmem:[#allocation54_spill] sm:$0xff] %v10834_v0  ;;  %v10840_v29 = vsel %vm14311_vm14, %v3463_v16, %v3467_v49  ;;  %vm14313_vm1 = vmmov %vm14287_vm2  ;;  %vm14323_vm2 = vcmp.ne.s32.totalorder %v14233_v55, 0  ;;  %vm14324_vm14 = vcmp.ne.s32.totalorder %v10445_v58, 0 }
 0x317   : > { %14310 = vst [vmem:[#allocation67_spill] sm:$0xff] %v10837_v10  ;;  %v10846_v46 = vsel %vm14313_vm1, %v3467_v49, %v3471_v54  ;;  %vm14315_vm11 = vmmov %vm14313_vm1  ;;  %v3569_v57 = vsel %vm14323_vm2, %v10805_v7, 0.0  ;;  %v3571_v52 = vsel %vm14324_vm14, %v10813_v35, 0.0  ;;  %vm14330_vm2 = vcmp.ne.s32.totalorder %v10483_v44, 0 }
 0x318   : > { %14312 = vst [vmem:[#allocation105_spill] sm:$0xff] %v10840_v29  ;;  %v10849_v17 = vsel %vm14315_vm11, %v3471_v54, %v3475_v1  ;;  %vm14317_vm3 = vmmov %vm14313_vm1  ;;  %vm14326_vm11 = vcmp.ne.s32.totalorder %v10457_v59, 0  ;;  %vm14331_vm14 = vcmp.ne.s32.totalorder %v10487_v31, 0  ;;  %v3623_v35 = vmul.f32 %v14280_v11, %v3571_v52 }
 0x319   : > { %14314 = vst [vmem:[#allocation123_spill] sm:$0xff] %v10846_v46  ;;  %v10852_v50 = vsel %vm14317_vm3, %v3475_v1, %v3479_v4  ;;  %vm14319_vm7 = vmmov %vm14313_vm1  ;;  %v3575_v54 = vsel %vm14326_vm11, %v10834_v0, 0.0  ;;  %vm14327_vm3 = vcmp.ne.s32.totalorder %v10462_v48, 0  ;;  %v3583_v26 = vsel %vm14330_vm2, %v10849_v17, 0.0 }
 0x31a   : > { %14316 = vst [vmem:[#allocation124_spill] sm:$0xff] %v10849_v17  ;;  %v10856_v28 = vsel %vm14319_vm7, %v3479_v4, %v10810_v14  ;;  %vm14322_vm12 = vmmov %vm14313_vm1  ;;  %vm14325_vm1 = vcmp.ne.s32.totalorder %v10452_v45, 0  ;;  %v3577_v23 = vsel %vm14327_vm3, %v10837_v10, 0.0  ;;  %vm14328_vm7 = vcmp.ne.s32.totalorder %v10467_v15, 0 }
 0x31b   : > { %14318 = vst [vmem:[#allocation125_spill] sm:$0xff] %v10852_v50  ;;  %v3488_v16 = vsel %vm14322_vm12, %v10810_v14, %v14321_v61  ;;  %v3573_v49 = vsel %vm14325_vm1, %v10831_v19, 0.0  ;;  %v3579_v1 = vsel %vm14328_vm7, %v10840_v29, 0.0  ;;  %vm14329_vm12 = vcmp.ne.s32.totalorder %v10471_v22, 0 }
 0x31c   : > { %14320 = vst [vmem:[#allocation126_spill] sm:$0xff] %v10856_v28  ;;  %v3581_v4 = vsel %vm14329_vm12, %v10846_v46, 0.0  ;;  %v3585_v63 = vsel %vm14331_vm14, %v10852_v50, 0.0  ;;  %vm14334_vm1 = vcmask 1040384   ;;  %v3976_v10 = vadd.f32 %v3847_v30, %v3663_v53  ;;  %v14338_v53 = vld [vmem:[#allocation74_spill] sm:$0xff] }
 0x31d   : > { %v3859_v61 = vsel %vm14334_vm1, %v14333_v38, %v14332_v9  ;;  %v3978_v29 = vadd.f32 %v3851_v25, %v3665_v21  ;;  %v3980_v0 = vadd.f32 %v3855_v39, %v3667_v6  ;;  %vm14336_vm11 = vcmp.ne.s32.totalorder %v10490_v47, 0  ;;  %v14347_v47 = vld [vmem:[#allocation103_spill] sm:$0xff]  ;;  %vm14351_vm7 = vmmov %vm14334_vm1 }
 0x31e   : > { %v10894_v19 = vadd.f32 %v3859_v61, %v3669_v20  ;;  %v3587_v46 = vsel %vm14336_vm11, %v10856_v28, 0.0  ;;  %vm14337_vm3 = vcmp.ne.s32.totalorder %v10507_v62, 0  ;;  %v3621_v50 = vmul.f32 %v14280_v11, %v3569_v57  ;;  %v14343_v61 = vld [vmem:[#allocation63_spill] sm:$0xff]  ;;  %vm14352_vm12 = vmmov %vm14334_vm1 }
 0x31f   : > { %v3589_v17 = vsel %vm14337_vm3, %v3488_v16, 0.0  ;;  %v3368_v9 = vadd.f32 %v3318_v51, %v10635_v42  ;;  %v3370_v21 = vadd.f32 %v3320_v27, %v14338_v53  ;;  %v3625_v6 = vmul.f32 %v14280_v11, %v3573_v49  ;;  %v14339_v27 = vld [vmem:[#allocation10_spill] sm:$0xff]  ;;  %vm14353_vm2 = vmmov %vm14334_vm1 }
 0x320   : > { %14335 = vst [vmem:[#allocation127_spill] sm:$0xff] %v10894_v19  ;;  %v3627_v20 = vmul.f32 %v14280_v11, %v3575_v54  ;;  %v3629_v39 = vmul.f32 %v14280_v11, %v3577_v23  ;;  %v3631_v30 = vmul.f32 %v14280_v11, %v3579_v1  ;;  %v3633_v25 = vmul.f32 %v14280_v11, %v3581_v4  ;;  %v14341_v4 = vld [vmem:[#allocation95_spill] sm:$0xff]  ;;  %vm14359_vm11 = vmmov %vm14334_vm1 }
 0x321   : > { %v3635_v16 = vmul.f32 %v14280_v11, %v3583_v26  ;;  %v3637_v57 = vmul.f32 %v14280_v11, %v3585_v63  ;;  %v3639_v41 = vmul.f32 %v14280_v11, %v3587_v46  ;;  %v3641_v42 = vmul.f32 %v14280_v11, %v3589_v17  ;;  %v14342_v63 = vld [vmem:[#allocation99_spill] sm:$0xff]  ;;  %vm14360_vm3 = vmmov %vm14334_vm1 }
 0x322   : > { %v3671_v56 = vadd.f32 %v3621_v50, %v10773_v12  ;;  %v3673_v51 = vadd.f32 %v3623_v35, %v10777_v32  ;;  %v3729_v52 = vmul.f32 %v10321_v24, %v14339_v27  ;;  %v3731_v49 = vmul.f32 %v10346_v18, %v14339_v27  ;;  %v14340_v50 = vld [vmem:[#allocation9_spill] sm:$0xff]  ;;  %vm14361_vm9 = vmmov %vm14334_vm1 }
 0x323   : > { %v3675_v54 = vadd.f32 %v3625_v6, %v10780_v3  ;;  %v3733_v23 = vmul.f32 %v10428_v36, %v14339_v27  ;;  %v3735_v46 = vmul.f32 %v10522_v8, %v14339_v27  ;;  %v3737_v11 = vmul.f32 %v10527_v2, %v14339_v27  ;;  %v14344_v6 = vld [vmem:[#allocation106_spill] sm:$0xff]  ;;  %vm14362_vm0 = vmmov %vm14334_vm1 }
 0x324   : > { %v3677_v12 = vadd.f32 %v3627_v20, %v10783_v5  ;;  %v3679_v32 = vadd.f32 %v3629_v39, %v10791_v34  ;;  %v3739_v35 = vmul.f32 %v10532_v13, %v14339_v27  ;;  %v3741_v17 = vmul.f32 %v10669_v33, %v14339_v27  ;;  %v14345_v20 = vld [vmem:[#allocation16_spill] sm:$0xff] }
 0x325   : > { %v3681_v3 = vadd.f32 %v3631_v30, %v3360_v40  ;;  %v3743_v1 = vmul.f32 %v14340_v50, %v14339_v27  ;;  %v3745_v26 = vmul.f32 %v14341_v4, %v14339_v27  ;;  %v3747_v38 = vmul.f32 %v14342_v63, %v14339_v27  ;;  %v14346_v40 = vld [vmem:[#allocation94_spill] sm:$0xff] }
 0x326   : > { %v3683_v5 = vadd.f32 %v3633_v25, %v14343_v61  ;;  %v3862_v53 = vrot.slane %v3729_v52, 7  ;;  %v3866_v34 = vrot.slane %v3731_v49, 7  ;;  %v4084_v39 = vmul.f32 %v14345_v20, %v14344_v6  ;;  %v14349_v49 = vld [vmem:[#allocation120_spill] sm:$0xff] }
 0x327   : > { %v3870_v28 = vrot.slane %v3733_v23, 7  ;;  %v3874_v7 = vrot.slane %v3735_v46, 7  ;;  %v3878_v14 = vrot.slane %v3737_v11, 7  ;;  %v10944_v30 = vadd.f32 %v14346_v40, %v3976_v10 }
 0x328   : > { %v3882_v19 = vrot.slane %v3739_v35, 7  ;;  %v3886_v62 = vrot.slane %v3741_v17, 7  ;;  %v10947_v31 = vadd.f32 %v14347_v47, %v3978_v29  ;;  %v10949_v4 = vadd.f32 %v4084_v39, %v3980_v0  ;;  %v14354_v0 = vld [vmem:[#allocation84_spill] sm:$0xff] }
 0x329   : > { %v3890_v27 = vrot.slane %v3743_v1, 7  ;;  %v3894_v25 = vrot.slane %v3745_v26, 7  ;;  %v3898_v52 = vrot.slane %v3747_v38, 7  ;;  %v3902_v61 = vrot.slane %v14349_v49, 7  ;;  %v14356_v1 = vld [vmem:[#allocation69_spill] sm:$0xff] }
 0x32a   : > { %14348 = vst [vmem:[#allocation74_spill] sm:$0xff] %v10949_v4  ;;  %v3685_v6 = vadd.f32 %v3635_v16, %v10843_v43  ;;  %v3687_v23 = vadd.f32 %v3637_v57, %v3366_v37  ;;  %v3689_v46 = vadd.f32 %v3639_v41, %v3368_v9  ;;  %v3691_v11 = vadd.f32 %v3641_v42, %v3370_v21 }
 0x32b   : > { %v14350_v10 = vrot.slane %v10297_v60, 7  ;;  %v3867_v17 = vsel %vm14352_vm12, %v3862_v53, %v3866_v34  ;;  %v3871_v47 = vsel %vm14353_vm2, %v3866_v34, %v3870_v28  ;;  %v14355_v29 = vrot.slane %v14354_v0, 4  ;;  %vm14364_vm12 = vmmov %vm14362_vm0 }
 0x32c   : > { %v14357_v26 = vrot.slane %v14356_v1, 4  ;;  %vm14358_vm14 = vcmask 1043456   ;;  %v3875_v39 = vsel %vm14334_vm1, %v3870_v28, %v3874_v7  ;;  %v3879_v43 = vsel %vm14359_vm11, %v3874_v7, %v3878_v14  ;;  %vm14365_vm2 = vmmov %vm14362_vm0  ;;  %v14367_v1 = vld [vmem:[#allocation3_spill] sm:$0xff] }
 0x32d   : > { %v3863_v35 = vsel %vm14351_vm7, %v14350_v10, %v3862_v53  ;;  %v3883_v37 = vsel %vm14360_vm3, %v3878_v14, %v3882_v19  ;;  %v3887_v60 = vsel %vm14361_vm9, %v3882_v19, %v3886_v62  ;;  %v3891_v9 = vsel %vm14362_vm0, %v3886_v62, %v3890_v27  ;;  %vm14363_vm7 = vmmov %vm14362_vm0  ;;  %v14366_v19 = vld [vmem:[#allocation111_spill] sm:$0xff] }
 0x32e   : > { %v4216_v38 = vsel %vm14358_vm14, %v14357_v26, %v14355_v29  ;;  %v3895_v21 = vsel %vm14363_vm7, %v3890_v27, %v3894_v25  ;;  %v3899_v16 = vsel %vm14364_vm12, %v3894_v25, %v3898_v52  ;;  %v3903_v57 = vsel %vm14365_vm2, %v3898_v52, %v3902_v61  ;;  %v4006_v27 = vld [vmem:[#allocation2 + $0x20] sm:$0xf]  ;;  %vm14371_vm0 = vmmov %vm14358_vm14 }
 0x32f   : > { %v3984_v41 = vadd.f32 %v3863_v35, %v3671_v56  ;;  %v3986_v42 = vadd.f32 %v3867_v17, %v3673_v51  ;;  %v3988_v53 = vadd.f32 %v3871_v47, %v3675_v54  ;;  %v3990_v34 = vadd.f32 %v3875_v39, %v3677_v12  ;;  %v14376_v35 = vld [vmem:[#allocation75_spill] sm:$0xff]  ;;  %v14377_v17 = vld [vmem:[#allocation44_spill] sm:$0xff] }
 0x330   : > { %v3992_v40 = vadd.f32 %v3879_v43, %v3679_v32  ;;  %v3994_v28 = vadd.f32 %v3883_v37, %v3681_v3  ;;  %v3996_v49 = vadd.f32 %v3887_v60, %v3683_v5  ;;  %v3998_v7 = vadd.f32 %v3891_v9, %v3685_v6  ;;  %v14381_v39 = vld [vmem:[#allocation119_spill] sm:$0xff]  ;;  %v14383_v37 = vld [vmem:[#allocation121_spill] sm:$0xff] }
 0x331   : > { %v4000_v10 = vadd.f32 %v3895_v21, %v3687_v23  ;;  %v4002_v14 = vadd.f32 %v3899_v16, %v3689_v46  ;;  %v4004_v29 = vadd.f32 %v3903_v57, %v3691_v11  ;;  %vm14368_vm9 = vcmp.ne.s32.totalorder %v14367_v1, 13  ;;  %v14373_v23 = vld [vmem:[#allocation95_spill] sm:$0xff]  ;;  %v14374_v46 = vld [vmem:[#allocation118_spill] sm:$0xff] }
 0x332   : > { %v4034_v62 = vsel %vm14368_vm9, %v14366_v19, 0.0  ;;  %v4036_v25 = vsel %vm2960_vm10, %v10321_v24, 0.0  ;;  %v4038_v56 = vsel %vm2961_vm4, %v10346_v18, 0.0  ;;  %v4040_v51 = vsel %vm2962_vm6, %v10428_v36, 0.0  ;;  %v14385_v21 = vld [vmem:[#allocation58_spill] sm:$0xff]  ;;  %vm14400_vm9 = vmmov %vm14371_vm0 }
 0x333   : > { %v14369_v54 = vrot.slane %v14366_v19, 4  ;;  %v14370_v12 = vrot.slane %v14354_v0, 4  ;;  %v4042_v3 = vsel %vm2963_vm8, %v10522_v8, 0.0  ;;  %v4044_v5 = vsel %vm2964_vm13, %v10527_v2, 0.0  ;;  %v14379_v0 = vld [vmem:[#allocation50_spill] sm:$0xff] }
 0x334   : > { %v4046_v52 = vsel %vm2965_vm15, %v10532_v13, 0.0  ;;  %v4048_v61 = vsel %vm2966_vm5, %v10669_v33, 0.0  ;;  %vm14372_vm14 = vcmp.ne.s32.totalorder %v10483_v44, 13  ;;  %vm14375_vm1 = vcmp.ne.s32.totalorder %v14374_v46, 13  ;;  %v14392_v46 = vld [vmem:[#allocation45_spill] sm:$0xff] }
 0x335   : > { %v4220_v32 = vsel %vm14371_vm0, %v14370_v12, %v14369_v54  ;;  %v4050_v6 = vsel %vm14372_vm14, %v14340_v50, 0.0  ;;  %v4052_v11 = vsel %vm14375_vm1, %v14373_v23, 0.0  ;;  %vm14378_vm11 = vcmp.ne.s32.totalorder %v14377_v17, 0  ;;  %v14388_v17 = vld [vmem:[#allocation24_spill] sm:$0xff]  ;;  %vm14404_vm14 = vmmov %vm14371_vm0 }
 0x336   : > { %v4339_v47 = vsel %vm14378_vm11, %v14376_v35, 0.0  ;;  %vm14380_vm3 = vcmp.ne.s32.totalorder %v14379_v0, 0  ;;  %vm14382_vm7 = vcmp.ne.s32.totalorder %v14381_v39, 13  ;;  %vm14384_vm12 = vcmp.ne.s32.totalorder %v14383_v37, 13  ;;  %v14387_v0 = vld [vmem:[#allocation97_spill] sm:$0xff]  ;;  %v14389_v37 = vld [vmem:[#allocation127_spill] sm:$0xff]  ;;  %vm14405_vm1 = vmmov %vm14371_vm0 }
 0x337   : > { %v4341_v26 = vsel %vm14380_vm3, %v4216_v38, 0.0  ;;  %v4054_v43 = vsel %vm14382_vm7, %v14342_v63, 0.0  ;;  %v4056_v60 = vsel %vm14384_vm12, %v4006_v27, 0.0  ;;  %v4086_v9 = vmul.f32 %v14345_v20, %v4034_v62  ;;  %v14391_v39 = vld [vmem:[#allocation78_spill] sm:$0xff]  ;;  %vm14406_vm11 = vmmov %vm14371_vm0 }
 0x338   : > { %vm14386_vm2 = vcmp.ne.s32.totalorder %v14385_v21, 0  ;;  %v4088_v57 = vmul.f32 %v14345_v20, %v4036_v25  ;;  %v4090_v54 = vmul.f32 %v14345_v20, %v4038_v56  ;;  %v4092_v12 = vmul.f32 %v14345_v20, %v4040_v51  ;;  %vm14408_vm3 = vmmov %vm14371_vm0 }
 0x339   : > { %v4343_v16 = vsel %vm14386_vm2, %v4220_v32, 0.0  ;;  %v4094_v38 = vmul.f32 %v14345_v20, %v4042_v3  ;;  %v4096_v35 = vmul.f32 %v14345_v20, %v4044_v5  ;;  %v4389_v4 = vmul.f32 %v14388_v17, %v14387_v0  ;;  %vm14409_vm7 = vmmov %vm14371_vm0 }
 0x33a   : > { %v4391_v27 = vmul.f32 %v14388_v17, %v4339_v47  ;;  %v4393_v62 = vmul.f32 %v14388_v17, %v4341_v26  ;;  %v4098_v21 = vmul.f32 %v14345_v20, %v4046_v52  ;;  %v4100_v32 = vmul.f32 %v14345_v20, %v4048_v61  ;;  %v14390_v61 = vld [vmem:[#allocation37_spill] sm:$0xff]  ;;  %vm14410_vm12 = vmmov %vm14371_vm0 }
 0x33b   : > { %v4102_v25 = vmul.f32 %v14345_v20, %v4050_v6  ;;  %v4395_v56 = vmul.f32 %v14388_v17, %v4343_v16  ;;  %v4104_v51 = vmul.f32 %v14345_v20, %v4052_v11  ;;  %v4106_v3 = vmul.f32 %v14345_v20, %v4054_v43  ;;  %v14393_v16 = vld [vmem:[#allocation86_spill] sm:$0xff]  ;;  %v14394_v11 = vld [vmem:[#allocation5_spill] sm:$0xff]  ;;  %v14395_v43 = vld [vmem:[#allocation59_spill] sm:$0xff] }
 0x33c   : > { %v4108_v5 = vmul.f32 %v14345_v20, %v4056_v60  ;;  %v11036_v0 = vadd.f32 %v4086_v9, %v14389_v37  ;;  %v11038_v47 = vadd.f32 %v4088_v57, %v3984_v41  ;;  %v11040_v26 = vadd.f32 %v4090_v54, %v3986_v42 }
 0x33d   : > { %v11042_v52 = vadd.f32 %v4092_v12, %v3988_v53  ;;  %v4435_v6 = vadd.f32 %v14391_v39, %v14390_v61  ;;  %v4437_v17 = vadd.f32 %v14393_v16, %v14392_v46  ;;  %v11049_v44 = vadd.f32 %v4389_v4, %v14394_v11  ;;  %v11068_v46 = vld [vmem:[#allocation2 + $0x20] sm:$0xff]  ;;  %v14411_v11 = vld [vmem:[#allocation20_spill] sm:$0xff] }
 0x33e   : > { %v11052_v20 = vadd.f32 %v4391_v27, %v14395_v43  ;;  %v11055_v37 = vadd.f32 %v4393_v62, %v10944_v30  ;;  %v11057_v41 = vadd.f32 %v4094_v38, %v3990_v34  ;;  %v11059_v42 = vadd.f32 %v4096_v35, %v3992_v40  ;;  %14396 = vst [vmem:[#allocation10_spill] sm:$0xff] %v11068_v46 }
 0x33f   : > { %v11061_v53 = vadd.f32 %v4098_v21, %v3994_v28  ;;  %v11064_v39 = vadd.f32 %v4395_v56, %v10947_v31  ;;  %v11066_v60 = vadd.f32 %v4100_v32, %v3996_v49  ;;  %v4231_v4 = vrot.slane %v10428_v36, 4 }
 0x340   : > { %v4235_v9 = vrot.slane %v10522_v8, 4  ;;  %v4239_v30 = vrot.slane %v10527_v2, 4  ;;  %v11073_v57 = vadd.f32 %v4102_v25, %v3998_v7  ;;  %v4243_v34 = vrot.slane %v10532_v13, 4 }
 0x341   : > { %v4247_v40 = vrot.slane %v10669_v33, 4  ;;  %v4251_v28 = vrot.slane %v14340_v50, 4  ;;  %v11078_v31 = vadd.f32 %v4104_v51, %v4000_v10  ;;  %v11080_v49 = vadd.f32 %v4106_v3, %v4002_v14  ;;  %v11102_v51 = vld [vmem:[#allocation2 + $0x80] sm:$0xff] }
 0x342   : > { %v11082_v21 = vadd.f32 %v4108_v5, %v4004_v29  ;;  %v14398_v54 = vrot.slane %v10321_v24, 4  ;;  %v14399_v12 = vrot.slane %v14366_v19, 4  ;;  %v14401_v7 = vrot.slane %v10346_v18, 4  ;;  %14407 = vst [vmem:[#allocation106_spill] sm:$0xff] %v11102_v51 }
 0x343   : > { %v4255_v62 = vrot.slane %v14373_v23, 4  ;;  %v4259_v10 = vrot.slane %v14342_v63, 4  ;;  %v4263_v14 = vrot.slane %v11068_v46, 4  ;;  %v4236_v25 = vsel %vm14405_vm1, %v4231_v4, %v4235_v9  ;;  %v14421_v46 = vld [vmem:[#allocation100_spill] sm:$0xff] }
 0x344   : > { %14397 = vst [vmem:[#allocation63_spill] sm:$0xff] %v11082_v21  ;;  %v4224_v38 = vsel %vm14400_vm9, %v14399_v12, %v14398_v54  ;;  %v14402_v35 = vmov %v14398_v54  ;;  %v14403_v29 = vmov %v14401_v7  ;;  %v4240_v56 = vsel %vm14406_vm11, %v4235_v9, %v4239_v30  ;;  %v14412_v54 = vld [vmem:[#allocation77_spill] sm:$0xff]  ;;  %vm14429_vm11 = vmmov %vm14405_vm1  ;;  %v14431_v21 = vld [vmem:[#allocation92_spill] sm:$0xff] }
 0x345   : > { %v4228_v27 = vsel %vm14371_vm0, %v14402_v35, %v14401_v7  ;;  %v4232_v32 = vsel %vm14404_vm14, %v14403_v29, %v4231_v4  ;;  %v4267_v3 = vrot.slane %v11102_v51, 4  ;;  %v4244_v5 = vsel %vm14408_vm3, %v4239_v30, %v4243_v34  ;;  %v14414_v7 = vld [vmem:[#allocation47_spill] sm:$0xff]  ;;  %v14417_v35 = vld [vmem:[#allocation96_spill] sm:$0xff]  ;;  %vm14430_vm3 = vmmov %vm14405_vm1 }
 0x346   : > { %v4248_v61 = vsel %vm14409_vm7, %v4243_v34, %v4247_v40  ;;  %v4252_v16 = vsel %vm14410_vm12, %v4247_v40, %v4251_v28  ;;  %v11110_v43 = vmul.f32 %v14366_v19, %v14411_v11  ;;  %v14413_v12 = vrot.slane %v14412_v54, 5  ;;  %v14425_v19 = vld [vmem:[#allocation107_spill] sm:$0xff]  ;;  %vm14433_vm12 = vmmov %vm14405_vm1 }
 0x347   : > { %v14415_v4 = vrot.slane %v14414_v7, 5  ;;  %vm14416_vm2 = vcmask 1042432   ;;  %v14418_v29 = vrot.slane %v14417_v35, 5  ;;  %v14422_v34 = vrot.slane %v14421_v46, 5 }
 0x348   : > { %v14419_v51 = vmov %v14413_v12  ;;  %vm14420_vm9 = vmmov %vm14416_vm2  ;;  %v14426_v23 = vrot.slane %v14425_v19, 5  ;;  %v4264_v54 = vsel %vm14430_vm3, %v4259_v10, %v4263_v14  ;;  %vm14432_vm7 = vcmp.ne.s32.totalorder %v14431_v21, 0 }
 0x349   : > { %v4615_v9 = vsel %vm14416_vm2, %v14415_v4, %v14413_v12  ;;  %v4619_v30 = vsel %vm14420_vm9, %v14419_v51, %v14418_v29  ;;  %v14423_v40 = vmov %v14418_v29  ;;  %vm14424_vm0 = vmmov %vm14416_vm2  ;;  %v14427_v50 = vmov %v14422_v34 }
 0x34a   : > { %v4623_v63 = vsel %vm14424_vm0, %v14423_v40, %v14422_v34  ;;  %vm14428_vm14 = vmmov %vm14424_vm0  ;;  %v4256_v12 = vsel %vm14405_vm1, %v4251_v28, %v4255_v62  ;;  %v4260_v4 = vsel %vm14429_vm11, %v4255_v62, %v4259_v10  ;;  %v4345_v51 = vsel %vm14432_vm7, %v4224_v38, 0.0  ;;  %v14442_v62 = vld [vmem:[#allocation76_spill] sm:$0xff]  ;;  %v14448_v40 = vld [vmem:[#allocation121_spill] sm:$0xff] }
 0x34b   : > { %v4627_v7 = vsel %vm14428_vm14, %v14427_v50, %v14426_v23  ;;  %v4268_v29 = vsel %vm14433_vm12, %v4263_v14, %v4267_v3  ;;  %vm14434_vm2 = vcmp.ne.s32.totalorder %v14367_v1, 0  ;;  %vm14435_vm9 = vcmp.ne.s32.totalorder %v14233_v55, 0  ;;  %v14444_v14 = vld [vmem:[#allocation118_spill] sm:$0xff] }
 0x34c   : > { %v4347_v35 = vsel %vm14434_vm2, %v4228_v27, 0.0  ;;  %v4349_v34 = vsel %vm14435_vm9, %v4232_v32, 0.0  ;;  %vm14436_vm0 = vcmp.ne.s32.totalorder %v10445_v58, 0  ;;  %vm14437_vm14 = vcmp.ne.s32.totalorder %v10452_v45, 0 }
 0x34d   : > { %v4351_v50 = vsel %vm14436_vm0, %v4236_v25, 0.0  ;;  %v4353_v23 = vsel %vm14437_vm14, %v4240_v56, 0.0  ;;  %vm14438_vm1 = vcmp.ne.s32.totalorder %v10457_v59, 0  ;;  %vm14439_vm11 = vcmp.ne.s32.totalorder %v10462_v48, 0  ;;  %v14446_v56 = vld [vmem:[#allocation119_spill] sm:$0xff]  ;;  %v14450_v48 = vld [vmem:[#allocation24_spill] sm:$0xff] }
 0x34e   : > { %v4355_v46 = vsel %vm14438_vm1, %v4244_v5, 0.0  ;;  %v4357_v28 = vsel %vm14439_vm11, %v4248_v61, 0.0  ;;  %vm14440_vm3 = vcmp.ne.s32.totalorder %v10467_v15, 0  ;;  %vm14441_vm7 = vcmp.ne.s32.totalorder %v10471_v22, 0 }
 0x34f   : > { %v4359_v38 = vsel %vm14440_vm3, %v4252_v16, 0.0  ;;  %v4361_v27 = vsel %vm14441_vm7, %v4256_v12, 0.0  ;;  %vm14443_vm12 = vcmp.ne.s32.totalorder %v14442_v62, 0  ;;  %vm14445_vm2 = vcmp.ne.s32.totalorder %v14444_v14, 0 }
 0x350   : > { %v4363_v10 = vsel %vm14443_vm12, %v4260_v4, 0.0  ;;  %v4365_v32 = vsel %vm14445_vm2, %v4264_v54, 0.0  ;;  %v4630_v25 = vrot.slane %v11110_v43, 5  ;;  %vm14447_vm9 = vcmp.ne.s32.totalorder %v14446_v56, 0  ;;  %v14451_v4 = vld [vmem:[#allocation48_spill] sm:$0xff] }
 0x351   : > { %v4367_v5 = vsel %vm14447_vm9, %v4268_v29, 0.0  ;;  %vm14449_vm0 = vcmp.ne.s32.totalorder %v14448_v40, 0  ;;  %v4397_v15 = vmul.f32 %v14450_v48, %v4345_v51  ;;  %v4399_v16 = vmul.f32 %v14450_v48, %v4347_v35 }
 0x352   : > { %v4369_v61 = vsel %vm14449_vm0, %v4267_v3, 0.0  ;;  %v4401_v12 = vmul.f32 %v14450_v48, %v4349_v34  ;;  %v4403_v62 = vmul.f32 %v14450_v48, %v4351_v50  ;;  %v11168_v22 = vadd.f32 %v14451_v4, %v4435_v6 }
 0x353   : > { %v11170_v54 = vadd.f32 %v4615_v9, %v4437_v17  ;;  %v4405_v43 = vmul.f32 %v14450_v48, %v4353_v23  ;;  %v4407_v29 = vmul.f32 %v14450_v48, %v4355_v46  ;;  %v4409_v56 = vmul.f32 %v14450_v48, %v4357_v28 }
 0x354   : > { %v4411_v3 = vmul.f32 %v14450_v48, %v4359_v38  ;;  %v4413_v51 = vmul.f32 %v14450_v48, %v4361_v27  ;;  %v14452_v35 = vrot.slane %v14425_v19, 5  ;;  %vm14453_vm14 = vcmask 1042432   ;;  %v14454_v38 = vld [vmem:[#allocation74_spill] sm:$0xff] }
 0x355   : > { %v11181_v50 = vadd.f32 %v4619_v30, %v11049_v44  ;;  %v11184_v17 = vadd.f32 %v4623_v63, %v11052_v20  ;;  %v4415_v6 = vmul.f32 %v14450_v48, %v4363_v10  ;;  %v4417_v9 = vmul.f32 %v14450_v48, %v4365_v32  ;;  %v14456_v10 = vld [vmem:[#allocation9_spill] sm:$0xff]  ;;  %v14457_v32 = vld [vmem:[#allocation95_spill] sm:$0xff]  ;;  %vm14461_vm1 = vmmov %vm14453_vm14 }
 0x356   : > { %v4631_v34 = vsel %vm14453_vm14, %v14452_v35, %v4630_v25  ;;  %v11189_v23 = vadd.f32 %v4627_v7, %v11055_v37  ;;  %v4419_v19 = vmul.f32 %v14450_v48, %v4367_v5  ;;  %v4421_v28 = vmul.f32 %v14450_v48, %v4369_v61  ;;  %v14459_v5 = vld [vmem:[#allocation10_spill] sm:$0xff]  ;;  %vm14462_vm11 = vmmov %vm14461_vm1 }
 0x357   : > { %v11192_v46 = vadd.f32 %v4631_v34, %v11064_v39  ;;  %v11197_v44 = vadd.f32 %v4397_v15, %v14454_v38  ;;  %v4505_v63 = vmul.f32 %v10321_v24, %v14411_v11  ;;  %v11202_v20 = vadd.f32 %v4399_v16, %v11036_v0  ;;  %v14460_v61 = vld [vmem:[#allocation106_spill] sm:$0xff]  ;;  %v14463_v34 = vld [vmem:[#allocation55_spill] sm:$0xff]  ;;  %vm14483_vm0 = vmmov %vm14461_vm1 }
 0x358   : > { %v11205_v30 = vadd.f32 %v4401_v12, %v11038_v47  ;;  %v11208_v37 = vadd.f32 %v4403_v62, %v11040_v26  ;;  %v4507_v39 = vmul.f32 %v10346_v18, %v14411_v11  ;;  %v11213_v48 = vadd.f32 %v4405_v43, %v11042_v52  ;;  %vm14484_vm14 = vmmov %vm14483_vm0 }
 0x359   : > { %v11216_v15 = vadd.f32 %v4407_v29, %v11057_v41  ;;  %v11219_v24 = vadd.f32 %v4409_v56, %v11059_v42  ;;  %v11222_v0 = vadd.f32 %v4411_v3, %v11061_v53  ;;  %v11225_v47 = vadd.f32 %v4413_v51, %v11066_v60  ;;  %v4475_v41 = vld [vmem:[#allocation2 + $0x150] sm:$0x1] }
 0x35a   : > { %v11228_v26 = vadd.f32 %v4415_v6, %v11073_v57  ;;  %v4509_v18 = vmul.f32 %v10428_v36, %v14411_v11  ;;  %v4511_v52 = vmul.f32 %v10522_v8, %v14411_v11  ;;  %v4513_v42 = vmul.f32 %v10527_v2, %v14411_v11  ;;  %v14455_v36 = vld [vmem:[#allocation63_spill] sm:$0xff] }
 0x35b   : > { %v4515_v53 = vmul.f32 %v10532_v13, %v14411_v11  ;;  %v4517_v60 = vmul.f32 %v10669_v33, %v14411_v11  ;;  %v4634_v7 = vrot.slane %v4505_v63, 5  ;;  %v11241_v57 = vadd.f32 %v4417_v9, %v11078_v31  ;;  %v14458_v56 = vld [vmem:[#allocation99_spill] sm:$0xff]  ;;  %v14469_v63 = vld [vmem:[#allocation108_spill] sm:$0xff] }
 0x35c   : > { %v11244_v27 = vadd.f32 %v4419_v19, %v11080_v49  ;;  %v11247_v62 = vadd.f32 %v4421_v28, %v14455_v36  ;;  %v4638_v8 = vrot.slane %v4507_v39, 5  ;;  %v4519_v2 = vmul.f32 %v14456_v10, %v14411_v11  ;;  %v14464_v6 = vld [vmem:[#allocation39_spill] sm:$0xff]  ;;  %v14466_v19 = vld [vmem:[#allocation88_spill] sm:$0xff]  ;;  %v14467_v28 = vld [vmem:[#allocation29_spill] sm:$0xff] }
 0x35d   : > { %v4521_v13 = vmul.f32 %v14457_v32, %v14411_v11  ;;  %v4523_v33 = vmul.f32 %v14458_v56, %v14411_v11  ;;  %v4525_v31 = vmul.f32 %v14411_v11, %v14459_v5  ;;  %v4527_v49 = vmul.f32 %v14460_v61, %v14411_v11  ;;  %v14470_v39 = vld [vmem:[#allocation44_spill] sm:$0xff] }
 0x35e   : > { %v4529_v16 = vmul.f32 %v14411_v11, %v4475_v41  ;;  %v4642_v12 = vrot.slane %v4509_v18, 5  ;;  %v4646_v4 = vrot.slane %v4511_v52, 5  ;;  %v4635_v43 = vsel %vm14461_vm1, %v4630_v25, %v4634_v7  ;;  %v14472_v25 = vld [vmem:[#allocation56_spill] sm:$0xff]  ;;  %v14473_v41 = vld [vmem:[#allocation50_spill] sm:$0xff]  ;;  %vm14485_vm1 = vmmov %vm14483_vm0 }
 0x35f   : > { %v4650_v29 = vrot.slane %v4513_v42, 5  ;;  %v4654_v3 = vrot.slane %v4515_v53, 5  ;;  %v4658_v51 = vrot.slane %v4517_v60, 5  ;;  %v4639_v35 = vsel %vm14462_vm11, %v4634_v7, %v4638_v8  ;;  %v14475_v53 = vld [vmem:[#allocation65_spill] sm:$0xff]  ;;  %v14476_v60 = vld [vmem:[#allocation58_spill] sm:$0xff]  ;;  %vm14486_vm11 = vmmov %vm14483_vm0 }
 0x360   : > { %vm14465_vm3 = vcmp.ne.s32.totalorder %v14464_v6, 13  ;;  %vm14468_vm7 = vcmp.ne.s32.totalorder %v14467_v28, 13  ;;  %vm14471_vm12 = vcmp.ne.s32.totalorder %v14470_v39, 13  ;;  %v4662_v18 = vrot.slane %v4519_v2, 5  ;;  %v14481_v6 = vld [vmem:[#allocation46_spill] sm:$0xff]  ;;  %v14482_v39 = vld [vmem:[#allocation72_spill] sm:$0xff] }
 0x361   : > { %v4832_v9 = vsel %vm14465_vm3, %v14463_v34, 0.0  ;;  %v4834_v38 = vsel %vm14468_vm7, %v14466_v19, 0.0  ;;  %v4836_v11 = vsel %vm14471_vm12, %v14469_v63, 0.0  ;;  %v4666_v52 = vrot.slane %v4521_v13, 5  ;;  %v11280_v34 = vld [vmem:[%s13283_s3 + $0x10] ss:$0 sm:$0xff]  ;;  %vm14487_vm3 = vmmov %vm14483_vm0 }
 0x362   : > { %vm14474_vm2 = vcmp.ne.s32.totalorder %v14473_v41, 13  ;;  %vm14477_vm9 = vcmp.ne.s32.totalorder %v14476_v60, 13  ;;  %v4670_v36 = vrot.slane %v4523_v33, 5  ;;  %v4674_v10 = vrot.slane %v4525_v31, 5  ;;  %v14478_v19 = vld [vmem:[#allocation4_spill] sm:$0xff]  ;;  %v14479_v31 = vld [vmem:[#allocation23_spill] sm:$0xff]  ;;  %vm14488_vm7 = vmmov %vm14483_vm0 }
 0x363   : > { %v4838_v42 = vsel %vm14474_vm2, %v14472_v25, 0.0  ;;  %v4840_v7 = vsel %vm14477_vm9, %v14475_v53, 0.0  ;;  %v4678_v32 = vrot.slane %v4527_v49, 5  ;;  %v4682_v56 = vrot.slane %v4529_v16, 5  ;;  %v14480_v49 = vld [vmem:[#allocation26_spill] sm:$0xff]  ;;  %vm14489_vm12 = vmmov %vm14483_vm0 }
 0x364   : > { %v4882_v2 = vmul.f32 %v11280_v34, %v14478_v19  ;;  %v4884_v13 = vmul.f32 %v11280_v34, %v4832_v9  ;;  %v4886_v63 = vmul.f32 %v11280_v34, %v4834_v38  ;;  %v4888_v25 = vmul.f32 %v11280_v34, %v4836_v11  ;;  %vm14490_vm2 = vmmov %vm14483_vm0 }
 0x365   : > { %v4890_v53 = vmul.f32 %v11280_v34, %v4838_v42  ;;  %v4892_v33 = vmul.f32 %v11280_v34, %v4840_v7  ;;  %v11291_v16 = vadd.f32 %v14480_v49, %v14479_v31  ;;  %v11295_v28 = vadd.f32 %v14482_v39, %v14481_v6  ;;  %v4788_v31 = vld [vmem:[#allocation2 + $0x150] sm:$0x3]  ;;  %vm14491_vm9 = vmmov %vm14483_vm0 }
 0x366   : > { %v11298_v19 = vadd.f32 %v4882_v2, %v11168_v22  ;;  %v11301_v9 = vadd.f32 %v4884_v13, %v11170_v54  ;;  %v11304_v38 = vadd.f32 %v4886_v63, %v11181_v50  ;;  %v11307_v11 = vadd.f32 %v4888_v25, %v11184_v17  ;;  %v14505_v49 = vld [vmem:[#allocation123_spill] sm:$0xff] }
 0x367   : > { %v4643_v42 = vsel %vm14483_vm0, %v4638_v8, %v4642_v12  ;;  %v4647_v7 = vsel %vm14484_vm14, %v4642_v12, %v4646_v4  ;;  %v11312_v6 = vadd.f32 %v4890_v53, %v11189_v23  ;;  %v11315_v22 = vadd.f32 %v4892_v33, %v11192_v46  ;;  %vm14492_vm14 = vmmov %vm14483_vm0  ;;  %v14504_v53 = vld [vmem:[#allocation105_spill] sm:$0xff] }
 0x368   : > { %v4651_v54 = vsel %vm14485_vm1, %v4646_v4, %v4650_v29  ;;  %v4655_v39 = vsel %vm14486_vm11, %v4650_v29, %v4654_v3  ;;  %v4659_v50 = vsel %vm14487_vm3, %v4654_v3, %v4658_v51  ;;  %v4663_v17 = vsel %vm14488_vm7, %v4658_v51, %v4662_v18 }
 0x369   : > { %v4667_v2 = vsel %vm14489_vm12, %v4662_v18, %v4666_v52  ;;  %v4671_v8 = vsel %vm14490_vm2, %v4666_v52, %v4670_v36  ;;  %v4675_v12 = vsel %vm14491_vm9, %v4670_v36, %v4674_v10  ;;  %v4679_v23 = vsel %vm14483_vm0, %v4674_v10, %v4678_v32 }
 0x36a   : > { %v4683_v13 = vsel %vm14492_vm14, %v4678_v32, %v4682_v56  ;;  %v4798_v46 = vrot.slane %v14459_v5, 6  ;;  %v4802_v4 = vrot.slane %v14460_v61, 6  ;;  %v4806_v63 = vrot.slane %v4788_v31, 6  ;;  %v14503_v56 = vld [vmem:[#allocation67_spill] sm:$0xff]  ;;  %v14507_v31 = vld [vmem:[#allocation124_spill] sm:$0xff] }
 0x36b   : > { %v4760_v29 = vadd.f32 %v4635_v43, %v11197_v44  ;;  %v4762_v3 = vadd.f32 %v4639_v35, %v11202_v20  ;;  %v4764_v51 = vadd.f32 %v4643_v42, %v11205_v30  ;;  %v4766_v18 = vadd.f32 %v4647_v7, %v11208_v37  ;;  %v14493_v43 = vld [vmem:[#allocation17_spill] sm:$0xff] }
 0x36c   : > { %v4768_v52 = vadd.f32 %v4651_v54, %v11213_v48  ;;  %v4770_v36 = vadd.f32 %v4655_v39, %v11216_v15  ;;  %v4772_v10 = vadd.f32 %v4659_v50, %v11219_v24  ;;  %v4774_v32 = vadd.f32 %v4663_v17, %v11222_v0  ;;  %v14497_v24 = vld [vmem:[#allocation53_spill] sm:$0xff] }
 0x36d   : > { %v4776_v5 = vadd.f32 %v4667_v2, %v11225_v47  ;;  %v4778_v61 = vadd.f32 %v4671_v8, %v11228_v26  ;;  %v4780_v44 = vadd.f32 %v4675_v12, %v11241_v57  ;;  %v4782_v20 = vadd.f32 %v4679_v23, %v11244_v27  ;;  %v14499_v47 = vld [vmem:[#allocation122_spill] sm:$0xff]  ;;  %v14509_v50 = vld [vmem:[#allocation125_spill] sm:$0xff]  ;;  %v14512_v12 = vld [vmem:[#allocation76_spill] sm:$0xff] }
 0x36e   : > { %v4784_v30 = vadd.f32 %v4683_v13, %v11247_v62  ;;  %vm14494_vm1 = vcmask 1041408   ;;  %vm14498_vm7 = vcmp.ne.s32.totalorder %v14431_v21, 13  ;;  %vm14500_vm12 = vcmp.ne.s32.totalorder %v14367_v1, 13  ;;  %v14501_v57 = vld [vmem:[#allocation90_spill] sm:$0xff] }
 0x36f   : > { %v4799_v37 = vsel %vm14494_vm1, %v14493_v43, %v4798_v46  ;;  %vm14495_vm11 = vmmov %vm14494_vm1  ;;  %v4842_v0 = vsel %vm14498_vm7, %v14497_v24, 0.0  ;;  %v4844_v26 = vsel %vm14500_vm12, %v14499_v47, 0.0  ;;  %v4846_v27 = vsel %vm2960_vm10, %v14501_v57, 0.0  ;;  %v14502_v62 = vld [vmem:[#allocation54_spill] sm:$0xff] }
 0x370   : > { %v4803_v48 = vsel %vm14495_vm11, %v4798_v46, %v4802_v4  ;;  %vm14496_vm3 = vmmov %vm14494_vm1  ;;  %v4848_v35 = vsel %vm2961_vm4, %v14502_v62, 0.0  ;;  %v4850_v25 = vsel %vm2962_vm6, %v14503_v56, 0.0  ;;  %v4852_v33 = vsel %vm2963_vm8, %v14504_v53, 0.0  ;;  %v14511_v8 = vld [vmem:[#allocation126_spill] sm:$0xff] }
 0x371   : > { %v4807_v15 = vsel %vm14496_vm3, %v4802_v4, %v4806_v63  ;;  %v4854_v7 = vsel %vm2964_vm13, %v14505_v49, 0.0  ;;  %v4856_v39 = vsel %vm2965_vm15, %v14507_v31, 0.0  ;;  %v4858_v2 = vsel %vm2966_vm5, %v14509_v50, 0.0  ;;  %v14516_v4 = vld [vmem:[#allocation119_spill] sm:$0xff]  ;;  %vm14547_vm11 = vmmov %vm14498_vm7 }
 0x372   : > { %vm14513_vm2 = vcmp.ne.s32.totalorder %v14512_v12, 13  ;;  %vm14514_vm9 = vcmp.ne.s32.totalorder %v14444_v14, 13  ;;  %vm14515_vm0 = vcmp.ne.s32.totalorder %v14448_v40, 13  ;;  %vm14517_vm14 = vcmp.ne.s32.totalorder %v14516_v4, 13  ;;  %v14519_v14 = vld [vmem:[#allocation66_spill] sm:$0xff]  ;;  %vm14552_vm3 = vmmov %vm14500_vm12 }
 0x373   : > { %v4860_v23 = vsel %vm14513_vm2, %v14511_v8, 0.0  ;;  %v4862_v13 = vsel %vm14514_vm9, %v4799_v37, 0.0  ;;  %v4866_v46 = vsel %vm14515_vm0, %v4807_v15, 0.0  ;;  %v4864_v63 = vsel %vm14517_vm14, %v4803_v48, 0.0 }
 0x374   : > { %v4894_v43 = vmul.f32 %v11280_v34, %v4842_v0  ;;  %v4896_v24 = vmul.f32 %v11280_v34, %v4844_v26  ;;  %v4898_v47 = vmul.f32 %v11280_v34, %v4846_v27  ;;  %v4900_v57 = vmul.f32 %v11280_v34, %v4848_v35 }
 0x375   : > { %v4902_v62 = vmul.f32 %v11280_v34, %v4850_v25  ;;  %v4904_v56 = vmul.f32 %v11280_v34, %v4852_v33  ;;  %v4906_v37 = vmul.f32 %v11280_v34, %v4854_v7  ;;  %v4908_v53 = vmul.f32 %v11280_v34, %v4856_v39 }
 0x376   : > { %v4910_v15 = vmul.f32 %v11280_v34, %v4858_v2  ;;  %v4912_v48 = vmul.f32 %v11280_v34, %v4860_v23  ;;  %v4918_v0 = vmul.f32 %v11280_v34, %v4866_v46  ;;  %v4914_v26 = vmul.f32 %v11280_v34, %v4862_v13  ;;  %v5026_v2 = vld [vmem:[%s13285_s5] sm:$0x3]  ;;  %v14518_v13 = vld [vmem:[#allocation32_spill] sm:$0xff] }
 0x377   : > { %v4916_v27 = vmul.f32 %v11280_v34, %v4864_v63  ;;  %v4944_v49 = vadd.f32 %v4894_v43, %v4760_v29  ;;  %v4946_v35 = vadd.f32 %v4896_v24, %v4762_v3  ;;  %v4948_v31 = vadd.f32 %v4898_v47, %v4764_v51  ;;  %v14520_v29 = vld [vmem:[#allocation21_spill] sm:$0xff]  ;;  %v14521_v47 = vld [vmem:[#allocation28_spill] sm:$0xff] }
 0x378   : > { %v4950_v25 = vadd.f32 %v4900_v57, %v4766_v18  ;;  %v4952_v50 = vadd.f32 %v4902_v62, %v4768_v52  ;;  %v4954_v33 = vadd.f32 %v4904_v56, %v4770_v36  ;;  %v4956_v8 = vadd.f32 %v4906_v37, %v4772_v10  ;;  %v14522_v62 = vld [vmem:[#allocation30_spill] sm:$0xff] }
 0x379   : > { %v4958_v7 = vadd.f32 %v4908_v53, %v4774_v32  ;;  %v4960_v40 = vadd.f32 %v4910_v15, %v4776_v5  ;;  %v4962_v39 = vadd.f32 %v4912_v48, %v4778_v61  ;;  %v4964_v23 = vadd.f32 %v4914_v26, %v4780_v44 }
 0x37a   : > { %v4966_v46 = vadd.f32 %v4916_v27, %v4782_v20  ;;  %v4968_v4 = vadd.f32 %v4918_v0, %v4784_v30  ;;  %v4980_v34 = vmul.f32 %v14519_v14, %v14518_v13  ;;  %v4982_v3 = vmul.f32 %v14519_v14, %v14520_v29 }
 0x37b   : > { %v4984_v51 = vmul.f32 %v14519_v14, %v11291_v16  ;;  %v4986_v18 = vmul.f32 %v14519_v14, %v11295_v28  ;;  %v4988_v52 = vmul.f32 %v14519_v14, %v11298_v19  ;;  %v4990_v36 = vmul.f32 %v14519_v14, %v11301_v9 }
 0x37c   : > { %v4992_v10 = vmul.f32 %v14519_v14, %v11304_v38  ;;  %v4994_v32 = vmul.f32 %v14519_v14, %v11307_v11  ;;  %v5028_v5 = vperm.slane %v5026_v2, 0  ;;  %v4996_v61 = vmul.f32 %v14519_v14, %v11312_v6 }
 0x37d   : > { %v4998_v16 = vmul.f32 %v14519_v14, %v11315_v22  ;;  %v5000_v28 = vmul.f32 %v14519_v14, %v4944_v49  ;;  %v5002_v19 = vmul.f32 %v14519_v14, %v4946_v35  ;;  %v5004_v44 = vmul.f32 %v14519_v14, %v4948_v31 }
 0x37e   : > { %v5006_v9 = vmul.f32 %v14519_v14, %v4950_v25  ;;  %v5008_v38 = vmul.f32 %v14519_v14, %v4952_v50  ;;  %v5010_v20 = vmul.f32 %v14519_v14, %v4954_v33  ;;  %v5012_v11 = vmul.f32 %v14519_v14, %v4956_v8 }
 0x37f   : > { %v5014_v30 = vmul.f32 %v14519_v14, %v4958_v7  ;;  %v5016_v6 = vmul.f32 %v14519_v14, %v4960_v40  ;;  %v5018_v22 = vmul.f32 %v14519_v14, %v4962_v39  ;;  %v5020_v63 = vmul.f32 %v14519_v14, %v4964_v23 }
 0x380   : > { %v5022_v43 = vmul.f32 %v14519_v14, %v4966_v46  ;;  %v5024_v24 = vmul.f32 %v14519_v14, %v4968_v4  ;;  %v11431_v57 = vadd.f32 %v5028_v5, %v14521_v47  ;;  %v11434_v56 = vadd.f32 %v5028_v5, %v14522_v62 }
 0x381   : > { %v11436_v37 = vadd.f32 %v5028_v5, %v4980_v34  ;;  %v11438_v53 = vadd.f32 %v5028_v5, %v4982_v3  ;;  %v11440_v15 = vadd.f32 %v5028_v5, %v4984_v51  ;;  %v11442_v40 = vadd.f32 %v5028_v5, %v4986_v18 }
 0x382   : > { %v11444_v48 = vadd.f32 %v5028_v5, %v4988_v52  ;;  %v11446_v0 = vadd.f32 %v5028_v5, %v4990_v36  ;;  %v11448_v26 = vadd.f32 %v5028_v5, %v4992_v10  ;;  %v11450_v14 = vadd.f32 %v5028_v5, %v4994_v32 }
 0x383   : > { %14523 = vst [vmem:[#allocation16_spill] sm:$0xff] %v11436_v37  ;;  %v11452_v4 = vadd.f32 %v5028_v5, %v4996_v61  ;;  %v11454_v27 = vadd.f32 %v5028_v5, %v4998_v16  ;;  %v11456_v49 = vadd.f32 %v5028_v5, %v5000_v28  ;;  %v11458_v35 = vadd.f32 %v5028_v5, %v5002_v19 }
 0x384   : > { %14524 = vst [vmem:[#allocation94_spill] sm:$0xff] %v11438_v53  ;;  %v11460_v31 = vadd.f32 %v5028_v5, %v5004_v44  ;;  %v11462_v25 = vadd.f32 %v5028_v5, %v5006_v9  ;;  %v11464_v50 = vadd.f32 %v5028_v5, %v5008_v38  ;;  %v11466_v33 = vadd.f32 %v5028_v5, %v5010_v20 }
 0x385   : > { %v11468_v8 = vadd.f32 %v5028_v5, %v5012_v11  ;;  %v11470_v7 = vadd.f32 %v5028_v5, %v5014_v30  ;;  %v5084_v39 = vmul.f32 %v11434_v56, %v11434_v56  ;;  %v11474_v2 = vadd.f32 %v5028_v5, %v5016_v6 }
 0x386   : > { %v11476_v23 = vadd.f32 %v5028_v5, %v5018_v22  ;;  %v11478_v46 = vadd.f32 %v5028_v5, %v5020_v63  ;;  %v5082_v13 = vmul.f32 %v11431_v57, %v11431_v57  ;;  %v11482_v34 = vadd.f32 %v5028_v5, %v5022_v43 }
 0x387   : > { %v11484_v29 = vadd.f32 %v5028_v5, %v5024_v24  ;;  %v5086_v3 = vmul.f32 %v11436_v37, %v11436_v37  ;;  %v5088_v51 = vmul.f32 %v11438_v53, %v11438_v53  ;;  %v5090_v18 = vmul.f32 %v11440_v15, %v11440_v15 }
 0x388   : > { %v5092_v52 = vmul.f32 %v11442_v40, %v11442_v40  ;;  %v5094_v36 = vmul.f32 %v11444_v48, %v11444_v48  ;;  %v5096_v10 = vmul.f32 %v11446_v0, %v11446_v0  ;;  %v5098_v32 = vmul.f32 %v11448_v26, %v11448_v26 }
 0x389   : > { %v5100_v5 = vmul.f32 %v11450_v14, %v11450_v14  ;;  %v5102_v61 = vmul.f32 %v11452_v4, %v11452_v4  ;;  %v5134_v16 = vmul.f32 %v5084_v39, %v11434_v56  ;;  %v5104_v28 = vmul.f32 %v11454_v27, %v11454_v27 }
 0x38a   : > { %v5106_v19 = vmul.f32 %v11456_v49, %v11456_v49  ;;  %v5108_v44 = vmul.f32 %v11458_v35, %v11458_v35  ;;  %v5132_v9 = vmul.f32 %v5082_v13, %v11431_v57  ;;  %v5110_v38 = vmul.f32 %v11460_v31, %v11460_v31 }
 0x38b   : > { %v5112_v20 = vmul.f32 %v11462_v25, %v11462_v25  ;;  %v5114_v11 = vmul.f32 %v11464_v50, %v11464_v50  ;;  %v5136_v30 = vmul.f32 %v5086_v3, %v11436_v37  ;;  %v5116_v6 = vmul.f32 %v11466_v33, %v11466_v33 }
 0x38c   : > { %v5118_v22 = vmul.f32 %v11468_v8, %v11468_v8  ;;  %v5120_v63 = vmul.f32 %v11470_v7, %v11470_v7  ;;  %v5122_v43 = vmul.f32 %v11474_v2, %v11474_v2  ;;  %v5124_v24 = vmul.f32 %v11476_v23, %v11476_v23 }
 0x38d   : > { %v5126_v47 = vmul.f32 %v11478_v46, %v11478_v46  ;;  %v5138_v62 = vmul.f32 %v5088_v51, %v11438_v53  ;;  %v5184_v39 = vmul.f32 0.044715, %v5134_v16  ;;  %v5128_v13 = vmul.f32 %v11482_v34, %v11482_v34 }
 0x38e   : > { %v5130_v3 = vmul.f32 %v11484_v29, %v11484_v29  ;;  %v5140_v12 = vmul.f32 %v5090_v18, %v11440_v15  ;;  %v5182_v17 = vmul.f32 0.044715, %v5132_v9  ;;  %v5142_v54 = vmul.f32 %v5092_v52, %v11442_v40 }
 0x38f   : > { %v5144_v42 = vmul.f32 %v5094_v36, %v11444_v48  ;;  %v5146_v59 = vmul.f32 %v5096_v10, %v11446_v0  ;;  %v5186_v45 = vmul.f32 0.044715, %v5136_v30  ;;  %v5148_v58 = vmul.f32 %v5098_v32, %v11448_v26 }
 0x390   : > { %v5150_v51 = vmul.f32 %v5100_v5, %v11450_v14  ;;  %v5152_v16 = vmul.f32 %v5102_v61, %v11452_v4  ;;  %v5154_v55 = vmul.f32 %v5104_v28, %v11454_v27  ;;  %v5156_v60 = vmul.f32 %v5106_v19, %v11456_v49 }
 0x391   : > { %v5158_v18 = vmul.f32 %v5108_v44, %v11458_v35  ;;  %v5188_v9 = vmul.f32 0.044715, %v5138_v62  ;;  %v5234_v52 = vadd.f32 %v5184_v39, %v11434_v56  ;;  %v5160_v36 = vmul.f32 %v5110_v38, %v11460_v31 }
 0x392   : > { %v5162_v10 = vmul.f32 %v5112_v20, %v11462_v25  ;;  %v5164_v30 = vmul.f32 %v5114_v11, %v11464_v50  ;;  %v5232_v32 = vadd.f32 %v5182_v17, %v11431_v57  ;;  %v5166_v5 = vmul.f32 %v5116_v6, %v11466_v33 }
 0x393   : > { %v5168_v61 = vmul.f32 %v5118_v22, %v11468_v8  ;;  %v5190_v28 = vmul.f32 0.044715, %v5140_v12  ;;  %v5236_v19 = vadd.f32 %v5186_v45, %v11436_v37  ;;  %v5170_v44 = vmul.f32 %v5120_v63, %v11470_v7 }
 0x394   : > { %v5172_v62 = vmul.f32 %v5122_v43, %v11474_v2  ;;  %v5174_v39 = vmul.f32 %v5124_v24, %v11476_v23  ;;  %v5192_v38 = vmul.f32 0.044715, %v5142_v54  ;;  %v5176_v20 = vmul.f32 %v5126_v47, %v11478_v46 }
 0x395   : > { %v5194_v41 = vmul.f32 0.044715, %v5144_v42  ;;  %v5238_v11 = vadd.f32 %v5188_v9, %v11438_v53  ;;  %v5284_v17 = vmul.f32 0.7978846, %v5234_v52  ;;  %v5178_v6 = vmul.f32 %v5128_v13, %v11482_v34 }
 0x396   : > { %v5180_v22 = vmul.f32 %v5130_v3, %v11484_v29  ;;  %v5196_v12 = vmul.f32 0.044715, %v5146_v59  ;;  %v5282_v1 = vmul.f32 0.7978846, %v5232_v32  ;;  %v5198_v45 = vmul.f32 0.044715, %v5148_v58 }
 0x397   : > { %v5200_v21 = vmul.f32 0.044715, %v5150_v51  ;;  %v5240_v63 = vadd.f32 %v5190_v28, %v11440_v15  ;;  %v5286_v43 = vmul.f32 0.7978846, %v5236_v19  ;;  %v5202_v37 = vmul.f32 0.044715, %v5152_v16 }
 0x398   : > { %v5204_v24 = vmul.f32 0.044715, %v5154_v55  ;;  %v5206_v54 = vmul.f32 0.044715, %v5156_v60  ;;  %v5242_v47 = vadd.f32 %v5192_v38, %v11442_v40  ;;  %v5208_v42 = vmul.f32 0.044715, %v5158_v18 }
 0x399   : > { %v5244_v9 = vadd.f32 %v5194_v41, %v11444_v48  ;;  %v5288_v52 = vmul.f32 0.7978846, %v5238_v11  ;;  %6525 = vtanh.f32 %v5284_v17  ;;  %v5210_v13 = vmul.f32 0.044715, %v5160_v36  ;;  %v11565_v32 = vld [vmem:[#allocation2 + $0x58] sm:$0xff]  ;;  %v14526_v55 = vld [vmem:[#allocation14_spill] sm:$0xff] }
 0x39a   : > { %v5212_v53 = vmul.f32 0.044715, %v5162_v10  ;;  %v5214_v3 = vmul.f32 0.044715, %v5164_v30  ;;  %6527 = vtanh.f32 %v5282_v1  ;;  %v5216_v59 = vmul.f32 0.044715, %v5166_v5 }
 0x39b   : > { %v5246_v58 = vadd.f32 %v5196_v12, %v11446_v0  ;;  %v5290_v51 = vmul.f32 0.7978846, %v5240_v63  ;;  %6529 = vtanh.f32 %v5286_v43  ;;  %14525 = vst [vmem:[#allocation103_spill] sm:$0xff] %v11565_v32  ;;  %v11569_v60 = vmul.f32 %v11565_v32, %v14526_v55  ;;  %v14527_v19 = vld [vmem:[#allocation62_spill] sm:$0xff]  ;;  %v14528_v38 = vld [vmem:[#allocation87_spill] sm:$0xff] }
 0x39c   : > { %v5218_v16 = vmul.f32 0.044715, %v5168_v61  ;;  %v5220_v18 = vmul.f32 0.044715, %v5170_v44  ;;  %v5292_v41 = vmul.f32 0.7978846, %v5242_v47  ;;  %v5248_v36 = vadd.f32 %v5198_v45, %v11448_v26 }
 0x39d   : > { %v5222_v28 = vmul.f32 0.044715, %v5172_v62  ;;  %v5294_v10 = vmul.f32 0.7978846, %v5244_v9  ;;  %6531 = vtanh.f32 %v5288_v52  ;;  %v5224_v1 = vmul.f32 0.044715, %v5174_v39 }
 0x39e   : > { %v5226_v30 = vmul.f32 0.044715, %v5176_v20  ;;  %v5228_v5 = vmul.f32 0.044715, %v5178_v6  ;;  %v11574_v11 = vadd.f32 %v14528_v38, %v14527_v19  ;;  %v5230_v12 = vmul.f32 0.044715, %v5180_v22 }
 0x39f   : > { %v6526_v17 = vpop.eup %6525  ;;  %v5250_v63 = vadd.f32 %v5200_v21, %v11450_v14  ;;  %v5296_v43 = vmul.f32 0.7978846, %v5246_v58  ;;  %6533 = vtanh.f32 %v5290_v51  ;;  %v5252_v44 = vadd.f32 %v5202_v37, %v11452_v4 }
 0x3a0   : > { %v6528_v61 = vpop.eup %6527  ;;  %v5254_v62 = vadd.f32 %v5204_v24, %v11454_v27  ;;  %v5256_v45 = vadd.f32 %v5206_v54, %v11456_v49  ;;  %6535 = vtanh.f32 %v5292_v41  ;;  %v5258_v20 = vadd.f32 %v5208_v42, %v11458_v35 }
 0x3a1   : > { %v6530_v39 = vpop.eup %6529  ;;  %v5260_v6 = vadd.f32 %v5210_v13, %v11460_v31  ;;  %v5298_v47 = vmul.f32 0.7978846, %v5248_v36  ;;  %6537 = vtanh.f32 %v5294_v10  ;;  %v5262_v22 = vadd.f32 %v5212_v53, %v11462_v25 }
 0x3a2   : > { %v5264_v21 = vadd.f32 %v5214_v3, %v11464_v50  ;;  %v5266_v9 = vadd.f32 %v5216_v59, %v11466_v33  ;;  %v5384_v52 = vadd.f32 1.0, %v6526_v17  ;;  %v5268_v24 = vadd.f32 %v5218_v16, %v11468_v8 }
 0x3a3   : > { %v6532_v37 = vpop.eup %6531  ;;  %v5300_v58 = vmul.f32 0.7978846, %v5250_v63  ;;  %6539 = vtanh.f32 %v5296_v43  ;;  %v5382_v54 = vadd.f32 1.0, %v6528_v61  ;;  %v5270_v51 = vadd.f32 %v5220_v18, %v11470_v7 }
 0x3a4   : > { %v5272_v42 = vadd.f32 %v5222_v28, %v11474_v2  ;;  %v5302_v13 = vmul.f32 0.7978846, %v5252_v44  ;;  %v5386_v41 = vadd.f32 1.0, %v6530_v39  ;;  %v5274_v53 = vadd.f32 %v5224_v1, %v11476_v23 }
 0x3a5   : > { %v6534_v36 = vpop.eup %6533  ;;  %v5276_v3 = vadd.f32 %v5226_v30, %v11478_v46  ;;  %v5278_v59 = vadd.f32 %v5228_v5, %v11482_v34  ;;  %6541 = vtanh.f32 %v5298_v47  ;;  %v5304_v19 = vmul.f32 0.7978846, %v5254_v62 }
 0x3a6   : > { %v6536_v10 = vpop.eup %6535  ;;  %v5306_v16 = vmul.f32 0.7978846, %v5256_v45  ;;  %v5388_v38 = vadd.f32 1.0, %v6532_v37  ;;  %v5434_v17 = vmul.f32 0.5, %v5384_v52  ;;  %v5308_v43 = vmul.f32 0.7978846, %v5258_v20 }
 0x3a7   : > { %v6538_v63 = vpop.eup %6537  ;;  %v5310_v18 = vmul.f32 0.7978846, %v5260_v6  ;;  %6543 = vtanh.f32 %v5300_v58  ;;  %v5432_v28 = vmul.f32 0.5, %v5382_v54  ;;  %v5312_v61 = vmul.f32 0.7978846, %v5262_v22 }
 0x3a8   : > { %6545 = vtanh.f32 %v5302_v13  ;;  %v5390_v44 = vadd.f32 1.0, %v6534_v36  ;;  %v5436_v39 = vmul.f32 0.5, %v5386_v41  ;;  %v5280_v30 = vadd.f32 %v5230_v12, %v11484_v29  ;;  %v14531_v12 = vld [vmem:[#allocation16_spill] sm:$0xff] }
 0x3a9   : > { %v6540_v1 = vpop.eup %6539  ;;  %v5314_v55 = vmul.f32 0.7978846, %v5264_v21  ;;  %v5316_v5 = vmul.f32 0.7978846, %v5266_v9  ;;  %v5392_v47 = vadd.f32 1.0, %v6536_v10  ;;  %6547 = vtanh.f32 %v5304_v19 }
 0x3aa   : > { %v5394_v62 = vadd.f32 1.0, %v6538_v63  ;;  %v5438_v45 = vmul.f32 0.5, %v5388_v38  ;;  %v11593_v52 = vmul.f32 %v5434_v17, %v11434_v56  ;;  %v5318_v6 = vmul.f32 0.7978846, %v5268_v24  ;;  %v14533_v24 = vld [vmem:[#allocation94_spill] sm:$0xff]  ;;  %v14535_v17 = vld [vmem:[#allocation7_spill] sm:$0xff] }
 0x3ab   : > { %v6542_v20 = vpop.eup %6541  ;;  %v5320_v37 = vmul.f32 0.7978846, %v5270_v51  ;;  %6549 = vtanh.f32 %v5306_v16  ;;  %v11596_v22 = vmul.f32 %v5432_v28, %v11431_v57  ;;  %v5396_v58 = vadd.f32 1.0, %v6540_v1  ;;  %v14536_v63 = vld [vmem:[#allocation85_spill] sm:$0xff] }
 0x3ac   : > { %14529 = vst [vmem:[#allocation120_spill] sm:$0xff] %v11593_v52  ;;  %6551 = vtanh.f32 %v5308_v43  ;;  %v5440_v54 = vmul.f32 0.5, %v5390_v44  ;;  %v11599_v21 = vmul.f32 %v5436_v39, %v14531_v12  ;;  %v5322_v13 = vmul.f32 0.7978846, %v5272_v42 }
 0x3ad   : > { %14530 = vst [vmem:[#allocation84_spill] sm:$0xff] %v11596_v22  ;;  %v6544_v9 = vpop.eup %6543  ;;  %v5324_v41 = vmul.f32 0.7978846, %v5274_v53  ;;  %6553 = vtanh.f32 %v5310_v18  ;;  %v5442_v36 = vmul.f32 0.5, %v5392_v47  ;;  %v5398_v10 = vadd.f32 1.0, %v6542_v20 }
 0x3ae   : > { %14532 = vst [vmem:[#allocation69_spill] sm:$0xff] %v11599_v21  ;;  %v6546_v56 = vpop.eup %6545  ;;  %v5444_v19 = vmul.f32 0.5, %v5394_v62  ;;  %v11602_v51 = vmul.f32 %v5438_v45, %v14533_v24  ;;  %v5532_v57 = vadd.f32 %v11593_v52, %v11596_v22  ;;  %v5326_v16 = vmul.f32 0.7978846, %v5276_v3  ;;  %v14549_v24 = vld [vmem:[#allocation6_spill] sm:$0xff]  ;;  %v14590_v52 = vld [vmem:[#allocation60_spill] sm:$0xff] }
 0x3af   : > { %v11606_v38 = vmul.f32 0.7978846, %v5278_v59  ;;  %6555 = vtanh.f32 %v5312_v61  ;;  %v2917_v43 = vadd.f32 %v14536_v63, %v14535_v17  ;;  %v6548_v42 = vpop.eup %6547  ;;  %v5400_v53 = vadd.f32 1.0, %v6544_v9  ;;  %v14545_v9 = vld [vmem:[#allocation82_spill] sm:$0xff]  ;;  %v14550_v17 = vld [vmem:[#allocation91_spill] sm:$0xff] }
 0x3b0   : > { %14534 = vst [vmem:[#allocation111_spill] sm:$0xff] %v11602_v51  ;;  %v5446_v18 = vmul.f32 0.5, %v5396_v58  ;;  %v11611_v28 = vmul.f32 %v5440_v54, %v11440_v15  ;;  %v5533_v44 = vadd.f32 %v5532_v57, %v11599_v21  ;;  %v11614_v1 = vmul.f32 0.7978846, %v5280_v30  ;;  %v14540_v58 = vld [vmem:[#allocation109_spill] sm:$0xff]  ;;  %v14551_v63 = vld [vmem:[#allocation3_spill] sm:$0xff] }
 0x3b1   : > { %v6550_v39 = vpop.eup %6549  ;;  %6557 = vtanh.f32 %v5314_v55  ;;  %v5402_v47 = vadd.f32 1.0, %v6546_v56  ;;  %v11617_v3 = vmul.f32 %v5442_v36, %v11442_v40  ;;  %v5448_v61 = vmul.f32 0.5, %v5398_v10  ;;  %v14542_v30 = vld [vmem:[#allocation81_spill] sm:$0xff]  ;;  %v14546_v40 = vld [vmem:[#allocation92_spill] sm:$0xff] }
 0x3b2   : > { %14537 = vst [vmem:[#allocation75_spill] sm:$0xff] %v11611_v28  ;;  %v6552_v59 = vpop.eup %6551  ;;  %6559 = vtanh.f32 %v5316_v5  ;;  %v11620_v62 = vmul.f32 %v5444_v19, %v11444_v48  ;;  %v5534_v45 = vadd.f32 %v5533_v44, %v11602_v51  ;;  %v5404_v20 = vadd.f32 1.0, %v6548_v42  ;;  %v14588_v51 = vld [vmem:[#allocation98_spill] sm:$0xff] }
 0x3b3   : > { %14538 = vst [vmem:[#allocation97_spill] sm:$0xff] %v11617_v3  ;;  %v6554_v15 = vpop.eup %6553  ;;  %6561 = vtanh.f32 %v5318_v6  ;;  %v14541_v54 = vrot.slane %v14540_v58, 1  ;;  %v14543_v12 = vrot.slane %v14542_v30, 1  ;;  %vm14544_vm1 = vcmask 1046528   ;;  %v14556_v30 = vld [vmem:[#allocation101_spill] sm:$0xff] }
 0x3b4   : > { %14539 = vst [vmem:[#allocation127_spill] sm:$0xff] %v11620_v62  ;;  %v3245_v36 = vsel %vm14547_vm11, %v14545_v9, 0.0  ;;  %6563 = vtanh.f32 %v5320_v37  ;;  %v5450_v5 = vmul.f32 0.5, %v5400_v53  ;;  %v11632_v48 = vmul.f32 %v5446_v18, %v11446_v0  ;;  %v14554_v53 = vld [vmem:[#allocation13_spill] sm:$0xff] }
 0x3b5   : > { %v2801_v55 = vsel %vm14544_vm1, %v14543_v12, %v14541_v54  ;;  %v5535_v56 = vadd.f32 %v5534_v45, %v11611_v28  ;;  %v6556_v10 = vpop.eup %6555  ;;  %v5406_v6 = vadd.f32 1.0, %v6550_v39  ;;  %v5452_v19 = vmul.f32 0.5, %v5402_v47  ;;  %v14555_v47 = vld [vmem:[#allocation70_spill] sm:$0xff] }
 0x3b6   : > { %14548 = vst [vmem:[#allocation37_spill] sm:$0xff] %v11632_v48  ;;  %v2919_v57 = vadd.f32 %v2801_v55, %v14549_v24  ;;  %v3247_v42 = vsel %vm14552_vm3, %v14550_v17, 0.0  ;;  %6565 = vtanh.f32 %v5322_v13  ;;  %v11640_v44 = vmul.f32 %v5448_v61, %v11448_v26 }
 0x3b7   : > { %v5536_v37 = vadd.f32 %v5535_v56, %v11617_v3  ;;  %v3297_v0 = vmul.f32 %v14554_v53, %v3245_v36  ;;  %v6558_v18 = vpop.eup %6557  ;;  %v5408_v54 = vadd.f32 1.0, %v6552_v59  ;;  %v5454_v45 = vmul.f32 0.5, %v5404_v20  ;;  %v14558_v36 = vld [vmem:[#allocation8_spill] sm:$0xff]  ;;  %v14560_v59 = vld [vmem:[#allocation57_spill] sm:$0xff] }
 0x3b8   : > { %14553 = vst [vmem:[#allocation78_spill] sm:$0xff] %v11640_v44  ;;  %v3299_v39 = vmul.f32 %v14554_v53, %v3247_v42  ;;  %v3345_v12 = vadd.f32 %v14556_v30, %v14555_v47  ;;  %v6560_v55 = vpop.eup %6559  ;;  %6567 = vtanh.f32 %v5324_v41  ;;  %v11648_v9 = vmul.f32 %v5450_v5, %v11450_v14  ;;  %v14564_v3 = vld [vmem:[#allocation80_spill] sm:$0xff] }
 0x3b9   : > { %v5537_v26 = vadd.f32 %v5536_v37, %v11620_v62  ;;  %v3347_v13 = vadd.f32 %v3297_v0, %v2917_v43  ;;  %v6562_v61 = vpop.eup %6561  ;;  %v5410_v56 = vadd.f32 1.0, %v6554_v15  ;;  %v14559_v17 = vrot.slane %v14558_v36, 6  ;;  %v14575_v36 = vld [vmem:[#allocation112_spill] sm:$0xff] }
 0x3ba   : > { %14557 = vst [vmem:[#allocation45_spill] sm:$0xff] %v11648_v9  ;;  %v3349_v24 = vadd.f32 %v3299_v39, %v2919_v57  ;;  %v14561_v20 = vrot.slane %v14560_v59, 6  ;;  %vm14562_vm7 = vcmask 1041408   ;;  %v14565_v47 = vrot.slane %v14564_v3, 6  ;;  %v6564_v5 = vpop.eup %6563  ;;  %v14570_v57 = vld [vmem:[#allocation89_spill] sm:$0xff] }
 0x3bb   : > { %v14566_v41 = vmov %v14559_v17  ;;  %vm14567_vm12 = vmmov %vm14562_vm7  ;;  %v5456_v37 = vmul.f32 0.5, %v5406_v6  ;;  %v11666_v43 = vmul.f32 %v5452_v19, %v11452_v4  ;;  %v5538_v15 = vadd.f32 %v5537_v26, %v11632_v48  ;;  %v14580_v4 = vld [vmem:[#allocation50_spill] sm:$0xff] }
 0x3bc   : > { %v11656_v42 = vsel %vm14562_vm7, %v14561_v20, %v14559_v17  ;;  %v11663_v14 = vsel %vm14567_vm12, %v14566_v41, %v14565_v47  ;;  %v14571_v0 = vrot.slane %v14570_v57, 6  ;;  %v14572_v39 = vmov %v14565_v47  ;;  %vm14573_vm2 = vmmov %vm14562_vm7  ;;  %v6566_v26 = vpop.eup %6565 }
 0x3bd   : > { %14563 = vst [vmem:[#allocation86_spill] sm:$0xff] %v11656_v42  ;;  %6569 = vtanh.f32 %v5326_v16  ;;  %v5412_v17 = vadd.f32 1.0, %v6556_v10  ;;  %v14576_v59 = vrot.slane %v14575_v36, 6  ;;  %vm14578_vm9 = vmmov %vm14573_vm2  ;;  %vm14581_vm0 = vcmp.ne.s32.totalorder %v14580_v4, 0 }
 0x3be   : > { %14568 = vst [vmem:[#allocation5_spill] sm:$0xff] %v11663_v14  ;;  %v11674_v30 = vsel %vm14573_vm2, %v14572_v39, %v14571_v0  ;;  %v14577_v20 = vmov %v14571_v0  ;;  %v3562_v19 = vsel %vm14581_vm0, %v11656_v42, 0.0  ;;  %v5458_v47 = vmul.f32 0.5, %v5408_v54  ;;  %v14582_v0 = vld [vmem:[#allocation58_spill] sm:$0xff]  ;;  %v6568_v62 = vpop.eup %6567  ;;  %v14594_v42 = vld [vmem:[#allocation104_spill] sm:$0xff] }
 0x3bf   : > { %14569 = vst [vmem:[#allocation59_spill] sm:$0xff] %v11666_v43  ;;  %v11681_v6 = vsel %vm14578_vm9, %v14577_v20, %v14576_v59  ;;  %v5539_v41 = vadd.f32 %v5538_v15, %v11640_v44  ;;  %vm14583_vm14 = vcmp.ne.s32.totalorder %v14582_v0, 0  ;;  %vm14584_vm1 = vcmp.ne.s32.totalorder %v14546_v40, 0  ;;  %v14586_v59 = vld [vmem:[#allocation18_spill] sm:$0xff] }
 0x3c0   : > { %14574 = vst [vmem:[#allocation20_spill] sm:$0xff] %v11674_v30  ;;  %v3564_v16 = vsel %vm14583_vm14, %v11663_v14, 0.0  ;;  %v3566_v10 = vsel %vm14584_vm1, %v11674_v30, 0.0  ;;  %vm14585_vm11 = vcmp.ne.s32.totalorder %v14551_v63, 0  ;;  %v3614_v20 = vmul.f32 %v14586_v59, %v3562_v19 }
 0x3c1   : > { %14579 = vst [vmem:[#allocation77_spill] sm:$0xff] %v11681_v6  ;;  %v3568_v39 = vsel %vm14585_vm11, %v11681_v6, 0.0  ;;  %v3616_v48 = vmul.f32 %v14586_v59, %v3564_v16  ;;  %v3618_v54 = vmul.f32 %v14586_v59, %v3566_v10  ;;  %v11700_v15 = vmul.f32 %v5454_v45, %v11454_v27 }
 0x3c2   : > { %v5540_v44 = vadd.f32 %v5539_v41, %v11648_v9  ;;  %v3620_v28 = vmul.f32 %v14586_v59, %v3568_v39  ;;  %v14589_v21 = vrot.slane %v14588_v51, 7  ;;  %v14591_v22 = vrot.slane %v14590_v52, 7 }
 0x3c3   : > { %14587 = vst [vmem:[#allocation47_spill] sm:$0xff] %v11700_v15  ;;  %vm14592_vm3 = vcmask 1040384   ;;  %v5414_v30 = vadd.f32 1.0, %v6558_v18  ;;  %v5460_v19 = vmul.f32 0.5, %v5410_v56  ;;  %v3664_v16 = vadd.f32 %v3614_v20, %v11574_v11  ;;  %v6570_v9 = vpop.eup %6569  ;;  %v14598_v18 = vld [vmem:[#allocation110_spill] sm:$0xff] }
 0x3c4   : > { %v3849_v6 = vsel %vm14592_vm3, %v14591_v22, %v14589_v21  ;;  %v3666_v14 = vadd.f32 %v3616_v48, %v3345_v12  ;;  %v11711_v10 = vmul.f32 %v5456_v37, %v11456_v49  ;;  %v5541_v27 = vadd.f32 %v5540_v44, %v11666_v43  ;;  %vm14596_vm7 = vmmov %vm14592_vm3 }
 0x3c5   : > { %v3668_v45 = vadd.f32 %v3618_v54, %v3347_v13  ;;  %v3670_v41 = vadd.f32 %v3620_v28, %v3349_v24  ;;  %v13693_v39 = vrot.slane %v11569_v60, 7  ;;  %6571 = vtanh.f32 %v11606_v38  ;;  %vm14601_vm12 = vmmov %vm14592_vm3  ;;  %v6658_v38 = vld [vmem:[#allocation2 + $0x140] sm:$0xff]  ;;  %v6659_v24 = vld [vmem:[#allocation2 + $0x70] sm:$0xff] }
 0x3c6   : > { %14593 = vst [vmem:[#allocation96_spill] sm:$0xff] %v11711_v10  ;;  %v5416_v52 = vadd.f32 1.0, %v6560_v55  ;;  %v14595_v22 = vrot.slane %v14594_v42, 7  ;;  %v5462_v48 = vmul.f32 0.5, %v5412_v17  ;;  %v11722_v49 = vmul.f32 %v5458_v47, %v11458_v35  ;;  %v14602_v55 = vld [vmem:[#allocation22_spill] sm:$0xff]  ;;  %vm14607_vm9 = vmmov %vm14592_vm3 }
 0x3c7   : > { %v5542_v44 = vadd.f32 %v5541_v27, %v11700_v15  ;;  %v14599_v28 = vrot.slane %v14598_v18, 7  ;;  %v11731_v56 = vmul.f32 %v6658_v38, %v14602_v55  ;;  %vm14604_vm2 = vcmp.ne.s32.totalorder %v14580_v4, 13 }
 0x3c8   : > { %v3853_v11 = vsel %vm14596_vm7, %v14589_v21, %v14595_v22  ;;  %14597 = vst [vmem:[#allocation100_spill] sm:$0xff] %v11722_v49  ;;  %v14600_v12 = vmov %v14595_v22  ;;  %v4029_v51 = vsel %vm14604_vm2, %v6659_v24, 0.0  ;;  %6573 = vtanh.f32 %v11614_v1 }
 0x3c9   : > { %v3857_v13 = vsel %vm14601_vm12, %v14600_v12, %v14599_v28  ;;  %14603 = vst [vmem:[#allocation107_spill] sm:$0xff] %v11731_v56  ;;  %v5418_v35 = vadd.f32 1.0, %v6562_v61  ;;  %v5464_v37 = vmul.f32 0.5, %v5414_v30  ;;  %v11737_v17 = vmul.f32 %v5460_v19, %v11460_v31  ;;  %v14611_v19 = vld [vmem:[#allocation41_spill] sm:$0xff] }
 0x3ca   : > { %v5543_v47 = vadd.f32 %v5542_v44, %v11711_v10  ;;  %v11740_v42 = vadd.f32 %v3849_v6, %v3664_v16  ;;  %v5420_v20 = vadd.f32 1.0, %v6564_v5  ;;  %v14606_v54 = vmov %v14599_v28  ;;  %v11760_v5 = vld [vmem:[%s13283_s3 + $0x18] ss:$0 sm:$0xff]  ;;  %v14613_v16 = vld [vmem:[#allocation73_spill] sm:$0xff] }
 0x3cb   : > { %14605 = vst [vmem:[#allocation24_spill] sm:$0xff] %v11737_v17  ;;  %v3861_v27 = vsel %vm14607_vm9, %v14606_v54, %v13693_v39  ;;  %v11747_v22 = vadd.f32 %v3853_v11, %v3666_v14  ;;  %v11749_v21 = vadd.f32 %v3857_v13, %v3668_v45  ;;  %v5466_v1 = vmul.f32 0.5, %v5416_v52  ;;  %v6572_v6 = vpop.eup %6571  ;;  %v14616_v52 = vld [vmem:[#allocation33_spill] sm:$0xff]  ;;  %v11813_v39 = vld [vmem:[#allocation2 + $0x148] sm:$0xff] }
 0x3cc   : > { %v11752_v61 = vmul.f32 %v5462_v48, %v11462_v25  ;;  %v5544_v31 = vadd.f32 %v5543_v47, %v11722_v49  ;;  %v11755_v30 = vadd.f32 %v3861_v27, %v3670_v41  ;;  %14610 = vst [vmem:[#allocation63_spill] sm:$0xff] %v11760_v5  ;;  %v11764_v14 = vmul.f32 %v11760_v5, %v14611_v19  ;;  %v14615_v25 = vld [vmem:[#allocation79_spill] sm:$0xff]  ;;  %v14618_v41 = vld [vmem:[#allocation25_spill] sm:$0xff] }
 0x3cd   : > { %v11768_v45 = vmul.f32 %v11760_v5, %v14613_v16  ;;  %v11772_v11 = vmul.f32 %v14616_v52, %v14615_v25  ;;  %v14619_v48 = vld [vmem:[#allocation15_spill] sm:$0xff]  ;;  %v5422_v18 = vadd.f32 1.0, %v6566_v26  ;;  %v5468_v28 = vmul.f32 0.5, %v5418_v35  ;;  %v14623_v47 = vld [vmem:[#allocation93_spill] sm:$0xff]  ;;  %14635 = vst [vmem:[#allocation23_spill] sm:$0xff] %v11813_v39 }
 0x3ce   : > { %14608 = vst [vmem:[#allocation48_spill] sm:$0xff] %v11752_v61  ;;  %vm14620_vm0 = vcmp.ne.s32.totalorder %v14619_v48, 13  ;;  %v11780_v12 = vmul.f32 %v5464_v37, %v11464_v50  ;;  %v5545_v13 = vadd.f32 %v5544_v31, %v11737_v17  ;;  %v6574_v38 = vpop.eup %6573  ;;  %v11785_v54 = vmul.f32 %v14616_v52, %v14623_v47  ;;  %v14625_v19 = vld [vmem:[#allocation19_spill] sm:$0xff]  ;;  %v6661_v31 = vld [vmem:[#allocation2 + $0x28] sm:$0xff] }
 0x3cf   : > { %14609 = vst [vmem:[#allocation74_spill] sm:$0xff] %v11755_v30  ;;  %v11777_v44 = vsel %vm14620_vm0, %v14618_v41, 0.0  ;;  %v11789_v16 = vmul.f32 %v14625_v19, %v4029_v51  ;;  %v11792_v25 = vmul.f32 %v6659_v24, %v14602_v55  ;;  %v5424_v26 = vadd.f32 1.0, %v6568_v62 }
 0x3d0   : > { %14612 = vst [vmem:[#allocation9_spill] sm:$0xff] %v11764_v14  ;;  %v5470_v35 = vmul.f32 0.5, %v5420_v20  ;;  %v11795_v50 = vmul.f32 %v5466_v1, %v11466_v33  ;;  %v5546_v37 = vadd.f32 %v5545_v13, %v11752_v61  ;;  %vm14628_vm14 = vcmp.ne.s32.totalorder %v14582_v0, 13  ;;  %v14631_v20 = vld [vmem:[#allocation68_spill] sm:$0xff]  ;;  %v14632_v33 = vld [vmem:[#allocation29_spill] sm:$0xff] }
 0x3d1   : > { %14614 = vst [vmem:[#allocation95_spill] sm:$0xff] %v11768_v45  ;;  %v4031_v41 = vsel %vm14628_vm14, %v6661_v31, 0.0  ;;  %v11801_v48 = vmul.f32 %v6661_v31, %v14602_v55  ;;  %v5426_v47 = vadd.f32 1.0, %v6570_v9  ;;  %v5430_v51 = vadd.f32 1.0, %v6574_v38  ;;  %v14636_v31 = vld [vmem:[#allocation102_spill] sm:$0xff]  ;;  %v14640_v61 = vld [vmem:[#allocation12_spill] sm:$0xff] }
 0x3d2   : > { %14617 = vst [vmem:[#allocation99_spill] sm:$0xff] %v11772_v11  ;;  %v5472_v27 = vmul.f32 0.5, %v5422_v18  ;;  %v11804_v24 = vmul.f32 %v5468_v28, %v11468_v8  ;;  %v5547_v62 = vadd.f32 %v5546_v37, %v11780_v12  ;;  %vm14633_vm1 = vcmp.ne.s32.totalorder %v14632_v33, 0  ;;  %v11920_v45 = vld [vmem:[#allocation2 + $0x1c0] sm:$0x3f]  ;;  %v14697_v11 = vld [vmem:[#allocation118_spill] sm:$0xff] }
 0x3d3   : > { %14621 = vst [vmem:[#allocation10_spill] sm:$0xff] %v11777_v44  ;;  %v11810_v1 = vsel %vm14633_vm1, %v14631_v20, 0.0  ;;  %vm14637_vm11 = vcmp.ne.s32.totalorder %v14636_v31, 0  ;;  %v5428_v38 = vadd.f32 1.0, %v6572_v6  ;;  %v5474_v18 = vmul.f32 0.5, %v5424_v26  ;;  %v12039_v31 = vld [vmem:[#allocation2 + $0x160] sm:$0xff] }
 0x3d4   : > { %14622 = vst [vmem:[#allocation106_spill] sm:$0xff] %v11780_v12  ;;  %v2515_v9 = vsel %vm14637_vm11, %v11813_v39, 0.0  ;;  %v11819_v8 = vmul.f32 %v5470_v35, %v11470_v7  ;;  %v5548_v28 = vadd.f32 %v5547_v62, %v11795_v50  ;;  %v6712_v37 = vmov 196.0   ;;  %v14642_v62 = vld [vmem:[#allocation11_spill] sm:$0xff]  ;;  %vm14660_vm1 = vmmov %vm14637_vm11  ;;  %v11927_v33 = vld [vmem:[#allocation2 + $0x138] sm:$0x3] }
 0x3d5   : > { %14624 = vst [vmem:[#allocation55_spill] sm:$0xff] %v11785_v54  ;;  %6575 = vrcp.f32 %v6712_v37  ;;  %v11823_v20 = vmul.f32 %v14625_v19, %v4031_v41  ;;  %v11828_v12 = vmul.f32 %v11813_v39, %v14602_v55  ;;  %v2675_v6 = vmul.f32 %v11565_v32, %v14640_v61  ;;  %v12024_v55 = vld [vmem:[#allocation2 + $0x190] sm:$0xff] }
 0x3d6   : > { %14626 = vst [vmem:[#allocation88_spill] sm:$0xff] %v11792_v25  ;;  %v5476_v26 = vmul.f32 0.5, %v5426_v47  ;;  %v5480_v17 = vmul.f32 0.5, %v5430_v51  ;;  %v11833_v7 = vmul.f32 %v5472_v27, %v11474_v2  ;;  %v5549_v35 = vadd.f32 %v5548_v28, %v11804_v24  ;;  %v12020_v25 = vld [vmem:[#allocation2 + $0x60] sm:$0xff] }
 0x3d7   : > { %14627 = vst [vmem:[#allocation108_spill] sm:$0xff] %v11795_v50  ;;  %v2567_v37 = vmul.f32 %v14642_v62, %v2515_v9  ;;  %v3132_v41 = vrot.slane %v11565_v32, 2  ;;  %v11838_v50 = vld [vmem:[#allocation2 + $0x130] sm:$0xff]  ;;  %v5478_v10 = vmul.f32 0.5, %v5428_v38  ;;  %v11846_v47 = vmul.f32 %v5474_v18, %v11476_v23  ;;  %v11869_v9 = vld [vmem:[#allocation2 + $0x40] sm:$0xff] }
 0x3d8   : > { %14629 = vst [vmem:[#allocation56_spill] sm:$0xff] %v11801_v48  ;;  %v11842_v13 = vmul.f32 %v11838_v50, %v14640_v61  ;;  %v3136_v49 = vrot.slane %v11838_v50, 2  ;;  %v5550_v2 = vadd.f32 %v5549_v35, %v11819_v8  ;;  %v3449_v27 = vrot.slane %v11838_v50, 6 }
 0x3d9   : > { %14630 = vst [vmem:[#allocation65_spill] sm:$0xff] %v11804_v24  ;;  %vm14645_vm3 = vcmp.ne.s32.totalorder %v14546_v40, 13  ;;  %v2804_v38 = vrot.slane %v2675_v6, 1  ;;  %v11861_v23 = vmul.f32 %v5476_v26, %v11478_v46  ;;  %v11864_v18 = vmul.f32 %v5480_v17, %v11484_v29  ;;  %v2641_v24 = vld [vmem:[#allocation2 + $0x1c0] sm:$0x1f] }
 0x3da   : > { %14634 = vst [vmem:[#allocation4_spill] sm:$0xff] %v11810_v1  ;;  %v11853_v51 = vsel %vm14645_vm3, %v11813_v39, 0.0  ;;  %v5551_v35 = vadd.f32 %v5550_v2, %v11833_v7  ;;  %v11873_v28 = vmul.f32 %v11869_v9, %v14640_v61  ;;  %v14648_v6 = vrot.slane %v14570_v57, 2  ;;  %v3696_v40 = vld [vmem:[#allocation2 + $0x138] sm:$0x7]  ;;  %v14699_v1 = vld [vmem:[#allocation119_spill] sm:$0xff] }
 0x3db   : > { %14638 = vst [vmem:[#allocation26_spill] sm:$0xff] %v11819_v8  ;;  %v11858_v15 = vpop.eup %6575  ;;  %vm14649_vm7 = vcmask 1045504   ;;  %v11879_v26 = vmul.f32 %v5478_v10, %v11482_v34  ;;  %v14652_v2 = vrot.slane %v14575_v36, 6  ;;  %vm14653_vm2 = vcmask 1041408  }
 0x3dc   : > { %14639 = vst [vmem:[#allocation46_spill] sm:$0xff] %v11828_v12  ;;  %v3133_v46 = vsel %vm14649_vm7, %v14648_v6, %v3132_v41  ;;  %v5552_v29 = vadd.f32 %v5551_v35, %v11846_v47  ;;  %vm14651_vm12 = vmmov %vm14649_vm7  ;;  %v5595_v57 = vmul.f32 196.0, %v11858_v15  ;;  %v14655_v6 = vld [vmem:[#allocation71_spill] sm:$0xff]  ;;  %vm14657_vm0 = vcmask 1043456  }
 0x3dd   : > { %14641 = vst [vmem:[#allocation72_spill] sm:$0xff] %v11833_v7  ;;  %v3137_v17 = vsel %vm14651_vm12, %v3132_v41, %v3136_v49  ;;  %v11886_v43 = vsel %vm14653_vm2, %v14652_v2, %v3449_v27  ;;  %vm14656_vm9 = vcmp.ne.s32.totalorder %v14655_v6, 0  ;;  %v5555_v41 = vsel %vm14657_vm0, %v11864_v18, 0.0  ;;  %vm14666_vm3 = vmmov %vm14649_vm7 }
 0x3de   : > { %14643 = vst [vmem:[#allocation17_spill] sm:$0xff] %v11838_v50  ;;  %v2517_v34 = vsel %vm14656_vm9, %v11565_v32, 0.0  ;;  %v5553_v10 = vadd.f32 %v5552_v29, %v11861_v23  ;;  %v14658_v36 = vrot.slane %v14540_v58, 1  ;;  %vm14659_vm14 = vcmask 1046528   ;;  %vm14668_vm7 = vmmov %vm14653_vm2 }
 0x3df   : > { %14644 = vst [vmem:[#allocation53_spill] sm:$0xff] %v11846_v47  ;;  %v3249_v2 = vsel %vm2960_vm10, %v3133_v46, 0.0  ;;  %v3251_v8 = vsel %vm2961_vm4, %v3137_v17, 0.0  ;;  %v3570_v29 = vsel %vm14660_vm1, %v11886_v43, 0.0  ;;  %v14663_v17 = vrot.slane %v11842_v13, 1  ;;  %vm14664_vm11 = vmmov %vm14659_vm14 }
 0x3e0   : > { %14646 = vst [vmem:[#allocation122_spill] sm:$0xff] %v11861_v23  ;;  %v2805_v35 = vsel %vm14659_vm14, %v14658_v36, %v2804_v38  ;;  %v14661_v23 = vld [vmem:[#allocation14_spill] sm:$0xff]  ;;  %v11913_v36 = vld [vmem:[#allocation2 + $0x98] sm:$0xff]  ;;  %v5554_v7 = vadd.f32 %v5553_v10, %v11879_v26  ;;  %v5596_v14 = vsub.f32 1.0, %v5595_v57  ;;  %v2569_v5 = vmul.f32 %v14642_v62, %v2517_v34  ;;  %vm14686_vm1 = vmmov %vm14664_vm11 }
 0x3e1   : > { %14647 = vst [vmem:[#allocation90_spill] sm:$0xff] %v11864_v18  ;;  %v11910_v18 = vmul.f32 %v11838_v50, %v14661_v23  ;;  %v2809_v47 = vsel %vm14664_vm11, %v2804_v38, %v14663_v17  ;;  %v2921_v44 = vadd.f32 %v2805_v35, %v2567_v37  ;;  %v11925_v58 = vmul.f32 %v14640_v61, %v2641_v24 }
 0x3e2   : > { %14650 = vst [vmem:[#allocation54_spill] sm:$0xff] %v11879_v26  ;;  %v5556_v46 = vadd.f32 %v5555_v41, %v5554_v7  ;;  %v3303_v10 = vmul.f32 %v14554_v53, %v3251_v8  ;;  %v3622_v26 = vmul.f32 %v14586_v59, %v3570_v29  ;;  %v2923_v38 = vadd.f32 %v2809_v47, %v2569_v5  ;;  %v14670_v8 = vld [vmem:[#allocation113_spill] sm:$0xff] }
 0x3e3   : > { %14654 = vst [vmem:[#allocation67_spill] sm:$0xff] %v11886_v43  ;;  %v3301_v43 = vmul.f32 %v14554_v53, %v3249_v2  ;;  %v14665_v17 = vrot.slane %v11869_v9, 2  ;;  %v14667_v37 = vrot.slane %v11869_v9, 6  ;;  %vm14671_vm12 = vcmp.ne.s32.totalorder %v14670_v8, 0 }
 0x3e4   : > { %14662 = vst [vmem:[#allocation105_spill] sm:$0xff] %v11910_v18  ;;  %v5557_v7 = vrot.slane %v5556_v46, 4  ;;  %v2519_v41 = vsel %vm14671_vm12, %v11838_v50, 0.0  ;;  %v11946_v5 = vmul.f32 %v11869_v9, %v14661_v23  ;;  %v5597_v47 = vmul.f32 %v11858_v15, %v5596_v14 }
 0x3e5   : > { %v3141_v57 = vsel %vm14666_vm3, %v3136_v49, %v14665_v17  ;;  %v11937_v34 = vsel %vm14668_vm7, %v3449_v27, %v14667_v37  ;;  %v14673_v27 = vld [vmem:[#allocation114_spill] sm:$0xff]  ;;  %v3351_v29 = vadd.f32 %v3301_v43, %v2921_v44  ;;  %v11954_v17 = vmul.f32 %v14661_v23, %v3696_v40 }
 0x3e6   : > { %14669 = vst [vmem:[#allocation123_spill] sm:$0xff] %v11937_v34  ;;  %vm14674_vm2 = vcmp.ne.s32.totalorder %v14673_v27, 0  ;;  %v5558_v37 = vadd.f32 %v5557_v7, %v5556_v46  ;;  %v3253_v35 = vsel %vm2962_vm6, %v3141_v57, 0.0  ;;  %v3572_v24 = vsel %vm14656_vm9, %v11937_v34, 0.0  ;;  %v12004_v34 = vld [vmem:[#allocation2 + $0x1b0] sm:$0xff] }
 0x3e7   : > { %14672 = vst [vmem:[#allocation124_spill] sm:$0xff] %v11946_v5  ;;  %v2521_v2 = vsel %vm14674_vm2, %v11869_v9, 0.0  ;;  %v11962_v49 = vmul.f32 %v14642_v62, %v2519_v41  ;;  %v11964_v14 = vadd.f32 %v3303_v10, %v2923_v38  ;;  %v11966_v12 = vadd.f32 %v3622_v26, %v3351_v29 }
 0x3e8   : > { %14675 = vst [vmem:[#allocation125_spill] sm:$0xff] %v11954_v17  ;;  %v14678_v43 = vrot.slane %v11910_v18, 7  ;;  %v14679_v40 = vrot.slane %v11569_v60, 7  ;;  %vm14680_vm0 = vcmask 1040384   ;;  %v5559_v46 = vrot.slane %v5558_v37, 2 }
 0x3e9   : > { %14676 = vst [vmem:[#allocation126_spill] sm:$0xff] %v11964_v14  ;;  %v11976_v57 = vmul.f32 %v14642_v62, %v2521_v2  ;;  %vm14682_vm14 = vcmp.ne.s32.totalorder %v14551_v63, 13  ;;  %v5598_v26 = vadd.f32 %v11858_v15, %v5597_v47  ;;  %v14684_v38 = vrot.slane %v11873_v28, 1 }
 0x3ea   : > { %14677 = vst [vmem:[#allocation32_spill] sm:$0xff] %v11966_v12  ;;  %v11973_v44 = vsel %vm14680_vm0, %v14679_v40, %v14678_v43  ;;  %v11982_v10 = vsel %vm14682_vm14, %v11565_v32, 0.0  ;;  %v14685_v60 = vrot.slane %v11842_v13, 1  ;;  %v11991_v29 = vmul.f32 %v14554_v53, %v3253_v35  ;;  %v14688_v40 = vld [vmem:[#allocation115_spill] sm:$0xff]  ;;  %v2410_v13 = vld [vmem:[#allocation2 + $0x1c0] sm:$0xf] }
 0x3eb   : > { %14681 = vst [vmem:[#allocation66_spill] sm:$0xff] %v11973_v44  ;;  %v11994_v2 = vmul.f32 %v14586_v59, %v3572_v24  ;;  %v5560_v43 = vadd.f32 %v5559_v46, %v5558_v37  ;;  %vm5599_vm11 = vweird.f32 %v11858_v15  ;;  %vm14689_vm3 = vcmp.ne.s32.totalorder %v14688_v40, 0  ;;  %v14690_v35 = vld [vmem:[#allocation116_spill] sm:$0xff]  ;;  %v12009_v24 = vld [vmem:[#allocation2 + $0x48] sm:$0xff]  ;;  %v14692_v37 = vld [vmem:[#allocation117_spill] sm:$0xff] }
 0x3ec   : > { %14683 = vst [vmem:[#allocation21_spill] sm:$0xff] %v11982_v10  ;;  %v2813_v41 = vsel %vm14686_vm1, %v14685_v60, %v14684_v38  ;;  %v2523_v7 = vsel %vm14689_vm3, %v11913_v36, 0.0  ;;  %v12002_v47 = vmul.f32 %v14625_v19, %v11853_v51  ;;  %vm14691_vm7 = vcmp.ne.s32.totalorder %v14690_v35, 0  ;;  %v14695_v10 = vld [vmem:[#allocation76_spill] sm:$0xff]  ;;  %vm14705_vm3 = vmmov %vm14686_vm1 }
 0x3ed   : > { %14687 = vst [vmem:[#allocation28_spill] sm:$0xff] %v11994_v2  ;;  %v2525_v38 = vsel %vm14691_vm7, %v12004_v34, 0.0  ;;  %vm14693_vm12 = vcmp.ne.s32.totalorder %v14692_v37, 0  ;;  %v2681_v60 = vmul.f32 %v11913_v36, %v14640_v61  ;;  %v2683_v51 = vmul.f32 %v12004_v34, %v14640_v61  ;;  %vm14706_vm7 = vmmov %vm14686_vm1 }
 0x3ee   : > { %v2527_v46 = vsel %vm14693_vm12, %v12009_v24, 0.0  ;;  %v5561_v63 = vrot.slane %v5560_v43, 1  ;;  %v2685_v48 = vmul.f32 %v12009_v24, %v14640_v61  ;;  %v2687_v56 = vmul.f32 %v12020_v25, %v14640_v61  ;;  %vm14707_vm12 = vmmov %vm14686_vm1 }
 0x3ef   : > { %v2689_v30 = vmul.f32 %v12024_v55, %v14640_v61  ;;  %v12031_v19 = vsel %vm5599_vm11, %v11858_v15, %v5598_v26  ;;  %vm14696_vm2 = vcmp.ne.s32.totalorder %v14695_v10, 0  ;;  %vm14698_vm9 = vcmp.ne.s32.totalorder %v14697_v11, 0  ;;  %v14701_v15 = vld [vmem:[#allocation121_spill] sm:$0xff]  ;;  %vm14704_vm11 = vmmov %vm14686_vm1 }
 0x3f0   : > { %14694 = vst [vmem:[#allocation30_spill] sm:$0xff] %v12031_v19  ;;  %v2529_v54 = vsel %vm14696_vm2, %v12020_v25, 0.0  ;;  %v2531_v6 = vsel %vm14698_vm9, %v12024_v55, 0.0  ;;  %v2691_v50 = vmul.f32 %v12039_v31, %v14640_v61  ;;  %v5562_v52 = vadd.f32 %v5561_v63, %v5560_v43  ;;  %vm14708_vm2 = vmmov %vm14686_vm1 }
 0x3f1   : > { %vm14700_vm0 = vcmp.ne.s32.totalorder %v14699_v1, 0  ;;  %vm14702_vm14 = vcmp.ne.s32.totalorder %v14701_v15, 0  ;;  %v2575_v12 = vmul.f32 %v14642_v62, %v2523_v7  ;;  %v2577_v0 = vmul.f32 %v14642_v62, %v2525_v38 }
 0x3f2   : > { %v2533_v44 = vsel %vm14700_vm0, %v12039_v31, 0.0  ;;  %v2535_v26 = vsel %vm14702_vm14, %v2410_v13, 0.0  ;;  %v2579_v4 = vmul.f32 %v14642_v62, %v2527_v46  ;;  %v2816_v17 = vrot.slane %v2681_v60, 1 }
 0x3f3   : > { %v2820_v18 = vrot.slane %v2683_v51, 1  ;;  %v5601_v5 = vmul.f32 %v12031_v19, %v5562_v52  ;;  %v2824_v32 = vrot.slane %v2685_v48, 1  ;;  %v2828_v61 = vrot.slane %v2687_v56, 1 }
 0x3f4   : > { %v2832_v63 = vrot.slane %v2689_v30, 1  ;;  %v2581_v43 = vmul.f32 %v14642_v62, %v2529_v54  ;;  %v2583_v2 = vmul.f32 %v14642_v62, %v2531_v6  ;;  %v2836_v14 = vrot.slane %v2691_v50, 1 }
 0x3f5   : > { %v3148_v13 = vrot.slane %v12004_v34, 2  ;;  %5652 = vmatmul.f32.vlgmr.msrb.gmra.mxu0 %v5601_v5  ;;  %v3152_v7 = vrot.slane %v12009_v24, 2  ;;  %v3156_v38 = vrot.slane %v12020_v25, 2  ;;  %v3160_v46 = vrot.slane %v12024_v55, 2 }
 0x3f6   : > { %v3164_v60 = vrot.slane %v12039_v31, 2  ;;  %v2585_v52 = vmul.f32 %v14642_v62, %v2533_v44  ;;  %v2587_v56 = vmul.f32 %v14642_v62, %v2535_v26  ;;  %v14703_v30 = vrot.slane %v11873_v28, 1 }
 0x3f7   : > { %v2840_v50 = vrot.slane %v11925_v58, 1  ;;  %v2821_v48 = vsel %vm14704_vm11, %v2816_v17, %v2820_v18  ;;  %v2825_v6 = vsel %vm14705_vm3, %v2820_v18, %v2824_v32  ;;  %v2829_v5 = vsel %vm14706_vm7, %v2824_v32, %v2828_v61  ;;  %vm14718_vm7 = vmmov %vm14708_vm2 }
 0x3f8   : > { %v2817_v54 = vsel %vm14686_vm1, %v14703_v30, %v2816_v17  ;;  %v2833_v51 = vsel %vm14707_vm12, %v2828_v61, %v2832_v63  ;;  %v2837_v19 = vsel %vm14708_vm2, %v2832_v63, %v2836_v14  ;;  %v2925_v44 = vadd.f32 %v2813_v41, %v11962_v49 }
 0x3f9   : > { %v14709_v62 = vrot.slane %v11913_v36, 2  ;;  %v14710_v28 = vrot.slane %v11869_v9, 2  ;;  %vm14711_vm9 = vcmask 1045504   ;;  %v2841_v49 = vsel %vm14718_vm7, %v2836_v14, %v2840_v50 }
 0x3fa   : > { %vm14713_vm0 = vmmov %vm14711_vm9  ;;  %v2927_v41 = vadd.f32 %v2817_v54, %v11976_v57  ;;  %v2929_v30 = vadd.f32 %v2821_v48, %v2575_v12  ;;  %v2931_v3 = vadd.f32 %v2825_v6, %v2577_v0  ;;  %v2933_v39 = vadd.f32 %v2829_v5, %v2579_v4 }
 0x3fb   : > { %v3145_v26 = vsel %vm14711_vm9, %v14710_v28, %v14709_v62  ;;  %v14712_v58 = vmov %v14709_v62  ;;  %vm14714_vm14 = vmmov %vm14713_vm0  ;;  %v14719_v62 = vrot.slane %v11920_v45, 2  ;;  %vm14721_vm2 = vcmp.ne.s32.totalorder %v14695_v10, 13 }
 0x3fc   : > { %v3149_v17 = vsel %vm14713_vm0, %v14712_v58, %v3148_v13  ;;  %v3153_v18 = vsel %vm14714_vm14, %v3148_v13, %v3152_v7  ;;  %vm14715_vm1 = vmmov %vm14713_vm0  ;;  %v3255_v13 = vsel %vm2963_vm8, %v3145_v26, 0.0  ;;  %vm14722_vm9 = vcmp.ne.s32.totalorder %v14697_v11, 13 }
 0x3fd   : > { %v3157_v32 = vsel %vm14715_vm1, %v3152_v7, %v3156_v38  ;;  %vm14716_vm11 = vmmov %vm14713_vm0  ;;  %v3257_v7 = vsel %vm2964_vm13, %v3149_v17, 0.0  ;;  %v2935_v12 = vadd.f32 %v2833_v51, %v2581_v43  ;;  %v2937_v57 = vadd.f32 %v2837_v19, %v2583_v2 }
 0x3fe   : > { %v3161_v61 = vsel %vm14716_vm11, %v3156_v38, %v3160_v46  ;;  %vm14717_vm3 = vmmov %vm14713_vm0  ;;  %v3259_v38 = vsel %vm2965_vm15, %v3153_v18, 0.0  ;;  %v3261_v14 = vsel %vm2966_vm5, %v3157_v32, 0.0  ;;  %v14724_v48 = vmov %v14719_v62  ;;  %v12118_v18 = vld [vmem:[#allocation2 + $0x1c0] sm:$0xff] }
 0x3ff   : > { %v3165_v63 = vsel %vm14717_vm3, %v3160_v46, %v3164_v60  ;;  %vm14720_vm12 = vmmov %vm14713_vm0  ;;  %v3263_v0 = vsel %vm14721_vm2, %v3161_v61, 0.0  ;;  %v2939_v46 = vadd.f32 %v2841_v49, %v2585_v52  ;;  %vm14723_vm0 = vcmp.ne.s32.totalorder %v14699_v1, 13  ;;  %14726 = vst [vmem:[#allocation62_spill] sm:$0xff] %v12118_v18  ;;  %v12121_v61 = vld [vmem:[#allocation2 + $0xd0] sm:$0xff] }
 0x400   : > { %v3169_v28 = vsel %vm14720_vm12, %v3164_v60, %v14719_v62  ;;  %v3265_v4 = vsel %vm14722_vm9, %v3165_v63, 0.0  ;;  %v2941_v60 = vadd.f32 %v2840_v50, %v2587_v56  ;;  %vm14725_vm14 = vcmp.ne.s32.totalorder %v14701_v15, 13  ;;  %14727 = vst [vmem:[#allocation87_spill] sm:$0xff] %v12121_v61 }
 0x401   : > { %v3267_v54 = vsel %vm14723_vm0, %v3169_v28, 0.0  ;;  %v3269_v6 = vsel %vm14725_vm14, %v14724_v48, 0.0  ;;  %v3307_v5 = vmul.f32 %v14554_v53, %v3255_v13  ;;  %v3309_v26 = vmul.f32 %v14554_v53, %v3257_v7 }
 0x402   : > { %v3311_v58 = vmul.f32 %v14554_v53, %v3259_v38  ;;  %v3313_v17 = vmul.f32 %v14554_v53, %v3261_v14  ;;  %v3315_v19 = vmul.f32 %v14554_v53, %v3263_v0  ;;  %v3317_v2 = vmul.f32 %v14554_v53, %v3265_v4 }
 0x403   : > { %v3457_v43 = vrot.slane %v11913_v36, 6  ;;  %v3461_v52 = vrot.slane %v12004_v34, 6  ;;  %v3465_v45 = vrot.slane %v12009_v24, 6  ;;  %v3469_v56 = vrot.slane %v12020_v25, 6 }
 0x404   : > { %v3473_v50 = vrot.slane %v12024_v55, 6  ;;  %v3477_v51 = vrot.slane %v12039_v31, 6  ;;  %v3481_v32 = vrot.slane %v12118_v18, 6  ;;  %v12124_v63 = vrot.slane %v12121_v61, 6 }
 0x405   : > { %v3319_v49 = vmul.f32 %v14554_v53, %v3267_v54  ;;  %v3321_v62 = vmul.f32 %v14554_v53, %v3269_v6  ;;  %v3355_v28 = vadd.f32 %v11991_v29, %v2925_v44  ;;  %v3357_v13 = vadd.f32 %v3307_v5, %v2927_v41 }
 0x406   : > { %14728 = vst [vmem:[#allocation16_spill] sm:$0xff] %v12124_v63  ;;  %v3359_v7 = vadd.f32 %v3309_v26, %v2929_v30  ;;  %v3361_v38 = vadd.f32 %v3311_v58, %v2931_v3  ;;  %v3363_v14 = vadd.f32 %v3313_v17, %v2933_v39  ;;  %v3365_v0 = vadd.f32 %v3315_v19, %v2935_v12 }
 0x407   : > { %v14729_v4 = vrot.slane %v11869_v9, 6  ;;  %vm14730_vm1 = vcmask 1041408   ;;  %v3367_v41 = vadd.f32 %v3317_v2, %v2937_v57  ;;  %v3369_v30 = vadd.f32 %v3319_v49, %v2939_v46  ;;  %v14758_v49 = vld [vmem:[#allocation23_spill] sm:$0xff] }
 0x408   : > { %vm14732_vm11 = vmmov %vm14730_vm1  ;;  %v3371_v12 = vadd.f32 %v3321_v62, %v2941_v60  ;;  %v14746_v54 = vrot.slane %v11927_v33, 6  ;;  %v12188_v2 = vadd.f32 %v11789_v16, %v11740_v42  ;;  %v3736_v16 = vmul.f32 %v12004_v34, %v14661_v23 }
 0x409   : > { %v12132_v48 = vsel %vm14730_vm1, %v14729_v4, %v3457_v43  ;;  %v12135_v18 = vsel %vm14732_vm11, %v3457_v43, %v3461_v52  ;;  %vm14734_vm3 = vmmov %vm14730_vm1  ;;  %vm14749_vm11 = vcmp.ne.s32.totalorder %v14673_v27, 0  ;;  %v12192_v43 = vadd.f32 %v11823_v20, %v11747_v22  ;;  %v14760_v4 = vld [vmem:[#allocation80_spill] sm:$0xff] }
 0x40a   : > { %14731 = vst [vmem:[#allocation94_spill] sm:$0xff] %v12132_v48  ;;  %v12138_v61 = vsel %vm14734_vm3, %v3461_v52, %v3465_v45  ;;  %vm14736_vm7 = vmmov %vm14730_vm1  ;;  %v3576_v26 = vsel %vm14749_vm11, %v12135_v18, 0.0  ;;  %vm14750_vm3 = vcmp.ne.s32.totalorder %v14688_v40, 0  ;;  %v12196_v52 = vadd.f32 %v12002_v47, %v11749_v21 }
 0x40b   : > { %14733 = vst [vmem:[#allocation7_spill] sm:$0xff] %v12135_v18  ;;  %v12141_v53 = vsel %vm14736_vm7, %v3465_v45, %v3469_v56  ;;  %vm14738_vm12 = vmmov %vm14730_vm1  ;;  %v3578_v58 = vsel %vm14750_vm3, %v12138_v61, 0.0  ;;  %vm14751_vm7 = vcmp.ne.s32.totalorder %v14690_v35, 0  ;;  %v3734_v22 = vmul.f32 %v11913_v36, %v14661_v23 }
 0x40c   : > { %14735 = vst [vmem:[#allocation85_spill] sm:$0xff] %v12138_v61  ;;  %v12144_v29 = vsel %vm14738_vm12, %v3469_v56, %v3473_v50  ;;  %vm14740_vm2 = vmmov %vm14730_vm1  ;;  %v3580_v57 = vsel %vm14751_vm7, %v12141_v53, 0.0  ;;  %vm14752_vm12 = vcmp.ne.s32.totalorder %v14692_v37, 0  ;;  %v3628_v56 = vmul.f32 %v14586_v59, %v3576_v26 }
 0x40d   : > { %14737 = vst [vmem:[#allocation109_spill] sm:$0xff] %v12141_v53  ;;  %v12147_v3 = vsel %vm14740_vm2, %v3473_v50, %v3477_v51  ;;  %vm14742_vm9 = vmmov %vm14730_vm1  ;;  %v3582_v33 = vsel %vm14752_vm12, %v12144_v29, 0.0  ;;  %vm14753_vm2 = vcmp.ne.s32.totalorder %v14695_v10, 0  ;;  %v3630_v50 = vmul.f32 %v14586_v59, %v3578_v58 }
 0x40e   : > { %14739 = vst [vmem:[#allocation81_spill] sm:$0xff] %v12144_v29  ;;  %v12150_v39 = vsel %vm14742_vm9, %v3477_v51, %v3481_v32  ;;  %vm14744_vm0 = vmmov %vm14730_vm1  ;;  %vm14748_vm1 = vcmp.ne.s32.totalorder %v14670_v8, 0  ;;  %v3584_v46 = vsel %vm14753_vm2, %v12147_v3, 0.0  ;;  %vm14754_vm9 = vcmp.ne.s32.totalorder %v14697_v11, 0 }
 0x40f   : > { %14741 = vst [vmem:[#allocation82_spill] sm:$0xff] %v12147_v3  ;;  %v12154_v44 = vsel %vm14744_vm0, %v3481_v32, %v12124_v63  ;;  %vm14747_vm14 = vmmov %vm14744_vm0  ;;  %v3574_v5 = vsel %vm14748_vm1, %v12132_v48, 0.0  ;;  %v3586_v60 = vsel %vm14754_vm9, %v12150_v39, 0.0  ;;  %vm14755_vm0 = vcmp.ne.s32.totalorder %v14699_v1, 0  ;;  %v14765_v3 = vld [vmem:[#allocation62_spill] sm:$0xff] }
 0x410   : > { %14743 = vst [vmem:[#allocation6_spill] sm:$0xff] %v12150_v39  ;;  %v3490_v6 = vsel %vm14747_vm14, %v12124_v63, %v14746_v54  ;;  %v3588_v17 = vsel %vm14755_vm0, %v12154_v44, 0.0  ;;  %vm14756_vm14 = vcmp.ne.s32.totalorder %v14701_v15, 0  ;;  %v3626_v45 = vmul.f32 %v14586_v59, %v3574_v5 }
 0x411   : > { %14745 = vst [vmem:[#allocation91_spill] sm:$0xff] %v12154_v44  ;;  %v3590_v19 = vsel %vm14756_vm14, %v3490_v6, 0.0  ;;  %v3632_v51 = vmul.f32 %v14586_v59, %v3580_v57  ;;  %v3634_v32 = vmul.f32 %v14586_v59, %v3582_v33  ;;  %v3636_v42 = vmul.f32 %v14586_v59, %v3584_v46  ;;  %v14763_v33 = vld [vmem:[#allocation126_spill] sm:$0xff]  ;;  %v14764_v46 = vld [vmem:[#allocation28_spill] sm:$0xff] }
 0x412   : > { %14757 = vst [vmem:[#allocation13_spill] sm:$0xff] %v12196_v52  ;;  %v3738_v21 = vmul.f32 %v12009_v24, %v14661_v23  ;;  %v3740_v20 = vmul.f32 %v12020_v25, %v14661_v23  ;;  %v3742_v47 = vmul.f32 %v12024_v55, %v14661_v23  ;;  %v14759_v62 = vrot.slane %v14758_v49, 4 }
 0x413   : > { %v14761_v54 = vrot.slane %v14760_v4, 4  ;;  %vm14762_vm1 = vcmask 1043456   ;;  %v3638_v5 = vmul.f32 %v14586_v59, %v3586_v60  ;;  %v3640_v26 = vmul.f32 %v14586_v59, %v3588_v17  ;;  %v14766_v4 = vld [vmem:[#allocation87_spill] sm:$0xff] }
 0x414   : > { %v3642_v58 = vmul.f32 %v14586_v59, %v3590_v19  ;;  %v3744_v57 = vmul.f32 %v12039_v31, %v14661_v23  ;;  %v3674_v44 = vadd.f32 %v14764_v46, %v14763_v33  ;;  %v3676_v39 = vadd.f32 %v3626_v45, %v3355_v28  ;;  %v14767_v46 = vld [vmem:[#allocation103_spill] sm:$0xff]  ;;  %vm14770_vm11 = vmmov %vm14762_vm1 }
 0x415   : > { %v4218_v6 = vsel %vm14762_vm1, %v14761_v54, %v14759_v62  ;;  %v3746_v29 = vmul.f32 %v14765_v3, %v14661_v23  ;;  %v3748_v53 = vmul.f32 %v14766_v4, %v14661_v23  ;;  %v3678_v62 = vadd.f32 %v3628_v56, %v3357_v13 }
 0x416   : > { %v3680_v54 = vadd.f32 %v3630_v50, %v3359_v7  ;;  %v3872_v60 = vrot.slane %v3734_v22, 7  ;;  %v3876_v61 = vrot.slane %v3736_v16, 7  ;;  %v3682_v17 = vadd.f32 %v3632_v51, %v3361_v38  ;;  %v14771_v7 = vld [vmem:[#allocation124_spill] sm:$0xff]  ;;  %v14773_v38 = vld [vmem:[#allocation105_spill] sm:$0xff]  ;;  %v14787_v16 = vld [vmem:[#allocation50_spill] sm:$0xff] }
 0x417   : > { %v3880_v18 = vrot.slane %v3738_v21, 7  ;;  %v3884_v59 = vrot.slane %v3740_v20, 7  ;;  %v3888_v19 = vrot.slane %v3742_v47, 7  ;;  %v3684_v63 = vadd.f32 %v3634_v32, %v3363_v14  ;;  %v14789_v20 = vld [vmem:[#allocation58_spill] sm:$0xff] }
 0x418   : > { %v3686_v48 = vadd.f32 %v3636_v42, %v3365_v0  ;;  %v3688_v52 = vadd.f32 %v3638_v5, %v3367_v41  ;;  %v3892_v15 = vrot.slane %v3744_v57, 7  ;;  %v3690_v33 = vadd.f32 %v3640_v26, %v3369_v30  ;;  %v14786_v42 = vld [vmem:[#allocation125_spill] sm:$0xff]  ;;  %v14794_v5 = vld [vmem:[#allocation66_spill] sm:$0xff] }
 0x419   : > { %v3896_v28 = vrot.slane %v3746_v29, 7  ;;  %v3900_v45 = vrot.slane %v3748_v53, 7  ;;  %v14768_v1 = vrot.slane %v14767_v46, 4  ;;  %v14769_v11 = vrot.slane %v14758_v49, 4  ;;  %v14793_v49 = vld [vmem:[#allocation32_spill] sm:$0xff] }
 0x41a   : > { %v3692_v13 = vadd.f32 %v3642_v58, %v3371_v12  ;;  %v14772_v56 = vrot.slane %v14771_v7, 7  ;;  %v14774_v50 = vrot.slane %v14773_v38, 7  ;;  %vm14775_vm3 = vcmask 1040384  }
 0x41b   : > { %v4222_v23 = vsel %vm14770_vm11, %v14769_v11, %v14768_v1  ;;  %vm14777_vm7 = vmmov %vm14775_vm3  ;;  %v14782_v11 = vld [vmem:[#allocation83_spill] sm:$0xff]  ;;  %v14783_v1 = vld [vmem:[#allocation44_spill] sm:$0xff]  ;;  %v3904_v22 = vrot.slane %v14786_v42, 7  ;;  %vm14788_vm11 = vcmp.ne.s32.totalorder %v14787_v16, 0  ;;  %v3985_v26 = vadd.f32 %v14794_v5, %v14793_v49 }
 0x41c   : > { %v3869_v51 = vsel %vm14775_vm3, %v14774_v50, %v14772_v56  ;;  %v14776_v14 = vmov %v14772_v56  ;;  %vm14778_vm12 = vmmov %vm14775_vm3  ;;  %vm14784_vm14 = vcmp.ne.s32.totalorder %v14783_v1, 0  ;;  %v4342_v21 = vsel %vm14788_vm11, %v4218_v6, 0.0  ;;  %v14808_v49 = vld [vmem:[#allocation118_spill] sm:$0xff]  ;;  %v14810_v5 = vld [vmem:[#allocation119_spill] sm:$0xff] }
 0x41d   : > { %v3873_v0 = vsel %vm14777_vm7, %v14776_v14, %v3872_v60  ;;  %v3877_v29 = vsel %vm14778_vm12, %v3872_v60, %v3876_v61  ;;  %vm14779_vm2 = vmmov %vm14775_vm3  ;;  %v4340_v12 = vsel %vm14784_vm14, %v14782_v11, 0.0  ;;  %vm14790_vm3 = vcmp.ne.s32.totalorder %v14789_v20, 0  ;;  %v14816_v1 = vld [vmem:[#allocation74_spill] sm:$0xff] }
 0x41e   : > { %v3881_v53 = vsel %vm14779_vm2, %v3876_v61, %v3880_v18  ;;  %vm14780_vm9 = vmmov %vm14779_vm2  ;;  %v4344_v47 = vsel %vm14790_vm3, %v4222_v23, 0.0  ;;  %v3987_v58 = vadd.f32 %v3869_v51, %v3674_v44  ;;  %v3989_v57 = vadd.f32 %v3873_v0, %v3676_v39  ;;  %v14798_v39 = vld [vmem:[#allocation17_spill] sm:$0xff]  ;;  %v14800_v0 = vld [vmem:[#allocation71_spill] sm:$0xff] }
 0x41f   : > { %v3885_v41 = vsel %vm14780_vm9, %v3880_v18, %v3884_v59  ;;  %vm14781_vm0 = vmmov %vm14779_vm2  ;;  %v3991_v60 = vadd.f32 %v3877_v29, %v3678_v62  ;;  %v3993_v38 = vadd.f32 %v3881_v53, %v3680_v54  ;;  %v14799_v62 = vld [vmem:[#allocation102_spill] sm:$0xff]  ;;  %v4037_v51 = vsel %vm2960_vm10, %v14798_v39, 0.0  ;;  %v14802_v53 = vld [vmem:[#allocation99_spill] sm:$0xff] }
 0x420   : > { %v3889_v30 = vsel %vm14781_vm0, %v3884_v59, %v3888_v19  ;;  %vm14785_vm1 = vmmov %vm14781_vm0  ;;  %v14795_v59 = vld [vmem:[#allocation4_spill] sm:$0xff]  ;;  %v3995_v6 = vadd.f32 %v3885_v41, %v3682_v17  ;;  %v4039_v54 = vsel %vm2961_vm4, %v11869_v9, 0.0  ;;  %v14801_v29 = vld [vmem:[#allocation42_spill] sm:$0xff]  ;;  %vm14807_vm9 = vcmp.ne.s32.totalorder %v14695_v10, 13 }
 0x421   : > { %v3893_v32 = vsel %vm14785_vm1, %v3888_v19, %v3892_v15  ;;  %vm14791_vm7 = vmmov %vm14781_vm0  ;;  %v14796_v19 = vld [vmem:[#allocation33_spill] sm:$0xff]  ;;  %v4007_v17 = vld [vmem:[#allocation2 + $0x138] sm:$0xf]  ;;  %v4436_v41 = vadd.f32 %v14802_v53, %v14801_v29  ;;  %vm14811_vm14 = vcmp.ne.s32.totalorder %v14810_v5, 13  ;;  %vm14822_vm11 = vcmask 1042432  }
 0x422   : > { %v3897_v61 = vsel %vm14791_vm7, %v3892_v15, %v3896_v28  ;;  %vm14792_vm12 = vmmov %vm14781_vm0  ;;  %v4390_v7 = vmul.f32 %v14796_v19, %v14795_v59  ;;  %v4392_v56 = vmul.f32 %v14796_v19, %v4340_v12  ;;  %v4394_v50 = vmul.f32 %v14796_v19, %v4342_v21  ;;  %v14803_v12 = vld [vmem:[#allocation40_spill] sm:$0xff]  ;;  %v14804_v21 = vld [vmem:[#allocation55_spill] sm:$0xff] }
 0x423   : > { %v3901_v18 = vsel %vm14792_vm12, %v3896_v28, %v3900_v45  ;;  %v4396_v23 = vmul.f32 %v14796_v19, %v4344_v47  ;;  %vm14797_vm2 = vmmov %vm14781_vm0  ;;  %v3997_v28 = vadd.f32 %v3889_v30, %v3684_v63  ;;  %v3999_v14 = vadd.f32 %v3893_v32, %v3686_v48  ;;  %v14805_v63 = vld [vmem:[#allocation52_spill] sm:$0xff] }
 0x424   : > { %v3905_v15 = vsel %vm14797_vm2, %v3900_v45, %v3904_v22  ;;  %v4001_v11 = vadd.f32 %v3897_v61, %v3688_v52  ;;  %v4003_v42 = vadd.f32 %v3901_v18, %v3690_v33  ;;  %v12276_v45 = vadd.f32 %v14804_v21, %v14803_v12  ;;  %v14806_v52 = vld [vmem:[#allocation64_spill] sm:$0xff]  ;;  %vm14826_vm3 = vmmov %vm14822_vm11 }
 0x425   : > { %v4005_v44 = vadd.f32 %v3905_v15, %v3692_v13  ;;  %v12279_v48 = vadd.f32 %v4390_v7, %v14805_v63  ;;  %v12282_v33 = vadd.f32 %v4392_v56, %v14806_v52  ;;  %v4041_v13 = vsel %vm2962_vm6, %v11913_v36, 0.0  ;;  %v14812_v7 = vld [vmem:[#allocation121_spill] sm:$0xff]  ;;  %vm14830_vm7 = vmmov %vm14826_vm3 }
 0x426   : > { %v4043_v30 = vsel %vm2963_vm8, %v12004_v34, 0.0  ;;  %v12291_v32 = vadd.f32 %v4394_v50, %v12188_v2  ;;  %v12294_v22 = vadd.f32 %v4396_v23, %v12192_v43  ;;  %v4045_v47 = vsel %vm2964_vm13, %v12009_v24, 0.0  ;;  %v14814_v50 = vld [vmem:[#allocation21_spill] sm:$0xff]  ;;  %v14815_v23 = vld [vmem:[#allocation19_spill] sm:$0xff]  ;;  %vm14834_vm12 = vmmov %vm14826_vm3 }
 0x427   : > { %v4047_v61 = vsel %vm2965_vm15, %v12020_v25, 0.0  ;;  %v4049_v18 = vsel %vm2966_vm5, %v12024_v55, 0.0  ;;  %v4051_v2 = vsel %vm14807_vm9, %v12039_v31, 0.0  ;;  %vm14809_vm0 = vcmp.ne.s32.totalorder %v14808_v49, 13 }
 0x428   : > { %v4053_v43 = vsel %vm14809_vm0, %v14765_v3, 0.0  ;;  %v4055_v59 = vsel %vm14811_vm14, %v14766_v4, 0.0  ;;  %vm14813_vm1 = vcmp.ne.s32.totalorder %v14812_v7, 13  ;;  %v4087_v15 = vmul.f32 %v14815_v23, %v14814_v50  ;;  %v14817_v7 = vld [vmem:[#allocation22_spill] sm:$0xff] }
 0x429   : > { %v4057_v56 = vsel %vm14813_vm1, %v4007_v17, 0.0  ;;  %v4089_v29 = vmul.f32 %v14815_v23, %v4037_v51  ;;  %v4091_v53 = vmul.f32 %v14815_v23, %v4039_v54  ;;  %v4093_v12 = vmul.f32 %v14815_v23, %v4041_v13 }
 0x42a   : > { %v4095_v21 = vmul.f32 %v14815_v23, %v4043_v30  ;;  %v4097_v63 = vmul.f32 %v14815_v23, %v4045_v47  ;;  %v4099_v52 = vmul.f32 %v14815_v23, %v4047_v61  ;;  %v4101_v20 = vmul.f32 %v14815_v23, %v4049_v18  ;;  %v6673_v18 = vld [vmem:[#allocation2 + $0x58] sm:$0xff] }
 0x42b   : > { %v4103_v16 = vmul.f32 %v14815_v23, %v4051_v2  ;;  %v4105_v17 = vmul.f32 %v14815_v23, %v4053_v43  ;;  %v4107_v50 = vmul.f32 %v14815_v23, %v4055_v59  ;;  %v4109_v51 = vmul.f32 %v14815_v23, %v4057_v56  ;;  %v14818_v43 = vld [vmem:[#allocation107_spill] sm:$0xff]  ;;  %v14820_v59 = vld [vmem:[#allocation49_spill] sm:$0xff] }
 0x42c   : > { %v12330_v54 = vadd.f32 %v4087_v15, %v14816_v1  ;;  %v12332_v13 = vadd.f32 %v4089_v29, %v3985_v26  ;;  %v12334_v30 = vadd.f32 %v4091_v53, %v3987_v58  ;;  %v12336_v47 = vadd.f32 %v4093_v12, %v3989_v57  ;;  %v14823_v1 = vld [vmem:[#allocation88_spill] sm:$0xff] }
 0x42d   : > { %v12338_v61 = vadd.f32 %v4095_v21, %v3991_v60  ;;  %v12341_v2 = vmul.f32 %v6673_v18, %v14817_v7  ;;  %v14819_v5 = vrot.slane %v14818_v43, 5  ;;  %v14821_v49 = vrot.slane %v14820_v59, 5  ;;  %v14827_v57 = vld [vmem:[#allocation56_spill] sm:$0xff]  ;;  %v14831_v18 = vld [vmem:[#allocation46_spill] sm:$0xff] }
 0x42e   : > { %v14824_v23 = vrot.slane %v14823_v1, 5  ;;  %v14828_v15 = vrot.slane %v14827_v57, 5  ;;  %v12358_v53 = vadd.f32 %v4097_v63, %v3993_v38  ;;  %v12360_v12 = vadd.f32 %v4099_v52, %v3995_v6  ;;  %v12382_v57 = vld [vmem:[#allocation2 + $0x138] sm:$0xff] }
 0x42f   : > { %v4617_v56 = vsel %vm14822_vm11, %v14821_v49, %v14819_v5  ;;  %v14825_v26 = vmov %v14819_v5  ;;  %v4233_v21 = vrot.slane %v11913_v36, 4  ;;  %v14832_v49 = vrot.slane %v14831_v18, 5 }
 0x430   : > { %v4621_v58 = vsel %vm14826_vm3, %v14825_v26, %v14824_v23  ;;  %v14829_v60 = vmov %v14824_v23  ;;  %v14833_v5 = vmov %v14828_v15  ;;  %v12368_v59 = vadd.f32 %v4101_v20, %v3997_v28 }
 0x431   : > { %v4625_v29 = vsel %vm14830_vm7, %v14829_v60, %v14828_v15  ;;  %v4629_v43 = vsel %vm14834_vm12, %v14833_v5, %v14832_v49  ;;  %v4237_v23 = vrot.slane %v12004_v34, 4  ;;  %v4241_v1 = vrot.slane %v12009_v24, 4 }
 0x432   : > { %v4245_v26 = vrot.slane %v12020_v25, 4  ;;  %v12373_v38 = vadd.f32 %v4103_v16, %v3999_v14  ;;  %v12375_v6 = vadd.f32 %v4105_v17, %v4001_v11  ;;  %v12377_v63 = vadd.f32 %v4107_v50, %v4003_v42 }
 0x433   : > { %v4249_v52 = vrot.slane %v12024_v55, 4  ;;  %v12380_v15 = vadd.f32 %v4109_v51, %v4005_v44  ;;  %v4253_v20 = vrot.slane %v12039_v31, 4  ;;  %v4257_v28 = vrot.slane %v14765_v3, 4 }
 0x434   : > { %14835 = vst [vmem:[#allocation70_spill] sm:$0xff] %v12373_v38  ;;  %v4632_v60 = vrot.slane %v12341_v2, 5  ;;  %v14839_v49 = vrot.slane %v14798_v39, 4  ;;  %v14840_v16 = vrot.slane %v14767_v46, 4  ;;  %vm14841_vm2 = vcmask 1043456  }
 0x435   : > { %14836 = vst [vmem:[#allocation101_spill] sm:$0xff] %v12375_v6  ;;  %v14842_v11 = vrot.slane %v11869_v9, 4  ;;  %vm14844_vm9 = vmmov %vm14841_vm2  ;;  %v4261_v51 = vrot.slane %v14766_v4, 4  ;;  %v12426_v38 = vadd.f32 %v4625_v29, %v12282_v33 }
 0x436   : > { %14837 = vst [vmem:[#allocation8_spill] sm:$0xff] %v12377_v63  ;;  %v4226_v14 = vsel %vm14841_vm2, %v14840_v16, %v14839_v49  ;;  %v14843_v42 = vmov %v14839_v49  ;;  %vm14846_vm0 = vmmov %vm14841_vm2  ;;  %v4265_v63 = vrot.slane %v12382_v57, 4  ;;  %vm14855_vm2 = vcmask 1042432  }
 0x437   : > { %14838 = vst [vmem:[#allocation57_spill] sm:$0xff] %v12380_v15  ;;  %v4230_v44 = vsel %vm14844_vm9, %v14843_v42, %v14842_v11  ;;  %v14845_v17 = vmov %v14842_v11  ;;  %vm14847_vm14 = vmmov %vm14846_vm0  ;;  %v14850_v15 = vld [vmem:[#allocation51_spill] sm:$0xff]  ;;  %v12409_v11 = vld [vmem:[#allocation2 + $0x80] sm:$0xff] }
 0x438   : > { %v4234_v50 = vsel %vm14846_vm0, %v14845_v17, %v4233_v21  ;;  %v4238_v2 = vsel %vm14847_vm14, %v4233_v21, %v4237_v23  ;;  %vm14848_vm1 = vmmov %vm14846_vm0  ;;  %v12405_v49 = vadd.f32 %v14850_v15, %v4436_v41  ;;  %v4269_v42 = vrot.slane %v12409_v11, 4 }
 0x439   : > { %v4242_v5 = vsel %vm14848_vm1, %v4237_v23, %v4241_v1  ;;  %vm14849_vm11 = vmmov %vm14846_vm0  ;;  %v12413_v17 = vadd.f32 %v4617_v56, %v12276_v45  ;;  %v12421_v15 = vadd.f32 %v4621_v58, %v12279_v48  ;;  %v12429_v45 = vadd.f32 %v4629_v43, %v12291_v32 }
 0x43a   : > { %v4246_v46 = vsel %vm14849_vm11, %v4241_v1, %v4245_v26  ;;  %vm14851_vm3 = vmmov %vm14846_vm0  ;;  %v14854_v1 = vrot.slane %v14831_v18, 5  ;;  %vm14860_vm14 = vcmp.ne.s32.totalorder %v14799_v62, 0  ;;  %v4506_v48 = vmul.f32 %v14798_v39, %v14817_v7  ;;  %v14905_v62 = vld [vmem:[#allocation31_spill] sm:$0xff] }
 0x43b   : > { %v4250_v16 = vsel %vm14851_vm3, %v4245_v26, %v4249_v52  ;;  %vm14852_vm7 = vmmov %vm14846_vm0  ;;  %v14856_v26 = vld [vmem:[#allocation92_spill] sm:$0xff]  ;;  %v4508_v58 = vmul.f32 %v11869_v9, %v14817_v7  ;;  %v4262_v33 = vsel %vm14848_vm1, %v4257_v28, %v4261_v51 }
 0x43c   : > { %v4254_v21 = vsel %vm14852_vm7, %v4249_v52, %v4253_v20  ;;  %vm14853_vm12 = vmmov %vm14846_vm0  ;;  %v4633_v41 = vsel %vm14855_vm2, %v14854_v1, %v4632_v60  ;;  %vm14857_vm9 = vcmp.ne.s32.totalorder %v14856_v26, 0  ;;  %v14858_v52 = vld [vmem:[#allocation3_spill] sm:$0xff]  ;;  %vm14863_vm7 = vcmp.ne.s32.totalorder %v14800_v0, 0 }
 0x43d   : > { %v4258_v23 = vsel %vm14853_vm12, %v4253_v20, %v4257_v28  ;;  %v4346_v6 = vsel %vm14857_vm9, %v4226_v14, 0.0  ;;  %v12432_v56 = vadd.f32 %v4633_v41, %v12294_v22  ;;  %vm14859_vm0 = vcmp.ne.s32.totalorder %v14858_v52, 0  ;;  %vm14861_vm11 = vmmov %vm14848_vm1  ;;  %v14872_v1 = vld [vmem:[#allocation119_spill] sm:$0xff]  ;;  %v14874_v41 = vld [vmem:[#allocation121_spill] sm:$0xff] }
 0x43e   : > { %v4348_v18 = vsel %vm14859_vm0, %v4230_v44, 0.0  ;;  %v4350_v20 = vsel %vm14860_vm14, %v4234_v50, 0.0  ;;  %v4266_v32 = vsel %vm14861_vm11, %v4261_v51, %v4265_v63  ;;  %vm14862_vm3 = vmmov %vm14848_vm1  ;;  %v12447_v22 = vmul.f32 %v11913_v36, %v14817_v7 }
 0x43f   : > { %v4270_v29 = vsel %vm14862_vm3, %v4265_v63, %v4269_v42  ;;  %v4352_v43 = vsel %vm14863_vm7, %v4238_v2, 0.0  ;;  %vm14864_vm12 = vcmp.ne.s32.totalorder %v14670_v8, 0  ;;  %vm14865_vm2 = vcmp.ne.s32.totalorder %v14673_v27, 0 }
 0x440   : > { %v4354_v14 = vsel %vm14864_vm12, %v4242_v5, 0.0  ;;  %v4356_v39 = vsel %vm14865_vm2, %v4246_v46, 0.0  ;;  %v4398_v9 = vmul.f32 %v14796_v19, %v4346_v6  ;;  %vm14866_vm9 = vcmp.ne.s32.totalorder %v14688_v40, 0  ;;  %v14870_v46 = vld [vmem:[#allocation118_spill] sm:$0xff] }
 0x441   : > { %v4358_v28 = vsel %vm14866_vm9, %v4250_v16, 0.0  ;;  %vm14867_vm0 = vcmp.ne.s32.totalorder %v14690_v35, 0  ;;  %v4400_v36 = vmul.f32 %v14796_v19, %v4348_v18  ;;  %v4402_v44 = vmul.f32 %v14796_v19, %v4350_v20  ;;  %v14894_v35 = vld [vmem:[#allocation58_spill] sm:$0xff] }
 0x442   : > { %v4360_v63 = vsel %vm14867_vm0, %v4254_v21, 0.0  ;;  %vm14868_vm14 = vcmp.ne.s32.totalorder %v14692_v37, 0  ;;  %vm14869_vm1 = vcmp.ne.s32.totalorder %v14695_v10, 0  ;;  %v4636_v2 = vrot.slane %v4506_v48, 5  ;;  %v14891_v10 = vld [vmem:[#allocation50_spill] sm:$0xff]  ;;  %v14893_v37 = vld [vmem:[#allocation77_spill] sm:$0xff] }
 0x443   : > { %v4362_v50 = vsel %vm14868_vm14, %v4258_v23, 0.0  ;;  %v4364_v51 = vsel %vm14869_vm1, %v4262_v33, 0.0  ;;  %v4640_v5 = vrot.slane %v4508_v58, 5  ;;  %vm14871_vm11 = vcmp.ne.s32.totalorder %v14870_v46, 0  ;;  %v14876_v58 = vld [vmem:[#allocation13_spill] sm:$0xff] }
 0x444   : > { %v4366_v6 = vsel %vm14871_vm11, %v4266_v32, 0.0  ;;  %vm14873_vm3 = vcmp.ne.s32.totalorder %v14872_v1, 0  ;;  %vm14875_vm7 = vcmp.ne.s32.totalorder %v14874_v41, 0  ;;  %v12474_v20 = vmul.f32 %v14796_v19, %v4352_v43  ;;  %v14882_v41 = vld [vmem:[#allocation39_spill] sm:$0xff]  ;;  %v14888_v1 = vld [vmem:[#allocation44_spill] sm:$0xff] }
 0x445   : > { %v4368_v16 = vsel %vm14873_vm3, %v4270_v29, 0.0  ;;  %v4370_v21 = vsel %vm14875_vm7, %v4269_v42, 0.0  ;;  %v12477_v23 = vmul.f32 %v14796_v19, %v4354_v14  ;;  %v12480_v48 = vmul.f32 %v14796_v19, %v4356_v39 }
 0x446   : > { %v4448_v33 = vadd.f32 %v4398_v9, %v14876_v58  ;;  %v12484_v32 = vmul.f32 %v14796_v19, %v4358_v28  ;;  %v12487_v29 = vmul.f32 %v14796_v19, %v4360_v63  ;;  %v4450_v42 = vadd.f32 %v4400_v36, %v12330_v54  ;;  %v14881_v63 = vld [vmem:[#allocation61_spill] sm:$0xff]  ;;  %v14884_v36 = vld [vmem:[#allocation86_spill] sm:$0xff] }
 0x447   : > { %v4452_v18 = vadd.f32 %v4402_v44, %v12332_v13  ;;  %v12492_v43 = vmul.f32 %v14796_v19, %v4362_v50  ;;  %v12495_v14 = vmul.f32 %v14796_v19, %v4364_v51  ;;  %vm14877_vm12 = vcmask 1042432   ;;  %v14885_v13 = vld [vmem:[#allocation29_spill] sm:$0xff] }
 0x448   : > { %v4637_v39 = vsel %vm14877_vm12, %v4632_v60, %v4636_v2  ;;  %vm14878_vm2 = vmmov %vm14877_vm12  ;;  %v14879_v28 = vrot.slane %v12447_v22, 5  ;;  %vm14883_vm0 = vcmp.ne.s32.totalorder %v14882_v41, 13  ;;  %vm14886_vm14 = vcmp.ne.s32.totalorder %v14885_v13, 13  ;;  %v14887_v50 = vld [vmem:[#allocation5_spill] sm:$0xff]  ;;  %v14890_v60 = vld [vmem:[#allocation20_spill] sm:$0xff] }
 0x449   : > { %v4641_v9 = vsel %vm14878_vm2, %v4636_v2, %v4640_v5  ;;  %vm14880_vm9 = vmmov %vm14878_vm2  ;;  %v4833_v54 = vsel %vm14883_vm0, %v14881_v63, 0.0  ;;  %v4835_v44 = vsel %vm14886_vm14, %v14884_v36, 0.0  ;;  %vm14889_vm1 = vcmp.ne.s32.totalorder %v14888_v1, 13  ;;  %v14898_v36 = vld [vmem:[#allocation123_spill] sm:$0xff] }
 0x44a   : > { %v4645_v58 = vsel %vm14880_vm9, %v4640_v5, %v14879_v28  ;;  %v4837_v51 = vsel %vm14889_vm1, %v14887_v50, 0.0  ;;  %v4761_v46 = vadd.f32 %v4637_v39, %v4448_v33  ;;  %vm14892_vm11 = vcmp.ne.s32.totalorder %v14891_v10, 13  ;;  %v14896_v28 = vld [vmem:[#allocation67_spill] sm:$0xff]  ;;  %v14900_v50 = vld [vmem:[#allocation94_spill] sm:$0xff]  ;;  %vm14916_vm9 = vmmov %vm14878_vm2 }
 0x44b   : > { %v4839_v2 = vsel %vm14892_vm11, %v14890_v60, 0.0  ;;  %vm14895_vm3 = vcmp.ne.s32.totalorder %v14894_v35, 13  ;;  %vm14897_vm7 = vcmp.ne.s32.totalorder %v14856_v26, 13  ;;  %v4763_v63 = vadd.f32 %v4641_v9, %v4450_v42  ;;  %v14901_v10 = vld [vmem:[#allocation10_spill] sm:$0xff]  ;;  %v14902_v39 = vld [vmem:[#allocation63_spill] sm:$0xff]  ;;  %vm14917_vm0 = vmmov %vm14878_vm2 }
 0x44c   : > { %v4841_v5 = vsel %vm14895_vm3, %v14893_v37, 0.0  ;;  %v4843_v41 = vsel %vm14897_vm7, %v14896_v28, 0.0  ;;  %v4765_v13 = vadd.f32 %v4645_v58, %v4452_v18  ;;  %vm14899_vm12 = vcmp.ne.s32.totalorder %v14858_v52, 13  ;;  %v14903_v9 = vld [vmem:[#allocation43_spill] sm:$0xff]  ;;  %v14904_v58 = vld [vmem:[#allocation9_spill] sm:$0xff]  ;;  %vm14918_vm14 = vmmov %vm14917_vm0 }
 0x44d   : > { %v4845_v1 = vsel %vm14899_vm12, %v14898_v36, 0.0  ;;  %v4847_v33 = vsel %vm2960_vm10, %v14900_v50, 0.0  ;;  %v4883_v60 = vmul.f32 %v14902_v39, %v14901_v10  ;;  %v4885_v35 = vmul.f32 %v14902_v39, %v4833_v54  ;;  %v14906_v36 = vld [vmem:[#allocation95_spill] sm:$0xff]  ;;  %vm14915_vm10 = vmmov %vm14878_vm2 }
 0x44e   : > { %v4887_v37 = vmul.f32 %v14902_v39, %v4835_v44  ;;  %v4889_v26 = vmul.f32 %v14902_v39, %v4837_v51  ;;  %v4891_v42 = vmul.f32 %v14902_v39, %v4839_v2  ;;  %v4893_v18 = vmul.f32 %v14902_v39, %v4841_v5  ;;  %vm14919_vm1 = vmmov %vm14917_vm0 }
 0x44f   : > { %v4895_v52 = vmul.f32 %v14902_v39, %v4843_v41  ;;  %v4929_v28 = vadd.f32 %v14904_v58, %v14903_v9  ;;  %v4931_v50 = vadd.f32 %v14906_v36, %v14905_v62  ;;  %v4933_v10 = vadd.f32 %v4883_v60, %v12405_v49  ;;  %vm14920_vm11 = vmmov %vm14917_vm0 }
 0x450   : > { %v4935_v54 = vadd.f32 %v4885_v35, %v12413_v17  ;;  %v4937_v44 = vadd.f32 %v4887_v37, %v12421_v15  ;;  %v4897_v51 = vmul.f32 %v14902_v39, %v4845_v1  ;;  %v4939_v2 = vadd.f32 %v4889_v26, %v12426_v38  ;;  %vm14921_vm3 = vmmov %vm14917_vm0 }
 0x451   : > { %v4941_v5 = vadd.f32 %v4891_v42, %v12429_v45  ;;  %v4943_v41 = vadd.f32 %v4893_v18, %v12432_v56  ;;  %v4418_v40 = vmul.f32 %v14796_v19, %v4366_v6  ;;  %v4420_v9 = vmul.f32 %v14796_v19, %v4368_v16  ;;  %v14907_v16 = vld [vmem:[#allocation38_spill] sm:$0xff]  ;;  %vm14922_vm7 = vmmov %vm14917_vm0 }
 0x452   : > { %v4422_v58 = vmul.f32 %v14796_v19, %v4370_v21  ;;  %v4899_v49 = vmul.f32 %v14902_v39, %v4847_v33  ;;  %v4512_v17 = vmul.f32 %v12004_v34, %v14817_v7  ;;  %v4514_v15 = vmul.f32 %v12009_v24, %v14817_v7  ;;  %v14908_v21 = vld [vmem:[#allocation34_spill] sm:$0xff]  ;;  %v14909_v34 = vld [vmem:[#allocation27_spill] sm:$0xff]  ;;  %vm14923_vm12 = vmmov %vm14917_vm0 }
 0x453   : > { %v4945_v1 = vadd.f32 %v4895_v52, %v4761_v46  ;;  %v4947_v38 = vadd.f32 %v4897_v51, %v4763_v63  ;;  %v4516_v45 = vmul.f32 %v12020_v25, %v14817_v7  ;;  %v4518_v56 = vmul.f32 %v12024_v55, %v14817_v7  ;;  %v4476_v46 = vld [vmem:[#allocation2 + $0xe0] sm:$0x1] }
 0x454   : > { %v4520_v6 = vmul.f32 %v12039_v31, %v14817_v7  ;;  %v4949_v19 = vadd.f32 %v4899_v49, %v4765_v13  ;;  %v12561_v33 = vmul.f32 %v14908_v21, %v14907_v16  ;;  %v12565_v39 = vmul.f32 %v14908_v21, %v14909_v34 }
 0x455   : > { %v12568_v24 = vmul.f32 %v14908_v21, %v4929_v28  ;;  %v12571_v25 = vmul.f32 %v14908_v21, %v4931_v50  ;;  %v12574_v55 = vmul.f32 %v14908_v21, %v4933_v10  ;;  %v12577_v31 = vmul.f32 %v14908_v21, %v4935_v54 }
 0x456   : > { %v12580_v63 = vmul.f32 %v14908_v21, %v4937_v44  ;;  %v12583_v13 = vmul.f32 %v14908_v21, %v4939_v2  ;;  %v12586_v60 = vmul.f32 %v14908_v21, %v4941_v5  ;;  %v12589_v35 = vmul.f32 %v14908_v21, %v4943_v41  ;;  %v14910_v2 = vld [vmem:[#allocation70_spill] sm:$0xff] }
 0x457   : > { %v12592_v37 = vmul.f32 %v14908_v21, %v4945_v1  ;;  %v12595_v26 = vmul.f32 %v14908_v21, %v4947_v38  ;;  %v4454_v42 = vadd.f32 %v12474_v20, %v12334_v30  ;;  %v4522_v18 = vmul.f32 %v14765_v3, %v14817_v7 }
 0x458   : > { %v4524_v52 = vmul.f32 %v14766_v4, %v14817_v7  ;;  %v12604_v28 = vmul.f32 %v14908_v21, %v4949_v19  ;;  %v4456_v62 = vadd.f32 %v12477_v23, %v12336_v47  ;;  %v4526_v36 = vmul.f32 %v14817_v7, %v12382_v57 }
 0x459   : > { %v4528_v50 = vmul.f32 %v12409_v11, %v14817_v7  ;;  %v4530_v30 = vmul.f32 %v14817_v7, %v4476_v46  ;;  %v4458_v3 = vadd.f32 %v12480_v48, %v12338_v61  ;;  %v4460_v4 = vadd.f32 %v12484_v32, %v12358_v53  ;;  %v14911_v61 = vld [vmem:[#allocation101_spill] sm:$0xff] }
 0x45a   : > { %v4648_v20 = vrot.slane %v4512_v17, 5  ;;  %v4652_v10 = vrot.slane %v4514_v15, 5  ;;  %v4462_v54 = vadd.f32 %v12487_v29, %v12360_v12  ;;  %v4656_v47 = vrot.slane %v4516_v45, 5  ;;  %v4789_v17 = vld [vmem:[#allocation2 + $0xe0] sm:$0x3]  ;;  %v14912_v15 = vld [vmem:[#allocation8_spill] sm:$0xff] }
 0x45b   : > { %v4660_v23 = vrot.slane %v4518_v56, 5  ;;  %v4664_v44 = vrot.slane %v4520_v6, 5  ;;  %v4464_v51 = vadd.f32 %v12492_v43, %v12368_v59  ;;  %v4466_v7 = vadd.f32 %v12495_v14, %v14910_v2  ;;  %v14913_v12 = vld [vmem:[#allocation57_spill] sm:$0xff]  ;;  %v14928_v2 = vld [vmem:[#allocation7_spill] sm:$0xff] }
 0x45c   : > { %v4668_v5 = vrot.slane %v4522_v18, 5  ;;  %v4672_v41 = vrot.slane %v4524_v52, 5  ;;  %v4468_v48 = vadd.f32 %v4418_v40, %v14911_v61  ;;  %v4676_v49 = vrot.slane %v4526_v36, 5 }
 0x45d   : > { %v4680_v53 = vrot.slane %v4528_v50, 5  ;;  %v4684_v32 = vrot.slane %v4530_v30, 5  ;;  %v4470_v1 = vadd.f32 %v4420_v9, %v14912_v15  ;;  %v4472_v29 = vadd.f32 %v4422_v58, %v14913_v12  ;;  %v14940_v15 = vld [vmem:[#allocation118_spill] sm:$0xff] }
 0x45e   : > { %v14914_v38 = vrot.slane %v12447_v22, 5  ;;  %v4653_v59 = vsel %vm14878_vm2, %v4648_v20, %v4652_v10  ;;  %v4657_v43 = vsel %vm14916_vm9, %v4652_v10, %v4656_v47  ;;  %v4661_v14 = vsel %vm14917_vm0, %v4656_v47, %v4660_v23  ;;  %v14924_v10 = vld [vmem:[#allocation16_spill] sm:$0xff] }
 0x45f   : > { %v4665_v40 = vsel %vm14918_vm14, %v4660_v23, %v4664_v44  ;;  %v4800_v56 = vrot.slane %v12382_v57, 6  ;;  %v4669_v6 = vsel %vm14919_vm1, %v4664_v44, %v4668_v5  ;;  %v4673_v9 = vsel %vm14920_vm11, %v4668_v5, %v4672_v41 }
 0x460   : > { %v4649_v45 = vsel %vm14915_vm10, %v14914_v38, %v4648_v20  ;;  %v4804_v58 = vrot.slane %v12409_v11, 6  ;;  %v4808_v19 = vrot.slane %v4789_v17, 6  ;;  %v4677_v22 = vsel %vm14921_vm3, %v4672_v41, %v4676_v49  ;;  %v14933_v41 = vld [vmem:[#allocation82_spill] sm:$0xff]  ;;  %v14938_v17 = vld [vmem:[#allocation76_spill] sm:$0xff] }
 0x461   : > { %v4681_v16 = vsel %vm14922_vm7, %v4676_v49, %v4680_v53  ;;  %v4685_v34 = vsel %vm14923_vm12, %v4680_v53, %v4684_v32  ;;  %v4767_v46 = vadd.f32 %v4649_v45, %v4454_v42  ;;  %v4769_v18 = vadd.f32 %v4653_v59, %v4456_v62  ;;  %v14929_v42 = vld [vmem:[#allocation85_spill] sm:$0xff]  ;;  %v14935_v49 = vld [vmem:[#allocation6_spill] sm:$0xff]  ;;  %v14937_v32 = vld [vmem:[#allocation91_spill] sm:$0xff] }
 0x462   : > { %v4771_v52 = vadd.f32 %v4657_v43, %v4458_v3  ;;  %v4773_v36 = vadd.f32 %v4661_v14, %v4460_v4  ;;  %v4775_v50 = vadd.f32 %v4665_v40, %v4462_v54  ;;  %v4777_v30 = vadd.f32 %v4669_v6, %v4464_v51  ;;  %v14930_v3 = vld [vmem:[#allocation109_spill] sm:$0xff]  ;;  %v14942_v45 = vld [vmem:[#allocation119_spill] sm:$0xff]  ;;  %v6676_v40 = vld [vmem:[%s13283_s3 + $0x18] ss:$0 sm:$0xff] }
 0x463   : > { %v4779_v57 = vadd.f32 %v4673_v9, %v4466_v7  ;;  %v4781_v20 = vadd.f32 %v4677_v22, %v4468_v48  ;;  %vm14925_vm10 = vcmask 1041408   ;;  %v4783_v23 = vadd.f32 %v4681_v16, %v4470_v1  ;;  %v14931_v54 = vld [vmem:[#allocation81_spill] sm:$0xff] }
 0x464   : > { %v4801_v47 = vsel %vm14925_vm10, %v14924_v10, %v4800_v56  ;;  %vm14926_vm2 = vmmov %vm14925_vm10  ;;  %v4849_v5 = vsel %vm2961_vm4, %v14928_v2, 0.0  ;;  %v4851_v62 = vsel %vm2962_vm6, %v14929_v42, 0.0  ;;  %v4853_v4 = vsel %vm2963_vm8, %v14930_v3, 0.0  ;;  %v6675_v1 = vld [vmem:[%s13285_s5] sm:$0x3] }
 0x465   : > { %v4805_v11 = vsel %vm14926_vm2, %v4800_v56, %v4804_v58  ;;  %vm14927_vm9 = vmmov %vm14926_vm2  ;;  %v4855_v7 = vsel %vm2964_vm13, %v14931_v54, 0.0  ;;  %v4857_v48 = vsel %vm2965_vm15, %v14933_v41, 0.0  ;;  %v4859_v0 = vsel %vm2966_vm5, %v14935_v49, 0.0  ;;  %v14944_v43 = vld [vmem:[#allocation121_spill] sm:$0xff] }
 0x466   : > { %v4809_v44 = vsel %vm14927_vm9, %v4804_v58, %v4808_v19  ;;  %vm14939_vm4 = vcmp.ne.s32.totalorder %v14938_v17, 13  ;;  %vm14941_vm6 = vcmp.ne.s32.totalorder %v14940_v15, 13  ;;  %v12670_v12 = vperm.slane %v6675_v1, 1 }
 0x467   : > { %v4861_v8 = vsel %vm14939_vm4, %v14937_v32, 0.0  ;;  %v4863_v27 = vsel %vm14941_vm6, %v4801_v47, 0.0  ;;  %v4785_v38 = vadd.f32 %v4685_v34, %v4472_v29  ;;  %vm14943_vm8 = vcmp.ne.s32.totalorder %v14942_v45, 13  ;;  %v14946_v47 = vld [vmem:[#allocation35_spill] sm:$0xff] }
 0x468   : > { %v4865_v59 = vsel %vm14943_vm8, %v4805_v11, 0.0  ;;  %vm14945_vm13 = vcmp.ne.s32.totalorder %v14944_v43, 13  ;;  %v4901_v56 = vmul.f32 %v6676_v40, %v4849_v5  ;;  %v4903_v6 = vmul.f32 %v6676_v40, %v4851_v62 }
 0x469   : > { %v4867_v14 = vsel %vm14945_vm13, %v4809_v44, 0.0  ;;  %v4905_v9 = vmul.f32 %v6676_v40, %v4853_v4  ;;  %v4907_v58 = vmul.f32 %v6676_v40, %v4855_v7  ;;  %v4909_v19 = vmul.f32 %v6676_v40, %v4857_v48  ;;  %v14947_v44 = vld [vmem:[#allocation36_spill] sm:$0xff] }
 0x46a   : > { %v4911_v22 = vmul.f32 %v6676_v40, %v4859_v0  ;;  %v4913_v16 = vmul.f32 %v6676_v40, %v4861_v8  ;;  %v4915_v10 = vmul.f32 %v6676_v40, %v4863_v27  ;;  %v12681_v29 = vadd.f32 %v12670_v12, %v14946_v47 }
 0x46b   : > { %v4919_v34 = vmul.f32 %v6676_v40, %v4867_v14  ;;  %v4951_v11 = vadd.f32 %v4901_v56, %v4767_v46  ;;  %v4953_v2 = vadd.f32 %v4903_v6, %v4769_v18  ;;  %v12685_v42 = vadd.f32 %v12670_v12, %v14947_v44 }
 0x46c   : > { %v4917_v3 = vmul.f32 %v6676_v40, %v4865_v59  ;;  %v4955_v5 = vadd.f32 %v4905_v9, %v4771_v52  ;;  %v4957_v62 = vadd.f32 %v4907_v58, %v4773_v36  ;;  %v12689_v4 = vadd.f32 %v12670_v12, %v12561_v33 }
 0x46d   : > { %v4959_v54 = vadd.f32 %v4909_v19, %v4775_v50  ;;  %v4961_v51 = vadd.f32 %v4911_v22, %v4777_v30  ;;  %v4963_v7 = vadd.f32 %v4913_v16, %v4779_v57  ;;  %v4965_v41 = vadd.f32 %v4915_v10, %v4781_v20 }
 0x46e   : > { %v4967_v61 = vadd.f32 %v4917_v3, %v4783_v23  ;;  %v12693_v46 = vadd.f32 %v12670_v12, %v12565_v39  ;;  %v5085_v18 = vmul.f32 %v12681_v29, %v12681_v29  ;;  %v4969_v48 = vadd.f32 %v4919_v34, %v4785_v38 }
 0x46f   : > { %v5007_v52 = vmul.f32 %v14908_v21, %v4951_v11  ;;  %v5009_v36 = vmul.f32 %v14908_v21, %v4953_v2  ;;  %v5083_v33 = vmul.f32 %v12685_v42, %v12685_v42  ;;  %v5011_v50 = vmul.f32 %v14908_v21, %v4955_v5 }
 0x470   : > { %v5013_v30 = vmul.f32 %v14908_v21, %v4957_v62  ;;  %v12705_v57 = vadd.f32 %v12670_v12, %v12568_v24  ;;  %v5087_v39 = vmul.f32 %v12689_v4, %v12689_v4  ;;  %v5015_v20 = vmul.f32 %v14908_v21, %v4959_v54 }
 0x471   : > { %v5017_v23 = vmul.f32 %v14908_v21, %v4961_v51  ;;  %v5019_v49 = vmul.f32 %v14908_v21, %v4963_v7  ;;  %v5021_v53 = vmul.f32 %v14908_v21, %v4965_v41  ;;  %v5023_v0 = vmul.f32 %v14908_v21, %v4967_v61 }
 0x472   : > { %v12716_v32 = vadd.f32 %v12670_v12, %v12571_v25  ;;  %v5089_v24 = vmul.f32 %v12693_v46, %v12693_v46  ;;  %v5135_v17 = vmul.f32 %v5085_v18, %v12681_v29  ;;  %v5025_v8 = vmul.f32 %v14908_v21, %v4969_v48 }
 0x473   : > { %v12724_v15 = vadd.f32 %v12670_v12, %v12574_v55  ;;  %v12728_v27 = vadd.f32 %v12670_v12, %v12577_v31  ;;  %v5133_v1 = vmul.f32 %v5083_v33, %v12685_v42  ;;  %v12733_v25 = vadd.f32 %v12670_v12, %v12580_v63 }
 0x474   : > { %v12737_v38 = vadd.f32 %v12670_v12, %v12583_v13  ;;  %v5091_v21 = vmul.f32 %v12705_v57, %v12705_v57  ;;  %v5137_v55 = vmul.f32 %v5087_v39, %v12689_v4  ;;  %v12744_v45 = vadd.f32 %v12670_v12, %v12586_v60 }
 0x475   : > { %v12748_v31 = vadd.f32 %v12670_v12, %v12589_v35  ;;  %v12752_v63 = vadd.f32 %v12670_v12, %v12592_v37  ;;  %v12756_v13 = vadd.f32 %v12670_v12, %v12595_v26  ;;  %v12760_v59 = vadd.f32 %v12670_v12, %v12604_v28 }
 0x476   : > { %v5093_v60 = vmul.f32 %v12716_v32, %v12716_v32  ;;  %v5139_v43 = vmul.f32 %v5089_v24, %v12693_v46  ;;  %v5185_v14 = vmul.f32 0.044715, %v5135_v17  ;;  %v12766_v35 = vadd.f32 %v12670_v12, %v5007_v52 }
 0x477   : > { %v12769_v37 = vadd.f32 %v12670_v12, %v5009_v36  ;;  %v12772_v40 = vadd.f32 %v12670_v12, %v5011_v50  ;;  %v5183_v26 = vmul.f32 0.044715, %v5133_v1  ;;  %v12775_v56 = vadd.f32 %v12670_v12, %v5013_v30 }
 0x478   : > { %v5095_v28 = vmul.f32 %v12724_v15, %v12724_v15  ;;  %v5141_v6 = vmul.f32 %v5091_v21, %v12705_v57  ;;  %v5187_v9 = vmul.f32 0.044715, %v5137_v55  ;;  %v12781_v58 = vadd.f32 %v12670_v12, %v5015_v20 }
 0x479   : > { %v12784_v19 = vadd.f32 %v12670_v12, %v5017_v23  ;;  %v12787_v22 = vadd.f32 %v12670_v12, %v5019_v49  ;;  %v12790_v16 = vadd.f32 %v12670_v12, %v5021_v53  ;;  %v5097_v10 = vmul.f32 %v12728_v27, %v12728_v27 }
 0x47a   : > { %v5143_v47 = vmul.f32 %v5093_v60, %v12716_v32  ;;  %v5189_v34 = vmul.f32 0.044715, %v5139_v43  ;;  %v5235_v11 = vadd.f32 %v5185_v14, %v12681_v29  ;;  %v12797_v2 = vadd.f32 %v12670_v12, %v5023_v0 }
 0x47b   : > { %v12800_v44 = vadd.f32 %v12670_v12, %v5025_v8  ;;  %v5099_v3 = vmul.f32 %v12733_v25, %v12733_v25  ;;  %v5233_v5 = vadd.f32 %v5183_v26, %v12685_v42  ;;  %v5101_v62 = vmul.f32 %v12737_v38, %v12737_v38 }
 0x47c   : > { %v5145_v54 = vmul.f32 %v5095_v28, %v12724_v15  ;;  %v5191_v51 = vmul.f32 0.044715, %v5141_v6  ;;  %v5237_v7 = vadd.f32 %v5187_v9, %v12689_v4  ;;  %v5103_v41 = vmul.f32 %v12744_v45, %v12744_v45 }
 0x47d   : > { %v5105_v12 = vmul.f32 %v12748_v31, %v12748_v31  ;;  %v5107_v61 = vmul.f32 %v12752_v63, %v12752_v63  ;;  %v5109_v18 = vmul.f32 %v12756_v13, %v12756_v13  ;;  %v5147_v48 = vmul.f32 %v5097_v10, %v12728_v27 }
 0x47e   : > { %v5193_v52 = vmul.f32 0.044715, %v5143_v47  ;;  %v5239_v36 = vadd.f32 %v5189_v34, %v12693_v46  ;;  %v5285_v33 = vmul.f32 0.7978846, %v5235_v11  ;;  %v5111_v50 = vmul.f32 %v12760_v59, %v12760_v59 }
 0x47f   : > { %v5113_v30 = vmul.f32 %v12766_v35, %v12766_v35  ;;  %v5115_v39 = vmul.f32 %v12769_v37, %v12769_v37  ;;  %v5283_v20 = vmul.f32 0.7978846, %v5233_v5  ;;  %v5149_v23 = vmul.f32 %v5099_v3, %v12733_v25 }
 0x480   : > { %v5195_v49 = vmul.f32 0.044715, %v5145_v54  ;;  %v5241_v53 = vadd.f32 %v5191_v51, %v12705_v57  ;;  %v5287_v0 = vmul.f32 0.7978846, %v5237_v7  ;;  %v5117_v24 = vmul.f32 %v12772_v40, %v12772_v40 }
 0x481   : > { %v5119_v17 = vmul.f32 %v12775_v56, %v12775_v56  ;;  %v5121_v8 = vmul.f32 %v12781_v58, %v12781_v58  ;;  %v5151_v1 = vmul.f32 %v5101_v62, %v12737_v38  ;;  %v5197_v21 = vmul.f32 0.044715, %v5147_v48 }
 0x482   : > { %v5243_v55 = vadd.f32 %v5193_v52, %v12716_v32  ;;  %v5289_v60 = vmul.f32 0.7978846, %v5239_v36  ;;  %6577 = vtanh.f32 %v5285_v33  ;;  %v5123_v43 = vmul.f32 %v12784_v19, %v12784_v19 }
 0x483   : > { %v5153_v14 = vmul.f32 %v5103_v41, %v12744_v45  ;;  %v5155_v26 = vmul.f32 %v5105_v12, %v12748_v31  ;;  %6579 = vtanh.f32 %v5283_v20  ;;  %v5199_v28 = vmul.f32 0.044715, %v5149_v23 }
 0x484   : > { %v5245_v6 = vadd.f32 %v5195_v49, %v12724_v15  ;;  %v5291_v9 = vmul.f32 0.7978846, %v5241_v53  ;;  %6581 = vtanh.f32 %v5287_v0  ;;  %v5125_v10 = vmul.f32 %v12787_v22, %v12787_v22 }
 0x485   : > { %v5127_v47 = vmul.f32 %v12790_v16, %v12790_v16  ;;  %v5129_v34 = vmul.f32 %v12797_v2, %v12797_v2  ;;  %v5157_v11 = vmul.f32 %v5107_v61, %v12752_v63  ;;  %v5201_v3 = vmul.f32 0.044715, %v5151_v1 }
 0x486   : > { %v5247_v5 = vadd.f32 %v5197_v21, %v12728_v27  ;;  %v5293_v62 = vmul.f32 0.7978846, %v5243_v55  ;;  %6583 = vtanh.f32 %v5289_v60  ;;  %v5131_v54 = vmul.f32 %v12800_v44, %v12800_v44 }
 0x487   : > { %v5159_v51 = vmul.f32 %v5109_v18, %v12756_v13  ;;  %v5161_v7 = vmul.f32 %v5111_v50, %v12760_v59  ;;  %v5203_v41 = vmul.f32 0.044715, %v5153_v14  ;;  %v5205_v48 = vmul.f32 0.044715, %v5155_v26 }
 0x488   : > { %v6578_v12 = vpop.eup %6577  ;;  %v5249_v52 = vadd.f32 %v5199_v28, %v12733_v25  ;;  %v5295_v36 = vmul.f32 0.7978846, %v5245_v6  ;;  %6585 = vtanh.f32 %v5291_v9  ;;  %v5163_v33 = vmul.f32 %v5113_v30, %v12766_v35 }
 0x489   : > { %v6580_v61 = vpop.eup %6579  ;;  %v5165_v20 = vmul.f32 %v5115_v39, %v12769_v37  ;;  %v5167_v23 = vmul.f32 %v5117_v24, %v12772_v40  ;;  %v5169_v49 = vmul.f32 %v5119_v17, %v12775_v56  ;;  %v5207_v18 = vmul.f32 0.044715, %v5157_v11 }
 0x48a   : > { %v6582_v53 = vpop.eup %6581  ;;  %v5251_v50 = vadd.f32 %v5201_v3, %v12737_v38  ;;  %v5297_v0 = vmul.f32 0.7978846, %v5247_v5  ;;  %6587 = vtanh.f32 %v5293_v62  ;;  %v5171_v1 = vmul.f32 %v5121_v8, %v12781_v58 }
 0x48b   : > { %v12860_v21 = vmul.f32 %v5123_v43, %v12784_v19  ;;  %v5253_v55 = vadd.f32 %v5203_v41, %v12744_v45  ;;  %v5385_v30 = vadd.f32 1.0, %v6578_v12  ;;  %v5209_v39 = vmul.f32 0.044715, %v5159_v51 }
 0x48c   : > { %v6584_v60 = vpop.eup %6583  ;;  %v5255_v24 = vadd.f32 %v5205_v48, %v12748_v31  ;;  %v5299_v14 = vmul.f32 0.7978846, %v5249_v52  ;;  %6589 = vtanh.f32 %v5295_v36  ;;  %v12865_v17 = vmul.f32 %v5125_v10, %v12787_v22 }
 0x48d   : > { %v12868_v26 = vmul.f32 %v5127_v47, %v12790_v16  ;;  %v5383_v28 = vadd.f32 1.0, %v6580_v61  ;;  %v5387_v8 = vadd.f32 1.0, %v6582_v53  ;;  %v5211_v43 = vmul.f32 0.044715, %v5161_v7 }
 0x48e   : > { %v6586_v6 = vpop.eup %6585  ;;  %v5257_v9 = vadd.f32 %v5207_v18, %v12752_v63  ;;  %v5301_v11 = vmul.f32 0.7978846, %v5251_v50  ;;  %6591 = vtanh.f32 %v5297_v0  ;;  %v12872_v3 = vmul.f32 %v5129_v34, %v12797_v2 }
 0x48f   : > { %v5303_v5 = vmul.f32 0.7978846, %v5253_v55  ;;  %v5389_v62 = vadd.f32 1.0, %v6584_v60  ;;  %v5435_v51 = vmul.f32 0.5, %v5385_v30  ;;  %v5213_v10 = vmul.f32 0.044715, %v5163_v33 }
 0x490   : > { %v6588_v41 = vpop.eup %6587  ;;  %v5259_v12 = vadd.f32 %v5209_v39, %v12756_v13  ;;  %v5305_v47 = vmul.f32 0.7978846, %v5255_v24  ;;  %6593 = vtanh.f32 %v5299_v14  ;;  %v12876_v48 = vmul.f32 %v5131_v54, %v12800_v44 }
 0x491   : > { %v5391_v7 = vadd.f32 1.0, %v6586_v6  ;;  %v5433_v52 = vmul.f32 0.5, %v5383_v28  ;;  %v5437_v36 = vmul.f32 0.5, %v5387_v8  ;;  %v5215_v53 = vmul.f32 0.044715, %v5165_v20 }
 0x492   : > { %v6590_v61 = vpop.eup %6589  ;;  %v5261_v34 = vadd.f32 %v5211_v43, %v12760_v59  ;;  %v5307_v18 = vmul.f32 0.7978846, %v5257_v9  ;;  %6595 = vtanh.f32 %v5301_v11  ;;  %v5393_v50 = vadd.f32 1.0, %v6588_v41 }
 0x493   : > { %6597 = vtanh.f32 %v5303_v5  ;;  %v5439_v0 = vmul.f32 0.5, %v5389_v62  ;;  %v12880_v33 = vmul.f32 %v5435_v51, %v12681_v29  ;;  %v5217_v30 = vmul.f32 0.044715, %v5167_v23 }
 0x494   : > { %v6592_v55 = vpop.eup %6591  ;;  %v5263_v54 = vadd.f32 %v5213_v10, %v12766_v35  ;;  %v5309_v60 = vmul.f32 0.7978846, %v5259_v12  ;;  %6599 = vtanh.f32 %v5305_v47  ;;  %v5395_v39 = vadd.f32 1.0, %v6590_v61 }
 0x495   : > { %v5441_v24 = vmul.f32 0.5, %v5391_v7  ;;  %v12884_v20 = vmul.f32 %v5433_v52, %v12685_v42  ;;  %v12887_v14 = vmul.f32 %v5437_v36, %v12689_v4  ;;  %v5219_v8 = vmul.f32 0.044715, %v5169_v49 }
 0x496   : > { %v6594_v28 = vpop.eup %6593  ;;  %v5265_v6 = vadd.f32 %v5215_v53, %v12769_v37  ;;  %v5311_v29 = vmul.f32 0.7978846, %v5261_v34  ;;  %6601 = vtanh.f32 %v5307_v18  ;;  %v5397_v43 = vadd.f32 1.0, %v6592_v55 }
 0x497   : > { %v5443_v23 = vmul.f32 0.5, %v5393_v50  ;;  %v12891_v9 = vmul.f32 %v5439_v0, %v12693_v46  ;;  %v5563_v11 = vadd.f32 %v12880_v33, %v12884_v20  ;;  %v5221_v42 = vmul.f32 0.044715, %v5171_v1 }
 0x498   : > { %v6596_v5 = vpop.eup %6595  ;;  %v5267_v62 = vadd.f32 %v5217_v30, %v12772_v40  ;;  %v5313_v4 = vmul.f32 0.7978846, %v5263_v54  ;;  %6603 = vtanh.f32 %v5309_v60  ;;  %v5399_v49 = vadd.f32 1.0, %v6594_v28 }
 0x499   : > { %v6598_v51 = vpop.eup %6597  ;;  %v5445_v41 = vmul.f32 0.5, %v5395_v39  ;;  %v12897_v10 = vmul.f32 %v5441_v24, %v12705_v57  ;;  %v5564_v12 = vadd.f32 %v5563_v11, %v12887_v14  ;;  %v5223_v46 = vmul.f32 0.044715, %v12860_v21 }
 0x49a   : > { %v6600_v47 = vpop.eup %6599  ;;  %v5269_v7 = vadd.f32 %v5219_v8, %v12775_v56  ;;  %v5315_v52 = vmul.f32 0.7978846, %v5265_v6  ;;  %6605 = vtanh.f32 %v5311_v29  ;;  %v5401_v1 = vadd.f32 1.0, %v6596_v5 }
 0x49b   : > { %v5447_v36 = vmul.f32 0.5, %v5397_v43  ;;  %v12903_v61 = vmul.f32 %v5443_v23, %v12716_v32  ;;  %v5565_v53 = vadd.f32 %v5564_v12, %v12891_v9  ;;  %v5225_v57 = vmul.f32 0.044715, %v12865_v17 }
 0x49c   : > { %v6602_v34 = vpop.eup %6601  ;;  %v5271_v18 = vadd.f32 %v5221_v42, %v12781_v58  ;;  %v5317_v50 = vmul.f32 0.7978846, %v5267_v62  ;;  %6607 = vtanh.f32 %v5313_v4  ;;  %v5403_v0 = vadd.f32 1.0, %v6598_v51 }
 0x49d   : > { %v5449_v21 = vmul.f32 0.5, %v5399_v49  ;;  %v12909_v55 = vmul.f32 %v5445_v41, %v12724_v15  ;;  %v5566_v30 = vadd.f32 %v5565_v53, %v12897_v10  ;;  %v5227_v32 = vmul.f32 0.044715, %v12868_v26 }
 0x49e   : > { %v6604_v54 = vpop.eup %6603  ;;  %v5273_v60 = vadd.f32 %v5223_v46, %v12784_v19  ;;  %v5319_v39 = vmul.f32 0.7978846, %v5269_v7  ;;  %6609 = vtanh.f32 %v5315_v52  ;;  %v5405_v24 = vadd.f32 1.0, %v6600_v47 }
 0x49f   : > { %v5451_v17 = vmul.f32 0.5, %v5401_v1  ;;  %v12915_v28 = vmul.f32 %v5447_v36, %v12728_v27  ;;  %v5567_v8 = vadd.f32 %v5566_v30, %v12903_v61  ;;  %v5231_v15 = vmul.f32 0.044715, %v12876_v48 }
 0x4a0   : > { %v6606_v6 = vpop.eup %6605  ;;  %v5275_v29 = vadd.f32 %v5225_v57, %v12787_v22  ;;  %v5321_v43 = vmul.f32 0.7978846, %v5271_v18  ;;  %6611 = vtanh.f32 %v5317_v50  ;;  %v5407_v23 = vadd.f32 1.0, %v6602_v34 }
 0x4a1   : > { %v5453_v26 = vmul.f32 0.5, %v5403_v0  ;;  %v12921_v11 = vmul.f32 %v5449_v21, %v12733_v25  ;;  %v5568_v5 = vadd.f32 %v5567_v8, %v12909_v55  ;;  %v5229_v27 = vmul.f32 0.044715, %v12872_v3 }
 0x4a2   : > { %v6608_v42 = vpop.eup %6607  ;;  %v5277_v62 = vadd.f32 %v5227_v32, %v12790_v16  ;;  %v5323_v4 = vmul.f32 0.7978846, %v5273_v60  ;;  %6613 = vtanh.f32 %v5319_v39  ;;  %v5409_v51 = vadd.f32 1.0, %v6604_v54 }
 0x4a3   : > { %v5455_v48 = vmul.f32 0.5, %v5405_v24  ;;  %v12927_v49 = vmul.f32 %v5451_v17, %v12737_v38  ;;  %v5569_v41 = vadd.f32 %v5568_v5, %v12915_v28  ;;  %v5281_v25 = vadd.f32 %v5231_v15, %v12800_v44 }
 0x4a4   : > { %v6610_v12 = vpop.eup %6609  ;;  %v5325_v47 = vmul.f32 0.7978846, %v5275_v29  ;;  %6615 = vtanh.f32 %v5321_v43  ;;  %v5411_v46 = vadd.f32 1.0, %v6606_v6  ;;  %v5457_v7 = vmul.f32 0.5, %v5407_v23 }
 0x4a5   : > { %v12932_v3 = vmul.f32 %v5453_v26, %v12744_v45  ;;  %v5570_v52 = vadd.f32 %v5569_v41, %v12921_v11  ;;  %v5279_v36 = vadd.f32 %v5229_v27, %v12797_v2  ;;  %v5327_v53 = vmul.f32 0.7978846, %v5277_v62 }
 0x4a6   : > { %v6612_v1 = vpop.eup %6611  ;;  %6617 = vtanh.f32 %v5323_v4  ;;  %v5413_v38 = vadd.f32 1.0, %v6608_v42  ;;  %v5459_v34 = vmul.f32 0.5, %v5409_v51  ;;  %v12937_v57 = vmul.f32 %v5455_v48, %v12748_v31 }
 0x4a7   : > { %v5571_v18 = vadd.f32 %v5570_v52, %v12927_v49  ;;  %v5331_v0 = vmul.f32 0.7978846, %v5281_v25  ;;  %6619 = vtanh.f32 %v5325_v47  ;;  %v5415_v21 = vadd.f32 1.0, %v6610_v12 }
 0x4a8   : > { %v6614_v50 = vpop.eup %6613  ;;  %v5461_v45 = vmul.f32 0.5, %v5411_v46  ;;  %v12941_v30 = vmul.f32 %v5457_v7, %v12752_v63  ;;  %v5329_v60 = vmul.f32 0.7978846, %v5279_v36  ;;  %6621 = vtanh.f32 %v5327_v53 }
 0x4a9   : > { %v5572_v54 = vadd.f32 %v5571_v18, %v12932_v3  ;;  %v5417_v39 = vadd.f32 1.0, %v6612_v1  ;;  %v5463_v24 = vmul.f32 0.5, %v5413_v38  ;;  %v12945_v31 = vmul.f32 %v5459_v34, %v12756_v13 }
 0x4aa   : > { %v6616_v32 = vpop.eup %6615  ;;  %6623 = vtanh.f32 %v5331_v0  ;;  %v5419_v6 = vadd.f32 1.0, %v6614_v50  ;;  %v5465_v15 = vmul.f32 0.5, %v5415_v21  ;;  %v12949_v29 = vmul.f32 %v5461_v45, %v12760_v59 }
 0x4ab   : > { %v5573_v17 = vadd.f32 %v5572_v54, %v12937_v57  ;;  %6625 = vtanh.f32 %v5329_v60  ;;  %v5421_v23 = vadd.f32 1.0, %v6616_v32  ;;  %v5467_v26 = vmul.f32 0.5, %v5417_v39 }
 0x4ac   : > { %v6618_v8 = vpop.eup %6617  ;;  %v12953_v5 = vmul.f32 %v5463_v24, %v12766_v35  ;;  %v5469_v62 = vmul.f32 0.5, %v5419_v6  ;;  %v12957_v4 = vmul.f32 %v5465_v15, %v12769_v37  ;;  %vm14948_vm15 = vcmask 1043456  }
 0x4ad   : > { %v5574_v63 = vadd.f32 %v5573_v17, %v12941_v30  ;;  %v6620_v43 = vpop.eup %6619  ;;  %v5423_v27 = vadd.f32 1.0, %v6618_v8  ;;  %v5471_v41 = vmul.f32 0.5, %v5421_v23  ;;  %v12961_v12 = vmul.f32 %v5467_v26, %v12772_v40  ;;  %v5653_v23 = vpop.f32.mrf.mxu0 }
 0x4ae   : > { %v6622_v42 = vpop.eup %6621  ;;  %v5425_v48 = vadd.f32 1.0, %v6620_v43  ;;  %v12965_v7 = vmul.f32 %v5469_v62, %v12775_v56  ;;  %vm5706_vm11 = vcmask 130048   ;;  %vm14968_vm8 = vcmask 523264  }
 0x4af   : > { %v5575_v13 = vadd.f32 %v5574_v63, %v12945_v31  ;;  %v5427_v47 = vadd.f32 1.0, %v6622_v42  ;;  %v5473_v46 = vmul.f32 0.5, %v5423_v27  ;;  %v12969_v53 = vmul.f32 %v5471_v41, %v12781_v58  ;;  %v14949_v63 = vld [vmem:[#allocation30_spill] sm:$0xff]  ;;  %v5699_v42 = vld [vmem:[%s13288_s8 + $0x18] sm:$0xff]  ;;  %v5696_v27 = vld [vmem:[%s13288_s8] sm:$0xff] }
 0x4b0   : > { %v6624_v51 = vpop.eup %6623  ;;  %v5475_v36 = vmul.f32 0.5, %v5425_v48  ;;  %5744 = vmatpush.msra.mxu1 %v5699_v42  ;;  %vm14971_vm13 = vmmov %vm14968_vm8 }
 0x4b1   : > { %v5576_v59 = vadd.f32 %v5575_v13, %v12949_v29  ;;  %v6626_v35 = vpop.eup %6625  ;;  %v5431_v37 = vadd.f32 1.0, %v6624_v51  ;;  %v5477_v40 = vmul.f32 0.5, %v5427_v47  ;;  %v12973_v34 = vmul.f32 %v5473_v46, %v12784_v19  ;;  %v5698_v13 = vld [vmem:[%s13288_s8 + $0x10] sm:$0xff] }
 0x4b2   : > { %v5429_v1 = vadd.f32 1.0, %v6626_v35  ;;  %v12977_v56 = vmul.f32 %v5475_v36, %v12787_v22  ;;  %5724 = vmatpush.msra.mxu0 %v5698_v13 }
 0x4b3   : > { %v5577_v25 = vadd.f32 %v5576_v59, %v12953_v5  ;;  %v5481_v50 = vmul.f32 0.5, %v5431_v37  ;;  %v12981_v45 = vmul.f32 %v5477_v40, %v12790_v16  ;;  %v5697_v59 = vld [vmem:[%s13288_s8 + $0x8] sm:$0xff] }
 0x4b4   : > { %v5479_v0 = vmul.f32 0.5, %v5429_v1  ;;  %5725 = vmatpush.msra.mxu0 %v5696_v27  ;;  %5745 = vmatpush.msra.mxu1 %v5697_v59  ;;  %v6397_v27 = vld [vmem:[%s13290_s10 + $0x18] sm:$0xff]  ;;  %v6396_v59 = vld [vmem:[%s13290_s10 + $0x10] sm:$0xff] }
 0x4b5   : > { %v5578_v52 = vadd.f32 %v5577_v25, %v12957_v4  ;;  %v12985_v54 = vmul.f32 %v5481_v50, %v12800_v44 }
 0x4b6   : > { %v12988_v19 = vmul.f32 %v5479_v0, %v12797_v2  ;;  %v5635_v2 = vld [vmem:[%s13287_s7] sm:$0x1] }
 0x4b7   : > { %v5579_v38 = vadd.f32 %v5578_v52, %v12961_v12  ;;  %v5586_v22 = vsel %vm14948_vm15, %v12985_v54, 0.0  ;;  %v5654_v26 = vadd.f32 %v5653_v23, %v5635_v2  ;;  %v5700_v0 = vld [vmem:[%s13289_s9] sm:$0x3]  ;;  %vm14972_vm15 = vmmov %vm14968_vm8 }
 0x4b8   : > { %v6406_v2 = vld [vmem:[%s13290_s10 + $0x60] sm:$0xff] }
 0x4b9   : > { %v5580_v18 = vadd.f32 %v5579_v38, %v12965_v7 }
 0x4bb   : > { %v5581_v21 = vadd.f32 %v5580_v18, %v12969_v53 }
 0x4bd   : > { %v5582_v58 = vadd.f32 %v5581_v21, %v12973_v34  ;;  %v5702_v21 = vperm.slane %v5700_v0, 0 }
 0x4bf   : > { %v5583_v32 = vadd.f32 %v5582_v58, %v12977_v56  ;;  %v5703_v58 = vperm.slane %v5700_v0, 1  ;;  %v6394_v0 = vld [vmem:[%s13290_s10] sm:$0xff] }
 0x4c1   : > { %v5584_v60 = vadd.f32 %v5583_v32, %v12981_v45 }
 0x4c3   : > { %v5585_v39 = vadd.f32 %v5584_v60, %v12988_v19 }
 0x4c5   : > { %v5587_v24 = vadd.f32 %v5586_v22, %v5585_v39  ;;  %v6401_v22 = vld [vmem:[%s13290_s10 + $0x38] sm:$0xff] }
 0x4c6   : > { %v6409_v39 = vld [vmem:[%s13290_s10 + $0x78] sm:$0xff]  ;;  %5998 = vmatpush.bf16.msra.mxu2 %v6401_v22 }
 0x4c7   : > { %v5588_v16 = vrot.slane %v5587_v24, 4  ;;  %6071 = vmatpush.bf16.msra.mxu3 %v6409_v39 }
 0x4c9   : > { %v5589_v17 = vadd.f32 %v5588_v16, %v5587_v24 }
 0x4cb   : > { %v5590_v8 = vrot.slane %v5589_v17, 2 }
 0x4cd   : > { %v5591_v6 = vadd.f32 %v5590_v8, %v5589_v17  ;;  %v6400_v17 = vld [vmem:[%s13290_s10 + $0x30] sm:$0xff] }
 0x4ce   : > { %v6408_v8 = vld [vmem:[%s13290_s10 + $0x70] sm:$0xff]  ;;  %5999 = vmatpush.bf16.msra.mxu2 %v6400_v17 }
 0x4cf   : > { %v5592_v15 = vrot.slane %v5591_v6, 1  ;;  %6072 = vmatpush.bf16.msra.mxu3 %v6408_v8 }
 0x4d1   : > { %v5593_v44 = vadd.f32 %v5592_v15, %v5591_v6 }
 0x4d3   : > { %v5602_v43 = vmul.f32 %v14949_v63, %v5593_v44  ;;  %v6399_v44 = vld [vmem:[%s13290_s10 + $0x28] sm:$0xff] }
 0x4d4   : > { %v6407_v63 = vld [vmem:[%s13290_s10 + $0x68] sm:$0xff]  ;;  %6000 = vmatpush.bf16.msra.mxu2 %v6399_v44 }
 0x4d5   : > { %5672 = vmatmul.f32.vlgmr.msrb.gmra.mxu1 %v5602_v43  ;;  %6073 = vmatpush.bf16.msra.mxu3 %v6407_v63  ;;  %v6398_v43 = vld [vmem:[%s13290_s10 + $0x20] sm:$0xff]  ;;  %v14951_v63 = vld [vmem:[#allocation120_spill] sm:$0xff] }
 0x4d8   : > { %6001 = vmatpush.bf16.msra.mxu2 %v6398_v43 }
 0x4d9   : > { %6074 = vmatpush.bf16.msra.mxu3 %v6406_v2 }
 0x4dc   : > { %6002 = vmatpush.bf16.msra.mxu2 %v6397_v27 }
 0x4e0   : > { %6003 = vmatpush.bf16.msra.mxu2 %v6396_v59 }
 0x552   : > { %v5673_v62 = vpop.f32.mrf.mxu1 }
 0x553   : > { %v5674_v51 = vadd.f32 %v5673_v62, %v5654_v26  ;;  %v6405_v62 = vld [vmem:[%s13290_s10 + $0x58] sm:$0xff] }
 0x554   : > { %6075 = vmatpush.bf16.msra.mxu3 %v6405_v62  ;;  %v14953_v62 = vld [vmem:[#allocation111_spill] sm:$0xff] }
 0x555   : > { %v6315_v48 = vmul.f32 -1.442695, %v5674_v51 }
 0x557   : > { %6627 = vpow2.f32 %v6315_v48 }
 0x55d   : > { %v6628_v41 = vpop.eup %6627 }
 0x55e   : > { %v5679_v25 = vadd.f32 1.0, %v6628_v41 }
 0x560   : > { %6629 = vrcp.f32 %v5679_v25  ;;  %v5691_v52 = vand.u32 2147483648, %v5679_v25  ;;  %v5689_v1 = vand.u32 2147483647, %v5679_v25  ;;  %vm5685_vm0 = vweird.f32 %v5679_v25 }
 0x562   : > { %v5692_v38 = vor.u32 1.1754944e-38, %v5691_v52  ;;  %vm5690_vm1 = vcmp.eq.f32.partialorder %v5689_v1, 8.507059e+37 }
 0x566   : > { %v6630_v35 = vpop.eup %6629 }
 0x567   : > { %v5681_v47 = vmul.f32 %v6630_v35, %v5679_v25  ;;  %vm5686_vm5 = vweird.f32 %v6630_v35 }
 0x568   : > { %vm5687_vm14 = vmor %vm5685_vm0, %vm5686_vm5 }
 0x569   : > { %v5682_v46 = vsub.f32 1.0, %v5681_v47  ;;  %v6395_v47 = vld [vmem:[%s13290_s10 + $0x8] sm:$0xff]  ;;  %vm14975_vm5 = vmmov %vm14968_vm8 }
 0x56a   : > { %6004 = vmatpush.bf16.msra.mxu2 %v6395_v47  ;;  %vm14976_vm0 = vmmov %vm14975_vm5 }
 0x56b   : > { %v5683_v37 = vmul.f32 %v6630_v35, %v5682_v46  ;;  %v6403_v46 = vld [vmem:[%s13290_s10 + $0x48] sm:$0xff] }
 0x56d   : > { %v5684_v36 = vadd.f32 %v6630_v35, %v5683_v37 }
 0x56e   : > { %6005 = vmatpush.bf16.msra.mxu2 %v6394_v0 }
 0x56f   : > { %v5688_v40 = vsel %vm5687_vm14, %v6630_v35, %v5684_v36  ;;  %vm14979_vm14 = vmmov %vm14976_vm0 }
 0x570   : > { %v5693_v18 = vsel %vm5690_vm1, %v5692_v38, %v5688_v40  ;;  %vm14980_vm1 = vmmov %vm14976_vm0 }
 0x571   : > { %v5695_v50 = vmul.f32 %v5693_v18, %v5674_v51  ;;  %v6404_v51 = vld [vmem:[%s13290_s10 + $0x50] sm:$0xff] }
 0x572   : > { %6076 = vmatpush.bf16.msra.mxu3 %v6404_v51 }
 0x573   : > { %6316 = vmatmul.msk.f32.vlgmr.msra.gmra.mxu0 %vm5706_vm11, %v5695_v50  ;;  %6317 = vmatmul.msk.f32.vlgmr.msra.gmra.mxu1 %vm5706_vm11, %v5695_v50  ;;  %vm14982_vm11 = vmmov %vm14976_vm0 }
 0x576   : > { %6077 = vmatpush.bf16.msra.mxu3 %v6403_v46 }
 0x5f0   : > { %v5727_v32 = vpop.f32.mrf.mxu0  ;;  %v5747_v60 = vpop.f32.mrf.mxu1 }
 0x5f1   : > { %v5728_v24 = vadd.f32 %v5727_v32, %v5702_v21  ;;  %v5748_v16 = vadd.f32 %v5747_v60, %v5703_v58  ;;  %v6402_v21 = vld [vmem:[%s13290_s10 + $0x40] sm:$0xff] }
 0x5f2   : > { %6078 = vmatpush.bf16.msra.mxu3 %v6402_v21  ;;  %v14959_v21 = vld [vmem:[#allocation45_spill] sm:$0xff] }
 0x5f3   : > { %v6318_v6 = vmul.f32 -1.442695, %v5728_v24  ;;  %v6319_v15 = vmul.f32 -1.442695, %v5748_v16 }
 0x5f5   : > { %6631 = vpow2.f32 %v6318_v6 }
 0x5f6   : > { %6633 = vpow2.f32 %v6319_v15  ;;  %v14950_v15 = vld [vmem:[#allocation84_spill] sm:$0xff] }
 0x5fb   : > { %v6632_v23 = vpop.eup %6631 }
 0x5fc   : > { %v6634_v26 = vpop.eup %6633  ;;  %v5756_v13 = vadd.f32 1.0, %v6632_v23 }
 0x5fd   : > { %v5757_v42 = vadd.f32 1.0, %v6634_v26 }
 0x5fe   : > { %6635 = vrcp.f32 %v5756_v13  ;;  %v5769_v37 = vand.u32 2147483648, %v5756_v13  ;;  %v5767_v38 = vand.u32 2147483647, %v5756_v13  ;;  %vm5763_vm12 = vweird.f32 %v5756_v13 }
 0x5ff   : > { %6637 = vrcp.f32 %v5757_v42  ;;  %v5784_v40 = vand.u32 2147483648, %v5757_v42  ;;  %v5782_v50 = vand.u32 2147483647, %v5757_v42  ;;  %vm5778_vm2 = vweird.f32 %v5757_v42 }
 0x600   : > { %v5770_v32 = vor.u32 1.1754944e-38, %v5769_v37  ;;  %vm5768_vm9 = vcmp.eq.f32.partialorder %v5767_v38, 8.507059e+37 }
 0x601   : > { %v5785_v39 = vor.u32 1.1754944e-38, %v5784_v40  ;;  %vm5783_vm6 = vcmp.eq.f32.partialorder %v5782_v50, 8.507059e+37 }
 0x604   : > { %v6636_v48 = vpop.eup %6635 }
 0x605   : > { %v6638_v41 = vpop.eup %6637  ;;  %v5759_v25 = vmul.f32 %v6636_v48, %v5756_v13  ;;  %vm5764_vm3 = vweird.f32 %v6636_v48 }
 0x606   : > { %v5774_v35 = vmul.f32 %v6638_v41, %v5757_v42  ;;  %vm5779_vm7 = vweird.f32 %v6638_v41  ;;  %vm5765_vm10 = vmor %vm5763_vm12, %vm5764_vm3  ;;  %v14952_v42 = vld [vmem:[#allocation69_spill] sm:$0xff] }
 0x607   : > { %v5760_v52 = vsub.f32 1.0, %v5759_v25  ;;  %vm5780_vm4 = vmor %vm5778_vm2, %vm5779_vm7 }
 0x608   : > { %v5775_v1 = vsub.f32 1.0, %v5774_v35  ;;  %v14955_v35 = vld [vmem:[#allocation97_spill] sm:$0xff]  ;;  %vm14983_vm3 = vmmov %vm14976_vm0 }
 0x609   : > { %v5761_v36 = vmul.f32 %v6636_v48, %v5760_v52  ;;  %vm14984_vm7 = vmmov %vm14976_vm0 }
 0x60a   : > { %v5776_v18 = vmul.f32 %v6638_v41, %v5775_v1  ;;  %vm14985_vm12 = vmmov %vm14976_vm0 }
 0x60b   : > { %v5762_v58 = vadd.f32 %v6636_v48, %v5761_v36  ;;  %v14957_v36 = vld [vmem:[#allocation37_spill] sm:$0xff]  ;;  %vm14987_vm2 = vmmov %vm14976_vm0 }
 0x60c   : > { %v5777_v60 = vadd.f32 %v6638_v41, %v5776_v18 }
 0x60d   : > { %v5766_v22 = vsel %vm5765_vm10, %v6636_v48, %v5762_v58  ;;  %vm14986_vm10 = vmmov %vm14976_vm0 }
 0x60e   : > { %v5771_v24 = vsel %vm5768_vm9, %v5770_v32, %v5766_v22  ;;  %v5781_v16 = vsel %vm5780_vm4, %v6638_v41, %v5777_v60  ;;  %vm14988_vm9 = vmmov %vm14976_vm0 }
 0x60f   : > { %v13062_v17 = vperm.slane %v5771_v24, 0  ;;  %v5786_v8 = vsel %vm5783_vm6, %v5785_v39, %v5781_v16  ;;  %v14961_v24 = vld [vmem:[#allocation47_spill] sm:$0xff]  ;;  %vm14989_vm4 = vmmov %vm14976_vm0 }
 0x610   : > { %v13064_v6 = vperm.slane %v5786_v8, 0  ;;  %vm14990_vm6 = vmmov %vm14976_vm0 }
 0x611   : > { %v5790_v44 = vmul.f32 %v13062_v17, %v14950_v15  ;;  %v5792_v43 = vmul.f32 %v13062_v17, %v14951_v63  ;;  %v5794_v27 = vmul.f32 %v13062_v17, %v14952_v42  ;;  %v5796_v59 = vmul.f32 %v13062_v17, %v14953_v62 }
 0x612   : > { %v5791_v2 = vmul.f32 %v13064_v6, %v12884_v20  ;;  %v5793_v23 = vmul.f32 %v13064_v6, %v12880_v33  ;;  %v5795_v51 = vmul.f32 %v13064_v6, %v12887_v14  ;;  %v5797_v48 = vmul.f32 %v13064_v6, %v12891_v9  ;;  %v14954_v33 = vld [vmem:[#allocation75_spill] sm:$0xff] }
 0x613   : > { %v5840_v26 = vpack.c.bf16 %v5792_v43, %v5790_v44  ;;  %v5842_v20 = vpack.c.bf16 %v5796_v59, %v5794_v27  ;;  %v5798_v25 = vmul.f32 %v13062_v17, %v14954_v33  ;;  %v5800_v47 = vmul.f32 %v13062_v17, %v14955_v35  ;;  %v14956_v9 = vld [vmem:[#allocation127_spill] sm:$0xff]  ;;  %v14963_v43 = vld [vmem:[#allocation100_spill] sm:$0xff] }
 0x614   : > { %v5841_v13 = vpack.c.bf16 %v5793_v23, %v5791_v2  ;;  %v5843_v41 = vpack.c.bf16 %v5797_v48, %v5795_v51  ;;  %v5799_v46 = vmul.f32 %v13064_v6, %v12897_v10  ;;  %v5801_v52 = vmul.f32 %v13064_v6, %v12903_v61  ;;  %v14958_v61 = vld [vmem:[#allocation78_spill] sm:$0xff]  ;;  %v14965_v27 = vld [vmem:[#allocation48_spill] sm:$0xff] }
 0x615   : > { %6006 = vmatmul.bf16.vlgmr.msra.gmra.mxu2 %v5840_v26  ;;  %v5844_v14 = vpack.c.bf16 %v5800_v47, %v5798_v25  ;;  %v5802_v1 = vmul.f32 %v13062_v17, %v14956_v9  ;;  %v5804_v38 = vmul.f32 %v13062_v17, %v14957_v36  ;;  %v5803_v40 = vmul.f32 %v13064_v6, %v12909_v55  ;;  %v13141_v47 = vld [vmem:[%s13291_s11] ss:$0 sm:$0xff]  ;;  %v14970_v36 = vld [vmem:[#allocation26_spill] sm:$0xff] }
 0x616   : > { %6079 = vmatmul.bf16.vlgmr.msra.gmra.mxu3 %v5841_v13  ;;  %v5845_v37 = vpack.c.bf16 %v5801_v52, %v5799_v46  ;;  %v5805_v18 = vmul.f32 %v13064_v6, %v12915_v28  ;;  %v5806_v0 = vmul.f32 %v13062_v17, %v14958_v61  ;;  %v5808_v58 = vmul.f32 %v13062_v17, %v14959_v21  ;;  %v14960_v28 = vld [vmem:[#allocation59_spill] sm:$0xff]  ;;  %v14969_v9 = vld [vmem:[#allocation65_spill] sm:$0xff] }
 0x617   : > { %v5846_v10 = vpack.c.bf16 %v5804_v38, %v5802_v1  ;;  %v5807_v32 = vmul.f32 %v13064_v6, %v12921_v11  ;;  %v5809_v60 = vmul.f32 %v13064_v6, %v12927_v49  ;;  %v5810_v39 = vmul.f32 %v13062_v17, %v14960_v28  ;;  %v14962_v49 = vld [vmem:[#allocation96_spill] sm:$0xff] }
 0x618   : > { %v5847_v50 = vpack.c.bf16 %v5805_v18, %v5803_v40  ;;  %v5848_v55 = vpack.c.bf16 %v5808_v58, %v5806_v0  ;;  %v5812_v16 = vmul.f32 %v13062_v17, %v14961_v24  ;;  %v5811_v8 = vmul.f32 %v13064_v6, %v12932_v3  ;;  %v14973_v24 = vld [vmem:[#allocation72_spill] sm:$0xff] }
 0x619   : > { %v5849_v22 = vpack.c.bf16 %v5809_v60, %v5807_v32  ;;  %v5813_v15 = vmul.f32 %v13064_v6, %v12937_v57  ;;  %v5814_v63 = vmul.f32 %v13062_v17, %v14962_v49  ;;  %v5816_v2 = vmul.f32 %v13062_v17, %v14963_v43  ;;  %v14964_v57 = vld [vmem:[#allocation24_spill] sm:$0xff]  ;;  %v6678_v32 = vld [vmem:[%s6842_s26 + $0x8] sm:$0xff] }
 0x61a   : > { %v5850_v11 = vpack.c.bf16 %v5812_v16, %v5810_v39  ;;  %v5815_v23 = vmul.f32 %v13064_v6, %v12941_v30  ;;  %v5817_v26 = vmul.f32 %v13064_v6, %v12945_v31  ;;  %v5818_v42 = vmul.f32 %v13062_v17, %v14964_v57  ;;  %v14966_v31 = vld [vmem:[#allocation106_spill] sm:$0xff] }
 0x61b   : > { %v5851_v44 = vpack.c.bf16 %v5813_v15, %v5811_v8  ;;  %v5852_v3 = vpack.c.bf16 %v5816_v2, %v5814_v63  ;;  %v5820_v62 = vmul.f32 %v13062_v17, %v14965_v27  ;;  %v5819_v59 = vmul.f32 %v13064_v6, %v12949_v29  ;;  %v14974_v8 = vld [vmem:[#allocation53_spill] sm:$0xff] }
 0x61c   : > { %v5853_v13 = vpack.c.bf16 %v5817_v26, %v5815_v23  ;;  %v5821_v51 = vmul.f32 %v13064_v6, %v12953_v5  ;;  %v5823_v25 = vmul.f32 %v13064_v6, %v12957_v4  ;;  %v5825_v29 = vmul.f32 %v13064_v6, %v12961_v12  ;;  %v6677_v4 = vld [vmem:[%s6842_s26] sm:$0xff] }
 0x61d   : > { %v5854_v30 = vpack.c.bf16 %v5820_v62, %v5818_v42  ;;  %v5826_v1 = vmul.f32 %v13062_v17, %v14969_v9  ;;  %v5828_v38 = vmul.f32 %v13062_v17, %v14970_v36  ;;  %v5827_v18 = vmul.f32 %v13064_v6, %v12965_v7  ;;  %v14981_v9 = vld [vmem:[#allocation90_spill] sm:$0xff] }
 0x61e   : > { %v5855_v48 = vpack.c.bf16 %v5821_v51, %v5819_v59  ;;  %v5857_v5 = vpack.c.bf16 %v5825_v29, %v5823_v25  ;;  %v5830_v16 = vmul.f32 %v13062_v17, %v14973_v24  ;;  %v5832_v15 = vmul.f32 %v13062_v17, %v14974_v8  ;;  %v14977_v59 = vld [vmem:[#allocation122_spill] sm:$0xff] }
 0x61f   : > { %v5858_v21 = vpack.c.bf16 %v5828_v38, %v5826_v1  ;;  %v5833_v49 = vmul.f32 %v13064_v6, %v12977_v56  ;;  %v6681_v56 = vld [vmem:[%s6842_s26 + $0x20] sm:$0xff]  ;;  %v5834_v51 = vmul.f32 %v13062_v17, %v14977_v59  ;;  %v5838_v1 = vmul.f32 %v13062_v17, %v14981_v9 }
 0x620   : > { %v5860_v23 = vpack.c.bf16 %v5832_v15, %v5830_v16  ;;  %v5839_v38 = vmul.f32 %v13064_v6, %v12985_v54  ;;  %v6693_v9 = vld [vmem:[%s6842_s26 + $0x80] sm:$0xff] }
 0x625   : > { %6011 = vmatmul.bf16.gmra.mxu2 %v5842_v20  ;;  %v5822_v20 = vmul.f32 %v13062_v17, %v14966_v31 }
 0x626   : > { %6084 = vmatmul.bf16.gmra.mxu3 %v5843_v41  ;;  %v14967_v41 = vld [vmem:[#allocation108_spill] sm:$0xff] }
 0x627   : > { %v5824_v33 = vmul.f32 %v13062_v17, %v14967_v41  ;;  %v5837_v41 = vmul.f32 %v13064_v6, %v12988_v19  ;;  %v6683_v19 = vld [vmem:[%s6842_s26 + $0x30] sm:$0xff] }
 0x629   : > { %v5856_v35 = vpack.c.bf16 %v5824_v33, %v5822_v20  ;;  %v5835_v20 = vmul.f32 %v13064_v6, %v12981_v45 }
 0x635   : > { %6016 = vmatmul.bf16.gmra.mxu2 %v5844_v14 }
 0x636   : > { %6089 = vmatmul.bf16.gmra.mxu3 %v5845_v37 }
 0x645   : > { %6021 = vmatmul.bf16.gmra.mxu2 %v5846_v10  ;;  %v5829_v10 = vmul.f32 %v13064_v6, %v12969_v53  ;;  %v6679_v53 = vld [vmem:[%s6842_s26 + $0x10] sm:$0xff] }
 0x646   : > { %6094 = vmatmul.bf16.gmra.mxu3 %v5847_v50 }
 0x647   : > { %v5859_v58 = vpack.c.bf16 %v5829_v10, %v5827_v18 }
 0x655   : > { %6026 = vmatmul.bf16.gmra.mxu2 %v5848_v55 }
 0x656   : > { %6099 = vmatmul.bf16.gmra.mxu3 %v5849_v22 }
 0x665   : > { %6031 = vmatmul.bf16.gmra.mxu2 %v5850_v11 }
 0x666   : > { %6104 = vmatmul.bf16.gmra.mxu3 %v5851_v44  ;;  %v5831_v44 = vmul.f32 %v13064_v6, %v12973_v34  ;;  %v6685_v6 = vld [vmem:[%s6842_s26 + $0x40] sm:$0xff] }
 0x668   : > { %v5861_v26 = vpack.c.bf16 %v5833_v49, %v5831_v44 }
 0x675   : > { %6036 = vmatmul.bf16.gmra.mxu2 %v5852_v3  ;;  %v6680_v3 = vld [vmem:[%s6842_s26 + $0x18] sm:$0xff] }
 0x676   : > { %6109 = vmatmul.bf16.gmra.mxu3 %v5853_v13 }
 0x685   : > { %6041 = vmatmul.bf16.gmra.mxu2 %v5854_v30  ;;  %v14978_v30 = vld [vmem:[#allocation54_spill] sm:$0xff] }
 0x686   : > { %6114 = vmatmul.bf16.gmra.mxu3 %v5855_v48  ;;  %v5836_v48 = vmul.f32 %v13062_v17, %v14978_v30  ;;  %v6690_v30 = vld [vmem:[%s6842_s26 + $0x68] sm:$0xff] }
 0x695   : > { %6046 = vmatmul.bf16.gmra.mxu2 %v5856_v35  ;;  %v5862_v35 = vpack.c.bf16 %v5836_v48, %v5834_v51 }
 0x696   : > { %6119 = vmatmul.bf16.gmra.mxu3 %v5857_v5  ;;  %v5863_v5 = vpack.c.bf16 %v5837_v41, %v5835_v20 }
 0x698   : > { %v6007_v46 = vpop.f32.mrf.mxu2 }
 0x699   : > { %v6008_v52 = vadd.f32 %v13141_v47, %v6007_v46  ;;  %v6080_v14 = vpop.f32.mrf.mxu3  ;;  %v6682_v46 = vld [vmem:[%s6842_s26 + $0x28] sm:$0xff] }
 0x69b   : > { %v6081_v37 = vadd.f32 %v6080_v14, %v6008_v52 }
 0x69d   : > { %v6144_v12 = vadd.f32 %v6677_v4, %v6081_v37 }
 0x69f   : > { %6169 = vst.msk [vmem:[%s13149_s24] sm:$0xff] %vm14968_vm8, %v6144_v12  ;;  %vm14991_vm8 = vmmov %vm14976_vm0 }
 0x6a0   : > { %v6009_v40 = vpop.f32.mrf.mxu2 }
 0x6a1   : > { %v6010_v50 = vadd.f32 %v13141_v47, %v6009_v40  ;;  %v6082_v61 = vpop.f32.mrf.mxu3 }
 0x6a3   : > { %v6083_v0 = vadd.f32 %v6082_v61, %v6010_v50  ;;  %v5864_v50 = vpack.c.bf16 %v5838_v1, %v5838_v1  ;;  %v5865_v61 = vpack.c.bf16 %v5839_v38, %v5839_v38 }
 0x6a5   : > { %v6145_v60 = vadd.f32 %v6678_v32, %v6083_v0  ;;  %6051 = vmatmul.bf16.gmra.mxu2 %v5858_v21  ;;  %v6684_v0 = vld [vmem:[%s6842_s26 + $0x38] sm:$0xff] }
 0x6a6   : > { %6124 = vmatmul.bf16.gmra.mxu3 %v5859_v58 }
 0x6a7   : > { %6170 = vst.msk [vmem:[%s13149_s24 + $0x8] sm:$0xff] %vm14971_vm13, %v6145_v60  ;;  %vm14992_vm13 = vmmov %vm14976_vm0 }
 0x6a8   : > { %v6012_v55 = vpop.f32.mrf.mxu2 }
 0x6a9   : > { %v6013_v7 = vadd.f32 %v13141_v47, %v6012_v55  ;;  %v6085_v22 = vpop.f32.mrf.mxu3 }
 0x6ab   : > { %v6086_v28 = vadd.f32 %v6085_v22, %v6013_v7 }
 0x6ad   : > { %v6146_v39 = vadd.f32 %v6679_v53, %v6086_v28  ;;  %v6686_v53 = vld [vmem:[%s6842_s26 + $0x48] sm:$0xff] }
 0x6af   : > { %6171 = vst.msk [vmem:[%s13149_s24 + $0x10] sm:$0xff] %vm14972_vm15, %v6146_v39  ;;  %vm14993_vm15 = vmmov %vm14976_vm0 }
 0x6b0   : > { %v6014_v11 = vpop.f32.mrf.mxu2 }
 0x6b1   : > { %v6015_v63 = vadd.f32 %v13141_v47, %v6014_v11  ;;  %v6087_v43 = vpop.f32.mrf.mxu3  ;;  %v6687_v11 = vld [vmem:[%s6842_s26 + $0x50] sm:$0xff] }
 0x6b3   : > { %v6088_v2 = vadd.f32 %v6087_v43, %v6015_v63 }
 0x6b5   : > { %v6147_v13 = vadd.f32 %v6680_v3, %v6088_v2  ;;  %6056 = vmatmul.bf16.gmra.mxu2 %v5860_v23  ;;  %v6688_v23 = vld [vmem:[%s6842_s26 + $0x58] sm:$0xff] }
 0x6b6   : > { %6129 = vmatmul.bf16.gmra.mxu3 %v5861_v26 }
 0x6b7   : > { %6172 = vst.msk [vmem:[%s13149_s24 + $0x18] sm:$0xff] %vm14975_vm5, %v6147_v13  ;;  %vm14994_vm5 = vmmov %vm14976_vm0 }
 0x6b8   : > { %v6017_v57 = vpop.f32.mrf.mxu2 }
 0x6b9   : > { %v6018_v34 = vadd.f32 %v13141_v47, %v6017_v57  ;;  %v6090_v42 = vpop.f32.mrf.mxu3 }
 0x6bb   : > { %v6091_v27 = vadd.f32 %v6090_v42, %v6018_v34  ;;  %v6689_v42 = vld [vmem:[%s6842_s26 + $0x60] sm:$0xff] }
 0x6bd   : > { %v6148_v62 = vadd.f32 %v6681_v56, %v6091_v27 }
 0x6bf   : > { %6173 = vst.msk [vmem:[%s13149_s24 + $0x20] sm:$0xff] %vm14976_vm0, %v6148_v62 }
 0x6c0   : > { %v6019_v31 = vpop.f32.mrf.mxu2 }
 0x6c1   : > { %v6020_v33 = vadd.f32 %v13141_v47, %v6019_v31  ;;  %v6092_v25 = vpop.f32.mrf.mxu3 }
 0x6c3   : > { %v6093_v29 = vadd.f32 %v6092_v25, %v6020_v33  ;;  %v6691_v25 = vld [vmem:[%s6842_s26 + $0x70] sm:$0xff] }
 0x6c5   : > { %v6149_v52 = vadd.f32 %v6682_v46, %v6093_v29  ;;  %6061 = vmatmul.bf16.gmra.mxu2 %v5862_v35 }
 0x6c6   : > { %6134 = vmatmul.bf16.gmra.mxu3 %v5863_v5 }
 0x6c7   : > { %6174 = vst.msk [vmem:[%s13149_s24 + $0x28] sm:$0xff] %vm14979_vm14, %v6149_v52  ;;  %vm14995_vm14 = vmmov %vm14976_vm0 }
 0x6c8   : > { %v6022_v14 = vpop.f32.mrf.mxu2 }
 0x6c9   : > { %v6023_v45 = vadd.f32 %v13141_v47, %v6022_v14  ;;  %v6095_v37 = vpop.f32.mrf.mxu3  ;;  %v6692_v14 = vld [vmem:[%s6842_s26 + $0x78] sm:$0xff] }
 0x6cb   : > { %v6096_v4 = vadd.f32 %v6095_v37, %v6023_v45 }
 0x6cd   : > { %v6150_v12 = vadd.f32 %v6683_v19, %v6096_v4 }
 0x6cf   : > { %6175 = vst.msk [vmem:[%s13149_s24 + $0x30] sm:$0xff] %vm14980_vm1, %v6150_v12  ;;  %vm14996_vm1 = vmmov %vm14976_vm0 }
 0x6d0   : > { %v6024_v36 = vpop.f32.mrf.mxu2 }
 0x6d1   : > { %v6025_v40 = vadd.f32 %v13141_v47, %v6024_v36  ;;  %v6097_v18 = vpop.f32.mrf.mxu3 }
 0x6d3   : > { %v6098_v10 = vadd.f32 %v6097_v18, %v6025_v40 }
 0x6d5   : > { %v6151_v21 = vadd.f32 %v6684_v0, %v6098_v10  ;;  %6066 = vmatmul.bf16.gmra.mxu2 %v5864_v50  ;;  %v6694_v10 = vld [vmem:[%s6842_s26 + $0x88] sm:$0xff] }
 0x6d6   : > { %6139 = vmatmul.bf16.gmra.mxu3 %v5865_v61 }
 0x6d7   : > { %6176 = vst.msk [vmem:[%s13149_s24 + $0x38] sm:$0xff] %vm14982_vm11, %v6151_v21  ;;  %vm14997_vm11 = vmmov %vm14976_vm0 }
 0x6d8   : > { %v6027_v17 = vpop.f32.mrf.mxu2 }
 0x6d9   : > { %v6028_v58 = vadd.f32 %v13141_v47, %v6027_v17  ;;  %v6100_v32 = vpop.f32.mrf.mxu3 }
 0x6db   : > { %v6101_v54 = vadd.f32 %v6100_v32, %v6028_v58  ;;  %v6695_v58 = vld [vmem:[%s6842_s26 + $0x90] sm:$0xff] }
 0x6dd   : > { %v6152_v60 = vadd.f32 %v6685_v6, %v6101_v54 }
 0x6df   : > { %6177 = vst.msk [vmem:[%s13149_s24 + $0x40] sm:$0xff] %vm14983_vm3, %v6152_v60  ;;  %vm6193_vm3 = vcmask 519168  }
 0x6e0   : > { %v6029_v55 = vpop.f32.mrf.mxu2 }
 0x6e1   : > { %v6030_v7 = vadd.f32 %v13141_v47, %v6029_v55  ;;  %v6102_v22 = vpop.f32.mrf.mxu3 }
 0x6e3   : > { %v6103_v28 = vadd.f32 %v6102_v22, %v6030_v7  ;;  %v6696_v7 = vld [vmem:[%s6842_s26 + $0x98] sm:$0xff] }
 0x6e5   : > { %v6153_v39 = vadd.f32 %v6686_v53, %v6103_v28 }
 0x6e7   : > { %6178 = vst.msk [vmem:[%s13149_s24 + $0x48] sm:$0xff] %vm14984_vm7, %v6153_v39 }
 0x6e8   : > { %v6032_v24 = vpop.f32.mrf.mxu2 }
 0x6e9   : > { %v6033_v16 = vadd.f32 %v13141_v47, %v6032_v24  ;;  %v6105_v8 = vpop.f32.mrf.mxu3 }
 0x6eb   : > { %v6106_v15 = vadd.f32 %v6105_v8, %v6033_v16  ;;  %v6697_v16 = vld [vmem:[%s6842_s26 + $0xa0] sm:$0xff] }
 0x6ed   : > { %v6154_v44 = vadd.f32 %v6687_v11, %v6106_v15 }
 0x6ef   : > { %6179 = vst.msk [vmem:[%s13149_s24 + $0x50] sm:$0xff] %vm14985_vm12, %v6154_v44 }
 0x6f0   : > { %v6034_v49 = vpop.f32.mrf.mxu2 }
 0x6f1   : > { %v6035_v63 = vadd.f32 %v13141_v47, %v6034_v49  ;;  %v6107_v43 = vpop.f32.mrf.mxu3 }
 0x6f3   : > { %v6108_v2 = vadd.f32 %v6107_v43, %v6035_v63  ;;  %v6698_v63 = vld [vmem:[%s6842_s26 + $0xa8] sm:$0xff] }
 0x6f5   : > { %v6155_v26 = vadd.f32 %v6688_v23, %v6108_v2 }
 0x6f7   : > { %6180 = vst.msk [vmem:[%s13149_s24 + $0x58] sm:$0xff] %vm14986_vm10, %v6155_v26 }
 0x6f8   : > { %v6037_v3 = vpop.f32.mrf.mxu2 }
 0x6f9   : > { %v6038_v13 = vadd.f32 %v13141_v47, %v6037_v3  ;;  %v6110_v57 = vpop.f32.mrf.mxu3 }
 0x6fb   : > { %v6111_v34 = vadd.f32 %v6110_v57, %v6038_v13  ;;  %v6699_v13 = vld [vmem:[%s6842_s26 + $0xb0] sm:$0xff] }
 0x6fd   : > { %v6156_v27 = vadd.f32 %v6689_v42, %v6111_v34 }
 0x6ff   : > { %6181 = vst.msk [vmem:[%s13149_s24 + $0x60] sm:$0xff] %vm14987_vm2, %v6156_v27 }
 0x700   : > { %v6039_v56 = vpop.f32.mrf.mxu2 }
 0x701   : > { %v6040_v62 = vadd.f32 %v13141_v47, %v6039_v56  ;;  %v6112_v59 = vpop.f32.mrf.mxu3 }
 0x703   : > { %v6113_v51 = vadd.f32 %v6112_v59, %v6040_v62  ;;  %v6700_v62 = vld [vmem:[%s6842_s26 + $0xb8] sm:$0xff] }
 0x705   : > { %v6157_v48 = vadd.f32 %v6690_v30, %v6113_v51 }
 0x707   : > { %6182 = vst.msk [vmem:[%s13149_s24 + $0x68] sm:$0xff] %vm14988_vm9, %v6157_v48 }
 0x708   : > { %v6042_v31 = vpop.f32.mrf.mxu2 }
 0x709   : > { %v6043_v20 = vadd.f32 %v13141_v47, %v6042_v31  ;;  %v6115_v41 = vpop.f32.mrf.mxu3 }
 0x70b   : > { %v6116_v33 = vadd.f32 %v6115_v41, %v6043_v20  ;;  %v6701_v20 = vld [vmem:[%s6842_s26 + $0xc0] sm:$0xf] }
 0x70d   : > { %v6158_v29 = vadd.f32 %v6691_v25, %v6116_v33 }
 0x70f   : > { %6183 = vst.msk [vmem:[%s13149_s24 + $0x70] sm:$0xff] %vm14989_vm4, %v6158_v29 }
 0x710   : > { %v6044_v35 = vpop.f32.mrf.mxu2 }
 0x711   : > { %v6045_v5 = vadd.f32 %v13141_v47, %v6044_v35  ;;  %v6117_v46 = vpop.f32.mrf.mxu3 }
 0x713   : > { %v6118_v52 = vadd.f32 %v6117_v46, %v6045_v5 }
 0x715   : > { %v6159_v45 = vadd.f32 %v6692_v14, %v6118_v52 }
 0x717   : > { %6184 = vst.msk [vmem:[%s13149_s24 + $0x78] sm:$0xff] %vm14990_vm6, %v6159_v45 }
 0x718   : > { %v6047_v37 = vpop.f32.mrf.mxu2 }
 0x719   : > { %v6048_v4 = vadd.f32 %v13141_v47, %v6047_v37  ;;  %v6120_v19 = vpop.f32.mrf.mxu3 }
 0x71b   : > { %v6121_v12 = vadd.f32 %v6120_v19, %v6048_v4 }
 0x71d   : > { %v6160_v1 = vadd.f32 %v6693_v9, %v6121_v12 }
 0x71f   : > { %6185 = vst.msk [vmem:[%s13149_s24 + $0x80] sm:$0xff] %vm14991_vm8, %v6160_v1 }
 0x720   : > { %v6049_v36 = vpop.f32.mrf.mxu2 }
 0x721   : > { %v6050_v38 = vadd.f32 %v13141_v47, %v6049_v36  ;;  %v6122_v40 = vpop.f32.mrf.mxu3 }
 0x723   : > { %v6123_v18 = vadd.f32 %v6122_v40, %v6050_v38 }
 0x725   : > { %v6161_v50 = vadd.f32 %v6694_v10, %v6123_v18 }
 0x727   : > { %6186 = vst.msk [vmem:[%s13149_s24 + $0x88] sm:$0xff] %vm14992_vm13, %v6161_v50 }
 0x728   : > { %v6052_v61 = vpop.f32.mrf.mxu2 }
 0x729   : > { %v6053_v0 = vadd.f32 %v13141_v47, %v6052_v61  ;;  %v6125_v21 = vpop.f32.mrf.mxu3 }
 0x72b   : > { %v6126_v17 = vadd.f32 %v6125_v21, %v6053_v0 }
 0x72d   : > { %v6162_v32 = vadd.f32 %v6695_v58, %v6126_v17 }
 0x72f   : > { %6187 = vst.msk [vmem:[%s13149_s24 + $0x90] sm:$0xff] %vm14993_vm15, %v6162_v32 }
 0x730   : > { %v6054_v54 = vpop.f32.mrf.mxu2 }
 0x731   : > { %v6055_v6 = vadd.f32 %v13141_v47, %v6054_v54  ;;  %v6127_v60 = vpop.f32.mrf.mxu3 }
 0x733   : > { %v6128_v55 = vadd.f32 %v6127_v60, %v6055_v6 }
 0x735   : > { %v6163_v22 = vadd.f32 %v6696_v7, %v6128_v55 }
 0x737   : > { %6188 = vst.msk [vmem:[%s13149_s24 + $0x98] sm:$0xff] %vm14994_vm5, %v6163_v22 }
 0x738   : > { %v6057_v28 = vpop.f32.mrf.mxu2 }
 0x739   : > { %v6058_v53 = vadd.f32 %v13141_v47, %v6057_v28  ;;  %v6130_v39 = vpop.f32.mrf.mxu3 }
 0x73b   : > { %v6131_v24 = vadd.f32 %v6130_v39, %v6058_v53 }
 0x73d   : > { %v6164_v8 = vadd.f32 %v6697_v16, %v6131_v24 }
 0x73f   : > { %6189 = vst.msk [vmem:[%s13149_s24 + $0xa0] sm:$0xff] %vm14976_vm0, %v6164_v8 }
 0x740   : > { %v6059_v15 = vpop.f32.mrf.mxu2 }
 0x741   : > { %v6060_v11 = vadd.f32 %v13141_v47, %v6059_v15  ;;  %v6132_v44 = vpop.f32.mrf.mxu3 }
 0x743   : > { %v6133_v49 = vadd.f32 %v6132_v44, %v6060_v11 }
 0x745   : > { %v6165_v43 = vadd.f32 %v6698_v63, %v6133_v49 }
 0x747   : > { %6190 = vst.msk [vmem:[%s13149_s24 + $0xa8] sm:$0xff] %vm14995_vm14, %v6165_v43 }
 0x748   : > { %v6062_v2 = vpop.f32.mrf.mxu2 }
 0x749   : > { %v6063_v23 = vadd.f32 %v13141_v47, %v6062_v2  ;;  %v6135_v26 = vpop.f32.mrf.mxu3 }
 0x74b   : > { %v6136_v3 = vadd.f32 %v6135_v26, %v6063_v23 }
 0x74d   : > { %v6166_v57 = vadd.f32 %v6699_v13, %v6136_v3 }
 0x74f   : > { %6191 = vst.msk [vmem:[%s13149_s24 + $0xb0] sm:$0xff] %vm14996_vm1, %v6166_v57 }
 0x750   : > { %v6064_v34 = vpop.f32.mrf.mxu2 }
 0x751   : > { %v6065_v42 = vadd.f32 %v13141_v47, %v6064_v34  ;;  %v6137_v27 = vpop.f32.mrf.mxu3 }
 0x753   : > { %v6138_v56 = vadd.f32 %v6137_v27, %v6065_v42 }
 0x755   : > { %v6167_v59 = vadd.f32 %v6700_v62, %v6138_v56 }
 0x757   : > { %6192 = vst.msk [vmem:[%s13149_s24 + $0xb8] sm:$0xff] %vm14997_vm11, %v6167_v59 }
 0x758   : > { %v6067_v51 = vpop.f32.mrf.mxu2 }
 0x759   : > { %v6068_v30 = vadd.f32 %v13141_v47, %v6067_v51  ;;  %v6140_v48 = vpop.f32.mrf.mxu3 }
 0x75b   : > { %v6141_v31 = vadd.f32 %v6140_v48, %v6068_v30 }
 0x75d   : > { %v6168_v41 = vadd.f32 %v6701_v20, %v6141_v31 }
 0x75f   : > { %6194 = vst.msk [vmem:[%s13149_s24 + $0xc0] sm:$0xf] %vm6193_vm3, %v6168_v41 }
 0x760   : > { %v6069_v33 = vpop.f32.mrf.mxu2 }
 0x761   : > { %v6142_v25 = vpop.f32.mrf.mxu3 }
 0x762 PF: > { %s22_s21 = sadd.s32 1, %s6708_s21  }
 0x763   : > { %p19_p4 = scmp.ge.s32.totalorder %s22_s21, 4  }
 0x765   :  { %21 = sbr.rel (!%p19_p4) target bundleno = 1 (0x1), region = 98 }

</bundles_post_ra>
